<compile_context>
chip_gen: v6e
topology: v6e:2x2x1
jax: 0.10.0
libtpu: 0.0.40
codegen_flags: <defaults>
</compile_context>

<pallas_src>
import functools
import math

import jax
import jax.numpy as jnp
from jax.experimental import pallas as pl
from jax.experimental.pallas import tpu as pltpu


# ----------------------------- in-kernel math helpers -----------------------------

_INV_SQRT2 = 0.7071067811865476


def _erf(x):
    # Abramowitz & Stegun 7.1.26 polynomial (max abs err ~1.5e-7); exp -> EUP.
    a1, a2, a3, a4, a5 = 0.254829592, -0.284496736, 1.421413741, -1.453152027, 1.061405429
    p = 0.3275911
    s = jnp.where(x >= 0.0, 1.0, -1.0)
    ax = jnp.abs(x)
    t = 1.0 / (1.0 + p * ax)
    poly = ((((a5 * t + a4) * t + a3) * t + a2) * t + a1) * t
    return s * (1.0 - poly * jnp.exp(-ax * ax))


def _gelu_exact(x):
    # nn.GELU() default = exact (erf-based) GELU.
    return 0.5 * x * (1.0 + _erf(x * _INV_SQRT2))


def _sigmoid(x):
    return 1.0 / (1.0 + jnp.exp(-x))


def _conv1x1_packed(x2d, w_ref, b_ref, *, H, P):
    """1x1 conv in the lane-packed (H, W*C) layout.

    w_ref is a (GC, GC) block-diagonal weight, GC = G*C with G = 128//C, so each
    128-lane (vreg-aligned) chunk of the packed row is an independent matmul.  The
    chunks are stacked along sublanes (free vreg placement) into one MXU matmul.
    """
    GC = w_ref.shape[0]
    n = P // GC
    if n == 1:
        y = jnp.dot(x2d, w_ref[...], preferred_element_type=jnp.float32)
    else:
        xs = jnp.concatenate([x2d[:, j * GC:(j + 1) * GC] for j in range(n)], axis=0)
        ys = jnp.dot(xs, w_ref[...], preferred_element_type=jnp.float32)      # (n*H, GC)
        y = jnp.concatenate([ys[j * H:(j + 1) * H, :] for j in range(n)], axis=1)
    return y + b_ref[...]


def _depthwise_conv_packed(y2d, w_ref, b_ref, *, k, dil, pad, H, C, P):
    """Depthwise 'same' conv in the lane-packed (H, W*C) layout.

    y2d   : (H, P) value, P = W*C, lane index = w*C + c.
    w_ref : (k*k, P) VMEM ref; row ky*k + kx holds tap (ky,kx) tiled over W, with the
            lanes whose source w would be out of range for that kx already zeroed
            (so circular pltpu.roll wrap-around contributes exactly zero).
    b_ref : (1, P) VMEM ref (bias tiled over W).
    """
    zrows = jnp.zeros((pad, P), jnp.float32)
    # Single padding step (H only); the W boundary is handled by the zeroed weights.
    ypad = jnp.concatenate([zrows, y2d, zrows], axis=0)               # (H+2p, P)

    acc = None
    for kx in range(k):
        sl = (kx * dil - pad) * C                                     # static lane shift
        if sl == 0:
            shifted = ypad
        else:
            # shifted[:, l] = ypad[:, (l + sl) mod P]; wrapped lanes are masked in w.
            shifted = pltpu.roll(ypad, shift=(-sl) % P, axis=1)
        # Reuse this W-shifted slab across all ky; H taps are plain row slices.
        for ky in range(k):
            t = ky * k + kx
            term = shifted[ky * dil: ky * dil + H, :] * w_ref[t:t + 1, :]
            acc = term if acc is None else acc + term
    return acc + b_ref[...]


# --------------------------------- Pallas kernel ----------------------------------

def temporal_attention_kernel(x_ref,
                              w_p1_ref, b_p1_ref,
                              w_dw0_ref, b_dw0_ref,
                              w_dw1_ref, b_dw1_ref,
                              w_c1_ref, b_c1_ref,
                              w_fc1_ref, w_fc2_ref,
                              w_p2_ref, b_p2_ref,
                              o_ref, *, C):
    x2d = x_ref[0].astype(jnp.float32)              # (H, W*C) lane-packed image
    H, P = x2d.shape

    # proj_1 (1x1 conv as aligned block-diag matmul) + exact GELU.  x2d is not used
    # again (residual is re-read from x_ref at the end) -> frees its vregs.
    y = _gelu_exact(_conv1x1_packed(x2d, w_p1_ref, b_p1_ref, H=H, P=P))   # (H, P)

    # Squeeze-excite gate, computed up front so only a (1, P) row stays live through
    # the depthwise section.  The W-group reduction (/W) and the W-broadcast are
    # folded into the pre-tiled FC weights (wrapper-side).
    row_mean = jnp.mean(y, axis=0, keepdims=True)                          # (1, P)
    h1 = jnp.maximum(
        jnp.dot(row_mean, w_fc1_ref[...], preferred_element_type=jnp.float32), 0.0)
    se_p = _sigmoid(jnp.dot(h1, w_fc2_ref[...], preferred_element_type=jnp.float32))

    # Large-kernel attention branch:
    #   depthwise 5x5 (pad 2) -> depthwise 7x7 dil=3 (pad 9) -> 1x1 conv.
    a = _depthwise_conv_packed(y, w_dw0_ref, b_dw0_ref, k=5, dil=1, pad=2, H=H, C=C, P=P)
    a = _depthwise_conv_packed(a, w_dw1_ref, b_dw1_ref, k=7, dil=3, pad=9, H=H, C=C, P=P)
    f_x = _conv1x1_packed(a, w_c1_ref, b_c1_ref, H=H, P=P)

    g = se_p * f_x * y                              # (H, P), lane-dense gating

    # proj_2 (1x1 conv) + residual shortcut (re-read from x_ref); lane-dense writeback.
    out = _conv1x1_packed(g, w_p2_ref, b_p2_ref, H=H, P=P)
    o_ref[0] = (out + x_ref[0].astype(jnp.float32)).astype(o_ref.dtype)


# ----------------------------------- wrapper ---------------------------------------

_PARAM_ORDER = ("w_p1", "b_p1", "w_dw0", "b_dw0", "w_dw1", "b_dw1",
                "w_c1", "b_c1", "w_fc1", "w_fc2", "w_p2", "b_p2")


def _pack_params(params, W):
    """Repack weights for the lane-packed (H, W*C) kernel layout (pure JAX, one-time)."""
    C = params["w_p1"].shape[0]
    P = W * C
    # G = W-groups per 1x1-conv matmul block; G*C = 128 keeps the chunks vreg-aligned
    # while shipping only a (G*C, G*C) weight instead of (P, P).
    G = math.gcd(W, max(1, 128 // C))
    eye_g = jnp.eye(G, dtype=jnp.float32)

    def blockdiag(w):      # (C, C) -> (G*C, G*C) block-diagonal
        return jnp.kron(eye_g, w)

    def tile_b(b):         # (1, C) -> (1, W*C), lane index w*C + c -> b[c]
        return jnp.tile(b, (1, W))

    def tile_dw(w, dil, pad):   # (k, k, C) -> (k*k, W*C), W-boundary lanes zeroed per kx
        k = w.shape[0]
        wt = jnp.tile(w, (1, 1, W)).reshape(k * k, P)
        wpos = jnp.arange(W)
        masks = []
        for ky in range(k):
            for kx in range(k):
                src_w = wpos + kx * dil - pad
                valid = ((src_w >= 0) & (src_w < W)).astype(jnp.float32)
                masks.append(jnp.repeat(valid, C))
        return wt * jnp.stack(masks, axis=0)

    return dict(
        w_p1=blockdiag(params["w_p1"]), b_p1=tile_b(params["b_p1"]),
        w_dw0=tile_dw(params["w_dw0"], 1, 2), b_dw0=tile_b(params["b_dw0"]),
        w_dw1=tile_dw(params["w_dw1"], 3, 9), b_dw1=tile_b(params["b_dw1"]),
        w_c1=blockdiag(params["w_c1"]), b_c1=tile_b(params["b_c1"]),
        # SE fold: (C,hidden) -> (P,hidden)/W and (hidden,C) -> (hidden,P).
        w_fc1=jnp.tile(params["w_fc1"], (W, 1)) / float(W),
        w_fc2=jnp.tile(params["w_fc2"], (1, W)),
        w_p2=blockdiag(params["w_p2"]), b_p2=tile_b(params["b_p2"]),
    )


def temporal_attention(x, params):
    """x: (B, H, W, C) float32 (NHWC), params: dict of weights (see init_params)."""
    B, H, W, C = x.shape
    P = W * C
    G = math.gcd(W, max(1, 128 // C))
    assert P % (G * C) == 0

    packed = _pack_params(params, W)
    weights = [packed[k] for k in _PARAM_ORDER]

    in_specs = ([pl.BlockSpec((1, H, P), lambda b: (b, 0, 0))]
                + [pl.BlockSpec(w.shape, lambda b, _n=w.ndim: (0,) * _n) for w in weights])
    out_spec = pl.BlockSpec((1, H, P), lambda b: (b, 0, 0))

    kernel = functools.partial(temporal_attention_kernel, C=C)

    out = pl.pallas_call(
        kernel,
        out_shape=jax.ShapeDtypeStruct((B, H, P), x.dtype),
        grid_spec=pltpu.PrefetchScalarGridSpec(
            num_scalar_prefetch=0,
            grid=(B,),
            in_specs=in_specs,
            out_specs=out_spec,
        ),
        compiler_params=pltpu.CompilerParams(dimension_semantics=("parallel",)),
    )(x.reshape(B, H, P), *weights)
    return out.reshape(B, H, W, C)


# --------------------------- deterministic parameter init --------------------------

def init_params(key, dim, reduction=16):
    red = max(dim // reduction, 4)
    hidden = dim // red
    ks = jax.random.split(key, 12)

    def unif(k, shape, fan_in):
        bound = 1.0 / (fan_in ** 0.5)
        return jax.random.uniform(k, shape, jnp.float32, -bound, bound)

    return dict(
        # proj_1: Conv2d(dim, dim, 1)  -> (in, out) matrix + bias
        w_p1=unif(ks[0], (dim, dim), dim), b_p1=unif(ks[1], (1, dim), dim),
        # conv0: depthwise 5x5 (groups=dim) -> (5, 5, dim)
        w_dw0=unif(ks[2], (5, 5, dim), 25), b_dw0=unif(ks[3], (1, dim), 25),
        # conv_spatial: depthwise 7x7, dilation 3 -> (7, 7, dim)
        w_dw1=unif(ks[4], (7, 7, dim), 49), b_dw1=unif(ks[5], (1, dim), 49),
        # conv1: Conv2d(dim, dim, 1)
        w_c1=unif(ks[6], (dim, dim), dim), b_c1=unif(ks[7], (1, dim), dim),
        # fc: Linear(dim, dim//red, bias=False), Linear(dim//red, dim, bias=False)
        w_fc1=unif(ks[8], (dim, hidden), dim), w_fc2=unif(ks[9], (hidden, dim), hidden),
        # proj_2: Conv2d(dim, dim, 1)
        w_p2=unif(ks[10], (dim, dim), dim), b_p2=unif(ks[11], (1, dim), dim),
    )


# ------------------------------- pure-JAX reference --------------------------------

def temporal_attention_ref(x, p):
    C = x.shape[-1]

    def conv1x1(t, w, b):
        return jnp.einsum('bhwi,io->bhwo', t, w) + b.reshape(1, 1, 1, -1)

    def dwconv(t, w, b, pad, dil):
        k = w.shape[0]
        out = jax.lax.conv_general_dilated(
            t, w.reshape(k, k, 1, C), window_strides=(1, 1),
            padding=[(pad, pad), (pad, pad)], rhs_dilation=(dil, dil),
            dimension_numbers=('NHWC', 'HWIO', 'NHWC'), feature_group_count=C)
        return out + b.reshape(1, 1, 1, C)

    y = conv1x1(x, p['w_p1'], p['b_p1'])
    y = jax.nn.gelu(y, approximate=False)
    u = y
    a = dwconv(u, p['w_dw0'], p['b_dw0'], pad=2, dil=1)
    a = dwconv(a, p['w_dw1'], p['b_dw1'], pad=9, dil=3)
    f_x = conv1x1(a, p['w_c1'], p['b_c1'])
    se = jnp.mean(u, axis=(1, 2))
    se = jax.nn.sigmoid(jnp.maximum(se @ p['w_fc1'], 0.0) @ p['w_fc2'])
    g = se[:, None, None, :] * f_x * u
    out = conv1x1(g, p['w_p2'], p['b_p2'])
    return out + x


# --------------------------------------- main --------------------------------------

if __name__ == "__main__":
    B, C, H, W = 2, 32, 16, 16          # d_model=32, kernel_size=21 (-> 5x5 + 7x7 dil 3)
    key = jax.random.PRNGKey(0)
    kx, kp = jax.random.split(key)
    x = jax.random.normal(kx, (B, H, W, C), jnp.float32)   # NHWC (= NCHW [2,32,16,16])
    params = init_params(kp, C)

    out = temporal_attention(x, params)
    out = jax.block_until_ready(out)

    ref = jax.block_until_ready(temporal_attention_ref(x, params))
    assert out.shape == (B, H, W, C)
    assert jnp.allclose(out, ref, atol=1e-3, rtol=1e-3), float(jnp.max(jnp.abs(out - ref)))

    print("KERNEL_OK")
</pallas_src>

<mosaic_0001>
module attributes {stable_mosaic.version = 11 : i64} {
  func.func @temporal_attention_kernel(%arg0: i32, %arg1: memref<1x16x512xf32, #tpu.memory_space<vmem>>, %arg2: memref<128x128xf32, #tpu.memory_space<vmem>>, %arg3: memref<1x512xf32, #tpu.memory_space<vmem>>, %arg4: memref<25x512xf32, #tpu.memory_space<vmem>>, %arg5: memref<1x512xf32, #tpu.memory_space<vmem>>, %arg6: memref<49x512xf32, #tpu.memory_space<vmem>>, %arg7: memref<1x512xf32, #tpu.memory_space<vmem>>, %arg8: memref<128x128xf32, #tpu.memory_space<vmem>>, %arg9: memref<1x512xf32, #tpu.memory_space<vmem>>, %arg10: memref<512x8xf32, #tpu.memory_space<vmem>>, %arg11: memref<8x512xf32, #tpu.memory_space<vmem>>, %arg12: memref<128x128xf32, #tpu.memory_space<vmem>>, %arg13: memref<1x512xf32, #tpu.memory_space<vmem>>, %arg14: memref<1x16x512xf32, #tpu.memory_space<vmem>>) attributes {dimension_semantics = [#tpu.dimension_semantics<parallel>], iteration_bounds = array<i64: 2>, scalar_prefetch = 0 : i64, scratch_operands = 0 : i64, tpu.core_type = #tpu.core_type<tc>, window_params = [{transform_indices = @transform_0, window_bounds = array<i64: 1, 16, 512>}, {pipeline_mode = #tpu.pipeline_mode<synchronous>, transform_indices = @transform_1, window_bounds = array<i64: 128, 128>}, {pipeline_mode = #tpu.pipeline_mode<synchronous>, transform_indices = @transform_2, window_bounds = array<i64: 1, 512>}, {pipeline_mode = #tpu.pipeline_mode<synchronous>, transform_indices = @transform_3, window_bounds = array<i64: 25, 512>}, {pipeline_mode = #tpu.pipeline_mode<synchronous>, transform_indices = @transform_4, window_bounds = array<i64: 1, 512>}, {pipeline_mode = #tpu.pipeline_mode<synchronous>, transform_indices = @transform_5, window_bounds = array<i64: 49, 512>}, {pipeline_mode = #tpu.pipeline_mode<synchronous>, transform_indices = @transform_6, window_bounds = array<i64: 1, 512>}, {pipeline_mode = #tpu.pipeline_mode<synchronous>, transform_indices = @transform_7, window_bounds = array<i64: 128, 128>}, {pipeline_mode = #tpu.pipeline_mode<synchronous>, transform_indices = @transform_8, window_bounds = array<i64: 1, 512>}, {pipeline_mode = #tpu.pipeline_mode<synchronous>, transform_indices = @transform_9, window_bounds = array<i64: 512, 8>}, {pipeline_mode = #tpu.pipeline_mode<synchronous>, transform_indices = @transform_10, window_bounds = array<i64: 8, 512>}, {pipeline_mode = #tpu.pipeline_mode<synchronous>, transform_indices = @transform_11, window_bounds = array<i64: 128, 128>}, {pipeline_mode = #tpu.pipeline_mode<synchronous>, transform_indices = @transform_12, window_bounds = array<i64: 1, 512>}, {transform_indices = @transform_13, window_bounds = array<i64: 1, 16, 512>}]} {
    %c0 = arith.constant 0 : index
    %c0_0 = arith.constant 0 : index
    %c0_1 = arith.constant 0 : index
    %0 = vector.load %arg1[%c0, %c0_0, %c0_1] : memref<1x16x512xf32, #tpu.memory_space<vmem>>, vector<1x16x512xf32>
    %1 = vector.shape_cast %0 : vector<1x16x512xf32> to vector<16x512xf32>
    %2 = vector.extract_strided_slice %1 {offsets = [0, 0], sizes = [16, 128], strides = [1, 1]} : vector<16x512xf32> to vector<16x128xf32>
    %3 = vector.extract_strided_slice %1 {offsets = [0, 128], sizes = [16, 128], strides = [1, 1]} : vector<16x512xf32> to vector<16x128xf32>
    %4 = vector.extract_strided_slice %1 {offsets = [0, 256], sizes = [16, 128], strides = [1, 1]} : vector<16x512xf32> to vector<16x128xf32>
    %5 = vector.extract_strided_slice %1 {offsets = [0, 384], sizes = [16, 128], strides = [1, 1]} : vector<16x512xf32> to vector<16x128xf32>
    %6 = tpu.concatenate %2, %3, %4, %5 in 0 : vector<16x128xf32>, vector<16x128xf32>, vector<16x128xf32>, vector<16x128xf32> -> vector<64x128xf32>
    %c0_2 = arith.constant 0 : index
    %c0_3 = arith.constant 0 : index
    %7 = vector.load %arg2[%c0_2, %c0_3] : memref<128x128xf32, #tpu.memory_space<vmem>>, vector<128x128xf32>
    %cst = arith.constant dense<0.000000e+00> : vector<64x128xf32>
    %8 = tpu.matmul %6, %7, %cst {dimension_numbers = #tpu.dot_dimension_numbers<[1], [0], [0], [1], [0, 0, 1, 1], [], []>} : vector<64x128xf32>, vector<128x128xf32>, vector<64x128xf32> -> vector<64x128xf32>
    %9 = vector.extract_strided_slice %8 {offsets = [0, 0], sizes = [16, 128], strides = [1, 1]} : vector<64x128xf32> to vector<16x128xf32>
    %10 = vector.extract_strided_slice %8 {offsets = [16, 0], sizes = [16, 128], strides = [1, 1]} : vector<64x128xf32> to vector<16x128xf32>
    %11 = vector.extract_strided_slice %8 {offsets = [32, 0], sizes = [16, 128], strides = [1, 1]} : vector<64x128xf32> to vector<16x128xf32>
    %12 = vector.extract_strided_slice %8 {offsets = [48, 0], sizes = [16, 128], strides = [1, 1]} : vector<64x128xf32> to vector<16x128xf32>
    %13 = tpu.concatenate %9, %10, %11, %12 in 1 : vector<16x128xf32>, vector<16x128xf32>, vector<16x128xf32>, vector<16x128xf32> -> vector<16x512xf32>
    %c0_4 = arith.constant 0 : index
    %c0_5 = arith.constant 0 : index
    %14 = vector.load %arg3[%c0_4, %c0_5] : memref<1x512xf32, #tpu.memory_space<vmem>>, vector<1x512xf32>
    %15 = vector.broadcast %14 : vector<1x512xf32> to vector<16x512xf32>
    %16 = arith.addf %13, %15 : vector<16x512xf32>
    %cst_6 = arith.constant 5.000000e-01 : f32
    %17 = vector.broadcast %cst_6 : f32 to vector<16x512xf32>
    %18 = arith.mulf %17, %16 : vector<16x512xf32>
    %cst_7 = arith.constant 0.707106769 : f32
    %19 = vector.broadcast %cst_7 : f32 to vector<16x512xf32>
    %20 = arith.mulf %16, %19 : vector<16x512xf32>
    %cst_8 = arith.constant 0.000000e+00 : f32
    %21 = vector.broadcast %cst_8 : f32 to vector<16x512xf32>
    %22 = arith.cmpf oge, %20, %21 : vector<16x512xf32>
    %cst_9 = arith.constant 1.000000e+00 : f32
    %cst_10 = arith.constant -1.000000e+00 : f32
    %23 = vector.broadcast %cst_9 : f32 to vector<16x512xf32>
    %24 = vector.broadcast %cst_10 : f32 to vector<16x512xf32>
    %25 = arith.select %22, %23, %24 : vector<16x512xi1>, vector<16x512xf32>
    %26 = math.absf %20 : vector<16x512xf32>
    %cst_11 = arith.constant 0.327591091 : f32
    %27 = vector.broadcast %cst_11 : f32 to vector<16x512xf32>
    %28 = arith.mulf %27, %26 : vector<16x512xf32>
    %cst_12 = arith.constant 1.000000e+00 : f32
    %29 = vector.broadcast %cst_12 : f32 to vector<16x512xf32>
    %30 = arith.addf %29, %28 : vector<16x512xf32>
    %cst_13 = arith.constant 1.000000e+00 : f32
    %31 = vector.broadcast %cst_13 : f32 to vector<16x512xf32>
    %32 = arith.divf %31, %30 : vector<16x512xf32>
    %cst_14 = arith.constant 1.06140542 : f32
    %33 = vector.broadcast %cst_14 : f32 to vector<16x512xf32>
    %34 = arith.mulf %33, %32 : vector<16x512xf32>
    %cst_15 = arith.constant -1.45315206 : f32
    %35 = vector.broadcast %cst_15 : f32 to vector<16x512xf32>
    %36 = arith.addf %34, %35 : vector<16x512xf32>
    %37 = arith.mulf %36, %32 : vector<16x512xf32>
    %cst_16 = arith.constant 1.42141378 : f32
    %38 = vector.broadcast %cst_16 : f32 to vector<16x512xf32>
    %39 = arith.addf %37, %38 : vector<16x512xf32>
    %40 = arith.mulf %39, %32 : vector<16x512xf32>
    %cst_17 = arith.constant -0.284496725 : f32
    %41 = vector.broadcast %cst_17 : f32 to vector<16x512xf32>
    %42 = arith.addf %40, %41 : vector<16x512xf32>
    %43 = arith.mulf %42, %32 : vector<16x512xf32>
    %cst_18 = arith.constant 0.254829586 : f32
    %44 = vector.broadcast %cst_18 : f32 to vector<16x512xf32>
    %45 = arith.addf %43, %44 : vector<16x512xf32>
    %46 = arith.mulf %45, %32 : vector<16x512xf32>
    %cst_19 = arith.constant 0.000000e+00 : f32
    %47 = vector.broadcast %cst_19 : f32 to vector<16x512xf32>
    %48 = arith.subf %47, %26 : vector<16x512xf32>
    %49 = arith.mulf %48, %26 : vector<16x512xf32>
    %50 = math.exp %49 : vector<16x512xf32>
    %51 = arith.mulf %46, %50 : vector<16x512xf32>
    %cst_20 = arith.constant 1.000000e+00 : f32
    %52 = vector.broadcast %cst_20 : f32 to vector<16x512xf32>
    %53 = arith.subf %52, %51 : vector<16x512xf32>
    %54 = arith.mulf %25, %53 : vector<16x512xf32>
    %cst_21 = arith.constant 1.000000e+00 : f32
    %55 = vector.broadcast %cst_21 : f32 to vector<16x512xf32>
    %56 = arith.addf %55, %54 : vector<16x512xf32>
    %57 = arith.mulf %18, %56 : vector<16x512xf32>
    %cst_22 = arith.constant dense<0.000000e+00> : vector<512xf32>
    %58 = vector.multi_reduction <add>, %57, %cst_22 [0] : vector<16x512xf32> to vector<512xf32>
    %59 = vector.shape_cast %58 : vector<512xf32> to vector<1x512xf32>
    %cst_23 = arith.constant 1.600000e+01 : f32
    %60 = vector.broadcast %cst_23 : f32 to vector<1x512xf32>
    %61 = arith.divf %59, %60 : vector<1x512xf32>
    %c0_24 = arith.constant 0 : index
    %c0_25 = arith.constant 0 : index
    %62 = vector.load %arg10[%c0_24, %c0_25] : memref<512x8xf32, #tpu.memory_space<vmem>>, vector<512x8xf32>
    %cst_26 = arith.constant dense<0.000000e+00> : vector<1x8xf32>
    %63 = tpu.matmul %61, %62, %cst_26 {dimension_numbers = #tpu.dot_dimension_numbers<[1], [0], [0], [1], [0, 0, 1, 1], [], []>} : vector<1x512xf32>, vector<512x8xf32>, vector<1x8xf32> -> vector<1x8xf32>
    %cst_27 = arith.constant 0.000000e+00 : f32
    %64 = vector.broadcast %cst_27 : f32 to vector<1x8xf32>
    %65 = arith.maximumf %63, %64 : vector<1x8xf32>
    %c0_28 = arith.constant 0 : index
    %c0_29 = arith.constant 0 : index
    %66 = vector.load %arg11[%c0_28, %c0_29] : memref<8x512xf32, #tpu.memory_space<vmem>>, vector<8x512xf32>
    %cst_30 = arith.constant dense<0.000000e+00> : vector<1x512xf32>
    %67 = tpu.matmul %65, %66, %cst_30 {dimension_numbers = #tpu.dot_dimension_numbers<[1], [0], [0], [1], [0, 0, 1, 1], [], []>} : vector<1x8xf32>, vector<8x512xf32>, vector<1x512xf32> -> vector<1x512xf32>
    %cst_31 = arith.constant 0.000000e+00 : f32
    %68 = vector.broadcast %cst_31 : f32 to vector<1x512xf32>
    %69 = arith.subf %68, %67 : vector<1x512xf32>
    %70 = math.exp %69 : vector<1x512xf32>
    %cst_32 = arith.constant 1.000000e+00 : f32
    %71 = vector.broadcast %cst_32 : f32 to vector<1x512xf32>
    %72 = arith.addf %71, %70 : vector<1x512xf32>
    %cst_33 = arith.constant 1.000000e+00 : f32
    %73 = vector.broadcast %cst_33 : f32 to vector<1x512xf32>
    %74 = arith.divf %73, %72 : vector<1x512xf32>
    %cst_34 = arith.constant 0.000000e+00 : f32
    %75 = vector.broadcast %cst_34 : f32 to vector<2x512xf32>
    %76 = tpu.concatenate %75, %57, %75 in 0 : vector<2x512xf32>, vector<16x512xf32>, vector<2x512xf32> -> vector<20x512xf32>
    %c64_i32 = arith.constant 64 : i32
    %77 = tpu.dynamic_rotate %76 by %c64_i32 dim 1 : vector<20x512xf32>, i32 -> vector<20x512xf32>
    %78 = vector.extract_strided_slice %77 {offsets = [0, 0], sizes = [16, 512], strides = [1, 1]} : vector<20x512xf32> to vector<16x512xf32>
    %c0_35 = arith.constant 0 : index
    %c0_36 = arith.constant 0 : index
    %79 = vector.load %arg4[%c0_35, %c0_36] : memref<25x512xf32, #tpu.memory_space<vmem>>, vector<1x512xf32>
    %80 = vector.broadcast %79 : vector<1x512xf32> to vector<16x512xf32>
    %81 = arith.mulf %78, %80 : vector<16x512xf32>
    %82 = vector.extract_strided_slice %77 {offsets = [1, 0], sizes = [16, 512], strides = [1, 1]} : vector<20x512xf32> to vector<16x512xf32>
    %c5 = arith.constant 5 : index
    %c0_37 = arith.constant 0 : index
    %83 = vector.load %arg4[%c5, %c0_37] : memref<25x512xf32, #tpu.memory_space<vmem>>, vector<1x512xf32>
    %84 = vector.broadcast %83 : vector<1x512xf32> to vector<16x512xf32>
    %85 = arith.mulf %82, %84 : vector<16x512xf32>
    %86 = arith.addf %81, %85 : vector<16x512xf32>
    %87 = vector.extract_strided_slice %77 {offsets = [2, 0], sizes = [16, 512], strides = [1, 1]} : vector<20x512xf32> to vector<16x512xf32>
    %c10 = arith.constant 10 : index
    %c0_38 = arith.constant 0 : index
    %88 = vector.load %arg4[%c10, %c0_38] : memref<25x512xf32, #tpu.memory_space<vmem>>, vector<1x512xf32>
    %89 = vector.broadcast %88 : vector<1x512xf32> to vector<16x512xf32>
    %90 = arith.mulf %87, %89 : vector<16x512xf32>
    %91 = arith.addf %86, %90 : vector<16x512xf32>
    %92 = vector.extract_strided_slice %77 {offsets = [3, 0], sizes = [16, 512], strides = [1, 1]} : vector<20x512xf32> to vector<16x512xf32>
    %c15 = arith.constant 15 : index
    %c0_39 = arith.constant 0 : index
    %93 = vector.load %arg4[%c15, %c0_39] : memref<25x512xf32, #tpu.memory_space<vmem>>, vector<1x512xf32>
    %94 = vector.broadcast %93 : vector<1x512xf32> to vector<16x512xf32>
    %95 = arith.mulf %92, %94 : vector<16x512xf32>
    %96 = arith.addf %91, %95 : vector<16x512xf32>
    %97 = vector.extract_strided_slice %77 {offsets = [4, 0], sizes = [16, 512], strides = [1, 1]} : vector<20x512xf32> to vector<16x512xf32>
    %c20 = arith.constant 20 : index
    %c0_40 = arith.constant 0 : index
    %98 = vector.load %arg4[%c20, %c0_40] : memref<25x512xf32, #tpu.memory_space<vmem>>, vector<1x512xf32>
    %99 = vector.broadcast %98 : vector<1x512xf32> to vector<16x512xf32>
    %100 = arith.mulf %97, %99 : vector<16x512xf32>
    %101 = arith.addf %96, %100 : vector<16x512xf32>
    %c32_i32 = arith.constant 32 : i32
    %102 = tpu.dynamic_rotate %76 by %c32_i32 dim 1 : vector<20x512xf32>, i32 -> vector<20x512xf32>
    %103 = vector.extract_strided_slice %102 {offsets = [0, 0], sizes = [16, 512], strides = [1, 1]} : vector<20x512xf32> to vector<16x512xf32>
    %c1 = arith.constant 1 : index
    %c0_41 = arith.constant 0 : index
    %104 = vector.load %arg4[%c1, %c0_41] : memref<25x512xf32, #tpu.memory_space<vmem>>, vector<1x512xf32>
    %105 = vector.broadcast %104 : vector<1x512xf32> to vector<16x512xf32>
    %106 = arith.mulf %103, %105 : vector<16x512xf32>
    %107 = arith.addf %101, %106 : vector<16x512xf32>
    %108 = vector.extract_strided_slice %102 {offsets = [1, 0], sizes = [16, 512], strides = [1, 1]} : vector<20x512xf32> to vector<16x512xf32>
    %c6 = arith.constant 6 : index
    %c0_42 = arith.constant 0 : index
    %109 = vector.load %arg4[%c6, %c0_42] : memref<25x512xf32, #tpu.memory_space<vmem>>, vector<1x512xf32>
    %110 = vector.broadcast %109 : vector<1x512xf32> to vector<16x512xf32>
    %111 = arith.mulf %108, %110 : vector<16x512xf32>
    %112 = arith.addf %107, %111 : vector<16x512xf32>
    %113 = vector.extract_strided_slice %102 {offsets = [2, 0], sizes = [16, 512], strides = [1, 1]} : vector<20x512xf32> to vector<16x512xf32>
    %c11 = arith.constant 11 : index
    %c0_43 = arith.constant 0 : index
    %114 = vector.load %arg4[%c11, %c0_43] : memref<25x512xf32, #tpu.memory_space<vmem>>, vector<1x512xf32>
    %115 = vector.broadcast %114 : vector<1x512xf32> to vector<16x512xf32>
    %116 = arith.mulf %113, %115 : vector<16x512xf32>
    %117 = arith.addf %112, %116 : vector<16x512xf32>
    %118 = vector.extract_strided_slice %102 {offsets = [3, 0], sizes = [16, 512], strides = [1, 1]} : vector<20x512xf32> to vector<16x512xf32>
    %c16 = arith.constant 16 : index
    %c0_44 = arith.constant 0 : index
    %119 = vector.load %arg4[%c16, %c0_44] : memref<25x512xf32, #tpu.memory_space<vmem>>, vector<1x512xf32>
    %120 = vector.broadcast %119 : vector<1x512xf32> to vector<16x512xf32>
    %121 = arith.mulf %118, %120 : vector<16x512xf32>
    %122 = arith.addf %117, %121 : vector<16x512xf32>
    %123 = vector.extract_strided_slice %102 {offsets = [4, 0], sizes = [16, 512], strides = [1, 1]} : vector<20x512xf32> to vector<16x512xf32>
    %c21 = arith.constant 21 : index
    %c0_45 = arith.constant 0 : index
    %124 = vector.load %arg4[%c21, %c0_45] : memref<25x512xf32, #tpu.memory_space<vmem>>, vector<1x512xf32>
    %125 = vector.broadcast %124 : vector<1x512xf32> to vector<16x512xf32>
    %126 = arith.mulf %123, %125 : vector<16x512xf32>
    %127 = arith.addf %122, %126 : vector<16x512xf32>
    %128 = vector.extract_strided_slice %76 {offsets = [0, 0], sizes = [16, 512], strides = [1, 1]} : vector<20x512xf32> to vector<16x512xf32>
    %c2 = arith.constant 2 : index
    %c0_46 = arith.constant 0 : index
    %129 = vector.load %arg4[%c2, %c0_46] : memref<25x512xf32, #tpu.memory_space<vmem>>, vector<1x512xf32>
    %130 = vector.broadcast %129 : vector<1x512xf32> to vector<16x512xf32>
    %131 = arith.mulf %128, %130 : vector<16x512xf32>
    %132 = arith.addf %127, %131 : vector<16x512xf32>
    %133 = vector.extract_strided_slice %76 {offsets = [1, 0], sizes = [16, 512], strides = [1, 1]} : vector<20x512xf32> to vector<16x512xf32>
    %c7 = arith.constant 7 : index
    %c0_47 = arith.constant 0 : index
    %134 = vector.load %arg4[%c7, %c0_47] : memref<25x512xf32, #tpu.memory_space<vmem>>, vector<1x512xf32>
    %135 = vector.broadcast %134 : vector<1x512xf32> to vector<16x512xf32>
    %136 = arith.mulf %133, %135 : vector<16x512xf32>
    %137 = arith.addf %132, %136 : vector<16x512xf32>
    %138 = vector.extract_strided_slice %76 {offsets = [2, 0], sizes = [16, 512], strides = [1, 1]} : vector<20x512xf32> to vector<16x512xf32>
    %c12 = arith.constant 12 : index
    %c0_48 = arith.constant 0 : index
    %139 = vector.load %arg4[%c12, %c0_48] : memref<25x512xf32, #tpu.memory_space<vmem>>, vector<1x512xf32>
    %140 = vector.broadcast %139 : vector<1x512xf32> to vector<16x512xf32>
    %141 = arith.mulf %138, %140 : vector<16x512xf32>
    %142 = arith.addf %137, %141 : vector<16x512xf32>
    %143 = vector.extract_strided_slice %76 {offsets = [3, 0], sizes = [16, 512], strides = [1, 1]} : vector<20x512xf32> to vector<16x512xf32>
    %c17 = arith.constant 17 : index
    %c0_49 = arith.constant 0 : index
    %144 = vector.load %arg4[%c17, %c0_49] : memref<25x512xf32, #tpu.memory_space<vmem>>, vector<1x512xf32>
    %145 = vector.broadcast %144 : vector<1x512xf32> to vector<16x512xf32>
    %146 = arith.mulf %143, %145 : vector<16x512xf32>
    %147 = arith.addf %142, %146 : vector<16x512xf32>
    %148 = vector.extract_strided_slice %76 {offsets = [4, 0], sizes = [16, 512], strides = [1, 1]} : vector<20x512xf32> to vector<16x512xf32>
    %c22 = arith.constant 22 : index
    %c0_50 = arith.constant 0 : index
    %149 = vector.load %arg4[%c22, %c0_50] : memref<25x512xf32, #tpu.memory_space<vmem>>, vector<1x512xf32>
    %150 = vector.broadcast %149 : vector<1x512xf32> to vector<16x512xf32>
    %151 = arith.mulf %148, %150 : vector<16x512xf32>
    %152 = arith.addf %147, %151 : vector<16x512xf32>
    %c480_i32 = arith.constant 480 : i32
    %153 = tpu.dynamic_rotate %76 by %c480_i32 dim 1 : vector<20x512xf32>, i32 -> vector<20x512xf32>
    %154 = vector.extract_strided_slice %153 {offsets = [0, 0], sizes = [16, 512], strides = [1, 1]} : vector<20x512xf32> to vector<16x512xf32>
    %c3 = arith.constant 3 : index
    %c0_51 = arith.constant 0 : index
    %155 = vector.load %arg4[%c3, %c0_51] : memref<25x512xf32, #tpu.memory_space<vmem>>, vector<1x512xf32>
    %156 = vector.broadcast %155 : vector<1x512xf32> to vector<16x512xf32>
    %157 = arith.mulf %154, %156 : vector<16x512xf32>
    %158 = arith.addf %152, %157 : vector<16x512xf32>
    %159 = vector.extract_strided_slice %153 {offsets = [1, 0], sizes = [16, 512], strides = [1, 1]} : vector<20x512xf32> to vector<16x512xf32>
    %c8 = arith.constant 8 : index
    %c0_52 = arith.constant 0 : index
    %160 = vector.load %arg4[%c8, %c0_52] : memref<25x512xf32, #tpu.memory_space<vmem>>, vector<1x512xf32>
    %161 = vector.broadcast %160 : vector<1x512xf32> to vector<16x512xf32>
    %162 = arith.mulf %159, %161 : vector<16x512xf32>
    %163 = arith.addf %158, %162 : vector<16x512xf32>
    %164 = vector.extract_strided_slice %153 {offsets = [2, 0], sizes = [16, 512], strides = [1, 1]} : vector<20x512xf32> to vector<16x512xf32>
    %c13 = arith.constant 13 : index
    %c0_53 = arith.constant 0 : index
    %165 = vector.load %arg4[%c13, %c0_53] : memref<25x512xf32, #tpu.memory_space<vmem>>, vector<1x512xf32>
    %166 = vector.broadcast %165 : vector<1x512xf32> to vector<16x512xf32>
    %167 = arith.mulf %164, %166 : vector<16x512xf32>
    %168 = arith.addf %163, %167 : vector<16x512xf32>
    %169 = vector.extract_strided_slice %153 {offsets = [3, 0], sizes = [16, 512], strides = [1, 1]} : vector<20x512xf32> to vector<16x512xf32>
    %c18 = arith.constant 18 : index
    %c0_54 = arith.constant 0 : index
    %170 = vector.load %arg4[%c18, %c0_54] : memref<25x512xf32, #tpu.memory_space<vmem>>, vector<1x512xf32>
    %171 = vector.broadcast %170 : vector<1x512xf32> to vector<16x512xf32>
    %172 = arith.mulf %169, %171 : vector<16x512xf32>
    %173 = arith.addf %168, %172 : vector<16x512xf32>
    %174 = vector.extract_strided_slice %153 {offsets = [4, 0], sizes = [16, 512], strides = [1, 1]} : vector<20x512xf32> to vector<16x512xf32>
    %c23 = arith.constant 23 : index
    %c0_55 = arith.constant 0 : index
    %175 = vector.load %arg4[%c23, %c0_55] : memref<25x512xf32, #tpu.memory_space<vmem>>, vector<1x512xf32>
    %176 = vector.broadcast %175 : vector<1x512xf32> to vector<16x512xf32>
    %177 = arith.mulf %174, %176 : vector<16x512xf32>
    %178 = arith.addf %173, %177 : vector<16x512xf32>
    %c448_i32 = arith.constant 448 : i32
    %179 = tpu.dynamic_rotate %76 by %c448_i32 dim 1 : vector<20x512xf32>, i32 -> vector<20x512xf32>
    %180 = vector.extract_strided_slice %179 {offsets = [0, 0], sizes = [16, 512], strides = [1, 1]} : vector<20x512xf32> to vector<16x512xf32>
    %c4 = arith.constant 4 : index
    %c0_56 = arith.constant 0 : index
    %181 = vector.load %arg4[%c4, %c0_56] : memref<25x512xf32, #tpu.memory_space<vmem>>, vector<1x512xf32>
    %182 = vector.broadcast %181 : vector<1x512xf32> to vector<16x512xf32>
    %183 = arith.mulf %180, %182 : vector<16x512xf32>
    %184 = arith.addf %178, %183 : vector<16x512xf32>
    %185 = vector.extract_strided_slice %179 {offsets = [1, 0], sizes = [16, 512], strides = [1, 1]} : vector<20x512xf32> to vector<16x512xf32>
    %c9 = arith.constant 9 : index
    %c0_57 = arith.constant 0 : index
    %186 = vector.load %arg4[%c9, %c0_57] : memref<25x512xf32, #tpu.memory_space<vmem>>, vector<1x512xf32>
    %187 = vector.broadcast %186 : vector<1x512xf32> to vector<16x512xf32>
    %188 = arith.mulf %185, %187 : vector<16x512xf32>
    %189 = arith.addf %184, %188 : vector<16x512xf32>
    %190 = vector.extract_strided_slice %179 {offsets = [2, 0], sizes = [16, 512], strides = [1, 1]} : vector<20x512xf32> to vector<16x512xf32>
    %c14 = arith.constant 14 : index
    %c0_58 = arith.constant 0 : index
    %191 = vector.load %arg4[%c14, %c0_58] : memref<25x512xf32, #tpu.memory_space<vmem>>, vector<1x512xf32>
    %192 = vector.broadcast %191 : vector<1x512xf32> to vector<16x512xf32>
    %193 = arith.mulf %190, %192 : vector<16x512xf32>
    %194 = arith.addf %189, %193 : vector<16x512xf32>
    %195 = vector.extract_strided_slice %179 {offsets = [3, 0], sizes = [16, 512], strides = [1, 1]} : vector<20x512xf32> to vector<16x512xf32>
    %c19 = arith.constant 19 : index
    %c0_59 = arith.constant 0 : index
    %196 = vector.load %arg4[%c19, %c0_59] : memref<25x512xf32, #tpu.memory_space<vmem>>, vector<1x512xf32>
    %197 = vector.broadcast %196 : vector<1x512xf32> to vector<16x512xf32>
    %198 = arith.mulf %195, %197 : vector<16x512xf32>
    %199 = arith.addf %194, %198 : vector<16x512xf32>
    %200 = vector.extract_strided_slice %179 {offsets = [4, 0], sizes = [16, 512], strides = [1, 1]} : vector<20x512xf32> to vector<16x512xf32>
    %c24 = arith.constant 24 : index
    %c0_60 = arith.constant 0 : index
    %201 = vector.load %arg4[%c24, %c0_60] : memref<25x512xf32, #tpu.memory_space<vmem>>, vector<1x512xf32>
    %202 = vector.broadcast %201 : vector<1x512xf32> to vector<16x512xf32>
    %203 = arith.mulf %200, %202 : vector<16x512xf32>
    %204 = arith.addf %199, %203 : vector<16x512xf32>
    %c0_61 = arith.constant 0 : index
    %c0_62 = arith.constant 0 : index
    %205 = vector.load %arg5[%c0_61, %c0_62] : memref<1x512xf32, #tpu.memory_space<vmem>>, vector<1x512xf32>
    %206 = vector.broadcast %205 : vector<1x512xf32> to vector<16x512xf32>
    %207 = arith.addf %204, %206 : vector<16x512xf32>
    %cst_63 = arith.constant 0.000000e+00 : f32
    %208 = vector.broadcast %cst_63 : f32 to vector<9x512xf32>
    %209 = tpu.concatenate %208, %207, %208 in 0 : vector<9x512xf32>, vector<16x512xf32>, vector<9x512xf32> -> vector<34x512xf32>
    %c288_i32 = arith.constant 288 : i32
    %210 = tpu.dynamic_rotate %209 by %c288_i32 dim 1 : vector<34x512xf32>, i32 -> vector<34x512xf32>
    %211 = vector.extract_strided_slice %210 {offsets = [0, 0], sizes = [16, 512], strides = [1, 1]} : vector<34x512xf32> to vector<16x512xf32>
    %c0_64 = arith.constant 0 : index
    %c0_65 = arith.constant 0 : index
    %212 = vector.load %arg6[%c0_64, %c0_65] : memref<49x512xf32, #tpu.memory_space<vmem>>, vector<1x512xf32>
    %213 = vector.broadcast %212 : vector<1x512xf32> to vector<16x512xf32>
    %214 = arith.mulf %211, %213 : vector<16x512xf32>
    %215 = vector.extract_strided_slice %210 {offsets = [3, 0], sizes = [16, 512], strides = [1, 1]} : vector<34x512xf32> to vector<16x512xf32>
    %c7_66 = arith.constant 7 : index
    %c0_67 = arith.constant 0 : index
    %216 = vector.load %arg6[%c7_66, %c0_67] : memref<49x512xf32, #tpu.memory_space<vmem>>, vector<1x512xf32>
    %217 = vector.broadcast %216 : vector<1x512xf32> to vector<16x512xf32>
    %218 = arith.mulf %215, %217 : vector<16x512xf32>
    %219 = arith.addf %214, %218 : vector<16x512xf32>
    %220 = vector.extract_strided_slice %210 {offsets = [6, 0], sizes = [16, 512], strides = [1, 1]} : vector<34x512xf32> to vector<16x512xf32>
    %c14_68 = arith.constant 14 : index
    %c0_69 = arith.constant 0 : index
    %221 = vector.load %arg6[%c14_68, %c0_69] : memref<49x512xf32, #tpu.memory_space<vmem>>, vector<1x512xf32>
    %222 = vector.broadcast %221 : vector<1x512xf32> to vector<16x512xf32>
    %223 = arith.mulf %220, %222 : vector<16x512xf32>
    %224 = arith.addf %219, %223 : vector<16x512xf32>
    %225 = vector.extract_strided_slice %210 {offsets = [9, 0], sizes = [16, 512], strides = [1, 1]} : vector<34x512xf32> to vector<16x512xf32>
    %c21_70 = arith.constant 21 : index
    %c0_71 = arith.constant 0 : index
    %226 = vector.load %arg6[%c21_70, %c0_71] : memref<49x512xf32, #tpu.memory_space<vmem>>, vector<1x512xf32>
    %227 = vector.broadcast %226 : vector<1x512xf32> to vector<16x512xf32>
    %228 = arith.mulf %225, %227 : vector<16x512xf32>
    %229 = arith.addf %224, %228 : vector<16x512xf32>
    %230 = vector.extract_strided_slice %210 {offsets = [12, 0], sizes = [16, 512], strides = [1, 1]} : vector<34x512xf32> to vector<16x512xf32>
    %c28 = arith.constant 28 : index
    %c0_72 = arith.constant 0 : index
    %231 = vector.load %arg6[%c28, %c0_72] : memref<49x512xf32, #tpu.memory_space<vmem>>, vector<1x512xf32>
    %232 = vector.broadcast %231 : vector<1x512xf32> to vector<16x512xf32>
    %233 = arith.mulf %230, %232 : vector<16x512xf32>
    %234 = arith.addf %229, %233 : vector<16x512xf32>
    %235 = vector.extract_strided_slice %210 {offsets = [15, 0], sizes = [16, 512], strides = [1, 1]} : vector<34x512xf32> to vector<16x512xf32>
    %c35 = arith.constant 35 : index
    %c0_73 = arith.constant 0 : index
    %236 = vector.load %arg6[%c35, %c0_73] : memref<49x512xf32, #tpu.memory_space<vmem>>, vector<1x512xf32>
    %237 = vector.broadcast %236 : vector<1x512xf32> to vector<16x512xf32>
    %238 = arith.mulf %235, %237 : vector<16x512xf32>
    %239 = arith.addf %234, %238 : vector<16x512xf32>
    %240 = vector.extract_strided_slice %210 {offsets = [18, 0], sizes = [16, 512], strides = [1, 1]} : vector<34x512xf32> to vector<16x512xf32>
    %c42 = arith.constant 42 : index
    %c0_74 = arith.constant 0 : index
    %241 = vector.load %arg6[%c42, %c0_74] : memref<49x512xf32, #tpu.memory_space<vmem>>, vector<1x512xf32>
    %242 = vector.broadcast %241 : vector<1x512xf32> to vector<16x512xf32>
    %243 = arith.mulf %240, %242 : vector<16x512xf32>
    %244 = arith.addf %239, %243 : vector<16x512xf32>
    %c192_i32 = arith.constant 192 : i32
    %245 = tpu.dynamic_rotate %209 by %c192_i32 dim 1 : vector<34x512xf32>, i32 -> vector<34x512xf32>
    %246 = vector.extract_strided_slice %245 {offsets = [0, 0], sizes = [16, 512], strides = [1, 1]} : vector<34x512xf32> to vector<16x512xf32>
    %c1_75 = arith.constant 1 : index
    %c0_76 = arith.constant 0 : index
    %247 = vector.load %arg6[%c1_75, %c0_76] : memref<49x512xf32, #tpu.memory_space<vmem>>, vector<1x512xf32>
    %248 = vector.broadcast %247 : vector<1x512xf32> to vector<16x512xf32>
    %249 = arith.mulf %246, %248 : vector<16x512xf32>
    %250 = arith.addf %244, %249 : vector<16x512xf32>
    %251 = vector.extract_strided_slice %245 {offsets = [3, 0], sizes = [16, 512], strides = [1, 1]} : vector<34x512xf32> to vector<16x512xf32>
    %c8_77 = arith.constant 8 : index
    %c0_78 = arith.constant 0 : index
    %252 = vector.load %arg6[%c8_77, %c0_78] : memref<49x512xf32, #tpu.memory_space<vmem>>, vector<1x512xf32>
    %253 = vector.broadcast %252 : vector<1x512xf32> to vector<16x512xf32>
    %254 = arith.mulf %251, %253 : vector<16x512xf32>
    %255 = arith.addf %250, %254 : vector<16x512xf32>
    %256 = vector.extract_strided_slice %245 {offsets = [6, 0], sizes = [16, 512], strides = [1, 1]} : vector<34x512xf32> to vector<16x512xf32>
    %c15_79 = arith.constant 15 : index
    %c0_80 = arith.constant 0 : index
    %257 = vector.load %arg6[%c15_79, %c0_80] : memref<49x512xf32, #tpu.memory_space<vmem>>, vector<1x512xf32>
    %258 = vector.broadcast %257 : vector<1x512xf32> to vector<16x512xf32>
    %259 = arith.mulf %256, %258 : vector<16x512xf32>
    %260 = arith.addf %255, %259 : vector<16x512xf32>
    %261 = vector.extract_strided_slice %245 {offsets = [9, 0], sizes = [16, 512], strides = [1, 1]} : vector<34x512xf32> to vector<16x512xf32>
    %c22_81 = arith.constant 22 : index
    %c0_82 = arith.constant 0 : index
    %262 = vector.load %arg6[%c22_81, %c0_82] : memref<49x512xf32, #tpu.memory_space<vmem>>, vector<1x512xf32>
    %263 = vector.broadcast %262 : vector<1x512xf32> to vector<16x512xf32>
    %264 = arith.mulf %261, %263 : vector<16x512xf32>
    %265 = arith.addf %260, %264 : vector<16x512xf32>
    %266 = vector.extract_strided_slice %245 {offsets = [12, 0], sizes = [16, 512], strides = [1, 1]} : vector<34x512xf32> to vector<16x512xf32>
    %c29 = arith.constant 29 : index
    %c0_83 = arith.constant 0 : index
    %267 = vector.load %arg6[%c29, %c0_83] : memref<49x512xf32, #tpu.memory_space<vmem>>, vector<1x512xf32>
    %268 = vector.broadcast %267 : vector<1x512xf32> to vector<16x512xf32>
    %269 = arith.mulf %266, %268 : vector<16x512xf32>
    %270 = arith.addf %265, %269 : vector<16x512xf32>
    %271 = vector.extract_strided_slice %245 {offsets = [15, 0], sizes = [16, 512], strides = [1, 1]} : vector<34x512xf32> to vector<16x512xf32>
    %c36 = arith.constant 36 : index
    %c0_84 = arith.constant 0 : index
    %272 = vector.load %arg6[%c36, %c0_84] : memref<49x512xf32, #tpu.memory_space<vmem>>, vector<1x512xf32>
    %273 = vector.broadcast %272 : vector<1x512xf32> to vector<16x512xf32>
    %274 = arith.mulf %271, %273 : vector<16x512xf32>
    %275 = arith.addf %270, %274 : vector<16x512xf32>
    %276 = vector.extract_strided_slice %245 {offsets = [18, 0], sizes = [16, 512], strides = [1, 1]} : vector<34x512xf32> to vector<16x512xf32>
    %c43 = arith.constant 43 : index
    %c0_85 = arith.constant 0 : index
    %277 = vector.load %arg6[%c43, %c0_85] : memref<49x512xf32, #tpu.memory_space<vmem>>, vector<1x512xf32>
    %278 = vector.broadcast %277 : vector<1x512xf32> to vector<16x512xf32>
    %279 = arith.mulf %276, %278 : vector<16x512xf32>
    %280 = arith.addf %275, %279 : vector<16x512xf32>
    %c96_i32 = arith.constant 96 : i32
    %281 = tpu.dynamic_rotate %209 by %c96_i32 dim 1 : vector<34x512xf32>, i32 -> vector<34x512xf32>
    %282 = vector.extract_strided_slice %281 {offsets = [0, 0], sizes = [16, 512], strides = [1, 1]} : vector<34x512xf32> to vector<16x512xf32>
    %c2_86 = arith.constant 2 : index
    %c0_87 = arith.constant 0 : index
    %283 = vector.load %arg6[%c2_86, %c0_87] : memref<49x512xf32, #tpu.memory_space<vmem>>, vector<1x512xf32>
    %284 = vector.broadcast %283 : vector<1x512xf32> to vector<16x512xf32>
    %285 = arith.mulf %282, %284 : vector<16x512xf32>
    %286 = arith.addf %280, %285 : vector<16x512xf32>
    %287 = vector.extract_strided_slice %281 {offsets = [3, 0], sizes = [16, 512], strides = [1, 1]} : vector<34x512xf32> to vector<16x512xf32>
    %c9_88 = arith.constant 9 : index
    %c0_89 = arith.constant 0 : index
    %288 = vector.load %arg6[%c9_88, %c0_89] : memref<49x512xf32, #tpu.memory_space<vmem>>, vector<1x512xf32>
    %289 = vector.broadcast %288 : vector<1x512xf32> to vector<16x512xf32>
    %290 = arith.mulf %287, %289 : vector<16x512xf32>
    %291 = arith.addf %286, %290 : vector<16x512xf32>
    %292 = vector.extract_strided_slice %281 {offsets = [6, 0], sizes = [16, 512], strides = [1, 1]} : vector<34x512xf32> to vector<16x512xf32>
    %c16_90 = arith.constant 16 : index
    %c0_91 = arith.constant 0 : index
    %293 = vector.load %arg6[%c16_90, %c0_91] : memref<49x512xf32, #tpu.memory_space<vmem>>, vector<1x512xf32>
    %294 = vector.broadcast %293 : vector<1x512xf32> to vector<16x512xf32>
    %295 = arith.mulf %292, %294 : vector<16x512xf32>
    %296 = arith.addf %291, %295 : vector<16x512xf32>
    %297 = vector.extract_strided_slice %281 {offsets = [9, 0], sizes = [16, 512], strides = [1, 1]} : vector<34x512xf32> to vector<16x512xf32>
    %c23_92 = arith.constant 23 : index
    %c0_93 = arith.constant 0 : index
    %298 = vector.load %arg6[%c23_92, %c0_93] : memref<49x512xf32, #tpu.memory_space<vmem>>, vector<1x512xf32>
    %299 = vector.broadcast %298 : vector<1x512xf32> to vector<16x512xf32>
    %300 = arith.mulf %297, %299 : vector<16x512xf32>
    %301 = arith.addf %296, %300 : vector<16x512xf32>
    %302 = vector.extract_strided_slice %281 {offsets = [12, 0], sizes = [16, 512], strides = [1, 1]} : vector<34x512xf32> to vector<16x512xf32>
    %c30 = arith.constant 30 : index
    %c0_94 = arith.constant 0 : index
    %303 = vector.load %arg6[%c30, %c0_94] : memref<49x512xf32, #tpu.memory_space<vmem>>, vector<1x512xf32>
    %304 = vector.broadcast %303 : vector<1x512xf32> to vector<16x512xf32>
    %305 = arith.mulf %302, %304 : vector<16x512xf32>
    %306 = arith.addf %301, %305 : vector<16x512xf32>
    %307 = vector.extract_strided_slice %281 {offsets = [15, 0], sizes = [16, 512], strides = [1, 1]} : vector<34x512xf32> to vector<16x512xf32>
    %c37 = arith.constant 37 : index
    %c0_95 = arith.constant 0 : index
    %308 = vector.load %arg6[%c37, %c0_95] : memref<49x512xf32, #tpu.memory_space<vmem>>, vector<1x512xf32>
    %309 = vector.broadcast %308 : vector<1x512xf32> to vector<16x512xf32>
    %310 = arith.mulf %307, %309 : vector<16x512xf32>
    %311 = arith.addf %306, %310 : vector<16x512xf32>
    %312 = vector.extract_strided_slice %281 {offsets = [18, 0], sizes = [16, 512], strides = [1, 1]} : vector<34x512xf32> to vector<16x512xf32>
    %c44 = arith.constant 44 : index
    %c0_96 = arith.constant 0 : index
    %313 = vector.load %arg6[%c44, %c0_96] : memref<49x512xf32, #tpu.memory_space<vmem>>, vector<1x512xf32>
    %314 = vector.broadcast %313 : vector<1x512xf32> to vector<16x512xf32>
    %315 = arith.mulf %312, %314 : vector<16x512xf32>
    %316 = arith.addf %311, %315 : vector<16x512xf32>
    %317 = vector.extract_strided_slice %209 {offsets = [0, 0], sizes = [16, 512], strides = [1, 1]} : vector<34x512xf32> to vector<16x512xf32>
    %c3_97 = arith.constant 3 : index
    %c0_98 = arith.constant 0 : index
    %318 = vector.load %arg6[%c3_97, %c0_98] : memref<49x512xf32, #tpu.memory_space<vmem>>, vector<1x512xf32>
    %319 = vector.broadcast %318 : vector<1x512xf32> to vector<16x512xf32>
    %320 = arith.mulf %317, %319 : vector<16x512xf32>
    %321 = arith.addf %316, %320 : vector<16x512xf32>
    %322 = vector.extract_strided_slice %209 {offsets = [3, 0], sizes = [16, 512], strides = [1, 1]} : vector<34x512xf32> to vector<16x512xf32>
    %c10_99 = arith.constant 10 : index
    %c0_100 = arith.constant 0 : index
    %323 = vector.load %arg6[%c10_99, %c0_100] : memref<49x512xf32, #tpu.memory_space<vmem>>, vector<1x512xf32>
    %324 = vector.broadcast %323 : vector<1x512xf32> to vector<16x512xf32>
    %325 = arith.mulf %322, %324 : vector<16x512xf32>
    %326 = arith.addf %321, %325 : vector<16x512xf32>
    %327 = vector.extract_strided_slice %209 {offsets = [6, 0], sizes = [16, 512], strides = [1, 1]} : vector<34x512xf32> to vector<16x512xf32>
    %c17_101 = arith.constant 17 : index
    %c0_102 = arith.constant 0 : index
    %328 = vector.load %arg6[%c17_101, %c0_102] : memref<49x512xf32, #tpu.memory_space<vmem>>, vector<1x512xf32>
    %329 = vector.broadcast %328 : vector<1x512xf32> to vector<16x512xf32>
    %330 = arith.mulf %327, %329 : vector<16x512xf32>
    %331 = arith.addf %326, %330 : vector<16x512xf32>
    %332 = vector.extract_strided_slice %209 {offsets = [9, 0], sizes = [16, 512], strides = [1, 1]} : vector<34x512xf32> to vector<16x512xf32>
    %c24_103 = arith.constant 24 : index
    %c0_104 = arith.constant 0 : index
    %333 = vector.load %arg6[%c24_103, %c0_104] : memref<49x512xf32, #tpu.memory_space<vmem>>, vector<1x512xf32>
    %334 = vector.broadcast %333 : vector<1x512xf32> to vector<16x512xf32>
    %335 = arith.mulf %332, %334 : vector<16x512xf32>
    %336 = arith.addf %331, %335 : vector<16x512xf32>
    %337 = vector.extract_strided_slice %209 {offsets = [12, 0], sizes = [16, 512], strides = [1, 1]} : vector<34x512xf32> to vector<16x512xf32>
    %c31 = arith.constant 31 : index
    %c0_105 = arith.constant 0 : index
    %338 = vector.load %arg6[%c31, %c0_105] : memref<49x512xf32, #tpu.memory_space<vmem>>, vector<1x512xf32>
    %339 = vector.broadcast %338 : vector<1x512xf32> to vector<16x512xf32>
    %340 = arith.mulf %337, %339 : vector<16x512xf32>
    %341 = arith.addf %336, %340 : vector<16x512xf32>
    %342 = vector.extract_strided_slice %209 {offsets = [15, 0], sizes = [16, 512], strides = [1, 1]} : vector<34x512xf32> to vector<16x512xf32>
    %c38 = arith.constant 38 : index
    %c0_106 = arith.constant 0 : index
    %343 = vector.load %arg6[%c38, %c0_106] : memref<49x512xf32, #tpu.memory_space<vmem>>, vector<1x512xf32>
    %344 = vector.broadcast %343 : vector<1x512xf32> to vector<16x512xf32>
    %345 = arith.mulf %342, %344 : vector<16x512xf32>
    %346 = arith.addf %341, %345 : vector<16x512xf32>
    %347 = vector.extract_strided_slice %209 {offsets = [18, 0], sizes = [16, 512], strides = [1, 1]} : vector<34x512xf32> to vector<16x512xf32>
    %c45 = arith.constant 45 : index
    %c0_107 = arith.constant 0 : index
    %348 = vector.load %arg6[%c45, %c0_107] : memref<49x512xf32, #tpu.memory_space<vmem>>, vector<1x512xf32>
    %349 = vector.broadcast %348 : vector<1x512xf32> to vector<16x512xf32>
    %350 = arith.mulf %347, %349 : vector<16x512xf32>
    %351 = arith.addf %346, %350 : vector<16x512xf32>
    %c416_i32 = arith.constant 416 : i32
    %352 = tpu.dynamic_rotate %209 by %c416_i32 dim 1 : vector<34x512xf32>, i32 -> vector<34x512xf32>
    %353 = vector.extract_strided_slice %352 {offsets = [0, 0], sizes = [16, 512], strides = [1, 1]} : vector<34x512xf32> to vector<16x512xf32>
    %c4_108 = arith.constant 4 : index
    %c0_109 = arith.constant 0 : index
    %354 = vector.load %arg6[%c4_108, %c0_109] : memref<49x512xf32, #tpu.memory_space<vmem>>, vector<1x512xf32>
    %355 = vector.broadcast %354 : vector<1x512xf32> to vector<16x512xf32>
    %356 = arith.mulf %353, %355 : vector<16x512xf32>
    %357 = arith.addf %351, %356 : vector<16x512xf32>
    %358 = vector.extract_strided_slice %352 {offsets = [3, 0], sizes = [16, 512], strides = [1, 1]} : vector<34x512xf32> to vector<16x512xf32>
    %c11_110 = arith.constant 11 : index
    %c0_111 = arith.constant 0 : index
    %359 = vector.load %arg6[%c11_110, %c0_111] : memref<49x512xf32, #tpu.memory_space<vmem>>, vector<1x512xf32>
    %360 = vector.broadcast %359 : vector<1x512xf32> to vector<16x512xf32>
    %361 = arith.mulf %358, %360 : vector<16x512xf32>
    %362 = arith.addf %357, %361 : vector<16x512xf32>
    %363 = vector.extract_strided_slice %352 {offsets = [6, 0], sizes = [16, 512], strides = [1, 1]} : vector<34x512xf32> to vector<16x512xf32>
    %c18_112 = arith.constant 18 : index
    %c0_113 = arith.constant 0 : index
    %364 = vector.load %arg6[%c18_112, %c0_113] : memref<49x512xf32, #tpu.memory_space<vmem>>, vector<1x512xf32>
    %365 = vector.broadcast %364 : vector<1x512xf32> to vector<16x512xf32>
    %366 = arith.mulf %363, %365 : vector<16x512xf32>
    %367 = arith.addf %362, %366 : vector<16x512xf32>
    %368 = vector.extract_strided_slice %352 {offsets = [9, 0], sizes = [16, 512], strides = [1, 1]} : vector<34x512xf32> to vector<16x512xf32>
    %c25 = arith.constant 25 : index
    %c0_114 = arith.constant 0 : index
    %369 = vector.load %arg6[%c25, %c0_114] : memref<49x512xf32, #tpu.memory_space<vmem>>, vector<1x512xf32>
    %370 = vector.broadcast %369 : vector<1x512xf32> to vector<16x512xf32>
    %371 = arith.mulf %368, %370 : vector<16x512xf32>
    %372 = arith.addf %367, %371 : vector<16x512xf32>
    %373 = vector.extract_strided_slice %352 {offsets = [12, 0], sizes = [16, 512], strides = [1, 1]} : vector<34x512xf32> to vector<16x512xf32>
    %c32 = arith.constant 32 : index
    %c0_115 = arith.constant 0 : index
    %374 = vector.load %arg6[%c32, %c0_115] : memref<49x512xf32, #tpu.memory_space<vmem>>, vector<1x512xf32>
    %375 = vector.broadcast %374 : vector<1x512xf32> to vector<16x512xf32>
    %376 = arith.mulf %373, %375 : vector<16x512xf32>
    %377 = arith.addf %372, %376 : vector<16x512xf32>
    %378 = vector.extract_strided_slice %352 {offsets = [15, 0], sizes = [16, 512], strides = [1, 1]} : vector<34x512xf32> to vector<16x512xf32>
    %c39 = arith.constant 39 : index
    %c0_116 = arith.constant 0 : index
    %379 = vector.load %arg6[%c39, %c0_116] : memref<49x512xf32, #tpu.memory_space<vmem>>, vector<1x512xf32>
    %380 = vector.broadcast %379 : vector<1x512xf32> to vector<16x512xf32>
    %381 = arith.mulf %378, %380 : vector<16x512xf32>
    %382 = arith.addf %377, %381 : vector<16x512xf32>
    %383 = vector.extract_strided_slice %352 {offsets = [18, 0], sizes = [16, 512], strides = [1, 1]} : vector<34x512xf32> to vector<16x512xf32>
    %c46 = arith.constant 46 : index
    %c0_117 = arith.constant 0 : index
    %384 = vector.load %arg6[%c46, %c0_117] : memref<49x512xf32, #tpu.memory_space<vmem>>, vector<1x512xf32>
    %385 = vector.broadcast %384 : vector<1x512xf32> to vector<16x512xf32>
    %386 = arith.mulf %383, %385 : vector<16x512xf32>
    %387 = arith.addf %382, %386 : vector<16x512xf32>
    %c320_i32 = arith.constant 320 : i32
    %388 = tpu.dynamic_rotate %209 by %c320_i32 dim 1 : vector<34x512xf32>, i32 -> vector<34x512xf32>
    %389 = vector.extract_strided_slice %388 {offsets = [0, 0], sizes = [16, 512], strides = [1, 1]} : vector<34x512xf32> to vector<16x512xf32>
    %c5_118 = arith.constant 5 : index
    %c0_119 = arith.constant 0 : index
    %390 = vector.load %arg6[%c5_118, %c0_119] : memref<49x512xf32, #tpu.memory_space<vmem>>, vector<1x512xf32>
    %391 = vector.broadcast %390 : vector<1x512xf32> to vector<16x512xf32>
    %392 = arith.mulf %389, %391 : vector<16x512xf32>
    %393 = arith.addf %387, %392 : vector<16x512xf32>
    %394 = vector.extract_strided_slice %388 {offsets = [3, 0], sizes = [16, 512], strides = [1, 1]} : vector<34x512xf32> to vector<16x512xf32>
    %c12_120 = arith.constant 12 : index
    %c0_121 = arith.constant 0 : index
    %395 = vector.load %arg6[%c12_120, %c0_121] : memref<49x512xf32, #tpu.memory_space<vmem>>, vector<1x512xf32>
    %396 = vector.broadcast %395 : vector<1x512xf32> to vector<16x512xf32>
    %397 = arith.mulf %394, %396 : vector<16x512xf32>
    %398 = arith.addf %393, %397 : vector<16x512xf32>
    %399 = vector.extract_strided_slice %388 {offsets = [6, 0], sizes = [16, 512], strides = [1, 1]} : vector<34x512xf32> to vector<16x512xf32>
    %c19_122 = arith.constant 19 : index
    %c0_123 = arith.constant 0 : index
    %400 = vector.load %arg6[%c19_122, %c0_123] : memref<49x512xf32, #tpu.memory_space<vmem>>, vector<1x512xf32>
    %401 = vector.broadcast %400 : vector<1x512xf32> to vector<16x512xf32>
    %402 = arith.mulf %399, %401 : vector<16x512xf32>
    %403 = arith.addf %398, %402 : vector<16x512xf32>
    %404 = vector.extract_strided_slice %388 {offsets = [9, 0], sizes = [16, 512], strides = [1, 1]} : vector<34x512xf32> to vector<16x512xf32>
    %c26 = arith.constant 26 : index
    %c0_124 = arith.constant 0 : index
    %405 = vector.load %arg6[%c26, %c0_124] : memref<49x512xf32, #tpu.memory_space<vmem>>, vector<1x512xf32>
    %406 = vector.broadcast %405 : vector<1x512xf32> to vector<16x512xf32>
    %407 = arith.mulf %404, %406 : vector<16x512xf32>
    %408 = arith.addf %403, %407 : vector<16x512xf32>
    %409 = vector.extract_strided_slice %388 {offsets = [12, 0], sizes = [16, 512], strides = [1, 1]} : vector<34x512xf32> to vector<16x512xf32>
    %c33 = arith.constant 33 : index
    %c0_125 = arith.constant 0 : index
    %410 = vector.load %arg6[%c33, %c0_125] : memref<49x512xf32, #tpu.memory_space<vmem>>, vector<1x512xf32>
    %411 = vector.broadcast %410 : vector<1x512xf32> to vector<16x512xf32>
    %412 = arith.mulf %409, %411 : vector<16x512xf32>
    %413 = arith.addf %408, %412 : vector<16x512xf32>
    %414 = vector.extract_strided_slice %388 {offsets = [15, 0], sizes = [16, 512], strides = [1, 1]} : vector<34x512xf32> to vector<16x512xf32>
    %c40 = arith.constant 40 : index
    %c0_126 = arith.constant 0 : index
    %415 = vector.load %arg6[%c40, %c0_126] : memref<49x512xf32, #tpu.memory_space<vmem>>, vector<1x512xf32>
    %416 = vector.broadcast %415 : vector<1x512xf32> to vector<16x512xf32>
    %417 = arith.mulf %414, %416 : vector<16x512xf32>
    %418 = arith.addf %413, %417 : vector<16x512xf32>
    %419 = vector.extract_strided_slice %388 {offsets = [18, 0], sizes = [16, 512], strides = [1, 1]} : vector<34x512xf32> to vector<16x512xf32>
    %c47 = arith.constant 47 : index
    %c0_127 = arith.constant 0 : index
    %420 = vector.load %arg6[%c47, %c0_127] : memref<49x512xf32, #tpu.memory_space<vmem>>, vector<1x512xf32>
    %421 = vector.broadcast %420 : vector<1x512xf32> to vector<16x512xf32>
    %422 = arith.mulf %419, %421 : vector<16x512xf32>
    %423 = arith.addf %418, %422 : vector<16x512xf32>
    %c224_i32 = arith.constant 224 : i32
    %424 = tpu.dynamic_rotate %209 by %c224_i32 dim 1 : vector<34x512xf32>, i32 -> vector<34x512xf32>
    %425 = vector.extract_strided_slice %424 {offsets = [0, 0], sizes = [16, 512], strides = [1, 1]} : vector<34x512xf32> to vector<16x512xf32>
    %c6_128 = arith.constant 6 : index
    %c0_129 = arith.constant 0 : index
    %426 = vector.load %arg6[%c6_128, %c0_129] : memref<49x512xf32, #tpu.memory_space<vmem>>, vector<1x512xf32>
    %427 = vector.broadcast %426 : vector<1x512xf32> to vector<16x512xf32>
    %428 = arith.mulf %425, %427 : vector<16x512xf32>
    %429 = arith.addf %423, %428 : vector<16x512xf32>
    %430 = vector.extract_strided_slice %424 {offsets = [3, 0], sizes = [16, 512], strides = [1, 1]} : vector<34x512xf32> to vector<16x512xf32>
    %c13_130 = arith.constant 13 : index
    %c0_131 = arith.constant 0 : index
    %431 = vector.load %arg6[%c13_130, %c0_131] : memref<49x512xf32, #tpu.memory_space<vmem>>, vector<1x512xf32>
    %432 = vector.broadcast %431 : vector<1x512xf32> to vector<16x512xf32>
    %433 = arith.mulf %430, %432 : vector<16x512xf32>
    %434 = arith.addf %429, %433 : vector<16x512xf32>
    %435 = vector.extract_strided_slice %424 {offsets = [6, 0], sizes = [16, 512], strides = [1, 1]} : vector<34x512xf32> to vector<16x512xf32>
    %c20_132 = arith.constant 20 : index
    %c0_133 = arith.constant 0 : index
    %436 = vector.load %arg6[%c20_132, %c0_133] : memref<49x512xf32, #tpu.memory_space<vmem>>, vector<1x512xf32>
    %437 = vector.broadcast %436 : vector<1x512xf32> to vector<16x512xf32>
    %438 = arith.mulf %435, %437 : vector<16x512xf32>
    %439 = arith.addf %434, %438 : vector<16x512xf32>
    %440 = vector.extract_strided_slice %424 {offsets = [9, 0], sizes = [16, 512], strides = [1, 1]} : vector<34x512xf32> to vector<16x512xf32>
    %c27 = arith.constant 27 : index
    %c0_134 = arith.constant 0 : index
    %441 = vector.load %arg6[%c27, %c0_134] : memref<49x512xf32, #tpu.memory_space<vmem>>, vector<1x512xf32>
    %442 = vector.broadcast %441 : vector<1x512xf32> to vector<16x512xf32>
    %443 = arith.mulf %440, %442 : vector<16x512xf32>
    %444 = arith.addf %439, %443 : vector<16x512xf32>
    %445 = vector.extract_strided_slice %424 {offsets = [12, 0], sizes = [16, 512], strides = [1, 1]} : vector<34x512xf32> to vector<16x512xf32>
    %c34 = arith.constant 34 : index
    %c0_135 = arith.constant 0 : index
    %446 = vector.load %arg6[%c34, %c0_135] : memref<49x512xf32, #tpu.memory_space<vmem>>, vector<1x512xf32>
    %447 = vector.broadcast %446 : vector<1x512xf32> to vector<16x512xf32>
    %448 = arith.mulf %445, %447 : vector<16x512xf32>
    %449 = arith.addf %444, %448 : vector<16x512xf32>
    %450 = vector.extract_strided_slice %424 {offsets = [15, 0], sizes = [16, 512], strides = [1, 1]} : vector<34x512xf32> to vector<16x512xf32>
    %c41 = arith.constant 41 : index
    %c0_136 = arith.constant 0 : index
    %451 = vector.load %arg6[%c41, %c0_136] : memref<49x512xf32, #tpu.memory_space<vmem>>, vector<1x512xf32>
    %452 = vector.broadcast %451 : vector<1x512xf32> to vector<16x512xf32>
    %453 = arith.mulf %450, %452 : vector<16x512xf32>
    %454 = arith.addf %449, %453 : vector<16x512xf32>
    %455 = vector.extract_strided_slice %424 {offsets = [18, 0], sizes = [16, 512], strides = [1, 1]} : vector<34x512xf32> to vector<16x512xf32>
    %c48 = arith.constant 48 : index
    %c0_137 = arith.constant 0 : index
    %456 = vector.load %arg6[%c48, %c0_137] : memref<49x512xf32, #tpu.memory_space<vmem>>, vector<1x512xf32>
    %457 = vector.broadcast %456 : vector<1x512xf32> to vector<16x512xf32>
    %458 = arith.mulf %455, %457 : vector<16x512xf32>
    %459 = arith.addf %454, %458 : vector<16x512xf32>
    %c0_138 = arith.constant 0 : index
    %c0_139 = arith.constant 0 : index
    %460 = vector.load %arg7[%c0_138, %c0_139] : memref<1x512xf32, #tpu.memory_space<vmem>>, vector<1x512xf32>
    %461 = vector.broadcast %460 : vector<1x512xf32> to vector<16x512xf32>
    %462 = arith.addf %459, %461 : vector<16x512xf32>
    %463 = vector.extract_strided_slice %462 {offsets = [0, 0], sizes = [16, 128], strides = [1, 1]} : vector<16x512xf32> to vector<16x128xf32>
    %464 = vector.extract_strided_slice %462 {offsets = [0, 128], sizes = [16, 128], strides = [1, 1]} : vector<16x512xf32> to vector<16x128xf32>
    %465 = vector.extract_strided_slice %462 {offsets = [0, 256], sizes = [16, 128], strides = [1, 1]} : vector<16x512xf32> to vector<16x128xf32>
    %466 = vector.extract_strided_slice %462 {offsets = [0, 384], sizes = [16, 128], strides = [1, 1]} : vector<16x512xf32> to vector<16x128xf32>
    %467 = tpu.concatenate %463, %464, %465, %466 in 0 : vector<16x128xf32>, vector<16x128xf32>, vector<16x128xf32>, vector<16x128xf32> -> vector<64x128xf32>
    %c0_140 = arith.constant 0 : index
    %c0_141 = arith.constant 0 : index
    %468 = vector.load %arg8[%c0_140, %c0_141] : memref<128x128xf32, #tpu.memory_space<vmem>>, vector<128x128xf32>
    %cst_142 = arith.constant dense<0.000000e+00> : vector<64x128xf32>
    %469 = tpu.matmul %467, %468, %cst_142 {dimension_numbers = #tpu.dot_dimension_numbers<[1], [0], [0], [1], [0, 0, 1, 1], [], []>} : vector<64x128xf32>, vector<128x128xf32>, vector<64x128xf32> -> vector<64x128xf32>
    %470 = vector.extract_strided_slice %469 {offsets = [0, 0], sizes = [16, 128], strides = [1, 1]} : vector<64x128xf32> to vector<16x128xf32>
    %471 = vector.extract_strided_slice %469 {offsets = [16, 0], sizes = [16, 128], strides = [1, 1]} : vector<64x128xf32> to vector<16x128xf32>
    %472 = vector.extract_strided_slice %469 {offsets = [32, 0], sizes = [16, 128], strides = [1, 1]} : vector<64x128xf32> to vector<16x128xf32>
    %473 = vector.extract_strided_slice %469 {offsets = [48, 0], sizes = [16, 128], strides = [1, 1]} : vector<64x128xf32> to vector<16x128xf32>
    %474 = tpu.concatenate %470, %471, %472, %473 in 1 : vector<16x128xf32>, vector<16x128xf32>, vector<16x128xf32>, vector<16x128xf32> -> vector<16x512xf32>
    %c0_143 = arith.constant 0 : index
    %c0_144 = arith.constant 0 : index
    %475 = vector.load %arg9[%c0_143, %c0_144] : memref<1x512xf32, #tpu.memory_space<vmem>>, vector<1x512xf32>
    %476 = vector.broadcast %475 : vector<1x512xf32> to vector<16x512xf32>
    %477 = arith.addf %474, %476 : vector<16x512xf32>
    %478 = vector.broadcast %74 : vector<1x512xf32> to vector<16x512xf32>
    %479 = arith.mulf %478, %477 : vector<16x512xf32>
    %480 = arith.mulf %479, %57 : vector<16x512xf32>
    %481 = vector.extract_strided_slice %480 {offsets = [0, 0], sizes = [16, 128], strides = [1, 1]} : vector<16x512xf32> to vector<16x128xf32>
    %482 = vector.extract_strided_slice %480 {offsets = [0, 128], sizes = [16, 128], strides = [1, 1]} : vector<16x512xf32> to vector<16x128xf32>
    %483 = vector.extract_strided_slice %480 {offsets = [0, 256], sizes = [16, 128], strides = [1, 1]} : vector<16x512xf32> to vector<16x128xf32>
    %484 = vector.extract_strided_slice %480 {offsets = [0, 384], sizes = [16, 128], strides = [1, 1]} : vector<16x512xf32> to vector<16x128xf32>
    %485 = tpu.concatenate %481, %482, %483, %484 in 0 : vector<16x128xf32>, vector<16x128xf32>, vector<16x128xf32>, vector<16x128xf32> -> vector<64x128xf32>
    %c0_145 = arith.constant 0 : index
    %c0_146 = arith.constant 0 : index
    %486 = vector.load %arg12[%c0_145, %c0_146] : memref<128x128xf32, #tpu.memory_space<vmem>>, vector<128x128xf32>
    %cst_147 = arith.constant dense<0.000000e+00> : vector<64x128xf32>
    %487 = tpu.matmul %485, %486, %cst_147 {dimension_numbers = #tpu.dot_dimension_numbers<[1], [0], [0], [1], [0, 0, 1, 1], [], []>} : vector<64x128xf32>, vector<128x128xf32>, vector<64x128xf32> -> vector<64x128xf32>
    %488 = vector.extract_strided_slice %487 {offsets = [0, 0], sizes = [16, 128], strides = [1, 1]} : vector<64x128xf32> to vector<16x128xf32>
    %489 = vector.extract_strided_slice %487 {offsets = [16, 0], sizes = [16, 128], strides = [1, 1]} : vector<64x128xf32> to vector<16x128xf32>
    %490 = vector.extract_strided_slice %487 {offsets = [32, 0], sizes = [16, 128], strides = [1, 1]} : vector<64x128xf32> to vector<16x128xf32>
    %491 = vector.extract_strided_slice %487 {offsets = [48, 0], sizes = [16, 128], strides = [1, 1]} : vector<64x128xf32> to vector<16x128xf32>
    %492 = tpu.concatenate %488, %489, %490, %491 in 1 : vector<16x128xf32>, vector<16x128xf32>, vector<16x128xf32>, vector<16x128xf32> -> vector<16x512xf32>
    %c0_148 = arith.constant 0 : index
    %c0_149 = arith.constant 0 : index
    %493 = vector.load %arg13[%c0_148, %c0_149] : memref<1x512xf32, #tpu.memory_space<vmem>>, vector<1x512xf32>
    %494 = vector.broadcast %493 : vector<1x512xf32> to vector<16x512xf32>
    %495 = arith.addf %492, %494 : vector<16x512xf32>
    %c0_150 = arith.constant 0 : index
    %c0_151 = arith.constant 0 : index
    %c0_152 = arith.constant 0 : index
    %496 = vector.load %arg1[%c0_150, %c0_151, %c0_152] : memref<1x16x512xf32, #tpu.memory_space<vmem>>, vector<1x16x512xf32>
    %497 = vector.shape_cast %496 : vector<1x16x512xf32> to vector<16x512xf32>
    %498 = arith.addf %495, %497 : vector<16x512xf32>
    %c0_153 = arith.constant 0 : index
    %c0_154 = arith.constant 0 : index
    %c0_155 = arith.constant 0 : index
    %499 = vector.load %arg14[%c0_153, %c0_154, %c0_155] : memref<1x16x512xf32, #tpu.memory_space<vmem>>, vector<1x16x512xf32>
    %500 = vector.shape_cast %499 : vector<1x16x512xf32> to vector<16x512xf32>
    %501 = vector.shape_cast %498 : vector<16x512xf32> to vector<1x16x512xf32>
    tpu.vector_store %arg14[%c0_153, %c0_154, %c0_155], %501 {strides = array<i32>} : memref<1x16x512xf32, #tpu.memory_space<vmem>>, vector<1x16x512xf32>,
    return
  }
  func.func @transform_0(%arg0: i32) -> (i32, i32, i32) {
    %c0_i32 = arith.constant 0 : i32
    %c0_i32_0 = arith.constant 0 : i32
    %c0_i32_1 = arith.constant 0 : i32
    return %arg0, %c0_i32, %c0_i32_0 : i32, i32, i32
  }
  func.func @transform_1(%arg0: i32) -> (i32, i32) {
    %c0_i32 = arith.constant 0 : i32
    %c0_i32_0 = arith.constant 0 : i32
    %c0_i32_1 = arith.constant 0 : i32
    return %c0_i32, %c0_i32_0 : i32, i32
  }
  func.func @transform_2(%arg0: i32) -> (i32, i32) {
    %c0_i32 = arith.constant 0 : i32
    %c0_i32_0 = arith.constant 0 : i32
    %c0_i32_1 = arith.constant 0 : i32
    return %c0_i32, %c0_i32_0 : i32, i32
  }
  func.func @transform_3(%arg0: i32) -> (i32, i32) {
    %c0_i32 = arith.constant 0 : i32
    %c0_i32_0 = arith.constant 0 : i32
    %c0_i32_1 = arith.constant 0 : i32
    return %c0_i32, %c0_i32_0 : i32, i32
  }
  func.func @transform_4(%arg0: i32) -> (i32, i32) {
    %c0_i32 = arith.constant 0 : i32
    %c0_i32_0 = arith.constant 0 : i32
    %c0_i32_1 = arith.constant 0 : i32
    return %c0_i32, %c0_i32_0 : i32, i32
  }
  func.func @transform_5(%arg0: i32) -> (i32, i32) {
    %c0_i32 = arith.constant 0 : i32
    %c0_i32_0 = arith.constant 0 : i32
    %c0_i32_1 = arith.constant 0 : i32
    return %c0_i32, %c0_i32_0 : i32, i32
  }
  func.func @transform_6(%arg0: i32) -> (i32, i32) {
    %c0_i32 = arith.constant 0 : i32
    %c0_i32_0 = arith.constant 0 : i32
    %c0_i32_1 = arith.constant 0 : i32
    return %c0_i32, %c0_i32_0 : i32, i32
  }
  func.func @transform_7(%arg0: i32) -> (i32, i32) {
    %c0_i32 = arith.constant 0 : i32
    %c0_i32_0 = arith.constant 0 : i32
    %c0_i32_1 = arith.constant 0 : i32
    return %c0_i32, %c0_i32_0 : i32, i32
  }
  func.func @transform_8(%arg0: i32) -> (i32, i32) {
    %c0_i32 = arith.constant 0 : i32
    %c0_i32_0 = arith.constant 0 : i32
    %c0_i32_1 = arith.constant 0 : i32
    return %c0_i32, %c0_i32_0 : i32, i32
  }
  func.func @transform_9(%arg0: i32) -> (i32, i32) {
    %c0_i32 = arith.constant 0 : i32
    %c0_i32_0 = arith.constant 0 : i32
    %c0_i32_1 = arith.constant 0 : i32
    return %c0_i32, %c0_i32_0 : i32, i32
  }
  func.func @transform_10(%arg0: i32) -> (i32, i32) {
    %c0_i32 = arith.constant 0 : i32
    %c0_i32_0 = arith.constant 0 : i32
    %c0_i32_1 = arith.constant 0 : i32
    return %c0_i32, %c0_i32_0 : i32, i32
  }
  func.func @transform_11(%arg0: i32) -> (i32, i32) {
    %c0_i32 = arith.constant 0 : i32
    %c0_i32_0 = arith.constant 0 : i32
    %c0_i32_1 = arith.constant 0 : i32
    return %c0_i32, %c0_i32_0 : i32, i32
  }
  func.func @transform_12(%arg0: i32) -> (i32, i32) {
    %c0_i32 = arith.constant 0 : i32
    %c0_i32_0 = arith.constant 0 : i32
    %c0_i32_1 = arith.constant 0 : i32
    return %c0_i32, %c0_i32_0 : i32, i32
  }
  func.func @transform_13(%arg0: i32) -> (i32, i32, i32) {
    %c0_i32 = arith.constant 0 : i32
    %c0_i32_0 = arith.constant 0 : i32
    %c0_i32_1 = arith.constant 0 : i32
    return %arg0, %c0_i32, %c0_i32_0 : i32, i32, i32
  }
}

</mosaic_0001>

<bundles_post_ra>
// kernel: tpu_custom_call.1
= control target key start
LH: loop header
LB: loop body
LE: loop exit
PB: predicated region body
PF: predicated region fallthrough
CT: control target
= control target key end

     0   :  { %18 = vsyncpa [#allocation3], 0  ;;  %s15388_s0 = inlined_call_operand.vmem [shape: f32[2,16,512], index: 0, kind: input, shape index: {}]   ;;  %s15389_s1 = inlined_call_operand.vmem [shape: f32[128,128], index: 1, kind: input, shape index: {}]   ;;  %s15390_s2 = inlined_call_operand.vmem [shape: f32[1,512], index: 2, kind: input, shape index: {}]   ;;  %s15391_s3 = inlined_call_operand.hbm [shape: f32[25,512], index: 3, kind: input, shape index: {}]   ;;  %s15392_s4 = inlined_call_operand.vmem [shape: f32[1,512], index: 4, kind: input, shape index: {}]   ;;  %s15393_s5 = inlined_call_operand.vmem [shape: f32[49,512], index: 5, kind: input, shape index: {}]   ;;  %s15394_s6 = inlined_call_operand.vmem [shape: f32[1,512], index: 6, kind: input, shape index: {}]   ;;  %s15395_s7 = inlined_call_operand.hbm [shape: f32[128,128], index: 7, kind: input, shape index: {}]   ;;  %s15396_s8 = inlined_call_operand.vmem [shape: f32[1,512], index: 8, kind: input, shape index: {}]   ;;  %s15397_s9 = inlined_call_operand.vmem [shape: f32[512,8], index: 9, kind: input, shape index: {}]   ;;  %s15398_s10 = inlined_call_operand.vmem [shape: f32[8,512], index: 10, kind: input, shape index: {}]   ;;  %s15399_s11 = inlined_call_operand.hbm [shape: f32[128,128], index: 11, kind: input, shape index: {}]   ;;  %s15400_s12 = inlined_call_operand.vmem [shape: f32[1,512], index: 12, kind: input, shape index: {}]   ;;  %s15401_s13 = inlined_call_operand.hbm [shape: f32[2,16,512], index: 13, kind: output, shape index: {}]  }
   0x1   :  { %19 = vsyncpa [#allocation6], 0 }
   0x2   :  { %20 = vsyncpa [#allocation4], 0 }
   0x3   :  { %22 = vsyncpa [#allocation4 + $0x1], 0  ;;  %s8460_s25 = smov 0   ;;  %s8462_s26 = smov 0  }
   0x4   :  { %s8464_s27 = smov 0   ;;  %s8466_s28 = smov 0  }
   0x5 LB: > { %15870 = sst [smem:[#allocation12_spill]] %s8362_s25  ;;  %s8481_s29 = sadd.s32 4294967295, %s8374_s28   ;;  %s8374_s28 = sphi %s8466_s28, %s17109_s28   ;;  %s8370_s27 = sphi %s8464_s27, %s17111_s27   ;;  %s8366_s26 = sphi %s8462_s26, %s17113_s26   ;;  %s8362_s25 = sphi %s8460_s25, %s17112_s25  }
   0x6   : > { %15871 = sst [smem:[#allocation13_spill]] %s8370_s27  ;;  %s7696_s30 = sadd.s32 4294967294, %s8374_s28  }
   0x7   : > { %s8485_s14 = sadd.s32 1, %s8374_s28   ;;  %s313_s15 = sadd.s32 1, %s8370_s27 }
   0x8   : > { %15872 = sst [smem:[#allocation14_spill]] %s8485_s14  ;;  %s310_s16 = ssub.s32 %s8374_s28, %s8485_s14 }
   0x9   : > { %p323_p0 = scmp.ne.s32.totalorder %s8370_s27, %s8366_s26  ;;  %p311_p1 = scmp.eq.s32.totalorder %s310_s16, 0 }
   0xa   : > { %p324_p2 = scmp.eq.s32.totalorder %s8481_s29, 1  ;;  %p329_p3 = scmp.ne.s32.totalorder %s8366_s26, %s8362_s25 }
   0xb   : > { %p330_p4 = scmp.eq.s32.totalorder %s7696_s30, 1  ;;  %p7697_p7 = scmp.ge.s32.totalorder %s8374_s28, 1 }
   0xc   : > { %s8496_s17 = scalar_select %p311_p1, %s8370_s27, %s313_s15  }
   0xd   : > { %p8498_p5 = por %p324_p2, %p323_p0  ;;  %p8502_p6 = por %p330_p4, %p329_p3 }
   0xe   : > { %15873 = sst [smem:[#allocation15_spill]] %s8496_s17  ;;  %p337_p8 = scmp.lt.s32.totalorder %s8374_s28, 3 }
   0xf   : > { %s15875_s19 = scalar_select %p8502_p6, 1, 0 }
  0x10   : > { %p8100_p9 = scmp.eq.s32.totalorder %s8481_s29, 0  ;;  %p8509_p10 = pnand %p7697_p7, %p337_p8 }
  0x11   : > { %15876 = sst [smem:[#allocation16_spill]] %s15875_s19  ;;  %s8376_s21 = smov [#allocation5]  }
  0x12   : > { %s377_s22 = sshll.u32 %s8376_s21, 4  ;;  %p8086_p11 = pneg %p8509_p10  ;;  %s378_s22 = int_to_ptr.vmem [resolvable:$true] %s377_s22 }
  0x13   : > { %s8377_s24 = smov [#allocation2]   ;;  %s8239_s15 = scalar_lea.vmem %s378_s22, 2048 }
  0x14   : > { %p8517_p12 = pnand %p8100_p9, %p8086_p11  ;;  %s355_s30 = sshll.u32 %s8377_s24, 4  ;;  %s356_s30 = int_to_ptr.vmem [resolvable:$true] %s355_s30 }
  0x15   : > { %p8240_p0 = scmp.ne.s32.totalorder %s378_s22, %s8239_s15  ;;  %p8247_p3 = scmp.lt.s32.totalorder %s378_s22, %s378_s22 }
  0x16   : > { %p8230_p13 = pneg %p8517_p12  ;;  %p8248_p4 = scmp.lt.s32.totalorder %s8239_s15, %s8239_s15 }
  0x18   : > { %p8242_p1 = pnand %p8240_p0, %p8230_p13  ;;  %p8249_p7 = por %p8248_p4, %p8247_p3 }
  0x1a   : > { %p8243_p2 = pneg %p8242_p1 }
  0x1c   : > { %p8250_p8 = pnand %p8249_p7, %p8243_p2 }
  0x1e   : > { %8253 = shalt.err (!%p8250_p8)
}
  0x1f   : > { %s8378_s16 = smov 128   ;;  %s8379_s21 = smov 8  }
  0x20   : > { %8092 = dma.hbm_to_vmem [thread:$0]  (!%p8517_p12), %s15395_s7, 2048, %s378_s22, [#allocation6], %s8378_s16, %s8378_s16, %s8379_s21  }
  0x21   : > { %s8265_s27 = scalar_lea.vmem %s356_s30, 2048  ;;  %p8273_p2 = scmp.lt.s32.totalorder %s356_s30, %s356_s30 }
  0x22   : > { %p8266_p11 = scmp.ne.s32.totalorder %s356_s30, %s8265_s27  ;;  %p8274_p3 = scmp.lt.s32.totalorder %s8265_s27, %s8265_s27 }
  0x24   : > { %p8268_p0 = pnand %p8266_p11, %p8230_p13  ;;  %p8275_p4 = por %p8274_p3, %p8273_p2 }
  0x26   : > { %p8269_p1 = pneg %p8268_p0 }
  0x28   : > { %p8276_p7 = pnand %p8275_p4, %p8269_p1 }
  0x2a   : > { %8279 = shalt.err (!%p8276_p7)
}
  0x2b   : > { %s8380_s15 = smov 512   ;;  %s8381_s14 = smov 32  }
  0x2c   : > { %8089 = dma.hbm_to_vmem [thread:$0]  (!%p8517_p12), %s15391_s3, 2048, %s356_s30, [#allocation3], %s8380_s15, %s8380_s15, %s8381_s14  }
  0x2d   : > { %s8382_s17 = smov [#allocation7]  }
  0x2e   : > { %s399_s22 = sshll.u32 %s8382_s17, 4  ;;  %s400_s22 = int_to_ptr.vmem [resolvable:$true] %s399_s22 }
  0x2f   : > { %s8291_s24 = scalar_lea.vmem %s400_s22, 2048  ;;  %p8299_p1 = scmp.lt.s32.totalorder %s400_s22, %s400_s22 }
  0x30   : > { %p8292_p8 = scmp.ne.s32.totalorder %s400_s22, %s8291_s24  ;;  %p8300_p2 = scmp.lt.s32.totalorder %s8291_s24, %s8291_s24 }
  0x32   : > { %p8294_p11 = pnand %p8292_p8, %p8230_p13  ;;  %p8301_p3 = por %p8300_p2, %p8299_p1 }
  0x34   : > { %p8295_p0 = pneg %p8294_p11 }
  0x36   : > { %p8302_p4 = pnand %p8301_p3, %p8295_p0 }
  0x38   : > { %8305 = shalt.err (!%p8302_p4)
}
  0x39   : > { %8095 = dma.hbm_to_vmem [thread:$0]  (!%p8517_p12), %s15399_s11, 2048, %s400_s22, [#allocation6], %s8378_s16, %s8378_s16, %s8379_s21  }
  0x3a   : > { %426 = sbr.rel (%p8509_p10) target bundleno = 1696 (0x6a0), region = 72 }
  0x3f   : > { %8349 = dma.done.wait (%p8100_p9), [#allocation3], 2048  }
  0x40   : > { %8351 = vsyncadd (%p8100_p9), [#allocation3], 4294965248 }
  0x41   : > { %8353 = dma.done.wait (%p8100_p9), [#allocation6], 4096  }
  0x42   : > { %8355 = vsyncadd (%p8100_p9), [#allocation6], 4294963200  ;;  %p478_p13 = scmp.lt.s32.totalorder %s8481_s29, 1  ;;  %v506_v0 = vld [vmem:[%s15389_s1 + $0x78] sm:$0xff]  ;;  %v505_v1 = vld [vmem:[%s15389_s1 + $0x70] sm:$0xff]  ;;  %vm1278_vm4 = vcmask 1041408  }
  0x43   : > { %7908 = vmatprep.subr.mxu0 %v506_v0  ;;  %v504_v2 = vld [vmem:[%s15389_s1 + $0x68] sm:$0xff]  ;;  %v503_v3 = vld [vmem:[%s15389_s1 + $0x60] sm:$0xff]  ;;  %v502_v5 = vld [vmem:[%s15389_s1 + $0x58] sm:$0xff]  ;;  %s8384_s25 = smov 64   ;;  %s8385_s27 = smov 32   ;;  %vm1427_vm9 = vcmask 1046528  }
  0x44   : > { %s479_s14 = scalar_select %p478_p13, %s8481_s29, 1  ;;  %7909 = vmatpush3.msra.mxu0 %v506_v0  ;;  %v501_v6 = vld [vmem:[%s15389_s1 + $0x50] sm:$0xff]  ;;  %v500_v7 = vld [vmem:[%s15389_s1 + $0x48] sm:$0xff]  ;;  %v499_v8 = vld [vmem:[%s15389_s1 + $0x40] sm:$0xff]  ;;  %vm1511_vm10 = vcmask 1045504   ;;  %vm1595_vm11 = vcmask 1044480  }
  0x45   : > { %7910 = vmatprep.subr.mxu0 %v505_v1  ;;  %v498_v9 = vld [vmem:[%s15389_s1 + $0x38] sm:$0xff]  ;;  %v497_v10 = vld [vmem:[%s15389_s1 + $0x30] sm:$0xff]  ;;  %v496_v11 = vld [vmem:[%s15389_s1 + $0x28] sm:$0xff]  ;;  %vm1679_vm12 = vcmask 1043456   ;;  %s475_s20 = sand.u32 1, %s8366_s26   ;;  %s7765_s21 = sshll.u32 %s8481_s29, 10 }
  0x46   : > { %s7764_s19 = sshll.u32 %s479_s14, 6  ;;  %7911 = vmatpush3.msra.mxu0 %v505_v1  ;;  %v495_v12 = vld [vmem:[%s15389_s1 + $0x20] sm:$0xff]  ;;  %v494_v13 = vld [vmem:[%s15389_s1 + $0x18] sm:$0xff]  ;;  %v493_v14 = vld [vmem:[%s15389_s1 + $0x10] sm:$0xff]  ;;  %s8386_s14 = smov 96  }
  0x47   : > { %s8577_s24 = scalar_lea.vmem %s15388_s0, %s7764_s19  ;;  %7912 = vmatprep.subr.mxu0 %v504_v2  ;;  %v492_v15 = vld [vmem:[%s15389_s1 + $0x8] sm:$0xff]  ;;  %v491_v16 = vld [vmem:[%s15389_s1] sm:$0xff]  ;;  %v922_v24 = vld [vmem:[%s15397_s9 + $0xf8] sm:$0xff]  ;;  %s7706_s19 = sshll.u32 %s475_s20, 6 }
  0x48   : > { %v483_v4 = vld [vmem:[%s8577_s24] sm:$0xff]  ;;  %7913 = vmatpush3.msra.mxu0 %v504_v2  ;;  %v484_v18 = vld [vmem:[%s8577_s24 + $0x8] sm:$0xff]  ;;  %v485_v20 = vld [vmem:[%s8577_s24 + $0x10] sm:$0xff]  ;;  %7790 = vmatprep.subr.mxu1 %v922_v24  ;;  %v614_v24 = vlaneseq  ;;  %s15316_s30 = scalar_lea.vmem [#allocation8], %s7706_s19  ;;  %s15342_s22 = scalar_lea.hbm %s15401_s13, %s7765_s21 }
  0x49   : > { %7940 = vmatprep.mubr.f32.mxu0 %v483_v4  ;;  %7914 = vmatprep.subr.mxu0 %v503_v3  ;;  %v487_v17 = vld [vmem:[%s8577_s24 + $0x20] sm:$0xff]  ;;  %v488_v19 = vld [vmem:[%s8577_s24 + $0x28] sm:$0xff]  ;;  %v489_v21 = vld [vmem:[%s8577_s24 + $0x30] sm:$0xff]  ;;  %s7603_s16 = sshll.u32 %s15316_s30, 4  ;;  %s15335_s16 = int_to_ptr.vmem [resolvable:$true] %s7603_s16 }
  0x4a   : > { %7915 = vmatpush3.msra.mxu0 %v503_v3  ;;  %v486_v22 = vld [vmem:[%s8577_s24 + $0x18] sm:$0xff]  ;;  %v921_v26 = vld [vmem:[%s15397_s9 + $0xf0] sm:$0xff]  ;;  %v920_v28 = vld [vmem:[%s15397_s9 + $0xe8] sm:$0xff]  ;;  %s8306_s29 = scalar_lea.vmem %s15335_s16, 1024 }
  0x4b   : > { %7916 = vmatprep.subr.mxu0 %v502_v5  ;;  %v490_v23 = vld [vmem:[%s8577_s24 + $0x38] sm:$0xff]  ;;  %v905_v27 = vld [vmem:[%s15397_s9 + $0x70] sm:$0xff]  ;;  %v904_v29 = vld [vmem:[%s15397_s9 + $0x68] sm:$0xff]  ;;  %p8307_p9 = scmp.ne.s32.totalorder %s15335_s16, %s8306_s29 }
  0x4c   : > { %7917 = vmatpush3.msra.mxu0 %v502_v5  ;;  %v906_v25 = vld [vmem:[%s15397_s9 + $0x78] sm:$0xff]  ;;  %v919_v30 = vld [vmem:[%s15397_s9 + $0xe0] sm:$0xff]  ;;  %v917_v36 = vld [vmem:[%s15397_s9 + $0xd0] sm:$0xff] }
  0x4d   : > { %7918 = vmatprep.subr.mxu0 %v501_v6  ;;  %7791 = vmatpush3.msra.mxu1 %v906_v25  ;;  %v903_v31 = vld [vmem:[%s15397_s9 + $0x60] sm:$0xff]  ;;  %v918_v32 = vld [vmem:[%s15397_s9 + $0xd8] sm:$0xff]  ;;  %v953_v37 = vld [vmem:[%s15397_s9 + $0x1f0] sm:$0xff]  ;;  %v615_v25 = vshrl.u32 %v614_v24, 7  ;;  %p8308_p10 = pnand %p8307_p9, %p8498_p5 }
  0x4e   : > { %7919 = vmatpush3.msra.mxu0 %v501_v6  ;;  %7792 = vmatprep.subr.mxu1 %v921_v26  ;;  %v954_v33 = vld [vmem:[%s15397_s9 + $0x1f8] sm:$0xff]  ;;  %v901_v38 = vld [vmem:[%s15397_s9 + $0x50] sm:$0xff]  ;;  %v916_v40 = vld [vmem:[%s15397_s9 + $0xc8] sm:$0xff] }
  0x4f   : > { %7920 = vmatprep.subr.mxu0 %v500_v7  ;;  %7793 = vmatpush3.msra.mxu1 %v905_v27  ;;  %v902_v34 = vld [vmem:[%s15397_s9 + $0x58] sm:$0xff]  ;;  %v937_v39 = vld [vmem:[%s15397_s9 + $0x170] sm:$0xff]  ;;  %v952_v41 = vld [vmem:[%s15397_s9 + $0x1e8] sm:$0xff]  ;;  %v8819_v26 = vsub.s32 0, %v615_v25  ;;  %p8309_p12 = pneg %p8308_p10 }
  0x50   : > { %7921 = vmatpush3.msra.mxu0 %v500_v7  ;;  %7794 = vmatprep.subr.mxu1 %v920_v28  ;;  %v938_v35 = vld [vmem:[%s15397_s9 + $0x178] sm:$0xff]  ;;  %v900_v42 = vld [vmem:[%s15397_s9 + $0x48] sm:$0xff]  ;;  %v915_v44 = vld [vmem:[%s15397_s9 + $0xc0] sm:$0xff] }
  0x51   : > { %7922 = vmatprep.subr.mxu0 %v499_v8  ;;  %7795 = vmatpush3.msra.mxu1 %v904_v29  ;;  %v936_v43 = vld [vmem:[%s15397_s9 + $0x168] sm:$0xff]  ;;  %v951_v45 = vld [vmem:[%s15397_s9 + $0x1e0] sm:$0xff]  ;;  %v914_v48 = vld [vmem:[%s15397_s9 + $0xb8] sm:$0xff]  ;;  %15879 = vst [vmem:[#allocation17_spill] sm:$0xff] %v8819_v26  ;;  %v8825_v29 = vsub.s32 1, %v615_v25 }
  0x52   : > { %7923 = vmatpush3.msra.mxu0 %v499_v8  ;;  %7796 = vmatprep.subr.mxu1 %v919_v30  ;;  %v899_v46 = vld [vmem:[%s15397_s9 + $0x40] sm:$0xff]  ;;  %v950_v49 = vld [vmem:[%s15397_s9 + $0x1d8] sm:$0xff]  ;;  %v913_v52 = vld [vmem:[%s15397_s9 + $0xb0] sm:$0xff] }
  0x53   : > { %7924 = vmatprep.subr.mxu0 %v498_v9  ;;  %7797 = vmatpush3.msra.mxu1 %v903_v31  ;;  %v935_v47 = vld [vmem:[%s15397_s9 + $0x160] sm:$0xff]  ;;  %v898_v50 = vld [vmem:[%s15397_s9 + $0x38] sm:$0xff]  ;;  %v949_v53 = vld [vmem:[%s15397_s9 + $0x1d0] sm:$0xff]  ;;  %15880 = vst [vmem:[#allocation18_spill] sm:$0xff] %v8825_v29 }
  0x54   : > { %7925 = vmatpush3.msra.mxu0 %v498_v9  ;;  %7798 = vmatprep.subr.mxu1 %v918_v32  ;;  %v934_v51 = vld [vmem:[%s15397_s9 + $0x158] sm:$0xff]  ;;  %v897_v54 = vld [vmem:[%s15397_s9 + $0x30] sm:$0xff]  ;;  %v912_v56 = vld [vmem:[%s15397_s9 + $0xa8] sm:$0xff] }
  0x55   : > { %7926 = vmatprep.subr.mxu0 %v497_v10  ;;  %7799 = vmatpush3.msra.mxu1 %v902_v34  ;;  %v933_v55 = vld [vmem:[%s15397_s9 + $0x150] sm:$0xff]  ;;  %v948_v57 = vld [vmem:[%s15397_s9 + $0x1c8] sm:$0xff]  ;;  %v911_v60 = vld [vmem:[%s15397_s9 + $0xa0] sm:$0xff] }
  0x56   : > { %7927 = vmatpush3.msra.mxu0 %v497_v10  ;;  %7800 = vmatprep.subr.mxu1 %v917_v36  ;;  %v896_v58 = vld [vmem:[%s15397_s9 + $0x28] sm:$0xff]  ;;  %v947_v61 = vld [vmem:[%s15397_s9 + $0x1c0] sm:$0xff]  ;;  %v910_v0 = vld [vmem:[%s15397_s9 + $0x98] sm:$0xff] }
  0x57   : > { %7928 = vmatprep.subr.mxu0 %v496_v11  ;;  %7801 = vmatpush3.msra.mxu1 %v901_v38  ;;  %v932_v59 = vld [vmem:[%s15397_s9 + $0x148] sm:$0xff]  ;;  %v895_v62 = vld [vmem:[%s15397_s9 + $0x20] sm:$0xff]  ;;  %v946_v1 = vld [vmem:[%s15397_s9 + $0x1b8] sm:$0xff] }
  0x58   : > { %7929 = vmatpush3.msra.mxu0 %v496_v11  ;;  %7802 = vmatprep.subr.mxu1 %v916_v40  ;;  %v931_v63 = vld [vmem:[%s15397_s9 + $0x140] sm:$0xff]  ;;  %v894_v2 = vld [vmem:[%s15397_s9 + $0x18] sm:$0xff]  ;;  %v909_v4 = vld [vmem:[%s15397_s9 + $0x90] sm:$0xff] }
  0x59   : > { %7930 = vmatprep.subr.mxu0 %v495_v12  ;;  %7803 = vmatpush3.msra.mxu1 %v900_v42  ;;  %v930_v3 = vld [vmem:[%s15397_s9 + $0x138] sm:$0xff]  ;;  %v945_v5 = vld [vmem:[%s15397_s9 + $0x1b0] sm:$0xff]  ;;  %v908_v8 = vld [vmem:[%s15397_s9 + $0x88] sm:$0xff] }
  0x5a   : > { %7931 = vmatpush3.msra.mxu0 %v495_v12  ;;  %7804 = vmatprep.subr.mxu1 %v915_v44  ;;  %v893_v6 = vld [vmem:[%s15397_s9 + $0x10] sm:$0xff]  ;;  %v944_v9 = vld [vmem:[%s15397_s9 + $0x1a8] sm:$0xff]  ;;  %v907_v12 = vld [vmem:[%s15397_s9 + $0x80] sm:$0xff] }
  0x5b   : > { %7932 = vmatprep.subr.mxu0 %v494_v13  ;;  %7805 = vmatpush3.msra.mxu1 %v899_v46  ;;  %v929_v7 = vld [vmem:[%s15397_s9 + $0x130] sm:$0xff]  ;;  %v892_v10 = vld [vmem:[%s15397_s9 + $0x8] sm:$0xff]  ;;  %v612_v27 = vld [vmem:[%s15390_s2] sm:$0xf] }
  0x5c   : > { %7933 = vmatpush3.msra.mxu0 %v494_v13  ;;  %7806 = vmatprep.subr.mxu1 %v914_v48  ;;  %v928_v11 = vld [vmem:[%s15397_s9 + $0x128] sm:$0xff]  ;;  %v943_v13 = vld [vmem:[%s15397_s9 + $0x1a0] sm:$0xff]  ;;  %v617_v28 = vrot.slane %v612_v27, %v8819_v26 }
  0x5d   : > { %7934 = vmatprep.subr.mxu0 %v493_v14  ;;  %7807 = vmatpush3.msra.mxu1 %v898_v50 }
  0x5e   : > { %7935 = vmatpush3.msra.mxu0 %v493_v14  ;;  %7808 = vmatprep.subr.mxu1 %v913_v52  ;;  %v891_v14 = vld [vmem:[%s15397_s9] sm:$0xff] }
  0x5f   : > { %7936 = vmatprep.subr.mxu0 %v492_v15  ;;  %7809 = vmatpush3.msra.mxu1 %v897_v54 }
  0x60   : > { %7937 = vmatpush3.msra.mxu0 %v492_v15  ;;  %7810 = vmatprep.subr.mxu1 %v912_v56  ;;  %v927_v15 = vld [vmem:[%s15397_s9 + $0x120] sm:$0xff] }
  0x61   : > { %7938 = vmatprep.subr.mxu0 %v491_v16  ;;  %7811 = vmatpush3.msra.mxu1 %v896_v58 }
  0x62   : > { %7939 = vmatpush3.msra.mxu0 %v491_v16  ;;  %7812 = vmatprep.subr.mxu1 %v911_v60  ;;  %v942_v16 = vld [vmem:[%s15397_s9 + $0x198] sm:$0xff] }
  0x63   : > { %7941 = vmatmul.mubr.f32.vlgmr.msra.gmra.mxu0 %v487_v17  ;;  %7825 = vmatprep.subr.mxu0 %v954_v33  ;;  %v926_v17 = vld [vmem:[%s15397_s9 + $0x118] sm:$0xff]  ;;  %v621_v33 = vrot.slane %v612_v27, %v8825_v29 }
  0x64   : > { %7943 = vmatprep.mubr.f32.mxu0 %v484_v18  ;;  %7826 = vmatpush3.msra.mxu0 %v938_v35  ;;  %v941_v18 = vld [vmem:[%s15397_s9 + $0x190] sm:$0xff] }
  0x65   : > { %7827 = vmatprep.subr.mxu0 %v953_v37  ;;  %7813 = vmatpush3.msra.mxu1 %v895_v62 }
  0x66   : > { %7828 = vmatpush3.msra.mxu0 %v937_v39  ;;  %7814 = vmatprep.subr.mxu1 %v910_v0 }
  0x67   : > { %7944 = vmatmul.mubr.f32.gmra.mxu0 %v488_v19  ;;  %7829 = vmatprep.subr.mxu0 %v952_v41  ;;  %v925_v19 = vld [vmem:[%s15397_s9 + $0x110] sm:$0xff]  ;;  %v8828_v41 = vsub.s32 2, %v615_v25 }
  0x68   : > { %7946 = vmatprep.mubr.f32.mxu0 %v485_v20  ;;  %7830 = vmatpush3.msra.mxu0 %v936_v43  ;;  %v940_v20 = vld [vmem:[%s15397_s9 + $0x188] sm:$0xff] }
  0x69   : > { %7831 = vmatprep.subr.mxu0 %v951_v45  ;;  %7815 = vmatpush3.msra.mxu1 %v894_v2  ;;  %15881 = vst [vmem:[#allocation19_spill] sm:$0xff] %v8828_v41 }
  0x6a   : > { %7832 = vmatpush3.msra.mxu0 %v935_v47  ;;  %7816 = vmatprep.subr.mxu1 %v909_v4 }
  0x6b   : > { %7947 = vmatmul.mubr.f32.gmra.mxu0 %v489_v21  ;;  %7833 = vmatprep.subr.mxu0 %v950_v49  ;;  %v924_v21 = vld [vmem:[%s15397_s9 + $0x108] sm:$0xff] }
  0x6c   : > { %7949 = vmatprep.mubr.f32.mxu0 %v486_v22  ;;  %7834 = vmatpush3.msra.mxu0 %v934_v51  ;;  %v939_v22 = vld [vmem:[%s15397_s9 + $0x180] sm:$0xff]  ;;  %v625_v51 = vrot.slane %v612_v27, %v8828_v41 }
  0x6d   : > { %7835 = vmatprep.subr.mxu0 %v949_v53  ;;  %7817 = vmatpush3.msra.mxu1 %v893_v6  ;;  %v8836_v53 = vsub.s32 3, %v615_v25 }
  0x6e   : > { %7836 = vmatpush3.msra.mxu0 %v933_v55  ;;  %7818 = vmatprep.subr.mxu1 %v908_v8 }
  0x6f   : > { %7950 = vmatmul.mubr.f32.gmra.mxu0 %v490_v23  ;;  %7837 = vmatprep.subr.mxu0 %v948_v57  ;;  %v923_v23 = vld [vmem:[%s15397_s9 + $0x100] sm:$0xff]  ;;  %15882 = vst [vmem:[#allocation20_spill] sm:$0xff] %v8836_v53  ;;  %v629_v60 = vrot.slane %v612_v27, %v8836_v53 }
  0x70   : > { %7838 = vmatpush3.msra.mxu0 %v932_v59  ;;  %7819 = vmatpush3.msra.mxu1 %v892_v10 }
  0x71   : > { %7839 = vmatprep.subr.mxu0 %v947_v61  ;;  %7820 = vmatprep.subr.mxu1 %v907_v12 }
  0x72   : > { %7840 = vmatpush3.msra.mxu0 %v931_v63  ;;  %7821 = vmatpush3.msra.mxu1 %v891_v14 }
  0x73   : > { %7841 = vmatprep.subr.mxu0 %v946_v1 }
  0x74   : > { %7842 = vmatpush3.msra.mxu0 %v930_v3 }
  0x75   : > { %7843 = vmatprep.subr.mxu0 %v945_v5 }
  0x76   : > { %7844 = vmatpush3.msra.mxu0 %v929_v7 }
  0x77   : > { %7845 = vmatprep.subr.mxu0 %v944_v9 }
  0x78   : > { %7846 = vmatpush3.msra.mxu0 %v928_v11 }
  0x79   : > { %7847 = vmatprep.subr.mxu0 %v943_v13 }
  0x7a   : > { %7848 = vmatpush3.msra.mxu0 %v927_v15 }
  0x7b   : > { %7849 = vmatprep.subr.mxu0 %v942_v16 }
  0x7c   : > { %7850 = vmatpush3.msra.mxu0 %v926_v17 }
  0x7d   : > { %7851 = vmatprep.subr.mxu0 %v941_v18  ;;  %v8383_v18 = vmov -1.0  }
  0x7e   : > { %7852 = vmatpush3.msra.mxu0 %v925_v19 }
  0x7f   : > { %7853 = vmatprep.subr.mxu0 %v940_v20 }
  0x80   : > { %7854 = vmatpush3.msra.mxu0 %v924_v21 }
  0x81   : > { %7855 = vmatprep.subr.mxu0 %v939_v22 }
  0x82   : > { %7856 = vmatpush3.msra.mxu0 %v923_v23 }
 0x123   : > { %v7942_v30 = vpop.f32.mrf.mxu0 }
 0x124   : > { %v638_v31 = vadd.f32 %v7942_v30, %v617_v28 }
 0x125   : > { %v573_v32 = vpop.f32.mrf.mxu0 }
 0x126   : > { %v654_v34 = vmul.f32 0.70710677, %v638_v31  ;;  %v634_v35 = vadd.f32 %v617_v28, %v573_v32  ;;  %v8854_v11 = vmul.f32 0.5, %v638_v31 }
 0x127   : > { %v7945_v36 = vpop.f32.mrf.mxu0 }
 0x128   : > { %v678_v37 = vand.u32 2147483647, %v654_v34  ;;  %v650_v38 = vmul.f32 0.70710677, %v634_v35  ;;  %v639_v39 = vadd.f32 %v7945_v36, %v621_v33  ;;  %vm662_vm0 = vcmp.ge.f32.partialorder %v654_v34, 0.0 }
 0x129   : > { %v583_v40 = vpop.f32.mrf.mxu0  ;;  %v8861_v14 = vmul.f32 0.5, %v634_v35  ;;  %v8864_v19 = vsel %vm662_vm0, 1.0, %v8383_v18  ;;  %vm3312_vm0 = vcmask 1040384  }
 0x12a   : > { %v686_v42 = vmul.f32 0.3275911, %v678_v37  ;;  %v674_v43 = vand.u32 2147483647, %v650_v38  ;;  %v8830_v44 = vmul.f32 0.70710677, %v639_v39  ;;  %v635_v45 = vadd.f32 %v621_v33, %v583_v40 }
 0x12b   : > { %v7948_v46 = vpop.f32.mrf.mxu0  ;;  %v790_v63 = vsub.f32 0.0, %v678_v37  ;;  %vm658_vm1 = vcmp.ge.f32.partialorder %v650_v38, 0.0  ;;  %v8876_v31 = vmul.f32 0.5, %v639_v39 }
 0x12c   : > { %v694_v47 = vadd.f32 1.0, %v686_v42  ;;  %v682_v48 = vmul.f32 0.3275911, %v674_v43  ;;  %v679_v49 = vand.u32 2147483647, %v8830_v44  ;;  %v8839_v58 = vadd.f32 %v7948_v46, %v625_v51 }
 0x12d   : > { %v8833_v50 = vmul.f32 0.70710677, %v635_v45  ;;  %v593_v52 = vpop.f32.mrf.mxu0  ;;  %v786_v3 = vsub.f32 0.0, %v674_v43  ;;  %v798_v7 = vmul.f32 %v790_v63, %v678_v37  ;;  %v8867_v20 = vsel %vm658_vm1, 1.0, %v8383_v18 }
 0x12e   : > { %8152 = vrcp.f32 %v694_v47  ;;  %v690_v54 = vadd.f32 1.0, %v682_v48  ;;  %v687_v55 = vmul.f32 0.3275911, %v679_v49  ;;  %v8842_v62 = vadd.f32 %v625_v51, %v593_v52 }
 0x12f   : > { %v675_v56 = vand.u32 2147483647, %v8833_v50  ;;  %v7951_v59 = vpop.f32.mrf.mxu0  ;;  %v8845_v0 = vmul.f32 0.70710677, %v8839_v58  ;;  %v791_v8 = vsub.f32 0.0, %v679_v49  ;;  %v794_v15 = vmul.f32 %v786_v3, %v674_v43 }
 0x130   : > { %8154 = vrcp.f32 %v690_v54  ;;  %v695_v57 = vadd.f32 1.0, %v687_v55  ;;  %v8848_v2 = vmul.f32 0.70710677, %v8842_v62  ;;  %v8851_v5 = vadd.f32 %v7951_v59, %v629_v60 }
 0x131   : > { %v683_v61 = vmul.f32 0.3275911, %v675_v56  ;;  %v680_v4 = vand.u32 2147483647, %v8845_v0  ;;  %v603_v6 = vpop.f32.mrf.mxu0  ;;  %v810_v25 = vmul.f32 1.442695, %v798_v7  ;;  %v799_v27 = vmul.f32 %v791_v8, %v679_v49 }
 0x132   : > { %8156 = vrcp.f32 %v695_v57  ;;  %v676_v10 = vand.u32 2147483647, %v8848_v2  ;;  %v8857_v12 = vmul.f32 0.70710677, %v8851_v5  ;;  %v8859_v13 = vadd.f32 %v629_v60, %v603_v6 }
 0x133   : > { %v691_v1 = vadd.f32 1.0, %v683_v61  ;;  %v688_v9 = vmul.f32 0.3275911, %v680_v4  ;;  %v787_v32 = vsub.f32 0.0, %v675_v56  ;;  %v802_v34 = vmul.f32 1.442695, %v794_v15 }
 0x134   : > { %v684_v17 = vmul.f32 0.3275911, %v676_v10  ;;  %v681_v21 = vand.u32 2147483647, %v8857_v12  ;;  %v8871_v22 = vmul.f32 0.70710677, %v8859_v13 }
 0x135   : > { %8158 = vrcp.f32 %v691_v1  ;;  %v696_v16 = vadd.f32 1.0, %v688_v9  ;;  %vm663_vm2 = vcmp.ge.f32.partialorder %v8830_v44, 0.0  ;;  %v8879_v35 = vmul.f32 0.5, %v635_v45 }
 0x136   : > { %v692_v28 = vadd.f32 1.0, %v684_v17  ;;  %v689_v33 = vmul.f32 0.3275911, %v681_v21  ;;  %v677_v36 = vand.u32 2147483647, %v8871_v22  ;;  %v792_v40 = vsub.f32 0.0, %v680_v4 }
 0x137   : > { %8160 = vrcp.f32 %v696_v16  ;;  %v812_v39 = vmul.f32 1.442695, %v799_v27  ;;  %v795_v49 = vmul.f32 %v787_v32, %v675_v56  ;;  %v788_v45 = vsub.f32 0.0, %v676_v10 }
 0x138   : > { %8162 = vrcp.f32 %v692_v28  ;;  %v697_v42 = vadd.f32 1.0, %v689_v33  ;;  %v685_v46 = vmul.f32 0.3275911, %v677_v36  ;;  %v793_v54 = vsub.f32 0.0, %v681_v21 }
 0x139   : > { %8164 = vpow2.f32 %v810_v25  ;;  %v8892_v59 = vsel %vm663_vm2, 1.0, %v8383_v18  ;;  %v800_v60 = vmul.f32 %v792_v40, %v680_v4  ;;  %v789_v1 = vsub.f32 0.0, %v677_v36 }
 0x13a   : > { %8166 = vrcp.f32 %v697_v42  ;;  %v693_v55 = vadd.f32 1.0, %v685_v46  ;;  %v804_v7 = vmul.f32 1.442695, %v795_v49  ;;  %v796_v8 = vmul.f32 %v788_v45, %v676_v10 }
 0x13b   : > { %v8873_v23 = vpop.eup %8152  ;;  %8168 = vpow2.f32 %v802_v34  ;;  %v801_v44 = vmul.f32 %v793_v54, %v681_v21  ;;  %v814_v17 = vmul.f32 1.442695, %v800_v60  ;;  %vm659_vm3 = vcmp.ge.f32.partialorder %v8833_v50, 0.0 }
 0x13c   : > { %v718_v30 = vmul.f32 1.0614054, %v8873_v23  ;;  %8170 = vrcp.f32 %v693_v55  ;;  %v797_v28 = vmul.f32 %v789_v1, %v677_v36  ;;  %v806_v33 = vmul.f32 1.442695, %v796_v8 }
 0x13d   : > { %v8882_v37 = vpop.eup %8154  ;;  %8172 = vpow2.f32 %v812_v39  ;;  %v816_v40 = vmul.f32 1.442695, %v801_v44  ;;  %vm664_vm5 = vcmp.ge.f32.partialorder %v8845_v0, 0.0  ;;  %vm660_vm6 = vcmp.ge.f32.partialorder %v8848_v2, 0.0 }
 0x13e   : > { %v726_v38 = vadd.f32 -1.4531521, %v718_v30  ;;  %v714_v43 = vmul.f32 1.0614054, %v8882_v37  ;;  %8174 = vpow2.f32 %v804_v7  ;;  %v808_v49 = vmul.f32 1.442695, %v797_v28 }
 0x13f   : > { %v8885_v47 = vpop.eup %8156  ;;  %8176 = vpow2.f32 %v814_v17  ;;  %vm665_vm7 = vcmp.ge.f32.partialorder %v8857_v12, 0.0  ;;  %vm661_vm8 = vcmp.ge.f32.partialorder %v8871_v22, 0.0  ;;  %vm1100_vm1 = vcmask 64512  }
 0x140   : > { %v734_v48 = vmul.f32 %v8873_v23, %v726_v38  ;;  %v722_v51 = vadd.f32 -1.4531521, %v714_v43  ;;  %v719_v52 = vmul.f32 1.0614054, %v8885_v47  ;;  %v8909_v43 = vsel %vm659_vm3, 1.0, %v8383_v18 }
 0x141   : > { %8178 = vpow2.f32 %v806_v33  ;;  %v669_v22 = vsel %vm661_vm8, 1.0, %v8383_v18 }
 0x142   : > { %v742_v57 = vadd.f32 1.4214138, %v734_v48  ;;  %v8894_v61 = vpop.eup %8158  ;;  %v730_v63 = vmul.f32 %v8882_v37, %v722_v51  ;;  %v727_v56 = vadd.f32 -1.4531521, %v719_v52  ;;  %8180 = vpow2.f32 %v816_v40 }
 0x143   : > { %v715_v6 = vmul.f32 1.0614054, %v8894_v61  ;;  %8182 = vpow2.f32 %v808_v49 }
 0x144   : > { %v750_v3 = vmul.f32 %v8873_v23, %v742_v57  ;;  %v738_v9 = vadd.f32 1.4214138, %v730_v63  ;;  %v735_v15 = vmul.f32 %v8885_v47, %v727_v56  ;;  %v8902_v30 = vpop.eup %8160 }
 0x145   : > { %v723_v4 = vadd.f32 -1.4531521, %v715_v6  ;;  %v720_v38 = vmul.f32 1.0614054, %v8902_v30  ;;  %v8911_v36 = vpop.eup %8162 }
 0x146   : > { %v758_v16 = vadd.f32 -0.28449672, %v750_v3  ;;  %v746_v25 = vmul.f32 %v8882_v37, %v738_v9  ;;  %v743_v27 = vadd.f32 1.4214138, %v735_v15  ;;  %v8165_v45 = vpop.eup %8164  ;;  %v716_v54 = vmul.f32 1.0614054, %v8911_v36 }
 0x147   : > { %v731_v10 = vmul.f32 %v8894_v61, %v723_v4  ;;  %v728_v48 = vadd.f32 -1.4531521, %v720_v38  ;;  %v8917_v55 = vpop.eup %8166 }
 0x148   : > { %v766_v32 = vmul.f32 %v8873_v23, %v758_v16  ;;  %v754_v34 = vadd.f32 -0.28449672, %v746_v25  ;;  %v751_v21 = vmul.f32 %v8885_v47, %v743_v27  ;;  %v724_v3 = vadd.f32 -1.4531521, %v716_v54  ;;  %v8169_v7 = vpop.eup %8168 }
 0x149   : > { %v739_v50 = vadd.f32 1.4214138, %v731_v10  ;;  %v736_v63 = vmul.f32 %v8902_v30, %v728_v48  ;;  %v721_v6 = vmul.f32 1.0614054, %v8917_v55  ;;  %v8923_v15 = vpop.eup %8170 }
 0x14a   : > { %v774_v42 = vadd.f32 0.2548296, %v766_v32  ;;  %v762_v39 = vmul.f32 %v8882_v37, %v754_v34  ;;  %v759_v46 = vadd.f32 -0.28449672, %v751_v21  ;;  %v732_v4 = vmul.f32 %v8911_v36, %v724_v3  ;;  %v8173_v10 = vpop.eup %8172 }
 0x14b   : > { %v747_v52 = vmul.f32 %v8894_v61, %v739_v50  ;;  %v744_v9 = vadd.f32 1.4214138, %v736_v63  ;;  %v729_v17 = vadd.f32 -1.4531521, %v721_v6  ;;  %v717_v32 = vmul.f32 1.0614054, %v8923_v15  ;;  %v8175_v49 = vpop.eup %8174 }
 0x14c   : > { %v782_v51 = vmul.f32 %v8873_v23, %v774_v42  ;;  %v770_v57 = vadd.f32 0.2548296, %v762_v39  ;;  %v767_v60 = vmul.f32 %v8885_v47, %v759_v46  ;;  %v740_v34 = vadd.f32 1.4214138, %v732_v4  ;;  %v8177_v63 = vpop.eup %8176 }
 0x14d   : > { %v755_v1 = vadd.f32 -0.28449672, %v747_v52  ;;  %v752_v28 = vmul.f32 %v8902_v30, %v744_v9  ;;  %v737_v21 = vmul.f32 %v8917_v55, %v729_v17  ;;  %v725_v50 = vadd.f32 -1.4531521, %v717_v32 }
 0x14e   : > { %v822_v56 = vmul.f32 %v8165_v45, %v782_v51  ;;  %v778_v23 = vmul.f32 %v8882_v37, %v770_v57  ;;  %v775_v8 = vadd.f32 0.2548296, %v767_v60  ;;  %v8179_v9 = vpop.eup %8178 }
 0x14f   : > { %v763_v16 = vmul.f32 %v8894_v61, %v755_v1  ;;  %v760_v42 = vadd.f32 -0.28449672, %v752_v28  ;;  %v745_v48 = vadd.f32 1.4214138, %v737_v21  ;;  %v733_v52 = vmul.f32 %v8923_v15, %v725_v50  ;;  %v8181_v17 = vpop.eup %8180 }
 0x150   : > { %v830_v44 = vsub.f32 1.0, %v822_v56  ;;  %v818_v25 = vmul.f32 %v8169_v7, %v778_v23  ;;  %v783_v27 = vmul.f32 %v8885_v47, %v775_v8  ;;  %v748_v47 = vmul.f32 %v8911_v36, %v740_v34 }
 0x151   : > { %v771_v33 = vadd.f32 0.2548296, %v763_v16  ;;  %v768_v51 = vmul.f32 %v8902_v30, %v760_v42  ;;  %v741_v6 = vadd.f32 1.4214138, %v733_v52 }
 0x152   : > { %v838_v37 = vmul.f32 %v830_v44, %v8864_v19  ;;  %v826_v38 = vsub.f32 1.0, %v818_v25  ;;  %v823_v40 = vmul.f32 %v8173_v10, %v783_v27  ;;  %v756_v60 = vadd.f32 -0.28449672, %v748_v47 }
 0x153   : > { %v779_v46 = vmul.f32 %v8894_v61, %v771_v33  ;;  %v753_v61 = vmul.f32 %v8917_v55, %v745_v48  ;;  %v776_v3 = vadd.f32 0.2548296, %v768_v51  ;;  %v749_v4 = vmul.f32 %v8923_v15, %v741_v6 }
 0x154   : > { %v846_v39 = vadd.f32 1.0, %v838_v37  ;;  %v834_v45 = vmul.f32 %v826_v38, %v8867_v20  ;;  %v831_v19 = vsub.f32 1.0, %v823_v40  ;;  %v764_v23 = vmul.f32 %v8911_v36, %v756_v60 }
 0x155   : > { %v819_v57 = vmul.f32 %v8175_v49, %v779_v46  ;;  %v761_v8 = vadd.f32 -0.28449672, %v753_v61  ;;  %v784_v16 = vmul.f32 %v8902_v30, %v776_v3  ;;  %v8183_v30 = vpop.eup %8182  ;;  %v757_v40 = vadd.f32 -0.28449672, %v749_v4 }
 0x156   : > { %v8939_v54 = vmul.f32 %v846_v39, %v8854_v11  ;;  %v842_v56 = vadd.f32 1.0, %v834_v45  ;;  %v839_v1 = vmul.f32 %v831_v19, %v8892_v59  ;;  %v772_v27 = vadd.f32 0.2548296, %v764_v23 }
 0x157   : > { %v827_v7 = vsub.f32 1.0, %v819_v57  ;;  %v769_v28 = vmul.f32 %v8917_v55, %v761_v8  ;;  %v765_v47 = vmul.f32 %v8923_v15, %v757_v40  ;;  %v644_v57 = vmul.f32 0.5, %v8842_v62 }
 0x158   : > { %15883 = vst [vmem:[#allocation21_spill] sm:$0xff] %v8939_v54  ;;  %v1283_v20 = vrot.slane %v8939_v54, 6  ;;  %v8946_v11 = vmul.f32 %v842_v56, %v8861_v14  ;;  %v847_v44 = vadd.f32 1.0, %v839_v1  ;;  %v780_v33 = vmul.f32 %v8911_v36, %v772_v27 }
 0x159   : > { %v835_v25 = vmul.f32 %v827_v7, %v8909_v43  ;;  %v824_v43 = vmul.f32 %v8177_v63, %v784_v16  ;;  %v777_v34 = vadd.f32 0.2548296, %v769_v28  ;;  %v672_v36 = vsel %vm664_vm5, 1.0, %v8383_v18 }
 0x15a   : > { %15884 = vst [vmem:[#allocation22_spill] sm:$0xff] %v8946_v11  ;;  %v8951_v59 = vsel %vm1278_vm4, %v1283_v20, 0.0  ;;  %v858_v32 = vadd.f32 %v8939_v54, %v8946_v11  ;;  %v1279_v14 = vrot.slane %v8946_v11, 6  ;;  %v8959_v10 = vmul.f32 %v847_v44, %v8876_v31 }
 0x15b   : > { %1315 = vrot.lane.b32.xlu0 %v8951_v59, %s8384_s25  ;;  %v843_v37 = vadd.f32 1.0, %v835_v25  ;;  %v648_v31 = vmul.f32 0.5, %v8839_v58  ;;  %v832_v50 = vsub.f32 1.0, %v824_v43  ;;  %v820_v39 = vmul.f32 %v8179_v9, %v780_v33 }
 0x15c   : > { %15885 = vst [vmem:[#allocation23_spill] sm:$0xff] %v8959_v10  ;;  %v8966_v21 = vsel %vm1278_vm4, %v1279_v14, %v1283_v20  ;;  %v1285_v38 = vrot.slane %v8959_v10, 6  ;;  %v785_v46 = vmul.f32 %v8917_v55, %v777_v34  ;;  %v668_v58 = vsel %vm660_vm6, 1.0, %v8383_v18 }
 0x15d   : > { %v8971_v42 = vmul.f32 %v843_v37, %v8879_v35  ;;  %1718 = vrot.lane.b32.xlu1 %v8966_v21, %s8385_s27  ;;  %v859_v35 = vrot.slane %v858_v32, 4  ;;  %v840_v48 = vmul.f32 %v832_v50, %v672_v36  ;;  %v828_v49 = vsub.f32 1.0, %v820_v39  ;;  %v9038_v39 = vld [vmem:[#allocation2 + $0x7] ss:$8 sm:$0xf] }
 0x15e   : > { %v8988_v55 = vsel %vm1278_vm4, %v1285_v38, 0.0  ;;  %v825_v0 = vmul.f32 %v8181_v17, %v785_v46  ;;  %v773_v45 = vadd.f32 0.2548296, %v765_v47  ;;  %v8994_v51 = vsel %vm1278_vm4, 0.0, %v1279_v14 }
 0x15f   : > { %15886 = vst [vmem:[#allocation24_spill] sm:$0xff] %v8971_v42  ;;  %1720 = vrot.lane.b32.xlu0 %v8951_v59, %s8385_s27  ;;  %v865_v2 = vadd.f32 %v8959_v10, %v8971_v42  ;;  %v860_v19 = vadd.f32 %v859_v35, %v858_v32  ;;  %v848_v52 = vadd.f32 1.0, %v840_v48  ;;  %v836_v60 = vmul.f32 %v828_v49, %v668_v58 }
 0x160   : > { %v833_v61 = vsub.f32 1.0, %v825_v0  ;;  %v781_v63 = vmul.f32 %v8923_v15, %v773_v45  ;;  %v1280_v3 = vrot.slane %v8971_v42, 6  ;;  %v673_v20 = vsel %vm665_vm7, 1.0, %v8383_v18 }
 0x161   : > { %1321 = vrot.lane.b32.xlu1 %v8988_v55, %s8384_s25  ;;  %v866_v56 = vrot.slane %v865_v2, 4  ;;  %v861_v1 = vrot.slane %v860_v19, 2  ;;  %v844_v6 = vadd.f32 1.0, %v836_v60  ;;  %v9007_v9 = vmul.f32 %v848_v52, %v648_v31  ;;  %v9068_v60 = vld [vmem:[#allocation2 + $0x24] ss:$8 sm:$0xf] }
 0x162   : > { %v841_v62 = vmul.f32 %v833_v61, %v673_v20  ;;  %v821_v7 = vmul.f32 %v8183_v30, %v781_v63  ;;  %v9019_v17 = vsel %vm1278_vm4, 0.0, %v1280_v3  ;;  %v649_v14 = vmul.f32 0.5, %v8851_v5 }
 0x163   : > { %1311 = vrot.lane.b32.xlu0 %v8994_v51, %s8384_s25  ;;  %v867_v23 = vadd.f32 %v866_v56, %v865_v2  ;;  %v862_v8 = vadd.f32 %v861_v1, %v860_v19  ;;  %15887 = vst [vmem:[#allocation25_spill] sm:$0xff] %v9007_v9  ;;  %v9009_v15 = vmul.f32 %v844_v6, %v644_v57  ;;  %v645_v30 = vmul.f32 0.5, %v8859_v13  ;;  %v9072_v1 = vld [vmem:[#allocation2 + $0x41] ss:$8 sm:$0xf] }
 0x164   : > { %v829_v44 = vsub.f32 1.0, %v821_v7  ;;  %v849_v25 = vadd.f32 1.0, %v841_v62  ;;  %v1287_v43 = vrot.slane %v9007_v9, 6  ;;  %v9032_v40 = vsel %vm1278_vm4, %v1280_v3, %v1285_v38  ;;  %v9083_v7 = vld [vmem:[#allocation2 + $0x46] ss:$8 sm:$0xf] }
 0x165   : > { %15888 = vst [vmem:[#allocation26_spill] sm:$0xff] %v9009_v15  ;;  %1726 = vrot.lane.b32.xlu1 %v8988_v55, %s8385_s27  ;;  %v868_v16 = vrot.slane %v867_v23, 2  ;;  %v872_v12 = vadd.f32 %v9007_v9, %v9009_v15  ;;  %v863_v4 = vrot.slane %v862_v8, 1  ;;  %v1281_v34 = vrot.slane %v9009_v15, 6 }
 0x166   : > { %v837_v27 = vmul.f32 %v829_v44, %v669_v22  ;;  %v9034_v50 = vmul.f32 %v849_v25, %v649_v14  ;;  %v9048_v38 = vrot.slane %v9038_v39, %v8828_v41  ;;  %v9051_v47 = vsel %vm1278_vm4, %v1287_v43, 0.0 }
 0x167   : > { %1313 = vrot.lane.b32.xlu0 %v8966_v21, %s8384_s25  ;;  %v869_v28 = vadd.f32 %v868_v16, %v867_v23  ;;  %v873_v32 = vrot.slane %v872_v12, 4  ;;  %v864_v31 = vadd.f32 %v863_v4, %v862_v8  ;;  %v9054_v48 = vsel %vm1278_vm4, %v1281_v34, %v1287_v43 }
 0x168   : > { %v845_v37 = vadd.f32 1.0, %v837_v27  ;;  %15889 = vst [vmem:[#allocation27_spill] sm:$0xff] %v9034_v50  ;;  %v2173_v45 = vrot.slane %v9038_v39, %v8825_v29  ;;  %v9064_v19 = vmul.f32 %v9048_v38, %v9054_v48  ;;  %v2196_v52 = vmul.f32 %v9048_v38, %v9051_v47 }
 0x169   : > { %1317 = vrot.lane.b32.xlu1 %v9019_v17, %s8384_s25  ;;  %v870_v18 = vrot.slane %v869_v28, 1  ;;  %v874_v33 = vadd.f32 %v873_v32, %v872_v12  ;;  %v887_v49 = vmul.f32 0.0625, %v864_v31  ;;  %v9075_v3 = vsel %vm1278_vm4, 0.0, %v1281_v34 }
 0x16a   : > { %v9036_v5 = vmul.f32 %v845_v37, %v645_v30  ;;  %v2217_v63 = vrot.slane %v9064_v19, 1  ;;  %v2187_v56 = vmul.f32 %v2173_v45, %v9019_v17  ;;  %v2226_v6 = vrot.slane %v2196_v52, 1 }
 0x16b   : > { %1716 = vrot.lane.b32.xlu0 %v8994_v51, %s8385_s27  ;;  %v871_v13 = vadd.f32 %v870_v18, %v869_v28  ;;  %v875_v46 = vrot.slane %v874_v33, 2  ;;  %v2256_v20 = vrot.slane %v9068_v60, %v8825_v29  ;;  %v2339_v62 = vrot.slane %v9072_v1, %v8825_v29 }
 0x16c   : > { %15890 = vst [vmem:[#allocation28_spill] sm:$0xff] %v9036_v5  ;;  %v879_v36 = vadd.f32 %v9034_v50, %v9036_v5  ;;  %v2195_v23 = vmul.f32 %v2173_v45, %v8988_v55  ;;  %v2422_v44 = vrot.slane %v9083_v7, %v8825_v29  ;;  %v9092_v16 = vrot.slane %v9068_v60, %v8828_v41 }
 0x16d   : > { %1319 = vrot.lane.b32.xlu1 %v9032_v40, %s8384_s25  ;;  %v888_v58 = vmul.f32 0.0625, %v871_v13  ;;  %v876_v35 = vadd.f32 %v875_v46, %v874_v33  ;;  %v1289_v12 = vrot.slane %v9034_v50, 6  ;;  %v1282_v22 = vrot.slane %v9036_v5, 6  ;;  %v9298_v50 = vld [vmem:[#allocation2 + $0x40] ss:$8 sm:$0xf] }
 0x16e   : > { %v880_v0 = vrot.slane %v879_v36, 4  ;;  %v9099_v25 = vsel %vm1427_vm9, %v2217_v63, %v2226_v6  ;;  %v2191_v28 = vmul.f32 %v2173_v45, %v9032_v40  ;;  %v2213_v32 = vrot.slane %v2187_v56, 1  ;;  %v9300_v5 = vld [vmem:[#allocation2 + $0x45] ss:$8 sm:$0xf] }
 0x16f   : > { %1722 = vrot.lane.b32.xlu0 %v9019_v17, %s8385_s27  ;;  %1019 = vmatprep.mubr.f32.mxu1 %v888_v58  ;;  %v877_v57 = vrot.slane %v876_v35, 1  ;;  %15891 = vst [vmem:[#allocation29_spill] sm:$0xff] %v9099_v25  ;;  %v2270_v14 = vmul.f32 %v2256_v20, %v9019_v17  ;;  %v2274_v30 = vmul.f32 %v2256_v20, %v9032_v40 }
 0x170   : > { %1020 = vmatmul.mubr.f32.vlgmr.msra.gmra.mxu1 %v887_v49  ;;  %v881_v2 = vadd.f32 %v880_v0, %v879_v36  ;;  %v2353_v37 = vmul.f32 %v2339_v62, %v9019_v17  ;;  %v2357_v18 = vmul.f32 %v2339_v62, %v9032_v40  ;;  %v2436_v43 = vmul.f32 %v2422_v44, %v9019_v17 }
 0x171   : > { %1724 = vrot.lane.b32.xlu1 %v9032_v40, %s8385_s27  ;;  %v878_v4 = vadd.f32 %v877_v57, %v876_v35  ;;  %v2214_v34 = vrot.slane %v2191_v28, 1  ;;  %v2296_v31 = vrot.slane %v2270_v14, 2  ;;  %v2440_v13 = vmul.f32 %v2422_v44, %v9032_v40 }
 0x172   : > { %v882_v61 = vrot.slane %v881_v2, 2  ;;  %v2297_v46 = vrot.slane %v2274_v30, 2  ;;  %v2379_v36 = vrot.slane %v2353_v37, 3  ;;  %v2380_v58 = vrot.slane %v2357_v18, 3 }
 0x173   : > { %1327 = vrot.lane.b32.xlu0 %v9051_v47, %s8384_s25  ;;  %v2343_v35 = vrot.slane %v9072_v1, %v8828_v41  ;;  %v9115_v49 = vsel %vm1278_vm4, %v1289_v12, 0.0  ;;  %v2462_v45 = vrot.slane %v2436_v43, 4  ;;  %v9120_v52 = vsel %vm1278_vm4, %v1282_v22, %v1289_v12 }
 0x174   : > { %v883_v8 = vadd.f32 %v882_v61, %v881_v2  ;;  %v2426_v2 = vrot.slane %v9083_v7, %v8828_v41  ;;  %v889_v57 = vmul.f32 0.0625, %v878_v4  ;;  %v9125_v61 = vsel %vm1427_vm9, %v2213_v32, %v2214_v34 }
 0x175   : > { %1325 = vrot.lane.b32.xlu1 %v9054_v48, %s8384_s25  ;;  %15892 = vst [vmem:[#allocation30_spill] sm:$0xff] %v9125_v61  ;;  %v9128_v56 = vsel %vm1511_vm10, %v2296_v31, %v2297_v46  ;;  %v9133_v6 = vsel %vm1595_vm11, %v2379_v36, %v2380_v58  ;;  %v2224_v12 = vrot.slane %v2195_v23, 1  ;;  %v2278_v4 = vmul.f32 %v2256_v20, %v8988_v55 }
 0x176   : > { %v884_v27 = vrot.slane %v883_v8, 1  ;;  %15893 = vst [vmem:[#allocation31_spill] sm:$0xff] %v9128_v56  ;;  %15894 = vst [vmem:[#allocation32_spill] sm:$0xff] %v9133_v6  ;;  %v2444_v28 = vmul.f32 %v2422_v44, %v8988_v55  ;;  %v2275_v32 = vmul.f32 %v9092_v16, %v9054_v48  ;;  %v2279_v14 = vmul.f32 %v9092_v16, %v9051_v47 }
 0x177   : > { %1323 = vrot.lane.b32.xlu0 %v9075_v3, %s8384_s25  ;;  %v9143_v30 = vsel %vm1278_vm4, 0.0, %v1282_v22  ;;  %v9149_v23 = vsel %vm1427_vm9, %v2214_v34, %v2224_v12  ;;  %v2307_v20 = vrot.slane %v2278_v4, 2  ;;  %v2441_v31 = vmul.f32 %v2426_v2, %v9054_v48 }
 0x178   : > { %v885_v33 = vadd.f32 %v884_v27, %v883_v8  ;;  %v2463_v8 = vrot.slane %v2440_v13, 4  ;;  %v2361_v27 = vmul.f32 %v2339_v62, %v8988_v55  ;;  %15896 = vst [vmem:[#allocation34_spill] sm:$0xff] %v9149_v23  ;;  %v2473_v44 = vrot.slane %v2444_v28, 4 }
 0x179   : > { %1730 = vrot.lane.b32.xlu1 %v9054_v48, %s8385_s27  ;;  %v2300_v18 = vrot.slane %v2275_v32, 2  ;;  %v2309_v43 = vrot.slane %v2279_v14, 2  ;;  %v9156_v22 = vsel %vm1511_vm10, %v2297_v46, %v2307_v20  ;;  %v2354_v12 = vmul.f32 %v2343_v35, %v9075_v3 }
 0x17a   : > { %v890_v0 = vmul.f32 0.0625, %v885_v33  ;;  %v9146_v37 = vsel %vm1679_vm12, %v2462_v45, %v2463_v8  ;;  %v2390_v62 = vrot.slane %v2361_v27, 3  ;;  %15897 = vst [vmem:[#allocation35_spill] sm:$0xff] %v9156_v22  ;;  %v2358_v33 = vmul.f32 %v2343_v35, %v9054_v48 }
 0x17b   : > { %1728 = vrot.lane.b32.xlu0 %v9075_v3, %s8385_s27  ;;  %15895 = vst [vmem:[#allocation33_spill] sm:$0xff] %v9146_v37  ;;  %v9164_v13 = vsel %vm1679_vm12, %v2463_v8, %v2473_v44  ;;  %v9167_v36 = vsel %vm1511_vm10, %v2300_v18, %v2309_v43  ;;  %v2445_v45 = vmul.f32 %v2426_v2, %v9051_v47  ;;  %v2382_v20 = vrot.slane %v2354_v12, 3 }
 0x17c   : > { %1089 = vmatprep.mubr.f32.mxu0 %v890_v0  ;;  %v9161_v34 = vsel %vm1595_vm11, %v2380_v58, %v2390_v62  ;;  %15899 = vst [vmem:[#allocation37_spill] sm:$0xff] %v9164_v13  ;;  %15900 = vst [vmem:[#allocation38_spill] sm:$0xff] %v9167_v36  ;;  %v2362_v0 = vmul.f32 %v2343_v35, %v9051_v47  ;;  %v2383_v46 = vrot.slane %v2358_v33, 3  ;;  %v2466_v58 = vrot.slane %v2441_v31, 4 }
 0x17d   : > { %1333 = vrot.lane.b32.xlu1 %v9115_v49, %s8384_s25  ;;  %1090 = vmatmul.mubr.f32.vlgmr.msra.gmra.mxu0 %v889_v57  ;;  %15898 = vst [vmem:[#allocation36_spill] sm:$0xff] %v9161_v34  ;;  %v2188_v57 = vmul.f32 %v9048_v38, %v9075_v3  ;;  %v2271_v8 = vmul.f32 %v9092_v16, %v9075_v3  ;;  %v2475_v28 = vrot.slane %v2445_v45, 4 }
 0x17e   : > { %v2437_v4 = vmul.f32 %v2426_v2, %v9075_v3  ;;  %v2392_v27 = vrot.slane %v2362_v0, 3  ;;  %v2181_v2 = vrot.slane %v9038_v39, %v8836_v53  ;;  %v9204_v43 = vsel %vm1595_vm11, %v2382_v20, %v2383_v46 }
 0x17f   : > { %1331 = vrot.lane.b32.xlu0 %v9120_v52, %s8384_s25  ;;  %v9189_v38 = vsel %vm1679_vm12, %v2466_v58, %v2475_v28  ;;  %v2216_v14 = vrot.slane %v2188_v57, 1  ;;  %v2299_v16 = vrot.slane %v2271_v8, 2  ;;  %15905 = vst [vmem:[#allocation43_spill] sm:$0xff] %v9204_v43  ;;  %v2264_v31 = vrot.slane %v9068_v60, %v8836_v53 }
 0x180   : > { %v9186_v32 = vsel %vm1595_vm11, %v2383_v46, %v2392_v27  ;;  %15902 = vst [vmem:[#allocation40_spill] sm:$0xff] %v9189_v38  ;;  %v2465_v35 = vrot.slane %v2437_v4, 4  ;;  %v2189_v19 = vmul.f32 %v2181_v2, %v9143_v30  ;;  %v2430_v0 = vrot.slane %v9083_v7, %v8836_v53 }
 0x181   : > { %1329 = vrot.lane.b32.xlu1 %v9143_v30, %s8384_s25  ;;  %15901 = vst [vmem:[#allocation39_spill] sm:$0xff] %v9186_v32  ;;  %v9196_v62 = vsel %vm1427_vm9, %v2216_v14, %v2217_v63  ;;  %v9199_v44 = vsel %vm1511_vm10, %v2299_v16, %v2300_v18  ;;  %v2272_v63 = vmul.f32 %v2264_v31, %v9143_v30 }
 0x182   : > { %15903 = vst [vmem:[#allocation41_spill] sm:$0xff] %v9196_v62  ;;  %15904 = vst [vmem:[#allocation42_spill] sm:$0xff] %v9199_v44  ;;  %v9207_v33 = vsel %vm1679_vm12, %v2465_v35, %v2466_v58  ;;  %v2347_v18 = vrot.slane %v9072_v1, %v8836_v53  ;;  %v2219_v45 = vrot.slane %v2189_v19, 1  ;;  %v2438_v58 = vmul.f32 %v2430_v0, %v9143_v30 }
 0x183   : > { %1732 = vrot.lane.b32.xlu0 %v9051_v47, %s8385_s27  ;;  %15906 = vst [vmem:[#allocation44_spill] sm:$0xff] %v9207_v33  ;;  %v2193_v57 = vmul.f32 %v2181_v2, %v9120_v52  ;;  %v2302_v8 = vrot.slane %v2272_v63, 2  ;;  %v2276_v12 = vmul.f32 %v2264_v31, %v9120_v52  ;;  %v2442_v28 = vmul.f32 %v2430_v0, %v9120_v52 }
 0x184   : > { %v2355_v46 = vmul.f32 %v2347_v18, %v9143_v30  ;;  %v2359_v27 = vmul.f32 %v2347_v18, %v9120_v52  ;;  %v2468_v20 = vrot.slane %v2438_v58, 4  ;;  %v2363_v58 = vmul.f32 %v2347_v18, %v9115_v49  ;;  %v2125_v18 = vld [vmem:[#allocation2 + $0x2] ss:$8 sm:$0xf] }
 0x185   : > { %1738 = vrot.lane.b32.xlu1 %v9115_v49, %s8385_s27  ;;  %v2220_v4 = vrot.slane %v2193_v57, 1  ;;  %v2303_v14 = vrot.slane %v2276_v12, 2  ;;  %v2469_v57 = vrot.slane %v2442_v28, 4  ;;  %v2130_v9 = vrot.slane %v2125_v18, %v8819_v26 }
 0x186   : > { %v2385_v16 = vrot.slane %v2355_v46, 3  ;;  %v2386_v63 = vrot.slane %v2359_v27, 3  ;;  %v2394_v28 = vrot.slane %v2363_v58, 3  ;;  %v9287_v58 = vld [vmem:[#allocation2 + $0x60] ss:$8 sm:$0xf]  ;;  %v2142_v15 = vrot.slane %v2125_v18, %v8836_v53 }
 0x187   : > { %2501 = vrot.lane.b32.xlu0 %v9019_v17, %s8386_s14  ;;  %v9235_v35 = vsel %vm1427_vm9, %v2219_v45, %v2220_v4  ;;  %v9238_v19 = vsel %vm1511_vm10, %v2302_v8, %v2303_v14  ;;  %v2280_v45 = vmul.f32 %v2264_v31, %v9115_v49  ;;  %v2446_v8 = vmul.f32 %v2430_v0, %v9115_v49  ;;  %v9271_v0 = vld [vmem:[#allocation2 + $0x5] ss:$8 sm:$0xf] }
 0x188   : > { %15907 = vst [vmem:[#allocation45_spill] sm:$0xff] %v9235_v35  ;;  %15908 = vst [vmem:[#allocation46_spill] sm:$0xff] %v9238_v19  ;;  %v9264_v31 = vsel %vm1595_vm11, %v2386_v63, %v2394_v28  ;;  %v9294_v28 = vld [vmem:[#allocation2 + $0x23] ss:$8 sm:$0xf]  ;;  %v9306_v10 = vrot.slane %v9068_v60, %v8819_v26  ;;  %v9317_v54 = vrot.slane %v9271_v0, %v8825_v29 }
 0x189   : > { %1734 = vrot.lane.b32.xlu1 %v9143_v30, %s8385_s27  ;;  %v2311_v12 = vrot.slane %v2280_v45, 2  ;;  %15913 = vst [vmem:[#allocation51_spill] sm:$0xff] %v9264_v31  ;;  %v9283_v45 = vld [vmem:[#allocation2 + $0x26] ss:$8 sm:$0xf]  ;;  %v9329_v60 = vrot.slane %v9083_v7, %v8819_v26  ;;  %v9361_v19 = vrot.slane %v9294_v28, %v8825_v29  ;;  %v9365_v35 = vrot.slane %v9298_v50, %v8825_v29 }
 0x18a   : > { %v9369_v33 = vrot.slane %v9300_v5, %v8825_v29  ;;  %v9394_v34 = vmul.f32 %v2130_v9, %v8994_v51  ;;  %v9397_v22 = vmul.f32 %v2142_v15, %v9143_v30  ;;  %v9400_v37 = vmul.f32 %v2130_v9, %v8966_v21 }
 0x18b   : > { %1736 = vrot.lane.b32.xlu0 %v9120_v52, %s8385_s27  ;;  %v2269_v56 = vmul.f32 %v9306_v10, %v8994_v51  ;;  %v9461_v61 = vmul.f32 %v9306_v10, %v8966_v21 }
 0x18c   : > { %15922 = vst [vmem:[#allocation60_spill] sm:$0xff] %v9394_v34  ;;  %15923 = vst [vmem:[#allocation61_spill] sm:$0xff] %v9397_v22  ;;  %v9453_v34 = vrot.slane %v9294_v28, %v8828_v41 }
 0x18d   : > { %2503 = vrot.lane.b32.xlu1 %v9032_v40, %s8386_s14  ;;  %15924 = vst [vmem:[#allocation62_spill] sm:$0xff] %v9400_v37 }
 0x18e   : > { %15933 = vst [vmem:[#allocation71_spill] sm:$0xff] %v9453_v34  ;;  %v9484_v34 = vrot.slane %v9271_v0, %v8819_v26 }
 0x18f   : > { %2507 = vrot.lane.b32.xlu0 %v9075_v3, %s8386_s14 }
 0x190   : > { %15937 = vst [vmem:[#allocation75_spill] sm:$0xff] %v9484_v34 }
 0x191   : > { %2509 = vrot.lane.b32.xlu1 %v9054_v48, %s8386_s14 }
 0x193   : > { %2505 = vrot.lane.b32.xlu0 %v8988_v55, %s8386_s14  ;;  %v2197_v55 = vmul.f32 %v2181_v2, %v9115_v49  ;;  %v9248_v2 = vsel %vm1679_vm12, %v2468_v20, %v2469_v57  ;;  %v2169_v20 = vrot.slane %v9038_v39, %v8819_v26  ;;  %v2134_v39 = vrot.slane %v2125_v18, %v8825_v29 }
 0x194   : > { %15910 = vst [vmem:[#allocation48_spill] sm:$0xff] %v9248_v2  ;;  %v9353_v2 = vrot.slane %v9287_v58, %v8819_v26 }
 0x195   : > { %2511 = vrot.lane.b32.xlu1 %v9051_v47, %s8386_s14  ;;  %v9245_v47 = vsel %vm1595_vm11, %v2385_v16, %v2386_v63  ;;  %v2228_v46 = vrot.slane %v2197_v55, 1  ;;  %v2477_v16 = vrot.slane %v2446_v8, 4  ;;  %v9261_v55 = vsel %vm1511_vm10, %v2303_v14, %v2311_v12  ;;  %v9279_v14 = vld [vmem:[#allocation2 + $0x44] ss:$8 sm:$0xf] }
 0x196   : > { %15909 = vst [vmem:[#allocation47_spill] sm:$0xff] %v9245_v47  ;;  %15912 = vst [vmem:[#allocation50_spill] sm:$0xff] %v9261_v55  ;;  %v9281_v63 = vld [vmem:[#allocation2 + $0x21] ss:$8 sm:$0xf]  ;;  %v9292_v12 = vand.u32 127, %v614_v24  ;;  %v9310_v24 = vrot.slane %v9072_v1, %v8819_v26  ;;  %v9313_v42 = vmul.f32 %v2169_v20, %v8951_v59  ;;  %v9337_v31 = vrot.slane %v9279_v14, %v8825_v29 }
 0x197   : > { %2517 = vrot.lane.b32.xlu0 %v9115_v49, %s8386_s14  ;;  %v9254_v27 = vsel %vm1427_vm9, %v2220_v4, %v2228_v46  ;;  %v9267_v49 = vsel %vm1679_vm12, %v2469_v57, %v2477_v16  ;;  %v9273_v4 = vld [vmem:[#allocation2 + $0x22] ss:$8 sm:$0xf]  ;;  %v9277_v46 = vld [vmem:[#allocation2 + $0x27] ss:$8 sm:$0xf]  ;;  %v2138_v16 = vrot.slane %v2125_v18, %v8828_v41  ;;  %v9341_v55 = vrot.slane %v9281_v63, %v8819_v26 }
 0x198   : > { %15911 = vst [vmem:[#allocation49_spill] sm:$0xff] %v9254_v27  ;;  %15914 = vst [vmem:[#allocation52_spill] sm:$0xff] %v9267_v49  ;;  %v9285_v57 = vld [vmem:[#allocation2 + $0x43] ss:$8 sm:$0xf]  ;;  %v9321_v11 = vrot.slane %v9273_v4, %v8825_v29  ;;  %v9333_v1 = vrot.slane %v9277_v46, %v8825_v29  ;;  %v9345_v27 = vrot.slane %v9283_v45, %v8819_v26  ;;  %vm1337_vm13 = vcmp.lt.s32.totalorder %v9292_v12, 64 }
 0x199   : > { %2515 = vrot.lane.b32.xlu1 %v9120_v52, %s8386_s14  ;;  %v9289_v8 = vld [vmem:[#allocation2 + $0x6] ss:$8 sm:$0xf]  ;;  %v9323_v18 = vld [vmem:[#allocation2] ss:$8 sm:$0xf]  ;;  %v9349_v7 = vrot.slane %v9285_v57, %v8819_v26  ;;  %v9382_v38 = vmul.f32 %v2134_v39, %v9019_v17  ;;  %v9385_v32 = vmul.f32 %v2134_v39, %v9032_v40  ;;  %v9388_v36 = vmul.f32 %v2138_v16, %v9075_v3 }
 0x19a   : > { %v9325_v49 = vld [vmem:[#allocation2 + $0x1] ss:$8 sm:$0xf]  ;;  %15915 = vst [vmem:[#allocation53_spill] sm:$0xff] %v9341_v55  ;;  %15916 = vst [vmem:[#allocation54_spill] sm:$0xff] %v9345_v27  ;;  %v9357_v47 = vrot.slane %v9289_v8, %v8825_v29  ;;  %v9373_v43 = vrot.slane %v9323_v18, %v8825_v29  ;;  %v9391_v13 = vmul.f32 %v2138_v16, %v9054_v48  ;;  %vm1740_vm14 = vcmp.lt.s32.totalorder %v9292_v12, 32 }
 0x19b   : > { %2513 = vrot.lane.b32.xlu0 %v9143_v30, %s8386_s14  ;;  %15917 = vst [vmem:[#allocation55_spill] sm:$0xff] %v9353_v2  ;;  %v9377_v44 = vrot.slane %v9325_v49, %v8825_v29  ;;  %15918 = vst [vmem:[#allocation56_spill] sm:$0xff] %v9382_v38  ;;  %v9403_v17 = vmul.f32 %v2142_v15, %v9120_v52  ;;  %v9409_v3 = vrot.slane %v9271_v0, %v8828_v41 }
 0x19c   : > { %15919 = vst [vmem:[#allocation57_spill] sm:$0xff] %v9385_v32  ;;  %15920 = vst [vmem:[#allocation58_spill] sm:$0xff] %v9388_v36  ;;  %v9413_v48 = vrot.slane %v9273_v4, %v8828_v41  ;;  %v9417_v30 = vrot.slane %v9277_v46, %v8828_v41  ;;  %v9421_v9 = vrot.slane %v9279_v14, %v8828_v41  ;;  %vm2519_vm15 = vcmp.lt.s32.totalorder %v9292_v12, 96 }
 0x19d   : > { %2495 = vrot.lane.b32.xlu1 %v8994_v51, %s8386_s14  ;;  %15921 = vst [vmem:[#allocation59_spill] sm:$0xff] %v9391_v13  ;;  %15925 = vst [vmem:[#allocation63_spill] sm:$0xff] %v9403_v17  ;;  %v9425_v15 = vrot.slane %v9281_v63, %v8825_v29  ;;  %v9429_v52 = vrot.slane %v9283_v45, %v8825_v29  ;;  %v9433_v39 = vrot.slane %v9285_v57, %v8825_v29 }
 0x19e   : > { %v9437_v16 = vrot.slane %v9287_v58, %v8825_v29  ;;  %v9441_v17 = vrot.slane %v9323_v18, %v8828_v41  ;;  %v9445_v37 = vrot.slane %v9325_v49, %v8828_v41  ;;  %v9449_v22 = vrot.slane %v9289_v8, %v8828_v41 }
 0x19f   : > { %2497 = vrot.lane.b32.xlu0 %v8966_v21, %s8386_s14  ;;  %15927 = vst [vmem:[#allocation65_spill] sm:$0xff] %v9429_v52  ;;  %15928 = vst [vmem:[#allocation66_spill] sm:$0xff] %v9433_v39  ;;  %v2186_v6 = vmul.f32 %v2169_v20, %v8994_v51  ;;  %v2190_v23 = vmul.f32 %v2169_v20, %v8966_v21  ;;  %v9469_v13 = vrot.slane %v9298_v50, %v8828_v41 }
 0x1a0   : > { %15929 = vst [vmem:[#allocation67_spill] sm:$0xff] %v9437_v16  ;;  %15930 = vst [vmem:[#allocation68_spill] sm:$0xff] %v9441_v17  ;;  %v9473_v32 = vrot.slane %v9300_v5, %v8828_v41  ;;  %v2352_v20 = vmul.f32 %v9310_v24, %v8994_v51  ;;  %v9498_v38 = vrot.slane %v9273_v4, %v8819_v26  ;;  %v2294_v16 = vrot.slane %v9461_v61, 2 }
 0x1a1   : > { %2499 = vrot.lane.b32.xlu1 %v8951_v59, %s8386_s14  ;;  %15931 = vst [vmem:[#allocation69_spill] sm:$0xff] %v9445_v37  ;;  %15932 = vst [vmem:[#allocation70_spill] sm:$0xff] %v9449_v22  ;;  %v9479_v37 = vmul.f32 %v9310_v24, %v8966_v21  ;;  %v9494_v22 = vmul.f32 %v9329_v60, %v8966_v21  ;;  %v9502_v17 = vrot.slane %v9273_v4, %v8836_v53 }
 0x1a2   : > { %15935 = vst [vmem:[#allocation73_spill] sm:$0xff] %v9469_v13  ;;  %15936 = vst [vmem:[#allocation74_spill] sm:$0xff] %v9473_v32  ;;  %v9488_v13 = vrot.slane %v9271_v0, %v8836_v53  ;;  %v2435_v32 = vmul.f32 %v9329_v60, %v8994_v51  ;;  %v9506_v34 = vrot.slane %v9277_v46, %v8819_v26  ;;  %v2210_v51 = vrot.slane %v2186_v6, 1 }
 0x1a3   : > { %15939 = vst [vmem:[#allocation77_spill] sm:$0xff] %v9498_v38  ;;  %15940 = vst [vmem:[#allocation78_spill] sm:$0xff] %v9502_v17  ;;  %v9510_v0 = vrot.slane %v9277_v46, %v8836_v53  ;;  %v2293_v21 = vrot.slane %v2269_v56, 2  ;;  %v9517_v38 = vrot.slane %v9279_v14, %v8819_v26  ;;  %v9521_v4 = vrot.slane %v9279_v14, %v8836_v53 }
 0x1a4   : > { %15938 = vst [vmem:[#allocation76_spill] sm:$0xff] %v9488_v13  ;;  %15941 = vst [vmem:[#allocation79_spill] sm:$0xff] %v9506_v34  ;;  %v2211_v13 = vrot.slane %v2190_v23, 1  ;;  %v2376_v34 = vrot.slane %v2352_v20, 3  ;;  %v2377_v17 = vrot.slane %v9479_v37, 3  ;;  %v9526_v6 = vrot.slane %v9281_v63, %v8828_v41 }
 0x1a5   : > { %v9530_v61 = vrot.slane %v9281_v63, %v8836_v53  ;;  %v2459_v56 = vrot.slane %v2435_v32, 4  ;;  %v2460_v23 = vrot.slane %v9494_v22, 4  ;;  %v9537_v14 = vrot.slane %v9283_v45, %v8828_v41 }
 0x1a6   : > { %15942 = vst [vmem:[#allocation80_spill] sm:$0xff] %v9526_v6  ;;  %v9541_v37 = vrot.slane %v9283_v45, %v8836_v53  ;;  %v9545_v20 = vrot.slane %v9285_v57, %v8828_v41  ;;  %v9549_v63 = vrot.slane %v9285_v57, %v8836_v53  ;;  %v9553_v22 = vrot.slane %v9287_v58, %v8828_v41 }
 0x1a7   : > { %15943 = vst [vmem:[#allocation81_spill] sm:$0xff] %v9530_v61  ;;  %15944 = vst [vmem:[#allocation82_spill] sm:$0xff] %v9537_v14  ;;  %v9557_v32 = vrot.slane %v9287_v58, %v8836_v53  ;;  %v9560_v14 = vsel %vm1427_vm9, %v2210_v51, %v2211_v13  ;;  %v9563_v45 = vsel %vm1511_vm10, %v2293_v21, %v2294_v16 }
 0x1a8   : > { %15945 = vst [vmem:[#allocation83_spill] sm:$0xff] %v9541_v37  ;;  %15946 = vst [vmem:[#allocation84_spill] sm:$0xff] %v9549_v63  ;;  %v9569_v57 = vrot.slane %v9323_v18, %v8819_v26  ;;  %v9572_v63 = vsel %vm1595_vm11, %v2376_v34, %v2377_v17  ;;  %v2277_v58 = vmul.f32 %v9306_v10, %v8951_v59 }
 0x1a9   : > { %15947 = vst [vmem:[#allocation85_spill] sm:$0xff] %v9553_v22  ;;  %15948 = vst [vmem:[#allocation86_spill] sm:$0xff] %v9557_v32  ;;  %v2222_v22 = vrot.slane %v9313_v42, 1  ;;  %v9579_v51 = vrot.slane %v9323_v18, %v8836_v53  ;;  %v9582_v21 = vsel %vm1679_vm12, %v2459_v56, %v2460_v23  ;;  %v9596_v10 = vrot.slane %v9289_v8, %v8819_v26 }
 0x1aa   : > { %15949 = vst [vmem:[#allocation87_spill] sm:$0xff] %v9560_v14  ;;  %15950 = vst [vmem:[#allocation88_spill] sm:$0xff] %v9563_v45  ;;  %v2360_v45 = vmul.f32 %v9310_v24, %v8951_v59  ;;  %v2443_v14 = vmul.f32 %v9329_v60, %v8951_v59  ;;  %v9600_v34 = vrot.slane %v9289_v8, %v8836_v53 }
 0x1ab   : > { %15951 = vst [vmem:[#allocation89_spill] sm:$0xff] %v9569_v57  ;;  %15952 = vst [vmem:[#allocation90_spill] sm:$0xff] %v9572_v63  ;;  %v9603_v18 = vsel %vm1427_vm9, %v2211_v13, %v2222_v22  ;;  %v9607_v59 = vrot.slane %v9294_v28, %v8819_v26  ;;  %v9611_v24 = vrot.slane %v9294_v28, %v8836_v53 }
 0x1ac   : > { %15953 = vst [vmem:[#allocation91_spill] sm:$0xff] %v9579_v51  ;;  %15954 = vst [vmem:[#allocation92_spill] sm:$0xff] %v9582_v21  ;;  %v9615_v60 = vrot.slane %v9298_v50, %v8819_v26  ;;  %v9619_v56 = vrot.slane %v9298_v50, %v8836_v53  ;;  %v2305_v50 = vrot.slane %v2277_v58, 2  ;;  %v9646_v63 = vrot.slane %v9300_v5, %v8836_v53 }
 0x1ad   : > { %15956 = vst [vmem:[#allocation94_spill] sm:$0xff] %v9596_v10  ;;  %15957 = vst [vmem:[#allocation95_spill] sm:$0xff] %v9600_v34 }
 0x1ae   : > { %15958 = vst [vmem:[#allocation96_spill] sm:$0xff] %v9603_v18  ;;  %15959 = vst [vmem:[#allocation97_spill] sm:$0xff] %v9607_v59  ;;  %v9636_v18 = vrot.slane %v9300_v5, %v8819_v26 }
 0x1af   : > { %15960 = vst [vmem:[#allocation98_spill] sm:$0xff] %v9611_v24  ;;  %15961 = vst [vmem:[#allocation99_spill] sm:$0xff] %v9615_v60  ;;  %v2471_v60 = vrot.slane %v2443_v14, 4  ;;  %v9659_v24 = vsel %vm1511_vm10, %v2294_v16, %v2305_v50  ;;  %v9665_v14 = vrot.slane %v9325_v49, %v8819_v26 }
 0x1b0   : > { %15962 = vst [vmem:[#allocation100_spill] sm:$0xff] %v9619_v56  ;;  %15963 = vst [vmem:[#allocation101_spill] sm:$0xff] %v9636_v18  ;;  %v2388_v56 = vrot.slane %v2360_v45, 3  ;;  %v9656_v18 = vld [vmem:[#allocation2 + $0x3] ss:$8 sm:$0xf] }
 0x1b1   : > { %15965 = vst [vmem:[#allocation103_spill] sm:$0xff] %v9646_v63  ;;  %15966 = vst [vmem:[#allocation104_spill] sm:$0xff] %v9656_v18  ;;  %v9667_v45 = vld [vmem:[#allocation2 + $0x20] ss:$8 sm:$0xf]  ;;  %v9675_v57 = vsel %vm1679_vm12, %v2460_v23, %v2471_v60  ;;  %v9692_v23 = vrot.slane %v9656_v18, %v8825_v29 }
 0x1b2   : > { %15967 = vst [vmem:[#allocation105_spill] sm:$0xff] %v9659_v24  ;;  %15968 = vst [vmem:[#allocation106_spill] sm:$0xff] %v9665_v14  ;;  %v9669_v63 = vld [vmem:[#allocation2 + $0x4] ss:$8 sm:$0xf]  ;;  %v9672_v10 = vsel %vm1595_vm11, %v2377_v17, %v2388_v56  ;;  %v9688_v17 = vrot.slane %v9325_v49, %v8836_v53  ;;  %v9707_v49 = vrot.slane %v9667_v45, %v8825_v29 }
 0x1b3   : > { %15969 = vst [vmem:[#allocation107_spill] sm:$0xff] %v9667_v45  ;;  %15970 = vst [vmem:[#allocation108_spill] sm:$0xff] %v9672_v10  ;;  %v9682_v24 = vld [vmem:[#allocation2 + $0x25] ss:$8 sm:$0xf]  ;;  %v9698_v60 = vrot.slane %v9669_v63, %v8825_v29 }
 0x1b4   : > { %15971 = vst [vmem:[#allocation109_spill] sm:$0xff] %v9675_v57  ;;  %15972 = vst [vmem:[#allocation110_spill] sm:$0xff] %v9682_v24  ;;  %v9711_v18 = vrot.slane %v9682_v24, %v8825_v29 }
 0x1b5   : > { %15973 = vst [vmem:[#allocation111_spill] sm:$0xff] %v9688_v17  ;;  %15974 = vst [vmem:[#allocation112_spill] sm:$0xff] %v9692_v23 }
 0x1b6   : > { %15976 = vst [vmem:[#allocation114_spill] sm:$0xff] %v9698_v60  ;;  %15978 = vst [vmem:[#allocation116_spill] sm:$0xff] %v9707_v49  ;;  %v9715_v60 = vrot.slane %v9669_v63, %v8819_v26 }
 0x1b7   : > { %15979 = vst [vmem:[#allocation117_spill] sm:$0xff] %v9711_v18 }
 0x1b8   : > { %15980 = vst [vmem:[#allocation118_spill] sm:$0xff] %v9715_v60 }
 0x1cd   : > { %v9379_v62 = vpop.permute.xlu0 %1315 }
 0x1cf   : > { %v9405_v40 = vpop.permute.xlu1 %1718 }
 0x1d0   : > { %15926 = vst [vmem:[#allocation64_spill] sm:$0xff] %v9405_v40 }
 0x1d1   : > { %v9463_v36 = vpop.permute.xlu0 %1720 }
 0x1d2   : > { %15934 = vst [vmem:[#allocation72_spill] sm:$0xff] %v9463_v36 }
 0x1d3   : > { %v9465_v25 = vpop.permute.xlu1 %1321 }
 0x1d4   : > { %v9625_v13 = vsel %vm1337_vm13, %v9379_v62, %v9465_v25 }
 0x1d5   : > { %v9533_v46 = vpop.permute.xlu0 %1311  ;;  %v1412_v5 = vmul.f32 %v9317_v54, %v9625_v13  ;;  %v1580_v60 = vmul.f32 %v9333_v1, %v9625_v13 }
 0x1d7   : > { %v9513_v39 = vpop.permute.xlu1 %1726  ;;  %v1442_v10 = vrot.slane %v1412_v5, 1 }
 0x1d9   : > { %v9628_v8 = vpop.permute.xlu0 %1313 }
 0x1db   : > { %v9565_v37 = vpop.permute.xlu1 %1317 }
 0x1dc   : > { %v9592_v42 = vsel %vm1337_vm13, %v9533_v46, %v9565_v37 }
 0x1dd   : > { %15955 = vst [vmem:[#allocation93_spill] sm:$0xff] %v9592_v42  ;;  %v1404_v22 = vmul.f32 %v9317_v54, %v9592_v42  ;;  %v1488_v51 = vmul.f32 %v9321_v11, %v9592_v42  ;;  %v1373_v14 = vmul.f32 %v9373_v43, %v9592_v42  ;;  %v9700_v56 = vpop.permute.xlu0 %1716  ;;  %v1572_v57 = vmul.f32 %v9333_v1, %v9592_v42 }
 0x1de   : > { %15977 = vst [vmem:[#allocation115_spill] sm:$0xff] %v9700_v56  ;;  %v1656_v45 = vmul.f32 %v9337_v31, %v9592_v42 }
 0x1df   : > { %v9630_v28 = vpop.permute.xlu1 %1319  ;;  %v1431_v34 = vrot.slane %v1404_v22, 1  ;;  %v1599_v24 = vrot.slane %v1572_v57, 3 }
 0x1e0   : > { %v9642_v21 = vsel %vm1337_vm13, %v9628_v8, %v9630_v28  ;;  %v1683_v49 = vrot.slane %v1656_v45, 4 }
 0x1e1   : > { %15964 = vst [vmem:[#allocation102_spill] sm:$0xff] %v9642_v21  ;;  %v1408_v59 = vmul.f32 %v9317_v54, %v9642_v21  ;;  %v9654_v58 = vmul.f32 %v9321_v11, %v9642_v21  ;;  %v9680_v54 = vmul.f32 %v9333_v1, %v9642_v21  ;;  %v9721_v23 = vmul.f32 %v9337_v31, %v9642_v21  ;;  %v9762_v57 = vpop.permute.xlu0 %1722 }
 0x1e2   : > { %v1749_v1 = vsel %vm1740_vm14, %v9463_v36, %v9513_v39  ;;  %v9809_v36 = vmul.f32 %v9349_v7, %v9642_v21 }
 0x1e3   : > { %v1432_v16 = vrot.slane %v1408_v59, 1  ;;  %v1516_v50 = vrot.slane %v9654_v58, 2  ;;  %v9694_v59 = vld [vmem:[#allocation2 + $0x42] ss:$8 sm:$0xf]  ;;  %v1515_v58 = vrot.slane %v1488_v51, 2 }
 0x1e4   : > { %15975 = vst [vmem:[#allocation113_spill] sm:$0xff] %v9694_v59  ;;  %v1600_v51 = vrot.slane %v9680_v54, 3  ;;  %v9725_v5 = vrot.slane %v9694_v59, %v8825_v29  ;;  %v1664_v54 = vmul.f32 %v9337_v31, %v9625_v13  ;;  %v1377_v59 = vmul.f32 %v9373_v43, %v9642_v21  ;;  %15989 = vst [vmem:[#allocation127_spill] sm:$0xff] %v9809_v36 }
 0x1e5   : > { %v1433_v22 = vsel %vm1427_vm9, %v1431_v34, %v1432_v16  ;;  %v1517_v34 = vsel %vm1511_vm10, %v1515_v58, %v1516_v50  ;;  %v1443_v58 = vsel %vm1427_vm9, %v1432_v16, %v1442_v10  ;;  %v9760_v43 = vmul.f32 %v9349_v7, %v9625_v13 }
 0x1e6   : > { %v1457_v53 = vadd.f32 %v1433_v22, %v1373_v14  ;;  %15981 = vst [vmem:[#allocation119_spill] sm:$0xff] %v9725_v5  ;;  %v9727_v14 = vld [vmem:[#allocation2 + $0x47] ss:$8 sm:$0xf]  ;;  %v1496_v22 = vmul.f32 %v9321_v11, %v9625_v13  ;;  %v9740_v5 = vpop.permute.xlu1 %1724  ;;  %v9744_v11 = vmul.f32 %v9341_v55, %v9625_v13  ;;  %v1601_v10 = vsel %vm1595_vm11, %v1599_v24, %v1600_v51 }
 0x1e7   : > { %15982 = vst [vmem:[#allocation120_spill] sm:$0xff] %v9727_v14  ;;  %v9756_v31 = vrot.slane %v9727_v14, %v8825_v29  ;;  %15986 = vst [vmem:[#allocation124_spill] sm:$0xff] %v9760_v43  ;;  %v1684_v16 = vrot.slane %v9721_v23, 4  ;;  %v9768_v55 = vmul.f32 %v9353_v2, %v9625_v13  ;;  %v1748_v29 = vsel %vm1740_vm14, %v9405_v40, %v9740_v5 }
 0x1e8   : > { %v1541_v26 = vadd.f32 %v1517_v34, %v1457_v53  ;;  %15983 = vst [vmem:[#allocation121_spill] sm:$0xff] %v9744_v11  ;;  %v9748_v53 = vmul.f32 %v9345_v27, %v9625_v13  ;;  %v1461_v34 = vadd.f32 %v1443_v58, %v1377_v59  ;;  %v1526_v27 = vrot.slane %v1496_v22, 2 }
 0x1e9   : > { %15985 = vst [vmem:[#allocation123_spill] sm:$0xff] %v9756_v31  ;;  %15987 = vst [vmem:[#allocation125_spill] sm:$0xff] %v9768_v55  ;;  %v1610_v14 = vrot.slane %v1580_v60, 3  ;;  %v1824_v31 = vmul.f32 %v9357_v47, %v1749_v1  ;;  %v1694_v17 = vrot.slane %v1664_v54, 4  ;;  %v1907_v24 = vmul.f32 %v9361_v19, %v1749_v1 }
 0x1ea   : > { %15984 = vst [vmem:[#allocation122_spill] sm:$0xff] %v9748_v53  ;;  %v1625_v18 = vadd.f32 %v1601_v10, %v1541_v26  ;;  %v9777_v23 = vmul.f32 %v9365_v35, %v1749_v1  ;;  %v1747_v26 = vsel %vm1740_vm14, %v9700_v56, %v9762_v57  ;;  %v1527_v13 = vsel %vm1511_vm10, %v1516_v50, %v1526_v27  ;;  %v9794_v50 = vpop.permute.xlu0 %1327  ;;  %v9803_v10 = vpop.permute.xlu1 %1325 }
 0x1eb   : > { %v9785_v59 = vmul.f32 %v9369_v33, %v1749_v1  ;;  %v1685_v60 = vsel %vm1679_vm12, %v1683_v49, %v1684_v16  ;;  %v1545_v22 = vadd.f32 %v1527_v13, %v1461_v34  ;;  %v1820_v45 = vmul.f32 %v9357_v47, %v1748_v29 }
 0x1ec   : > { %v1709_v40 = vadd.f32 %v1685_v60, %v1625_v18  ;;  %v1853_v56 = vrot.slane %v1824_v31, 1  ;;  %v1816_v27 = vmul.f32 %v9357_v47, %v1747_v26  ;;  %v9798_v49 = vrot.slane %v9669_v63, %v8828_v41 }
 0x1ed   : > { %v1936_v1 = vrot.slane %v1907_v24, 2  ;;  %v2019_v34 = vrot.slane %v9777_v23, 3  ;;  %v1777_v13 = vmul.f32 %v9377_v44, %v1747_v26  ;;  %v1611_v54 = vsel %vm1595_vm11, %v1600_v51, %v1610_v14 }
 0x1ee   : > { %15988 = vst [vmem:[#allocation126_spill] sm:$0xff] %v9798_v49  ;;  %v2102_v18 = vrot.slane %v9785_v59, 4  ;;  %v1629_v31 = vadd.f32 %v1611_v54, %v1545_v22  ;;  %v1843_v60 = vrot.slane %v1820_v45, 1  ;;  %v1903_v47 = vmul.f32 %v9361_v19, %v1748_v29 }
 0x1ef   : > { %v1785_v63 = vadd.f32 %v1777_v13, %v1709_v40  ;;  %v1899_v24 = vmul.f32 %v9361_v19, %v1747_v26  ;;  %v1343_v51 = vsel %vm1337_vm13, %v9465_v25, %v9794_v50  ;;  %v1842_v14 = vrot.slane %v1816_v27, 1 }
 0x1f0   : > { %v1986_v23 = vmul.f32 %v9365_v35, %v1748_v29  ;;  %v2069_v59 = vmul.f32 %v9369_v33, %v1748_v29  ;;  %v9822_v22 = vsel %vm1337_vm13, %v9630_v28, %v9803_v10  ;;  %v9826_v40 = vmul.f32 %v9353_v2, %v9642_v21  ;;  %v16015_v21 = vld [vmem:[#allocation79_spill] sm:$0xff] }
 0x1f1   : > { %v1982_v19 = vmul.f32 %v9365_v35, %v1747_v26  ;;  %v2065_v45 = vmul.f32 %v9369_v33, %v1747_v26  ;;  %v1695_v25 = vsel %vm1679_vm12, %v1684_v16, %v1694_v17  ;;  %v1844_v27 = vsel %vm1427_vm9, %v1842_v14, %v1843_v60  ;;  %v9841_v26 = vpop.permute.xlu0 %1323 }
 0x1f2   : > { %15990 = vst [vmem:[#allocation128_spill] sm:$0xff] %v9826_v40  ;;  %v1713_v54 = vadd.f32 %v1695_v25, %v1629_v31  ;;  %v1926_v13 = vrot.slane %v1903_v47, 2  ;;  %v1413_v58 = vmul.f32 %v9409_v3, %v1343_v51  ;;  %v9835_v28 = vmul.f32 %v9349_v7, %v9592_v42  ;;  %v16008_v40 = vld [vmem:[#allocation69_spill] sm:$0xff] }
 0x1f3   : > { %v1868_v2 = vadd.f32 %v1844_v27, %v1785_v63  ;;  %v1409_v35 = vmul.f32 %v9409_v3, %v9822_v22  ;;  %v1925_v43 = vrot.slane %v1899_v24, 2  ;;  %v1781_v33 = vmul.f32 %v9377_v44, %v1748_v29 }
 0x1f4   : > { %15991 = vst [vmem:[#allocation129_spill] sm:$0xff] %v9835_v28  ;;  %v2009_v17 = vrot.slane %v1986_v23, 3  ;;  %v2092_v16 = vrot.slane %v2069_v59, 4  ;;  %v2008_v47 = vrot.slane %v1982_v19, 3  ;;  %v2091_v14 = vrot.slane %v2065_v45, 4 }
 0x1f5   : > { %v1497_v7 = vmul.f32 %v9413_v48, %v1343_v51  ;;  %v1789_v25 = vadd.f32 %v1781_v33, %v1713_v54  ;;  %v1854_v55 = vsel %vm1427_vm9, %v1843_v60, %v1853_v56  ;;  %v1927_v63 = vsel %vm1511_vm10, %v1925_v43, %v1926_v13  ;;  %v15994_v54 = vld [vmem:[#allocation66_spill] sm:$0xff] }
 0x1f6   : > { %v1444_v27 = vrot.slane %v1413_v58, 1  ;;  %v1937_v24 = vsel %vm1511_vm10, %v1926_v13, %v1936_v1  ;;  %v1951_v28 = vadd.f32 %v1927_v63, %v1868_v2  ;;  %v9852_v29 = vsel %vm1337_vm13, %v9565_v37, %v9841_v26 }
 0x1f7   : > { %v1435_v44 = vrot.slane %v1409_v35, 1  ;;  %v2010_v23 = vsel %vm1595_vm11, %v2008_v47, %v2009_v17  ;;  %v2020_v59 = vsel %vm1595_vm11, %v2009_v17, %v2019_v34  ;;  %v2093_v19 = vsel %vm1679_vm12, %v2091_v14, %v2092_v16  ;;  %v15996_v17 = vld [vmem:[#allocation67_spill] sm:$0xff] }
 0x1f8   : > { %v2103_v56 = vsel %vm1679_vm12, %v2092_v16, %v2102_v18  ;;  %v1528_v43 = vrot.slane %v1497_v7, 2  ;;  %v1581_v58 = vmul.f32 %v9417_v30, %v1343_v51  ;;  %v9860_v2 = vmul.f32 %v9421_v9, %v1343_v51  ;;  %v15998_v16 = vld [vmem:[#allocation68_spill] sm:$0xff] }
 0x1f9   : > { %v1493_v1 = vmul.f32 %v9413_v48, %v9822_v22  ;;  %v1872_v37 = vadd.f32 %v1854_v55, %v1789_v25  ;;  %v9865_v60 = vmul.f32 %v9425_v15, %v1343_v51  ;;  %v9868_v45 = vmul.f32 %v9429_v52, %v1343_v51 }
 0x1fa   : > { %v1405_v34 = vmul.f32 %v9409_v3, %v9852_v29  ;;  %v2034_v18 = vadd.f32 %v2010_v23, %v1951_v28  ;;  %v9873_v13 = vmul.f32 %v15994_v54, %v1343_v51  ;;  %v1445_v35 = vsel %vm1427_vm9, %v1435_v44, %v1444_v27 }
 0x1fb   : > { %15992 = vst [vmem:[#allocation130_spill] sm:$0xff] %v9865_v60  ;;  %15993 = vst [vmem:[#allocation131_spill] sm:$0xff] %v9868_v45  ;;  %v1489_v33 = vmul.f32 %v9413_v48, %v9852_v29  ;;  %v9879_v55 = vmul.f32 %v15996_v17, %v1343_v51  ;;  %v1378_v47 = vmul.f32 %v15998_v16, %v9822_v22  ;;  %v1519_v3 = vrot.slane %v1493_v1, 2 }
 0x1fc   : > { %15995 = vst [vmem:[#allocation66_spill] sm:$0xff] %v9873_v13  ;;  %v1434_v14 = vrot.slane %v1405_v34, 1  ;;  %v1573_v7 = vmul.f32 %v9417_v30, %v9852_v29  ;;  %v1577_v28 = vmul.f32 %v9417_v30, %v9822_v22  ;;  %v1374_v25 = vmul.f32 %v15998_v16, %v9852_v29  ;;  %v9896_v30 = vpop.permute.xlu1 %1730 }
 0x1fd   : > { %15997 = vst [vmem:[#allocation67_spill] sm:$0xff] %v9879_v55  ;;  %v1518_v63 = vrot.slane %v1489_v33, 2  ;;  %v1955_v27 = vadd.f32 %v1937_v24, %v1872_v37  ;;  %v1612_v48 = vrot.slane %v1581_v58, 3  ;;  %v1462_v23 = vadd.f32 %v1445_v35, %v1378_v47 }
 0x1fe   : > { %v1436_v51 = vsel %vm1427_vm9, %v1434_v14, %v1435_v44  ;;  %v2117_v31 = vadd.f32 %v2093_v19, %v2034_v18  ;;  %v9894_v1 = vmul.f32 %v15994_v54, %v9822_v22  ;;  %v1602_v53 = vrot.slane %v1573_v7, 3  ;;  %v9904_v18 = vpop.permute.xlu0 %1728  ;;  %v16002_v7 = vld [vmem:[#allocation56_spill] sm:$0xff] }
 0x1ff   : > { %v1458_v36 = vadd.f32 %v1436_v51, %v1374_v25  ;;  %v1657_v24 = vmul.f32 %v9421_v9, %v9852_v29  ;;  %v1520_v58 = vsel %vm1511_vm10, %v1518_v63, %v1519_v3  ;;  %v1529_v44 = vsel %vm1511_vm10, %v1519_v3, %v1528_v43 }
 0x200   : > { %15999 = vst [vmem:[#allocation68_spill] sm:$0xff] %v9894_v1  ;;  %v1603_v19 = vrot.slane %v1577_v28, 3  ;;  %v1661_v37 = vmul.f32 %v9421_v9, %v9822_v22  ;;  %v2038_v33 = vadd.f32 %v2020_v59, %v1955_v27  ;;  %v9908_v16 = vmul.f32 %v15996_v17, %v9822_v22  ;;  %v16005_v9 = vld [vmem:[#allocation71_spill] sm:$0xff] }
 0x201   : > { %v1542_v35 = vadd.f32 %v1520_v58, %v1458_v36  ;;  %v9912_v47 = vmul.f32 %v15994_v54, %v9852_v29  ;;  %v1546_v14 = vadd.f32 %v1529_v44, %v1462_v23  ;;  %v9915_v25 = vadd.f32 %v16002_v7, %v2117_v31  ;;  %v1334_v58 = vpop.permute.xlu1 %1333  ;;  %v16004_v7 = vld [vmem:[#allocation70_spill] sm:$0xff] }
 0x202   : > { %16000 = vst [vmem:[#allocation132_spill] sm:$0xff] %v9908_v16  ;;  %v9921_v36 = vmul.f32 %v15996_v17, %v9852_v29  ;;  %v1686_v3 = vrot.slane %v1657_v24, 4  ;;  %v1604_v28 = vsel %vm1595_vm11, %v1602_v53, %v1603_v19  ;;  %v1744_v54 = vsel %vm1740_vm14, %v9762_v57, %v9904_v18  ;;  %v9940_v43 = vpop.permute.xlu0 %1331 }
 0x203   : > { %16001 = vst [vmem:[#allocation133_spill] sm:$0xff] %v9912_v47  ;;  %v1613_v31 = vsel %vm1595_vm11, %v1603_v19, %v1612_v48  ;;  %v1687_v63 = vrot.slane %v1661_v37, 4  ;;  %v1745_v27 = vsel %vm1740_vm14, %v9740_v5, %v9896_v30  ;;  %v1626_v17 = vadd.f32 %v1604_v28, %v1542_v35  ;;  %v16006_v19 = vld [vmem:[#allocation73_spill] sm:$0xff] }
 0x204   : > { %16003 = vst [vmem:[#allocation56_spill] sm:$0xff] %v9921_v36  ;;  %v2121_v23 = vadd.f32 %v2103_v56, %v2038_v33  ;;  %v1630_v53 = vadd.f32 %v1613_v31, %v1546_v14  ;;  %v1696_v44 = vrot.slane %v9860_v2, 4  ;;  %v1817_v57 = vmul.f32 %v16004_v7, %v1744_v54  ;;  %v16007_v33 = vld [vmem:[#allocation74_spill] sm:$0xff] }
 0x205   : > { %v1900_v48 = vmul.f32 %v16005_v9, %v1744_v54  ;;  %v1983_v37 = vmul.f32 %v16006_v19, %v1744_v54  ;;  %v1821_v5 = vmul.f32 %v16004_v7, %v1745_v27  ;;  %v9944_v56 = vmul.f32 %v16005_v9, %v1745_v27 }
 0x206   : > { %v1688_v35 = vsel %vm1679_vm12, %v1686_v3, %v1687_v63  ;;  %v2066_v14 = vmul.f32 %v16007_v33, %v1744_v54  ;;  %v1697_v28 = vsel %vm1679_vm12, %v1687_v63, %v1696_v44  ;;  %v9950_v2 = vmul.f32 %v16006_v19, %v1745_v27 }
 0x207   : > { %v1710_v31 = vadd.f32 %v1688_v35, %v1626_v17  ;;  %v1340_v51 = vsel %vm1337_vm13, %v9794_v50, %v1334_v58  ;;  %v1714_v24 = vadd.f32 %v1697_v28, %v1630_v53  ;;  %v9957_v59 = vmul.f32 %v16007_v33, %v1745_v27  ;;  %v16010_v17 = vld [vmem:[#allocation57_spill] sm:$0xff]  ;;  %v16011_v53 = vld [vmem:[#allocation76_spill] sm:$0xff] }
 0x208   : > { %v1778_v3 = vmul.f32 %v16008_v40, %v1744_v54  ;;  %v1845_v55 = vrot.slane %v1817_v57, 1  ;;  %v1928_v13 = vrot.slane %v1900_v48, 2  ;;  %v2011_v11 = vrot.slane %v1983_v37, 3  ;;  %v9974_v37 = vpop.permute.xlu0 %1732 }
 0x209   : > { %v9963_v63 = vsel %vm1337_vm13, %v1334_v58, %v9379_v62  ;;  %v9966_v44 = vadd.f32 %v16010_v17, %v2121_v23  ;;  %v1782_v50 = vmul.f32 %v16008_v40, %v1745_v27  ;;  %v2094_v35 = vrot.slane %v2066_v14, 4  ;;  %v16012_v58 = vld [vmem:[#allocation75_spill] sm:$0xff]  ;;  %v16013_v40 = vld [vmem:[#allocation77_spill] sm:$0xff]  ;;  %v16014_v14 = vld [vmem:[#allocation78_spill] sm:$0xff] }
 0x20a   : > { %16009 = vst [vmem:[#allocation70_spill] sm:$0xff] %v9963_v63  ;;  %v9970_v28 = vmul.f32 %v16011_v53, %v1340_v51  ;;  %v1846_v34 = vrot.slane %v1821_v5, 1  ;;  %v1929_v54 = vrot.slane %v9944_v56, 2  ;;  %v2012_v57 = vrot.slane %v9950_v2, 3 }
 0x20b   : > { %v1786_v48 = vadd.f32 %v1778_v3, %v1710_v31  ;;  %v2095_v62 = vrot.slane %v9957_v59, 4  ;;  %v9979_v23 = vmul.f32 %v16012_v58, %v9963_v63  ;;  %v9983_v27 = vmul.f32 %v16013_v40, %v9963_v63 }
 0x20c   : > { %v9986_v17 = vmul.f32 %v16014_v14, %v1340_v51  ;;  %v1790_v5 = vadd.f32 %v1782_v50, %v1714_v24  ;;  %v1847_v56 = vsel %vm1427_vm9, %v1845_v55, %v1846_v34  ;;  %v1930_v2 = vsel %vm1511_vm10, %v1928_v13, %v1929_v54  ;;  %v16020_v50 = vld [vmem:[#allocation83_spill] sm:$0xff] }
 0x20d   : > { %v2013_v31 = vsel %vm1595_vm11, %v2011_v11, %v2012_v57  ;;  %v2096_v59 = vsel %vm1679_vm12, %v2094_v35, %v2095_v62  ;;  %v9995_v42 = vmul.f32 %v16015_v21, %v9963_v63  ;;  %v1746_v36 = vsel %vm1740_vm14, %v9513_v39, %v9974_v37 }
 0x20e   : > { %v1869_v24 = vadd.f32 %v1847_v56, %v1786_v48  ;;  %v10002_v55 = vmul.f32 %v9510_v0, %v1340_v51  ;;  %v1825_v13 = vmul.f32 %v16004_v7, %v1746_v36  ;;  %v1908_v11 = vmul.f32 %v16005_v9, %v1746_v36 }
 0x20f   : > { %v1991_v16 = vmul.f32 %v16006_v19, %v1746_v36  ;;  %v10011_v45 = vmul.f32 %v9526_v6, %v1340_v51  ;;  %v2074_v56 = vmul.f32 %v16007_v33, %v1746_v36  ;;  %v10017_v9 = vmul.f32 %v9517_v38, %v9963_v63  ;;  %v16018_v33 = vld [vmem:[#allocation82_spill] sm:$0xff] }
 0x210   : > { %v1855_v39 = vrot.slane %v1825_v13, 1  ;;  %v1938_v48 = vrot.slane %v1908_v11, 2  ;;  %v10020_v7 = vmul.f32 %v9521_v4, %v1340_v51  ;;  %v10024_v3 = vmul.f32 %v9530_v61, %v9963_v63  ;;  %v1330_v13 = vpop.permute.xlu1 %1329 }
 0x211   : > { %16016 = vst [vmem:[#allocation71_spill] sm:$0xff] %v10011_v45  ;;  %v1952_v19 = vadd.f32 %v1930_v2, %v1869_v24  ;;  %v2021_v36 = vrot.slane %v1991_v16, 3  ;;  %v10029_v47 = vmul.f32 %v16018_v33, %v1340_v51  ;;  %v10033_v1 = vmul.f32 %v16020_v50, %v9963_v63 }
 0x212   : > { %16017 = vst [vmem:[#allocation73_spill] sm:$0xff] %v10024_v3  ;;  %v1856_v11 = vsel %vm1427_vm9, %v1846_v34, %v1855_v39  ;;  %v10039_v61 = vsel %vm1337_vm13, %v9803_v10, %v9940_v43  ;;  %v10043_v35 = vmul.f32 %v9545_v20, %v1340_v51  ;;  %v1939_v34 = vsel %vm1511_vm10, %v1929_v54, %v1938_v48  ;;  %v16023_v39 = vld [vmem:[#allocation85_spill] sm:$0xff] }
 0x213   : > { %16019 = vst [vmem:[#allocation74_spill] sm:$0xff] %v10029_v47  ;;  %16021 = vst [vmem:[#allocation69_spill] sm:$0xff] %v10033_v1  ;;  %v1873_v2 = vadd.f32 %v1856_v11, %v1790_v5  ;;  %v2104_v16 = vrot.slane %v2074_v56, 4  ;;  %v10047_v60 = vmul.f32 %v16023_v39, %v1340_v51  ;;  %v10053_v50 = vsel %vm1337_vm13, %v9940_v43, %v9628_v8  ;;  %v16028_v56 = vld [vmem:[#allocation84_spill] sm:$0xff] }
 0x214   : > { %16022 = vst [vmem:[#allocation57_spill] sm:$0xff] %v10043_v35  ;;  %v10058_v10 = vsel %vm1337_vm13, %v1330_v13, %v9533_v46  ;;  %v2035_v11 = vadd.f32 %v2013_v31, %v1952_v19  ;;  %v10062_v54 = vmul.f32 %v9545_v20, %v10039_v61  ;;  %v10066_v51 = vmul.f32 %v16023_v39, %v10039_v61 }
 0x215   : > { %16024 = vst [vmem:[#allocation76_spill] sm:$0xff] %v10047_v60  ;;  %16025 = vst [vmem:[#allocation75_spill] sm:$0xff] %v10058_v10  ;;  %v1956_v5 = vadd.f32 %v1939_v34, %v1873_v2  ;;  %v2022_v48 = vsel %vm1595_vm11, %v2012_v57, %v2021_v36  ;;  %v10073_v46 = vmul.f32 %v16028_v56, %v9963_v63  ;;  %v1739_v36 = vpop.permute.xlu1 %1738  ;;  %v16049_v35 = vrot.slane %v9979_v23, 1 }
 0x216   : > { %16026 = vst [vmem:[#allocation77_spill] sm:$0xff] %v10062_v54  ;;  %16027 = vst [vmem:[#allocation78_spill] sm:$0xff] %v10066_v51  ;;  %v10077_v31 = vmul.f32 %v16028_v56, %v10053_v50  ;;  %v10082_v19 = vsel %vm1337_vm13, %v9841_v26, %v1330_v13  ;;  %v2105_v57 = vsel %vm1679_vm12, %v2095_v62, %v2104_v16  ;;  %v16033_v13 = vld [vmem:[#allocation59_spill] sm:$0xff] }
 0x217   : > { %16029 = vst [vmem:[#allocation79_spill] sm:$0xff] %v10073_v46  ;;  %v2039_v2 = vadd.f32 %v2022_v48, %v1956_v5  ;;  %16031 = vst [vmem:[#allocation84_spill] sm:$0xff] %v10082_v19  ;;  %v1403_v34 = vmul.f32 %v16012_v58, %v10058_v10  ;;  %v2118_v24 = vadd.f32 %v2096_v59, %v2035_v11 }
 0x218   : > { %16030 = vst [vmem:[#allocation85_spill] sm:$0xff] %v10077_v31  ;;  %v10093_v26 = vmul.f32 %v9557_v32, %v10053_v50  ;;  %v10100_v8 = vsel %vm1740_vm14, %v9974_v37, %v1739_v36  ;;  %v1406_v5 = vmul.f32 %v16011_v53, %v10082_v19  ;;  %v1487_v59 = vmul.f32 %v16013_v40, %v10058_v10 }
 0x219   : > { %v2122_v48 = vadd.f32 %v2105_v57, %v2039_v2  ;;  %v10109_v2 = vmul.f32 %v9545_v20, %v10082_v19  ;;  %v1428_v57 = vrot.slane %v1403_v34, 1  ;;  %v10115_v37 = vmul.f32 %v16028_v56, %v10058_v10  ;;  %v16038_v34 = vld [vmem:[#allocation72_spill] sm:$0xff]  ;;  %v16039_v56 = vld [vmem:[#allocation95_spill] sm:$0xff]  ;;  %v1735_v33 = vpop.permute.xlu1 %1734 }
 0x21a   : > { %16032 = vst [vmem:[#allocation134_spill] sm:$0xff] %v10093_v26  ;;  %v1410_v63 = vmul.f32 %v16011_v53, %v10039_v61  ;;  %v10124_v11 = vmul.f32 %v16013_v40, %v10053_v50  ;;  %v10128_v20 = vmul.f32 %v16023_v39, %v10082_v19  ;;  %v16040_v53 = vld [vmem:[#allocation89_spill] sm:$0xff]  ;;  %v1437_v31 = vrot.slane %v1406_v5, 1  ;;  %v16041_v39 = vld [vmem:[#allocation58_spill] sm:$0xff] }
 0x21b   : > { %v2161_v16 = vadd.f32 %v16033_v13, %v2122_v48  ;;  %16034 = vst [vmem:[#allocation59_spill] sm:$0xff] %v10109_v2  ;;  %v1407_v48 = vmul.f32 %v16012_v58, %v10053_v50  ;;  %16035 = vst [vmem:[#allocation135_spill] sm:$0xff] %v10115_v37  ;;  %v16036_v13 = vld [vmem:[#allocation29_spill] sm:$0xff]  ;;  %v10133_v58 = vsel %vm1740_vm14, %v1739_v36, %v16038_v34  ;;  %v1512_v40 = vrot.slane %v1487_v59, 2  ;;  %v16043_v59 = vld [vmem:[#allocation94_spill] sm:$0xff] }
 0x21c   : > { %16037 = vst [vmem:[#allocation29_spill] sm:$0xff] %v10128_v20  ;;  %v1372_v43 = vmul.f32 %v16040_v53, %v10058_v10  ;;  %v1571_v37 = vmul.f32 %v16015_v21, %v10058_v10  ;;  %v10144_v26 = vadd.f32 %v16041_v39, %v2118_v24  ;;  %v1490_v36 = vmul.f32 %v16014_v14, %v10082_v19  ;;  %v16044_v39 = vld [vmem:[#allocation98_spill] sm:$0xff]  ;;  %v16045_v2 = vld [vmem:[#allocation91_spill] sm:$0xff] }
 0x21d   : > { %v10118_v62 = vadd.f32 %v16036_v13, %v2161_v16  ;;  %v10137_v16 = vmul.f32 %v16039_v56, %v10100_v8  ;;  %v1429_v13 = vrot.slane %v1407_v48, 1  ;;  %v1438_v46 = vrot.slane %v1410_v63, 1 }
 0x21e   : > { %16042 = vst [vmem:[#allocation72_spill] sm:$0xff] %v10144_v26  ;;  %v1513_v1 = vrot.slane %v10124_v11, 2  ;;  %v10153_v5 = vmul.f32 %v16015_v21, %v10053_v50  ;;  %v10157_v3 = vmul.f32 %v16043_v59, %v10133_v58  ;;  %v10162_v32 = vmul.f32 %v16044_v39, %v10100_v8 }
 0x21f   : > { %v1430_v34 = vsel %vm1427_vm9, %v1428_v57, %v1429_v13  ;;  %v1655_v63 = vmul.f32 %v9517_v38, %v10058_v10  ;;  %v1439_v11 = vsel %vm1427_vm9, %v1437_v31, %v1438_v46  ;;  %v1494_v21 = vmul.f32 %v16014_v14, %v10039_v61 }
 0x220   : > { %v1456_v48 = vadd.f32 %v1430_v34, %v1372_v43  ;;  %v1596_v43 = vrot.slane %v1571_v37, 3  ;;  %v1514_v57 = vsel %vm1511_vm10, %v1512_v40, %v1513_v1  ;;  %v10170_v34 = vpop.permute.xlu0 %2501  ;;  %v1375_v24 = vmul.f32 %v16045_v2, %v10082_v19  ;;  %v16046_v37 = vld [vmem:[#allocation97_spill] sm:$0xff] }
 0x221   : > { %v1574_v51 = vmul.f32 %v9510_v0, %v10082_v19  ;;  %v1658_v60 = vmul.f32 %v9521_v4, %v10082_v19  ;;  %v10180_v31 = vmul.f32 %v16046_v37, %v10133_v58  ;;  %v1521_v47 = vrot.slane %v1490_v36, 2 }
 0x222   : > { %v1540_v10 = vadd.f32 %v1514_v57, %v1456_v48  ;;  %v1597_v14 = vrot.slane %v10153_v5, 3  ;;  %v10185_v40 = vmul.f32 %v9517_v38, %v10053_v50  ;;  %v1680_v45 = vrot.slane %v1655_v63, 4  ;;  %v16047_v5 = vld [vmem:[#allocation99_spill] sm:$0xff] }
 0x223   : > { %v1459_v20 = vadd.f32 %v1439_v11, %v1375_v24  ;;  %v1522_v19 = vrot.slane %v1494_v21, 2  ;;  %v1578_v48 = vmul.f32 %v9510_v0, %v10039_v61  ;;  %v1662_v36 = vmul.f32 %v9521_v4, %v10039_v61  ;;  %v16048_v11 = vld [vmem:[#allocation115_spill] sm:$0xff] }
 0x224   : > { %v1598_v57 = vsel %vm1595_vm11, %v1596_v43, %v1597_v14  ;;  %v10196_v38 = vmul.f32 %v16047_v5, %v10133_v58  ;;  %v1605_v49 = vrot.slane %v1574_v51, 3  ;;  %v1689_v54 = vrot.slane %v1658_v60, 4  ;;  %v1737_v51 = vpop.permute.xlu0 %1736 }
 0x225   : > { %v1624_v6 = vadd.f32 %v1598_v57, %v1540_v10  ;;  %v1523_v63 = vsel %vm1511_vm10, %v1521_v47, %v1522_v19  ;;  %v1681_v24 = vrot.slane %v10185_v40, 4  ;;  %v1750_v0 = vsel %vm1740_vm14, %v1735_v33, %v16048_v11 }
 0x226   : > { %v1376_v43 = vmul.f32 %v16040_v53, %v10053_v50  ;;  %v1543_v21 = vadd.f32 %v1523_v63, %v1459_v20  ;;  %v1379_v4 = vmul.f32 %v16045_v2, %v10039_v61  ;;  %v1441_v60 = vsel %vm1427_vm9, %v1429_v13, %v16049_v35 }
 0x227   : > { %v16050_v10 = vrot.slane %v9970_v28, 1  ;;  %v1606_v40 = vrot.slane %v1578_v48, 3  ;;  %v1682_v57 = vsel %vm1679_vm12, %v1680_v45, %v1681_v24  ;;  %v1690_v11 = vrot.slane %v1662_v36, 4  ;;  %v16052_v45 = vld [vmem:[#allocation64_spill] sm:$0xff]  ;;  %v16053_v48 = vld [vmem:[#allocation106_spill] sm:$0xff] }
 0x228   : > { %v1460_v26 = vadd.f32 %v1441_v60, %v1376_v43  ;;  %v1708_v52 = vadd.f32 %v1682_v57, %v1624_v6  ;;  %v10217_v20 = vsel %vm1740_vm14, %v9904_v18, %v1735_v33  ;;  %v1815_v23 = vmul.f32 %v16043_v59, %v1750_v0 }
 0x229   : > { %v1447_v47 = vsel %vm1427_vm9, %v1438_v46, %v16050_v10  ;;  %v1607_v35 = vsel %vm1595_vm11, %v1605_v49, %v1606_v40  ;;  %v1691_v28 = vsel %vm1679_vm12, %v1689_v54, %v1690_v11  ;;  %v16051_v46 = vrot.slane %v9983_v27, 2 }
 0x22a   : > { %v1463_v2 = vadd.f32 %v1447_v47, %v1379_v4  ;;  %v1751_v6 = vsel %vm1740_vm14, %v1737_v51, %v16052_v45  ;;  %v1627_v53 = vadd.f32 %v1607_v35, %v1543_v21  ;;  %v1776_v36 = vmul.f32 %v16053_v48, %v1750_v0 }
 0x22b   : > { %v1525_v13 = vsel %vm1511_vm10, %v1513_v1, %v16051_v46  ;;  %v16054_v18 = vrot.slane %v9986_v17, 2  ;;  %v1818_v49 = vmul.f32 %v16039_v56, %v10217_v20  ;;  %v1898_v54 = vmul.f32 %v16046_v37, %v1750_v0  ;;  %v16057_v46 = vld [vmem:[#allocation101_spill] sm:$0xff] }
 0x22c   : > { %v1544_v63 = vadd.f32 %v1525_v13, %v1460_v26  ;;  %v1819_v1 = vmul.f32 %v16043_v59, %v1751_v6  ;;  %v1784_v43 = vadd.f32 %v1776_v36, %v1708_v52  ;;  %v1839_v4 = vrot.slane %v1815_v23, 1 }
 0x22d   : > { %v1531_v33 = vsel %vm1511_vm10, %v1522_v19, %v16054_v18  ;;  %v10237_v60 = vmul.f32 %v16046_v37, %v1751_v6  ;;  %v10240_v21 = vmul.f32 %v16047_v5, %v1751_v6  ;;  %v1981_v17 = vmul.f32 %v16047_v5, %v1750_v0  ;;  %v16058_v18 = vld [vmem:[#allocation111_spill] sm:$0xff] }
 0x22e   : > { %v1547_v27 = vadd.f32 %v1531_v33, %v1463_v2  ;;  %v16055_v19 = vrot.slane %v9995_v42, 3  ;;  %v10249_v10 = vsel %vm1740_vm14, %v9896_v30, %v1737_v51  ;;  %v1840_v59 = vrot.slane %v1819_v1, 1 }
 0x22f   : > { %v1711_v52 = vadd.f32 %v1691_v28, %v1627_v53  ;;  %v16056_v47 = vrot.slane %v10002_v55, 3  ;;  %v1923_v23 = vrot.slane %v10237_v60, 2  ;;  %v1922_v2 = vrot.slane %v1898_v54, 2 }
 0x230   : > { %v1609_v26 = vsel %vm1595_vm11, %v1597_v14, %v16055_v19  ;;  %v1692_v42 = vrot.slane %v10017_v9, 4  ;;  %v1841_v14 = vsel %vm1427_vm9, %v1839_v4, %v1840_v59  ;;  %v1698_v35 = vrot.slane %v10020_v7, 4  ;;  %v10290_v19 = vpop.permute.xlu1 %2503 }
 0x231   : > { %v1615_v37 = vsel %vm1595_vm11, %v1606_v40, %v16056_v47  ;;  %v1628_v57 = vadd.f32 %v1609_v26, %v1544_v63  ;;  %v1822_v30 = vmul.f32 %v16039_v56, %v10249_v10  ;;  %v1867_v51 = vadd.f32 %v1841_v14, %v1784_v43  ;;  %v1097_v56 = vld [vmem:[%s15398_s10 + $0x8] sm:$0xff]  ;;  %v16059_v63 = vld [vmem:[#allocation100_spill] sm:$0xff] }
 0x232   : > { %v1631_v5 = vadd.f32 %v1615_v37, %v1547_v27  ;;  %v2006_v28 = vrot.slane %v10240_v21, 3  ;;  %v2005_v55 = vrot.slane %v1981_v17, 3  ;;  %v2064_v40 = vmul.f32 %v16057_v46, %v1750_v0  ;;  %1134 = vmatprep.subr.mxu1 %v1097_v56  ;;  %v16060_v26 = vld [vmem:[#allocation30_spill] sm:$0xff] }
 0x233   : > { %v1693_v13 = vsel %vm1679_vm12, %v1681_v24, %v1692_v42  ;;  %v1924_v45 = vsel %vm1511_vm10, %v1922_v2, %v1923_v23  ;;  %v1699_v9 = vsel %vm1679_vm12, %v1690_v11, %v1698_v35  ;;  %v1780_v7 = vmul.f32 %v16053_v48, %v1751_v6  ;;  %v1096_v24 = vld [vmem:[%s15398_s10] sm:$0xff]  ;;  %v16063_v35 = vld [vmem:[#allocation34_spill] sm:$0xff] }
 0x234   : > { %v1712_v53 = vadd.f32 %v1693_v13, %v1628_v57  ;;  %v1950_v36 = vadd.f32 %v1924_v45, %v1867_v51  ;;  %v1934_v0 = vrot.slane %v10180_v31, 2  ;;  %v1779_v33 = vmul.f32 %v16058_v18, %v10217_v20  ;;  %1135 = vmatpush1.msra.mxu1 %v1096_v24  ;;  %v16065_v45 = vld [vmem:[#allocation103_spill] sm:$0xff]  ;;  %v10323_v24 = vpop.permute.xlu0 %2507 }
 0x235   : > { %v1715_v11 = vadd.f32 %v1699_v9, %v1631_v5  ;;  %v1783_v48 = vmul.f32 %v16058_v18, %v10249_v10  ;;  %v10282_v54 = vmul.f32 %v16059_v63, %v10100_v8  ;;  %v1849_v27 = vrot.slane %v1822_v30, 1 }
 0x236   : > { %v2007_v1 = vsel %vm1595_vm11, %v2005_v55, %v2006_v28  ;;  %v10288_v43 = vmul.f32 %v16057_v46, %v1751_v6  ;;  %v1787_v31 = vadd.f32 %v1779_v33, %v1711_v52  ;;  %v1848_v4 = vrot.slane %v1818_v49, 1  ;;  %v16062_v52 = vld [vmem:[#allocation31_spill] sm:$0xff] }
 0x237   : > { %v2033_v17 = vadd.f32 %v2007_v1, %v1950_v36  ;;  %v2239_v47 = vadd.f32 %v16060_v26, %v9915_v25  ;;  %v2088_v37 = vrot.slane %v2064_v40, 4  ;;  %v1788_v57 = vadd.f32 %v1780_v7, %v1712_v53  ;;  %v1099_v25 = vld [vmem:[%s15398_s10 + $0x18] sm:$0xff]  ;;  %v16068_v1 = vld [vmem:[#allocation33_spill] sm:$0xff]  ;;  %v16069_v26 = vld [vmem:[#allocation35_spill] sm:$0xff] }
 0x238   : > { %v1905_v2 = vmul.f32 %v16044_v39, %v10249_v10  ;;  %v2089_v5 = vrot.slane %v10288_v43, 4  ;;  %v1791_v42 = vadd.f32 %v1783_v48, %v1715_v11  ;;  %v16061_v6 = vrot.slane %v10157_v3, 1  ;;  %1205 = vmatprep.subr.mxu1 %v1099_v25  ;;  %v16066_v36 = vld [vmem:[#allocation32_spill] sm:$0xff] }
 0x239   : > { %v2322_v49 = vadd.f32 %v16062_v52, %v2239_v47  ;;  %v2243_v30 = vadd.f32 %v16063_v35, %v9966_v44  ;;  %v1901_v51 = vmul.f32 %v16044_v39, %v10217_v20  ;;  %v1850_v55 = vsel %vm1427_vm9, %v1848_v4, %v1849_v27  ;;  %v16067_v11 = vld [vmem:[#allocation60_spill] sm:$0xff] }
 0x23a   : > { %v1852_v14 = vsel %vm1427_vm9, %v1840_v59, %v16061_v6  ;;  %v16064_v40 = vrot.slane %v10137_v16, 1  ;;  %v2090_v59 = vsel %vm1679_vm12, %v2088_v37, %v2089_v5  ;;  %v2017_v44 = vrot.slane %v10196_v38, 3 }
 0x23b   : > { %v2072_v13 = vmul.f32 %v16057_v46, %v10133_v58  ;;  %v2075_v9 = vmul.f32 %v16065_v45, %v10100_v8  ;;  %v2116_v39 = vadd.f32 %v2090_v59, %v2033_v17  ;;  %v1871_v53 = vadd.f32 %v1852_v14, %v1788_v57  ;;  %v10329_v58 = vpop.permute.xlu1 %2509 }
 0x23c   : > { %v1858_v3 = vsel %vm1427_vm9, %v1849_v27, %v16064_v40  ;;  %v1932_v7 = vrot.slane %v1905_v2, 2  ;;  %v1988_v16 = vmul.f32 %v16059_v63, %v10249_v10  ;;  %v2405_v56 = vadd.f32 %v16066_v36, %v2322_v49  ;;  %v16072_v49 = vld [vmem:[#allocation116_spill] sm:$0xff] }
 0x23d   : > { %v2023_v18 = vrot.slane %v10282_v54, 3  ;;  %v1870_v33 = vadd.f32 %v1850_v55, %v1787_v31  ;;  %v1874_v38 = vadd.f32 %v1858_v3, %v1791_v42  ;;  %v10327_v48 = vadd.f32 %v16067_v11, %v2116_v39  ;;  %v16071_v42 = vld [vmem:[#allocation36_spill] sm:$0xff] }
 0x23e   : > { %v1931_v8 = vrot.slane %v1901_v51, 2  ;;  %v1984_v46 = vmul.f32 %v16059_v63, %v10217_v20  ;;  %v2067_v27 = vmul.f32 %v16065_v45, %v10217_v20  ;;  %v2488_v4 = vadd.f32 %v16068_v1, %v2405_v56  ;;  %v16076_v56 = vld [vmem:[#allocation117_spill] sm:$0xff] }
 0x23f   : > { %v1935_v54 = vsel %vm1511_vm10, %v1923_v23, %v1934_v0  ;;  %v2071_v31 = vmul.f32 %v16065_v45, %v10249_v10  ;;  %v2523_v17 = vsel %vm2519_vm15, %v10170_v34, %v10323_v24  ;;  %v2326_v47 = vadd.f32 %v16069_v26, %v2243_v30  ;;  %v2512_v40 = vpop.permute.xlu1 %2511 }
 0x240   : > { %v1933_v63 = vsel %vm1511_vm10, %v1931_v8, %v1932_v7  ;;  %v16070_v20 = vrot.slane %v10162_v32, 2  ;;  %v1954_v57 = vadd.f32 %v1935_v54, %v1871_v53  ;;  %v2015_v60 = vrot.slane %v1988_v16, 3  ;;  %v16073_v32 = vld [vmem:[#allocation37_spill] sm:$0xff]  ;;  %v16075_v53 = vld [vmem:[#allocation114_spill] sm:$0xff]  ;;  %v16077_v8 = vld [vmem:[#allocation119_spill] sm:$0xff] }
 0x241   : > { %v2100_v2 = vrot.slane %v2072_v13, 4  ;;  %v1953_v23 = vadd.f32 %v1933_v63, %v1870_v33  ;;  %v2409_v10 = vadd.f32 %v16071_v42, %v2326_v47  ;;  %v2106_v6 = vrot.slane %v2075_v9, 4  ;;  %v10363_v9 = vpop.permute.xlu0 %2505 }
 0x242   : > { %v1941_v37 = vsel %vm1511_vm10, %v1932_v7, %v16070_v20  ;;  %v2014_v14 = vrot.slane %v1984_v46, 3  ;;  %v2097_v52 = vrot.slane %v2067_v27, 4  ;;  %v2595_v35 = vmul.f32 %v16072_v49, %v2523_v17 }
 0x243   : > { %v1957_v0 = vadd.f32 %v1941_v37, %v1874_v38  ;;  %v2018_v30 = vsel %vm1595_vm11, %v2006_v28, %v2017_v44  ;;  %v2098_v25 = vrot.slane %v2071_v31, 4  ;;  %v2492_v51 = vadd.f32 %v16073_v32, %v2409_v10  ;;  %v16074_v44 = vld [vmem:[#allocation112_spill] sm:$0xff] }
 0x244   : > { %v2524_v55 = vsel %vm2519_vm15, %v10290_v19, %v10329_v58  ;;  %v2016_v3 = vsel %vm1595_vm11, %v2014_v14, %v2015_v60  ;;  %v2024_v59 = vsel %vm1595_vm11, %v2015_v60, %v2023_v18  ;;  %v2037_v13 = vadd.f32 %v2018_v30, %v1954_v57  ;;  %v16078_v60 = vld [vmem:[#allocation123_spill] sm:$0xff] }
 0x245   : > { %v2599_v45 = vmul.f32 %v16072_v49, %v2524_v55  ;;  %v2036_v21 = vadd.f32 %v2016_v3, %v1953_v23  ;;  %v10365_v28 = vadd.f32 %v2024_v59, %v1957_v0  ;;  %v2556_v39 = vmul.f32 %v16074_v44, %v2523_v17 }
 0x246   : > { %v10370_v7 = vmul.f32 %v16075_v53, %v9852_v29  ;;  %v2621_v16 = vrot.slane %v2595_v35, 1  ;;  %v2682_v33 = vmul.f32 %v16076_v56, %v2524_v55  ;;  %v2525_v18 = vsel %vm2519_vm15, %v10363_v9, %v2512_v40 }
 0x247   : > { %v2622_v36 = vrot.slane %v2599_v45, 1  ;;  %v2099_v38 = vsel %vm1679_vm12, %v2097_v52, %v2098_v25  ;;  %v2678_v11 = vmul.f32 %v16076_v56, %v2523_v17  ;;  %v2761_v46 = vmul.f32 %v16077_v8, %v2523_v17  ;;  %v16081_v45 = vld [vmem:[#allocation110_spill] sm:$0xff] }
 0x248   : > { %v2603_v27 = vmul.f32 %v16072_v49, %v2525_v18  ;;  %v2101_v1 = vsel %vm1679_vm12, %v2089_v5, %v2100_v2  ;;  %v2560_v54 = vmul.f32 %v16074_v44, %v2524_v55  ;;  %v2765_v26 = vmul.f32 %v16077_v8, %v2524_v55  ;;  %v10396_v2 = vpop.permute.xlu0 %2517  ;;  %v16079_v49 = vld [vmem:[#allocation107_spill] sm:$0xff] }
 0x249   : > { %v2623_v31 = vsel %vm1427_vm9, %v2621_v16, %v2622_v36  ;;  %v10387_v47 = vsel %vm1679_vm12, %v2098_v25, %v2106_v6  ;;  %v2564_v63 = vadd.f32 %v2556_v39, %v2488_v4  ;;  %v2686_v37 = vmul.f32 %v16076_v56, %v2525_v18  ;;  %v16082_v16 = vld [vmem:[#allocation38_spill] sm:$0xff] }
 0x24a   : > { %v2632_v20 = vrot.slane %v2603_v27, 1  ;;  %v10390_v57 = vadd.f32 %v2099_v38, %v2036_v21  ;;  %v2844_v23 = vmul.f32 %v16078_v60, %v2523_v17  ;;  %v2705_v43 = vrot.slane %v2682_v33, 2  ;;  %v10405_v17 = vpop.permute.xlu1 %2515  ;;  %v16083_v38 = vld [vmem:[#allocation113_spill] sm:$0xff] }
 0x24b   : > { %v10394_v5 = vmul.f32 %v16078_v60, %v2524_v55  ;;  %v10398_v0 = vadd.f32 %v2101_v1, %v2037_v13  ;;  %v2704_v42 = vrot.slane %v2678_v11, 2  ;;  %v2787_v10 = vrot.slane %v2761_v46, 3  ;;  %v16080_v55 = vld [vmem:[#allocation104_spill] sm:$0xff]  ;;  %v16084_v1 = vld [vmem:[#allocation39_spill] sm:$0xff] }
 0x24c   : > { %v2647_v6 = vadd.f32 %v2623_v31, %v2564_v63  ;;  %v2568_v14 = vadd.f32 %v2560_v54, %v2492_v51  ;;  %v2788_v4 = vrot.slane %v2765_v26, 3  ;;  %v2633_v52 = vsel %vm1427_vm9, %v2622_v36, %v2632_v20 }
 0x24d   : > { %v10403_v35 = vrot.slane %v16079_v49, %v8828_v41  ;;  %v2715_v30 = vrot.slane %v2686_v37, 2  ;;  %v2769_v25 = vmul.f32 %v16077_v8, %v2525_v18  ;;  %v2522_v32 = vsel %vm2519_vm15, %v2512_v40, %v10396_v2  ;;  %v16085_v37 = vld [vmem:[#allocation120_spill] sm:$0xff] }
 0x24e   : > { %v10413_v3 = vrot.slane %v16080_v55, %v8828_v41  ;;  %v2870_v51 = vrot.slane %v2844_v23, 4  ;;  %v2706_v59 = vsel %vm1511_vm10, %v2704_v42, %v2705_v43  ;;  %v2871_v13 = vrot.slane %v10394_v5, 4  ;;  %v16086_v23 = vld [vmem:[#allocation40_spill] sm:$0xff] }
 0x24f   : > { %v10419_v21 = vrot.slane %v16081_v45, %v8828_v41  ;;  %v2730_v44 = vadd.f32 %v2706_v59, %v2647_v6  ;;  %v2651_v39 = vadd.f32 %v2633_v52, %v2568_v14  ;;  %v2327_v36 = vadd.f32 %v16082_v16, %v10118_v62 }
 0x250   : > { %v2521_v40 = vsel %vm2519_vm15, %v10329_v58, %v10405_v17  ;;  %v2789_v56 = vsel %vm1595_vm11, %v2787_v10, %v2788_v4  ;;  %v2852_v33 = vmul.f32 %v16078_v60, %v2525_v18  ;;  %v10431_v11 = vrot.slane %v16083_v38, %v8828_v41 }
 0x251   : > { %v2604_v8 = vmul.f32 %v10403_v35, %v2522_v32  ;;  %v2716_v46 = vsel %vm1511_vm10, %v2705_v43, %v2715_v30  ;;  %v2798_v27 = vrot.slane %v2769_v25, 3  ;;  %v2410_v62 = vadd.f32 %v16084_v1, %v2327_v36 }
 0x252   : > { %v2561_v54 = vmul.f32 %v10413_v3, %v2521_v40  ;;  %v2687_v31 = vmul.f32 %v10419_v21, %v2522_v32  ;;  %v10439_v58 = vmul.f32 %v10403_v35, %v2521_v40  ;;  %v10442_v18 = vmul.f32 %v10419_v21, %v2521_v40 }
 0x253   : > { %v10445_v26 = vmul.f32 %v10431_v11, %v2521_v40  ;;  %v2813_v63 = vadd.f32 %v2789_v56, %v2730_v44  ;;  %v2734_v20 = vadd.f32 %v2716_v46, %v2651_v39  ;;  %v10449_v60 = vrot.slane %v16085_v37, %v8828_v41  ;;  %v16087_v46 = vld [vmem:[#allocation65_spill] sm:$0xff] }
 0x254   : > { %v2493_v43 = vadd.f32 %v16086_v23, %v2410_v62  ;;  %v2634_v5 = vrot.slane %v2604_v8, 1  ;;  %v2770_v42 = vmul.f32 %v10431_v11, %v2522_v32  ;;  %v2625_v10 = vrot.slane %v10439_v58, 1  ;;  %v16088_v62 = vld [vmem:[#allocation72_spill] sm:$0xff] }
 0x255   : > { %v2708_v6 = vrot.slane %v10442_v18, 2  ;;  %v2966_v14 = vmul.f32 %v9425_v15, %v9852_v29  ;;  %v2970_v52 = vmul.f32 %v9425_v15, %v9822_v22  ;;  %v2872_v49 = vsel %vm1679_vm12, %v2870_v51, %v2871_v13  ;;  %v16106_v18 = vld [vmem:[#allocation68_spill] sm:$0xff] }
 0x256   : > { %v2569_v30 = vadd.f32 %v2561_v54, %v2493_v43  ;;  %v2717_v25 = vrot.slane %v2687_v31, 2  ;;  %v2635_v55 = vsel %vm1427_vm9, %v2625_v10, %v2634_v5  ;;  %v2791_v59 = vrot.slane %v10445_v26, 3  ;;  %v16089_v54 = vld [vmem:[#allocation41_spill] sm:$0xff]  ;;  %v16129_v26 = vld [vmem:[#allocation78_spill] sm:$0xff] }
 0x257   : > { %v10463_v45 = vmul.f32 %v10449_v60, %v2521_v40  ;;  %v2896_v44 = vadd.f32 %v2872_v49, %v2813_v63  ;;  %v2799_v39 = vsel %vm1595_vm11, %v2788_v4, %v2798_v27  ;;  %v2881_v16 = vrot.slane %v2852_v33, 4  ;;  %v10476_v33 = vpop.permute.xlu0 %2513  ;;  %v16090_v63 = vld [vmem:[#allocation42_spill] sm:$0xff] }
 0x258   : > { %v2652_v36 = vadd.f32 %v2635_v55, %v2569_v30  ;;  %v2817_v56 = vadd.f32 %v2799_v39, %v2734_v20  ;;  %v2800_v38 = vrot.slane %v2770_v42, 3  ;;  %v2853_v15 = vmul.f32 %v10449_v60, %v2522_v32 }
 0x259   : > { %v2718_v51 = vsel %vm1511_vm10, %v2708_v6, %v2717_v25  ;;  %v2123_v8 = vadd.f32 %v10387_v47, %v10365_v28  ;;  %v3049_v40 = vmul.f32 %v16087_v46, %v9852_v29  ;;  %v2240_v4 = vadd.f32 %v16089_v54, %v16088_v62  ;;  %v16092_v25 = vld [vmem:[#allocation80_spill] sm:$0xff]  ;;  %v16096_v62 = vld [vmem:[#allocation61_spill] sm:$0xff] }
 0x25a   : > { %v2735_v1 = vadd.f32 %v2718_v51, %v2652_v36  ;;  %v2992_v27 = vrot.slane %v2966_v14, 1  ;;  %v3053_v32 = vmul.f32 %v16087_v46, %v9822_v22  ;;  %v2801_v31 = vsel %vm1595_vm11, %v2791_v59, %v2800_v38  ;;  %v16091_v14 = vld [vmem:[#allocation43_spill] sm:$0xff] }
 0x25b   : > { %v2874_v58 = vrot.slane %v10463_v45, 4  ;;  %v2993_v28 = vrot.slane %v2970_v52, 1  ;;  %v2882_v47 = vsel %vm1679_vm12, %v2871_v13, %v2881_v16  ;;  %v2323_v20 = vadd.f32 %v16090_v63, %v2240_v4  ;;  %v16093_v16 = vld [vmem:[#allocation44_spill] sm:$0xff] }
 0x25c   : > { %v2818_v29 = vadd.f32 %v2801_v31, %v2735_v1  ;;  %v2935_v37 = vadd.f32 %v10370_v7, %v2896_v44  ;;  %v2900_v23 = vadd.f32 %v2882_v47, %v2817_v56  ;;  %v2883_v43 = vrot.slane %v2853_v15, 4  ;;  %v16095_v1 = vld [vmem:[#allocation29_spill] sm:$0xff]  ;;  %v16098_v47 = vld [vmem:[#allocation130_spill] sm:$0xff] }
 0x25d   : > { %v2520_v5 = vsel %vm2519_vm15, %v10323_v24, %v10476_v33  ;;  %v3075_v42 = vrot.slane %v3049_v40, 2  ;;  %v2406_v49 = vadd.f32 %v16091_v14, %v2323_v20  ;;  %v2931_v13 = vmul.f32 %v16075_v53, %v9822_v22  ;;  %v16094_v22 = vld [vmem:[#allocation126_spill] sm:$0xff] }
 0x25e   : > { %v2557_v30 = vmul.f32 %v10413_v3, %v2520_v5  ;;  %v2596_v52 = vmul.f32 %v10403_v35, %v2520_v5  ;;  %v2884_v7 = vsel %vm1679_vm12, %v2874_v58, %v2883_v43  ;;  %v10501_v55 = vmul.f32 %v16092_v25, %v10039_v61 }
 0x25f   : > { %v2679_v24 = vmul.f32 %v10419_v21, %v2520_v5  ;;  %v2994_v44 = vsel %vm1427_vm9, %v2992_v27, %v2993_v28  ;;  %v2901_v39 = vadd.f32 %v2884_v7, %v2818_v29  ;;  %v2489_v3 = vadd.f32 %v16093_v16, %v2406_v49  ;;  %v16097_v27 = vld [vmem:[#allocation82_spill] sm:$0xff] }
 0x260   : > { %v2624_v36 = vrot.slane %v2596_v52, 1  ;;  %v3076_v35 = vrot.slane %v3053_v32, 2  ;;  %v3018_v56 = vadd.f32 %v2994_v44, %v2935_v37  ;;  %v2939_v38 = vadd.f32 %v2931_v13, %v2900_v23  ;;  %v16101_v23 = vld [vmem:[#allocation63_spill] sm:$0xff] }
 0x261   : > { %v2932_v53 = vmul.f32 %v16094_v22, %v10039_v61  ;;  %v2565_v15 = vadd.f32 %v2557_v30, %v2489_v3  ;;  %v2707_v46 = vrot.slane %v2679_v24, 2  ;;  %v2762_v40 = vmul.f32 %v10431_v11, %v2520_v5  ;;  %v16100_v11 = vld [vmem:[#allocation62_spill] sm:$0xff]  ;;  %v16102_v30 = vld [vmem:[#allocation87_spill] sm:$0xff]  ;;  %v16105_v24 = vld [vmem:[#allocation45_spill] sm:$0xff] }
 0x262   : > { %v2626_v51 = vsel %vm1427_vm9, %v2624_v36, %v2625_v10  ;;  %v3244_v21 = vrot.slane %v16095_v1, 4  ;;  %v2158_v54 = vadd.f32 %v16096_v62, %v10390_v57  ;;  %v2996_v4 = vrot.slane %v10501_v55, 1  ;;  %v16103_v52 = vld [vmem:[#allocation71_spill] sm:$0xff] }
 0x263   : > { %v10516_v32 = vmul.f32 %v16097_v27, %v10039_v61  ;;  %v3077_v31 = vsel %vm1511_vm10, %v3075_v42, %v3076_v35  ;;  %v16099_v29 = vrot.slane %v16098_v47, 1  ;;  %v2940_v63 = vadd.f32 %v2932_v53, %v2901_v39  ;;  %v16113_v53 = vld [vmem:[#allocation132_spill] sm:$0xff]  ;;  %v16118_v47 = vld [vmem:[#allocation57_spill] sm:$0xff] }
 0x264   : > { %v2648_v20 = vadd.f32 %v2626_v51, %v2565_v15  ;;  %v2159_v37 = vadd.f32 %v16100_v11, %v10398_v0  ;;  %v10525_v43 = vadd.f32 %v16101_v23, %v2123_v8  ;;  %v3101_v57 = vadd.f32 %v3077_v31, %v3018_v56  ;;  %v16112_v56 = vld [vmem:[#allocation88_spill] sm:$0xff]  ;;  %v16122_v23 = vld [vmem:[#allocation90_spill] sm:$0xff] }
 0x265   : > { %v3004_v10 = vsel %vm1427_vm9, %v2993_v28, %v16099_v29  ;;  %v2709_v61 = vsel %vm1511_vm10, %v2707_v46, %v2708_v6  ;;  %v2790_v49 = vrot.slane %v2762_v40, 3  ;;  %v2845_v42 = vmul.f32 %v10449_v60, %v2520_v5  ;;  %v16108_v6 = vld [vmem:[#allocation133_spill] sm:$0xff]  ;;  %v16110_v5 = vld [vmem:[#allocation131_spill] sm:$0xff]  ;;  %v16115_v51 = vld [vmem:[#allocation56_spill] sm:$0xff] }
 0x266   : > { %v3022_v14 = vadd.f32 %v3004_v10, %v2939_v38  ;;  %v2238_v28 = vadd.f32 %v16102_v30, %v10327_v48  ;;  %v16104_v13 = vrot.slane %v16103_v52, 1  ;;  %v3079_v8 = vrot.slane %v10516_v32, 2  ;;  %v16117_v32 = vld [vmem:[#allocation46_spill] sm:$0xff]  ;;  %v16120_v10 = vld [vmem:[#allocation77_spill] sm:$0xff] }
 0x267   : > { %v2731_v7 = vadd.f32 %v2709_v61, %v2648_v20  ;;  %v2241_v44 = vadd.f32 %v16105_v24, %v2158_v54  ;;  %v16107_v39 = vrot.slane %v16106_v18, 3  ;;  %v16109_v16 = vrot.slane %v16108_v6, 3  ;;  %v16123_v30 = vld [vmem:[#allocation74_spill] sm:$0xff]  ;;  %v16126_v24 = vld [vmem:[#allocation47_spill] sm:$0xff]  ;;  %v16127_v6 = vld [vmem:[#allocation76_spill] sm:$0xff] }
 0x268   : > { %v3006_v0 = vsel %vm1427_vm9, %v2996_v4, %v16104_v13  ;;  %v16111_v3 = vrot.slane %v16110_v5, 2  ;;  %v2321_v38 = vadd.f32 %v16112_v56, %v2238_v28  ;;  %v16114_v15 = vrot.slane %v16113_v53, 4  ;;  %v16133_v56 = vld [vmem:[#allocation20_spill] sm:$0xff] }
 0x269   : > { %v3160_v60 = vsel %vm1595_vm11, %v16109_v16, %v16107_v39  ;;  %v3023_v36 = vadd.f32 %v3006_v0, %v2940_v63  ;;  %v16116_v46 = vrot.slane %v16115_v51, 4  ;;  %v2324_v31 = vadd.f32 %v16117_v32, %v2241_v44  ;;  %v2496_v0 = vpop.permute.xlu1 %2495 }
 0x26a   : > { %v3087_v48 = vsel %vm1511_vm10, %v3076_v35, %v16111_v3  ;;  %v3184_v62 = vadd.f32 %v3160_v60, %v3101_v57  ;;  %v16119_v29 = vrot.slane %v16118_v47, 3  ;;  %v16121_v20 = vrot.slane %v16120_v10, 3  ;;  %v16136_v47 = vld [vmem:[#allocation59_spill] sm:$0xff] }
 0x26b   : > { %v3243_v40 = vsel %vm1679_vm12, %v16116_v46, %v16114_v15  ;;  %v10554_v54 = vadd.f32 %v3087_v48, %v3022_v14  ;;  %v2792_v63 = vsel %vm1595_vm11, %v2790_v49, %v2791_v59  ;;  %v2873_v11 = vrot.slane %v2845_v42, 4  ;;  %v16125_v14 = vld [vmem:[#allocation84_spill] sm:$0xff] }
 0x26c   : > { %v3172_v35 = vsel %vm1595_vm11, %v16121_v20, %v16119_v29  ;;  %v2404_v61 = vadd.f32 %v16122_v23, %v2321_v38  ;;  %v16124_v28 = vrot.slane %v16123_v30, 2  ;;  %v2967_v52 = vmul.f32 %v16092_v25, %v16125_v14  ;;  %v16131_v42 = vld [vmem:[#allocation92_spill] sm:$0xff]  ;;  %v16132_v25 = vld [vmem:[#allocation17_spill] sm:$0xff] }
 0x26d   : > { %v2814_v13 = vadd.f32 %v2792_v63, %v2731_v7  ;;  %v2407_v44 = vadd.f32 %v16126_v24, %v2324_v31  ;;  %v16128_v16 = vrot.slane %v16127_v6, 4  ;;  %v16130_v60 = vrot.slane %v16129_v26, 4  ;;  %v8200_v48 = vld [vmem:[#allocation2 + $0x20] ss:$8 sm:$0xf] }
 0x26e   : > { %v3089_v57 = vsel %vm1511_vm10, %v3079_v8, %v16124_v28  ;;  %v3050_v49 = vmul.f32 %v16097_v27, %v16125_v14  ;;  %v2487_v5 = vadd.f32 %v16131_v42, %v2404_v61  ;;  %v10580_v3 = vadd.f32 %v3243_v40, %v3184_v62  ;;  %v8201_v46 = vld [vmem:[#allocation2 + $0x25] ss:$8 sm:$0xf]  ;;  %v8202_v23 = vld [vmem:[#allocation2 + $0x42] ss:$8 sm:$0xf] }
 0x26f   : > { %v3106_v39 = vadd.f32 %v3089_v57, %v3023_v36  ;;  %v3255_v59 = vsel %vm1679_vm12, %v16130_v60, %v16128_v16  ;;  %v10583_v7 = vrot.slane %v8200_v48, %v16132_v25  ;;  %v10586_v38 = vrot.slane %v8200_v48, %v16133_v56  ;;  %v16134_v36 = vld [vmem:[#allocation48_spill] sm:$0xff] }
 0x270   : > { %v2490_v15 = vadd.f32 %v16134_v36, %v2407_v44  ;;  %v2875_v51 = vsel %vm1679_vm12, %v2873_v11, %v2874_v58  ;;  %v10593_v27 = vrot.slane %v8201_v46, %v16132_v25  ;;  %v2526_v40 = vsel %vm2519_vm15, %v2496_v0, %v10170_v34  ;;  %v8203_v61 = vld [vmem:[#allocation2 + $0x3] ss:$8 sm:$0xf]  ;;  %v8204_v57 = vld [vmem:[#allocation2 + $0x47] ss:$8 sm:$0xf] }
 0x271   : > { %v2529_v62 = vsel %vm2519_vm15, %v10476_v33, %v2496_v0  ;;  %v2928_v32 = vmul.f32 %v16094_v22, %v16125_v14  ;;  %v2995_v31 = vrot.slane %v2967_v52, 1  ;;  %v16135_v45 = vmov %v16121_v20  ;;  %v16141_v36 = vld [vmem:[#allocation105_spill] sm:$0xff] }
 0x272   : > { %v16137_v58 = vrot.slane %v16136_v47, 3  ;;  %v2897_v20 = vadd.f32 %v2875_v51, %v2814_v13  ;;  %v3189_v63 = vadd.f32 %v3172_v35, %v3106_v39  ;;  %v3078_v11 = vrot.slane %v3050_v49, 2  ;;  %v16138_v13 = vld [vmem:[#allocation96_spill] sm:$0xff] }
 0x273   : > { %v10611_v34 = vrot.slane %v8201_v46, %v16133_v56  ;;  %v10614_v33 = vrot.slane %v8202_v23, %v16132_v25  ;;  %v2538_v22 = vrot.slane %v8203_v61, %v16132_v25  ;;  %v10618_v10 = vrot.slane %v8203_v61, %v16133_v56 }
 0x274   : > { %v10608_v29 = vsel %vm1595_vm11, %v16137_v58, %v16135_v45  ;;  %v10621_v30 = vmul.f32 %v10583_v7, %v2526_v40  ;;  %v10624_v28 = vmul.f32 %v10586_v38, %v2529_v62  ;;  %v10627_v35 = vrot.slane %v8202_v23, %v16133_v56 }
 0x275   : > { %v10630_v14 = vrot.slane %v8204_v57, %v16132_v25  ;;  %v10633_v52 = vmul.f32 %v10593_v27, %v2526_v40  ;;  %v2242_v0 = vadd.f32 %v16138_v13, %v2159_v37  ;;  %v2997_v24 = vsel %vm1427_vm9, %v2995_v31, %v2996_v4  ;;  %v2498_v4 = vpop.permute.xlu0 %2497  ;;  %v16142_v31 = vld [vmem:[#allocation49_spill] sm:$0xff] }
 0x276   : > { %v16139_v44 = vmov %v16130_v60  ;;  %v2936_v6 = vadd.f32 %v2928_v32, %v2897_v20  ;;  %v10647_v16 = vrot.slane %v8204_v57, %v16133_v56  ;;  %v10649_v60 = vadd.f32 %v3255_v59, %v3189_v63  ;;  %v8205_v57 = vld [vmem:[#allocation2 + $0x4] ss:$8 sm:$0xf] }
 0x277   : > { %v10644_v39 = vsel %vm1679_vm12, %v3244_v21, %v16139_v44  ;;  %v3080_v49 = vsel %vm1511_vm10, %v3078_v11, %v3079_v8  ;;  %v10653_v37 = vmul.f32 %v10611_v34, %v2529_v62  ;;  %v10656_v55 = vmul.f32 %v10614_v33, %v2526_v40  ;;  %v16156_v63 = vld [vmem:[#allocation54_spill] sm:$0xff] }
 0x278   : > { %16140 = vst [vmem:[#allocation95_spill] sm:$0xff] %v10649_v60  ;;  %v2555_v26 = vmul.f32 %v2538_v22, %v2526_v40  ;;  %v2558_v1 = vmul.f32 %v10618_v10, %v2529_v62  ;;  %v2618_v21 = vrot.slane %v10621_v30, 1  ;;  %v2627_v42 = vrot.slane %v10624_v28, 1  ;;  %v16144_v30 = vld [vmem:[#allocation108_spill] sm:$0xff] }
 0x279   : > { %v10663_v59 = vmul.f32 %v10627_v35, %v2529_v62  ;;  %v10666_v8 = vmul.f32 %v10630_v14, %v2526_v40  ;;  %v2325_v51 = vadd.f32 %v16141_v36, %v2242_v0  ;;  %v3019_v46 = vadd.f32 %v2997_v24, %v2936_v6  ;;  %v16145_v0 = vld [vmem:[#allocation93_spill] sm:$0xff]  ;;  %v16146_v24 = vld [vmem:[#allocation118_spill] sm:$0xff]  ;;  %v16147_v6 = vld [vmem:[#allocation51_spill] sm:$0xff] }
 0x27a   : > { %v10670_v32 = vmul.f32 %v10647_v16, %v2529_v62  ;;  %v2245_v45 = vadd.f32 %v16142_v31, %v10525_v43  ;;  %v2527_v47 = vsel %vm2519_vm15, %v2498_v4, %v10290_v19  ;;  %v2563_v58 = vadd.f32 %v2555_v26, %v2487_v5  ;;  %v16143_v62 = vld [vmem:[#allocation50_spill] sm:$0xff]  ;;  %v16151_v36 = vld [vmem:[#allocation81_spill] sm:$0xff] }
 0x27b   : > { %v2710_v20 = vrot.slane %v10653_v37, 2  ;;  %v10682_v40 = vsel %vm2519_vm15, %v10405_v17, %v2498_v4  ;;  %v2566_v11 = vadd.f32 %v2558_v1, %v2490_v15  ;;  %v10686_v61 = vmul.f32 %v10583_v7, %v2527_v47  ;;  %v16148_v4 = vld [vmem:[#allocation53_spill] sm:$0xff]  ;;  %v16150_v1 = vld [vmem:[#allocation75_spill] sm:$0xff]  ;;  %v16153_v31 = vld [vmem:[#allocation102_spill] sm:$0xff] }
 0x27c   : > { %v2328_v23 = vadd.f32 %v16143_v62, %v2245_v45  ;;  %v10690_v43 = vmul.f32 %v10586_v38, %v10682_v40  ;;  %v2408_v28 = vadd.f32 %v16144_v30, %v2325_v51  ;;  %v10696_v17 = vrot.slane %v8205_v57, %v16133_v56  ;;  %v16154_v62 = vld [vmem:[#allocation52_spill] sm:$0xff] }
 0x27d   : > { %v3102_v15 = vadd.f32 %v3080_v49, %v3019_v46  ;;  %v10701_v44 = vmul.f32 %v16146_v24, %v16145_v0  ;;  %v10706_v26 = vmul.f32 %v16148_v4, %v16145_v0  ;;  %v10710_v51 = vmul.f32 %v16151_v36, %v16150_v1 }
 0x27e   : > { %v2411_v37 = vadd.f32 %v16147_v6, %v2328_v23  ;;  %v10714_v45 = vmul.f32 %v16148_v4, %v16153_v31  ;;  %v10718_v49 = vmul.f32 %v16151_v36, %v10053_v50  ;;  %v10722_v46 = vmul.f32 %v10696_v17, %v16150_v1  ;;  %v16155_v6 = vld [vmem:[#allocation109_spill] sm:$0xff] }
 0x27f   : > { %16149 = vst [vmem:[#allocation89_spill] sm:$0xff] %v10706_v26  ;;  %16152 = vst [vmem:[#allocation58_spill] sm:$0xff] %v10710_v51  ;;  %v2619_v30 = vrot.slane %v10686_v61, 1  ;;  %v2628_v57 = vrot.slane %v10690_v43, 1  ;;  %v2491_v13 = vadd.f32 %v16155_v6, %v2408_v28  ;;  %v2559_v5 = vmul.f32 %v2538_v22, %v2527_v47  ;;  %v2500_v6 = vpop.permute.xlu1 %2499 }
 0x280   : > { %v2494_v23 = vadd.f32 %v16154_v62, %v2411_v37  ;;  %v2681_v4 = vmul.f32 %v10593_v27, %v2527_v47  ;;  %v2684_v19 = vmul.f32 %v10611_v34, %v10682_v40  ;;  %v10732_v36 = vadd.f32 %v10608_v29, %v3102_v15  ;;  %v16158_v15 = vld [vmem:[#allocation83_spill] sm:$0xff] }
 0x281   : > { %v10736_v48 = vmul.f32 %v16156_v63, %v16145_v0  ;;  %v2764_v37 = vmul.f32 %v10614_v33, %v2527_v47  ;;  %v2767_v61 = vmul.f32 %v10627_v35, %v10682_v40  ;;  %v10747_v29 = vmul.f32 %v16156_v63, %v16153_v31 }
 0x282   : > { %v10751_v56 = vmul.f32 %v16158_v15, %v10053_v50  ;;  %v2620_v25 = vsel %vm1427_vm9, %v2618_v21, %v2619_v30  ;;  %v2629_v0 = vsel %vm1427_vm9, %v2627_v42, %v2628_v57  ;;  %v2562_v43 = vmul.f32 %v10618_v10, %v10682_v40 }
 0x283   : > { %16157 = vst [vmem:[#allocation94_spill] sm:$0xff] %v10736_v48  ;;  %v2567_v22 = vadd.f32 %v2559_v5, %v2491_v13  ;;  %v2702_v28 = vrot.slane %v2681_v4, 2  ;;  %v2711_v60 = vrot.slane %v2684_v19, 2  ;;  %v2785_v62 = vrot.slane %v2764_v37, 3 }
 0x284   : > { %v2794_v51 = vrot.slane %v2767_v61, 3  ;;  %v2847_v48 = vmul.f32 %v10630_v14, %v2527_v47  ;;  %v2528_v63 = vsel %vm2519_vm15, %v2500_v6, %v10363_v9  ;;  %v2646_v26 = vadd.f32 %v2620_v25, %v2563_v58 }
 0x285   : > { %v2649_v41 = vadd.f32 %v2629_v0, %v2566_v11  ;;  %v2531_v21 = vsel %vm2519_vm15, %v10396_v2, %v2500_v6  ;;  %v2602_v42 = vmul.f32 %v10583_v7, %v2528_v63  ;;  %v2685_v19 = vmul.f32 %v10593_v27, %v2528_v63 }
 0x286   : > { %v2605_v10 = vmul.f32 %v10586_v38, %v2531_v21  ;;  %v2688_v5 = vmul.f32 %v10611_v34, %v2531_v21  ;;  %v2768_v47 = vmul.f32 %v10614_v33, %v2528_v63  ;;  %v16159_v13 = vrot.slane %v10633_v52, 2 }
 0x287   : > { %v2712_v25 = vsel %vm1511_vm10, %v2710_v20, %v2711_v60  ;;  %v2630_v58 = vrot.slane %v2602_v42, 1  ;;  %v2771_v11 = vmul.f32 %v10627_v35, %v2531_v21  ;;  %v2570_v2 = vadd.f32 %v2562_v43, %v2494_v23 }
 0x288   : > { %v2703_v9 = vsel %vm1511_vm10, %v16159_v13, %v2702_v28  ;;  %v2636_v0 = vrot.slane %v2605_v10, 1  ;;  %v2713_v7 = vrot.slane %v2685_v19, 2  ;;  %v2719_v4 = vrot.slane %v2688_v5, 2 }
 0x289   : > { %v2729_v38 = vadd.f32 %v2703_v9, %v2646_v26  ;;  %v2850_v27 = vmul.f32 %v10647_v16, %v10682_v40  ;;  %v2631_v34 = vsel %vm1427_vm9, %v2619_v30, %v2630_v58  ;;  %v2796_v33 = vrot.slane %v2768_v47, 3 }
 0x28a   : > { %v16160_v52 = vrot.slane %v10656_v55, 3  ;;  %v2637_v20 = vsel %vm1427_vm9, %v2628_v57, %v2636_v0  ;;  %v2650_v61 = vadd.f32 %v2631_v34, %v2567_v22  ;;  %v2802_v6 = vrot.slane %v2771_v11, 3 }
 0x28b   : > { %v2732_v35 = vadd.f32 %v2712_v25, %v2649_v41  ;;  %v2868_v23 = vrot.slane %v2847_v48, 4  ;;  %v2653_v43 = vadd.f32 %v2637_v20, %v2570_v2  ;;  %v2714_v42 = vsel %vm1511_vm10, %v2702_v28, %v2713_v7  ;;  %v10789_v41 = vld [vmem:[%s15392_s4] sm:$0xf]  ;;  %v16166_v7 = vld [vmem:[#allocation18_spill] sm:$0xff] }
 0x28c   : > { %v2786_v37 = vsel %vm1595_vm11, %v16160_v52, %v2785_v62  ;;  %v2720_v26 = vsel %vm1511_vm10, %v2711_v60, %v2719_v4  ;;  %v2733_v10 = vadd.f32 %v2714_v42, %v2650_v61  ;;  %v2851_v40 = vmul.f32 %v10630_v14, %v2528_v63  ;;  %v16162_v63 = vld [vmem:[#allocation121_spill] sm:$0xff] }
 0x28d   : > { %v2854_v30 = vmul.f32 %v10647_v16, %v2531_v21  ;;  %v2812_v19 = vadd.f32 %v2786_v37, %v2729_v38  ;;  %v2877_v55 = vrot.slane %v2850_v27, 4  ;;  %v2736_v5 = vadd.f32 %v2720_v26, %v2653_v43 }
 0x28e   : > { %v2797_v47 = vsel %vm1595_vm11, %v2785_v62, %v2796_v33  ;;  %v2803_v48 = vsel %vm1595_vm11, %v2794_v51, %v2802_v6  ;;  %v2879_v22 = vrot.slane %v2851_v40, 4  ;;  %v16161_v28 = vrot.slane %v10663_v59, 3 }
 0x28f   : > { %v2816_v57 = vadd.f32 %v2797_v47, %v2733_v10  ;;  %v2885_v60 = vrot.slane %v2854_v30, 4  ;;  %v2930_v16 = vmul.f32 %v16146_v24, %v16153_v31  ;;  %v16163_v21 = vrot.slane %v16162_v63, 1  ;;  %v16174_v30 = vld [vmem:[#allocation122_spill] sm:$0xff] }
 0x290   : > { %v2795_v14 = vsel %vm1595_vm11, %v16161_v28, %v2794_v51  ;;  %v16164_v62 = vrot.slane %v10714_v45, 1  ;;  %v2819_v9 = vadd.f32 %v2803_v48, %v2736_v5  ;;  %v16165_v58 = vrot.slane %v10666_v8, 4  ;;  %v16167_v8 = vld [vmem:[#allocation66_spill] sm:$0xff] }
 0x291   : > { %v2815_v25 = vadd.f32 %v2795_v14, %v2732_v35  ;;  %v2880_v2 = vsel %vm1679_vm12, %v2868_v23, %v2879_v22  ;;  %v2886_v59 = vsel %vm1679_vm12, %v2877_v55, %v2885_v60  ;;  %v3283_v24 = vrot.slane %v10789_v41, %v16166_v7  ;;  %v16171_v35 = vld [vmem:[#allocation67_spill] sm:$0xff] }
 0x292   : > { %v3002_v13 = vsel %vm1427_vm9, %v16164_v62, %v16163_v21  ;;  %v2869_v11 = vsel %vm1679_vm12, %v16165_v58, %v2868_v23  ;;  %v2899_v51 = vadd.f32 %v2880_v2, %v2816_v57  ;;  %v2902_v0 = vadd.f32 %v2886_v59, %v2819_v9  ;;  %v16182_v22 = vld [vmem:[#allocation127_spill] sm:$0xff]  ;;  %v16190_v59 = vld [vmem:[#allocation58_spill] sm:$0xff] }
 0x293   : > { %v3073_v31 = vrot.slane %v10747_v29, 2  ;;  %v2895_v4 = vadd.f32 %v2869_v11, %v2812_v19  ;;  %v2933_v38 = vmul.f32 %v10696_v17, %v10053_v50  ;;  %v8387_v27 = vmov 0.0  }
 0x294   : > { %3345 = vrot.lane.b32.xlu0 %v8387_v27, %s8385_s27  ;;  %3911 = vrot.lane.b32.xlu1 %v8387_v27, %s8384_s25  ;;  %v16168_v34 = vrot.slane %v16167_v8, 3  ;;  %v16169_v33 = vrot.slane %v16106_v18, 3  ;;  %v16170_v37 = vrot.slane %v10670_v32, 4  ;;  %v2938_v20 = vadd.f32 %v2930_v16, %v2899_v51  ;;  %v16184_v16 = vld [vmem:[#allocation19_spill] sm:$0xff] }
 0x295   : > { %v3297_v50 = vadd.f32 %v3283_v24, %v10580_v3  ;;  %1168 = vmatprep.mubr.f32.mxu1 %v8387_v27  ;;  %v2941_v6 = vadd.f32 %v2933_v38, %v2902_v0  ;;  %v16172_v23 = vrot.slane %v16171_v35, 4  ;;  %v16173_v18 = vrot.slane %v16113_v53, 4  ;;  %v16176_v53 = vld [vmem:[#allocation73_spill] sm:$0xff]  ;;  %v16199_v35 = vld [vmem:[#allocation95_spill] sm:$0xff] }
 0x296   : > { %v3170_v52 = vsel %vm1595_vm11, %v16169_v33, %v16168_v34  ;;  %v2878_v29 = vsel %vm1679_vm12, %v16170_v37, %v2877_v55  ;;  %v3051_v32 = vmul.f32 %v16158_v15, %v16150_v1  ;;  %v3021_v42 = vadd.f32 %v3002_v13, %v2938_v20  ;;  %v16192_v38 = vld [vmem:[#allocation125_spill] sm:$0xff]  ;;  %v16194_v34 = vld [vmem:[#allocation128_spill] sm:$0xff] }
 0x297   : > { %v3188_v17 = vadd.f32 %v3170_v52, %v10554_v54  ;;  %v2898_v61 = vadd.f32 %v2878_v29, %v2815_v25  ;;  %v3253_v43 = vsel %vm1679_vm12, %v16173_v18, %v16172_v23  ;;  %v3314_v26 = vrot.slane %v3297_v50, 7  ;;  %v16188_v25 = vld [vmem:[#allocation94_spill] sm:$0xff]  ;;  %v16196_v52 = vld [vmem:[#allocation69_spill] sm:$0xff]  ;;  %v16200_v18 = vld [vmem:[#allocation79_spill] sm:$0xff] }
 0x298   : > { %v3268_v54 = vadd.f32 %v10644_v39, %v10732_v36  ;;  %v3082_v3 = vrot.slane %v10751_v56, 2  ;;  %v2934_v40 = vadd.f32 %v10701_v44, %v2895_v4  ;;  %v16175_v19 = vrot.slane %v16174_v30, 2  ;;  %4486 = vrot.lane.b32.xlu0 %v8387_v27, %s8386_s14  ;;  %v16180_v36 = vld [vmem:[#allocation124_spill] sm:$0xff]  ;;  %v16203_v30 = vld [vmem:[#allocation129_spill] sm:$0xff] }
 0x299   : > { %v3271_v10 = vadd.f32 %v3253_v43, %v3188_v17  ;;  %v16177_v5 = vrot.slane %v16176_v53, 1  ;;  %v16178_v15 = vrot.slane %v10718_v49, 1  ;;  %v10849_v39 = vsel %vm3312_vm0, 0.0, %v3314_v26 }
 0x29a   : > { %v3085_v55 = vsel %vm1511_vm10, %v3073_v31, %v16175_v19  ;;  %16179 = vst [vmem:[#allocation98_spill] sm:$0xff] %v10849_v39  ;;  %v2937_v44 = vadd.f32 %v10722_v46, %v2898_v61  ;;  %v16181_v57 = vrot.slane %v16180_v36, 3  ;;  %v16183_v60 = vrot.slane %v16182_v22, 3  ;;  %v16208_v36 = vld [vmem:[#allocation85_spill] sm:$0xff] }
 0x29b   : > { %v3008_v47 = vsel %vm1427_vm9, %v16178_v15, %v16177_v5  ;;  %v3104_v48 = vadd.f32 %v3085_v55, %v3021_v42  ;;  %v3301_v56 = vadd.f32 %v3283_v24, %v3271_v10  ;;  %v3287_v63 = vrot.slane %v10789_v41, %v16184_v16  ;;  %v16202_v42 = vld [vmem:[#allocation86_spill] sm:$0xff]  ;;  %v16205_v55 = vld [vmem:[#allocation55_spill] sm:$0xff] }
 0x29c   : > { %v3168_v28 = vsel %vm1595_vm11, %v16183_v60, %v16181_v57  ;;  %v3024_v14 = vadd.f32 %v3008_v47, %v2941_v6  ;;  %v16185_v21 = vmov %v16164_v62  ;;  %v16186_v62 = vld [vmem:[#allocation89_spill] sm:$0xff]  ;;  %v3072_v58 = vrot.slane %v16188_v25, 2  ;;  %3353 = vrot.lane.b32.xlu0 %v10849_v39, %s8385_s27  ;;  %v16206_v5 = vld [vmem:[#allocation134_spill] sm:$0xff] }
 0x29d   : > { %v16187_v13 = vrot.slane %v16186_v62, 1  ;;  %v3187_v11 = vadd.f32 %v3168_v28, %v3104_v48  ;;  %v3319_v46 = vrot.slane %v3301_v56, 7  ;;  %v16189_v2 = vmov %v16178_v15  ;;  %v7822_v62 = vpop.f32.mrf.mxu1 }
 0x29e   : > { %v16191_v51 = vrot.slane %v16190_v59, 1  ;;  %v3081_v24 = vrot.slane %v3051_v32, 2  ;;  %v16193_v8 = vrot.slane %v16192_v38, 4  ;;  %v16195_v45 = vrot.slane %v16194_v34, 4  ;;  %v16201_v32 = vld [vmem:[#allocation70_spill] sm:$0xff] }
 0x29f   : > { %v2991_v9 = vsel %vm1427_vm9, %v16187_v13, %v16185_v21  ;;  %v16197_v37 = vrot.slane %v16196_v52, 2  ;;  %v10883_v20 = vsel %vm3312_vm0, %v3319_v46, 0.0  ;;  %v10886_v50 = vsel %vm3312_vm0, %v3314_v26, %v3319_v46  ;;  %v16204_v26 = vld [vmem:[#allocation93_spill] sm:$0xff] }
 0x2a0   : > { %v3000_v0 = vsel %vm1427_vm9, %v16191_v51, %v16189_v2  ;;  %v3017_v4 = vadd.f32 %v2991_v9, %v2934_v40  ;;  %v3251_v33 = vsel %vm1679_vm12, %v16195_v45, %v16193_v8  ;;  %16198 = vst [vmem:[#allocation91_spill] sm:$0xff] %v10886_v50  ;;  %3355 = vrot.lane.b32.xlu1 %v10886_v50, %s8385_s27  ;;  %v3173_v43 = vrot.slane %v16200_v18, 3  ;;  %v10952_v52 = vld [vmem:[%s15393_s5 + $0xa5] ss:$8 sm:$0xf] }
 0x2a1   : > { %v3091_v29 = vsel %vm1511_vm10, %v3082_v3, %v16197_v37  ;;  %v10880_v49 = vadd.f32 %v3251_v33, %v3187_v11  ;;  %v3020_v17 = vadd.f32 %v3000_v0, %v2937_v44  ;;  %v3298_v6 = vadd.f32 %v3287_v63, %v3268_v54  ;;  %3357 = vrot.lane.b32.xlu0 %v10883_v20, %s8385_s27  ;;  %v16207_v54 = vld [vmem:[#allocation135_spill] sm:$0xff]  ;;  %v7823_v37 = vpop.f32.mrf.mxu1 }
 0x2a2   : > { %v3107_v61 = vadd.f32 %v3091_v29, %v3024_v14  ;;  %v3302_v23 = vadd.f32 %v3287_v63, %v16199_v35  ;;  %v3225_v10 = vmul.f32 %v16202_v42, %v16201_v32  ;;  %v3217_v40 = vmul.f32 %v16202_v42, %v16150_v1  ;;  %v10930_v0 = vld [vmem:[%s15393_s5 + $0x67] ss:$8 sm:$0xf]  ;;  %v10947_v33 = vld [vmem:[%s15393_s5 + $0x86] ss:$8 sm:$0xf] }
 0x2a3   : > { %v3155_v19 = vrot.slane %v16203_v30, 3  ;;  %v3214_v53 = vmul.f32 %v16205_v55, %v16204_v26  ;;  %v3248_v15 = vrot.slane %v16206_v5, 4  ;;  %v3074_v47 = vsel %vm1511_vm10, %v3072_v58, %v3073_v31 }
 0x2a4   : > { %v3164_v48 = vrot.slane %v16207_v54, 3  ;;  %v3083_v56 = vsel %vm1511_vm10, %v3081_v24, %v3082_v3  ;;  %v3100_v44 = vadd.f32 %v3074_v47, %v3017_v4  ;;  %v16209_v57 = vrot.slane %v16208_v36, 3  ;;  %3923 = vrot.lane.b32.xlu1 %v10883_v20, %s8384_s25 }
 0x2a5   : > { %v3103_v60 = vadd.f32 %v3083_v56, %v3020_v17  ;;  %v3315_v14 = vrot.slane %v3298_v6, 7  ;;  %v3321_v63 = vrot.slane %v3302_v23, 7  ;;  %v3256_v31 = vrot.slane %v3225_v10, 4  ;;  %3919 = vrot.lane.b32.xlu0 %v10849_v39, %s8384_s25  ;;  %v16214_v17 = vld [vmem:[#allocation17_spill] sm:$0xff]  ;;  %v16215_v6 = vld [vmem:[#allocation20_spill] sm:$0xff] }
 0x2a6   : > { %v3174_v1 = vsel %vm1595_vm11, %v16209_v57, %v3173_v43  ;;  %v3247_v21 = vrot.slane %v3217_v40, 4  ;;  %v16210_v13 = vrot.slane %v16182_v22, 3  ;;  %v3238_v25 = vrot.slane %v3214_v53, 4  ;;  %v10925_v22 = vld [vmem:[%s15393_s5 + $0x60] ss:$8 sm:$0xf]  ;;  %v7857_v43 = vpop.f32.mrf.mxu0 }
 0x2a7   : > { %v3190_v28 = vadd.f32 %v3174_v1, %v3107_v61  ;;  %v10916_v3 = vsel %vm3312_vm0, %v3315_v14, %v3321_v63  ;;  %v16211_v58 = vmov %v16209_v57  ;;  %v3257_v2 = vsel %vm1679_vm12, %v3248_v15, %v3256_v31 }
 0x2a8   : > { %v3157_v9 = vsel %vm1595_vm11, %v3155_v19, %v16210_v13  ;;  %v3166_v11 = vsel %vm1595_vm11, %v3164_v48, %v16211_v58  ;;  %4494 = vrot.lane.b32.xlu1 %v10849_v39, %s8386_s14  ;;  %v10935_v24 = vsel %vm3312_vm0, 0.0, %v3315_v14  ;;  %v10938_v4 = vsel %vm3312_vm0, %v3321_v63, 0.0 }
 0x2a9   : > { %v3183_v46 = vadd.f32 %v3157_v9, %v3100_v44  ;;  %v3186_v59 = vadd.f32 %v3166_v11, %v3103_v60  ;;  %v3273_v51 = vadd.f32 %v3257_v2, %v3190_v28  ;;  %16212 = vst [vmem:[#allocation97_spill] sm:$0xff] %v10935_v24  ;;  %v16213_v38 = vmov %v16195_v45  ;;  %v7858_v60 = vpop.f32.mrf.mxu0 }
 0x2aa   : > { %v3240_v8 = vsel %vm1679_vm12, %v3238_v25, %v16213_v38  ;;  %v3249_v45 = vsel %vm1679_vm12, %v3247_v21, %v3248_v15  ;;  %v5280_v29 = vrot.slane %v10925_v22, %v16184_v16  ;;  %v5363_v34 = vrot.slane %v10930_v0, %v16184_v16  ;;  %3921 = vrot.lane.b32.xlu0 %v10886_v50, %s8384_s25 }
 0x2ab   : > { %v3279_v61 = vrot.slane %v10789_v41, %v16214_v17  ;;  %v3291_v35 = vrot.slane %v10789_v41, %v16215_v6  ;;  %v5446_v23 = vrot.slane %v10947_v33, %v16184_v16  ;;  %v5529_v18 = vrot.slane %v10952_v52, %v16184_v16 }
 0x2ac   : > { %v5299_v32 = vmul.f32 %v5280_v29, %v10938_v4  ;;  %v5382_v42 = vmul.f32 %v5363_v34, %v10938_v4  ;;  %v5291_v10 = vmul.f32 %v5280_v29, %v10935_v24  ;;  %v5295_v40 = vmul.f32 %v5280_v29, %v10916_v3  ;;  %4496 = vrot.lane.b32.xlu1 %v10886_v50, %s8386_s14 }
 0x2ad   : > { %v3266_v30 = vadd.f32 %v3240_v8, %v3183_v46  ;;  %v3269_v41 = vadd.f32 %v3249_v45, %v3186_v59  ;;  %v10972_v19 = vadd.f32 %v3291_v35, %v3273_v51  ;;  %v7824_v26 = vadd.f32 %v7823_v37, %v7822_v62 }
 0x2ae   : > { %v5329_v55 = vrot.slane %v5299_v32, 1  ;;  %v5412_v53 = vrot.slane %v5382_v42, 4  ;;  %v5465_v5 = vmul.f32 %v5446_v23, %v10938_v4  ;;  %v5544_v15 = vmul.f32 %v5529_v18, %v10938_v4  ;;  %3361 = vrot.lane.b32.xlu0 %v10916_v3, %s8385_s27 }
 0x2af   : > { %v5548_v47 = vmul.f32 0.0, %v5529_v18  ;;  %v5319_v54 = vrot.slane %v5291_v10, 1  ;;  %v5320_v48 = vrot.slane %v5295_v40, 1  ;;  %v5374_v56 = vmul.f32 %v5363_v34, %v10935_v24 }
 0x2b0   : > { %v5495_v44 = vrot.slane %v5465_v5, 7  ;;  %v5569_v36 = vrot.slane %v5544_v15, 2  ;;  %v5378_v57 = vmul.f32 %v5363_v34, %v10916_v3  ;;  %v5457_v1 = vmul.f32 %v5446_v23, %v10935_v24  ;;  %3359 = vrot.lane.b32.xlu1 %v10935_v24, %s8385_s27 }
 0x2b1   : > { %v5578_v28 = vrot.slane %v5548_v47, 2  ;;  %v10986_v14 = vsel %vm1427_vm9, %v5319_v54, %v5320_v48  ;;  %v10989_v63 = vsel %vm1427_vm9, %v5320_v48, %v5329_v55  ;;  %v5402_v31 = vrot.slane %v5374_v56, 4 }
 0x2b2   : > { %16216 = vst [vmem:[#allocation99_spill] sm:$0xff] %v10986_v14  ;;  %16217 = vst [vmem:[#allocation115_spill] sm:$0xff] %v10989_v63  ;;  %v5403_v21 = vrot.slane %v5378_v57, 4  ;;  %v5461_v62 = vmul.f32 %v5446_v23, %v10916_v3  ;;  %v5485_v13 = vrot.slane %v5457_v1, 7  ;;  %v5540_v9 = vmul.f32 %v5529_v18, %v10916_v3  ;;  %3927 = vrot.lane.b32.xlu0 %v10916_v3, %s8384_s25  ;;  %v1098_v18 = vld [vmem:[%s15398_s10 + $0x10] sm:$0xff] }
 0x2b3   : > { %v10996_v25 = vsel %vm1511_vm10, %v5569_v36, %v5578_v28  ;;  %v7859_v58 = vadd.f32 %v7858_v60, %v7857_v43  ;;  %v3299_v11 = vadd.f32 %v3291_v35, %v3269_v41  ;;  %v3323_v46 = vrot.slane %v10972_v19, 7  ;;  %v11375_v14 = vld [vmem:[%s15393_s5 + $0x61] ss:$8 sm:$0xf] }
 0x2b4   : > { %16218 = vst [vmem:[#allocation64_spill] sm:$0xff] %v10996_v25  ;;  %v11000_v2 = vsel %vm1679_vm12, %v5402_v31, %v5403_v21  ;;  %v11003_v59 = vsel %vm1679_vm12, %v5403_v21, %v5412_v53  ;;  %v5486_v51 = vrot.slane %v5461_v62, 7  ;;  %v5568_v38 = vrot.slane %v5540_v9, 2  ;;  %3363 = vrot.lane.b32.xlu1 %v10938_v4, %s8385_s27 }
 0x2b5   : > { %16219 = vst [vmem:[#allocation106_spill] sm:$0xff] %v11000_v2  ;;  %16220 = vst [vmem:[#allocation101_spill] sm:$0xff] %v11003_v59  ;;  %v3300_v8 = vadd.f32 %v3279_v61, %v10880_v49  ;;  %v1092_v45 = vadd.f32 %v7859_v58, %v7824_v26  ;;  %v3316_v37 = vrot.slane %v3299_v11, 7  ;;  %v3296_v43 = vadd.f32 %v3279_v61, %v3266_v30 }
 0x2b6   : > { %v11009_v29 = vsel %vm3312_vm0, %v5485_v13, %v5486_v51  ;;  %v11012_v34 = vsel %vm3312_vm0, %v5486_v51, %v5495_v44  ;;  %v11015_v35 = vsel %vm1511_vm10, %v5568_v38, %v5569_v36  ;;  %3929 = vrot.lane.b32.xlu0 %v10938_v4, %s8384_s25  ;;  %v11044_v30 = vrot.slane %v10925_v22, %v16214_v17 }
 0x2b7   : > { %16221 = vst [vmem:[#allocation111_spill] sm:$0xff] %v11009_v29  ;;  %16222 = vst [vmem:[#allocation100_spill] sm:$0xff] %v11012_v34  ;;  %v1095_v23 = vmax.f32 %v1092_v45, 0.0  ;;  %v11020_v49 = vsel %vm3312_vm0, %v3316_v37, %v3323_v46  ;;  %v3313_v32 = vrot.slane %v3296_v43, 7  ;;  %v3317_v42 = vrot.slane %v3300_v8, 7 }
 0x2b8   : > { %16223 = vst [vmem:[#allocation30_spill] sm:$0xff] %v11015_v35  ;;  %3925 = vrot.lane.b32.xlu1 %v10935_v24, %s8384_s25  ;;  %v11032_v10 = vsel %vm3312_vm0, 0.0, %v3316_v37  ;;  %v11063_v53 = vrot.slane %v10930_v0, %v16214_v17  ;;  %v11067_v5 = vrot.slane %v10952_v52, %v16214_v17  ;;  %v11071_v15 = vrot.slane %v10947_v33, %v16214_v17 }
 0x2b9   : > { %7709 = vmatmul.mubr.msk.f32.vlgmr.msra.gmra.mxu1 %vm1100_vm1, %v1095_v23  ;;  %16224 = vst [vmem:[#allocation31_spill] sm:$0xff] %v11032_v10  ;;  %v11035_v40 = vsel %vm3312_vm0, %v3313_v32, %v3317_v42  ;;  %v11040_v61 = vsel %vm3312_vm0, %v3317_v42, 0.0  ;;  %v11054_v41 = vsel %vm3312_vm0, 0.0, %v3313_v32  ;;  %v3344_v56 = vsel %vm3312_vm0, %v3323_v46, 0.0 }
 0x2ba   : > { %1206 = vmatpush1.msra.mxu1 %v1098_v18  ;;  %1239 = vmatprep.mubr.f32.mxu1 %v8387_v27  ;;  %v11051_v27 = vmul.f32 %v11044_v30, %v11035_v40  ;;  %16225 = vst [vmem:[#allocation34_spill] sm:$0xff] %v11054_v41  ;;  %v5297_v19 = vmul.f32 %v11044_v30, %v11040_v61 }
 0x2bb   : > { %3367 = vrot.lane.b32.xlu0 %v11020_v49, %s8385_s27  ;;  %v11082_v54 = vmul.f32 %v11063_v53, %v11035_v40  ;;  %v5380_v48 = vmul.f32 %v11063_v53, %v11040_v61  ;;  %v11089_v44 = vmul.f32 %v11071_v15, %v11035_v40  ;;  %v5463_v36 = vmul.f32 %v11071_v15, %v11040_v61 }
 0x2bc   : > { %3365 = vrot.lane.b32.xlu1 %v11032_v10, %s8385_s27  ;;  %v15530_v26 = vrot.slane %v11051_v27, 1  ;;  %v5325_v55 = vrot.slane %v5297_v19, 1  ;;  %v5538_v57 = vmul.f32 %v11067_v5, %v11035_v40  ;;  %v11099_v28 = vmul.f32 %v11067_v5, %v11040_v61 }
 0x2bd   : > { %7710 = vmatmul.mubr.msk.f32.vlgmr.msra.gmra.mxu1 %vm1100_vm1, %v1095_v23  ;;  %v15529_v1 = vrot.slane %v11082_v54, 4  ;;  %v5408_v60 = vrot.slane %v5380_v48, 4  ;;  %v15528_v31 = vrot.slane %v11089_v44, 7  ;;  %v5491_v21 = vrot.slane %v5463_v36, 7 }
 0x2be   : > { %v11078_v47 = vsel %vm1427_vm9, %v15530_v26, %v5325_v55  ;;  %v5562_v13 = vrot.slane %v5538_v57, 2  ;;  %v15527_v9 = vrot.slane %v11099_v28, 2  ;;  %v5284_v11 = vrot.slane %v10925_v22, %v16215_v6 }
 0x2bf   : > { %3349 = vrot.lane.b32.xlu0 %v11035_v40, %s8385_s27  ;;  %16226 = vst [vmem:[#allocation103_spill] sm:$0xff] %v11078_v47  ;;  %v11107_v62 = vsel %vm1679_vm12, %v15529_v1, %v5408_v60  ;;  %v11113_v58 = vsel %vm3312_vm0, %v15528_v31, %v5491_v21  ;;  %v5367_v51 = vrot.slane %v10930_v0, %v16215_v6 }
 0x2c0   : > { %3347 = vrot.lane.b32.xlu1 %v11054_v41, %s8385_s27  ;;  %16227 = vst [vmem:[#allocation32_spill] sm:$0xff] %v11107_v62  ;;  %16228 = vst [vmem:[#allocation60_spill] sm:$0xff] %v11113_v58  ;;  %v11122_v46 = vsel %vm1511_vm10, %v5562_v13, %v15527_v9  ;;  %v5450_v38 = vrot.slane %v10947_v33, %v16215_v6  ;;  %v5533_v8 = vrot.slane %v10952_v52, %v16215_v6 }
 0x2c1   : > { %16229 = vst [vmem:[#allocation33_spill] sm:$0xff] %v11122_v46  ;;  %v5292_v45 = vmul.f32 %v5284_v11, %v11032_v10  ;;  %v5296_v37 = vmul.f32 %v5284_v11, %v11020_v49  ;;  %v5300_v23 = vmul.f32 %v5284_v11, %v3344_v56  ;;  %v5375_v18 = vmul.f32 %v5367_v51, %v11032_v10 }
 0x2c2   : > { %v5458_v43 = vmul.f32 %v5450_v38, %v11032_v10  ;;  %v5549_v32 = vmul.f32 0.0, %v5533_v8  ;;  %v5379_v42 = vmul.f32 %v5367_v51, %v11020_v49  ;;  %v5383_v36 = vmul.f32 %v5367_v51, %v3344_v56 }
 0x2c3   : > { %3351 = vrot.lane.b32.xlu0 %v11040_v61, %s8385_s27  ;;  %v5322_v19 = vrot.slane %v5292_v45, 1  ;;  %v5323_v55 = vrot.slane %v5296_v37, 1  ;;  %v5331_v48 = vrot.slane %v5300_v23, 1  ;;  %v5405_v57 = vrot.slane %v5375_v18, 4 }
 0x2c4   : > { %3369 = vrot.lane.b32.xlu1 %v3344_v56, %s8385_s27  ;;  %v5580_v60 = vrot.slane %v5549_v32, 2  ;;  %v5406_v21 = vrot.slane %v5379_v42, 4  ;;  %v5414_v9 = vrot.slane %v5383_v36, 4  ;;  %v5462_v31 = vmul.f32 %v5450_v38, %v11020_v49 }
 0x2c5   : > { %v11140_v13 = vsel %vm1427_vm9, %v5322_v19, %v5323_v55  ;;  %v11143_v11 = vsel %vm1427_vm9, %v5323_v55, %v5331_v48  ;;  %v5466_v45 = vmul.f32 %v5450_v38, %v3344_v56  ;;  %v5541_v37 = vmul.f32 %v5533_v8, %v11020_v49 }
 0x2c6   : > { %16230 = vst [vmem:[#allocation35_spill] sm:$0xff] %v11140_v13  ;;  %16231 = vst [vmem:[#allocation36_spill] sm:$0xff] %v11143_v11  ;;  %v11149_v51 = vsel %vm1679_vm12, %v5405_v57, %v5406_v21  ;;  %v5545_v23 = vmul.f32 %v5533_v8, %v3344_v56  ;;  %v5488_v18 = vrot.slane %v5458_v43, 7  ;;  %v11153_v32 = vsel %vm1679_vm12, %v5406_v21, %v5414_v9 }
 0x2c7   : > { %3931 = vrot.lane.b32.xlu0 %v11032_v10, %s8384_s25  ;;  %16232 = vst [vmem:[#allocation116_spill] sm:$0xff] %v11149_v51  ;;  %16233 = vst [vmem:[#allocation37_spill] sm:$0xff] %v11153_v32  ;;  %v5489_v42 = vrot.slane %v5462_v31, 7  ;;  %v5497_v19 = vrot.slane %v5466_v45, 7  ;;  %v5571_v55 = vrot.slane %v5541_v37, 2  ;;  %v5359_v31 = vrot.slane %v10930_v0, %v16166_v7 }
 0x2c8   : > { %3933 = vrot.lane.b32.xlu1 %v11020_v49, %s8384_s25  ;;  %v5572_v48 = vrot.slane %v5545_v23, 2  ;;  %v5442_v43 = vrot.slane %v10947_v33, %v16166_v7  ;;  %v7732_v23 = vld [vmem:[%s15393_s5 + $0x22] ss:$8 sm:$0xf] }
 0x2c9   : > { %v11157_v36 = vsel %vm3312_vm0, %v5488_v18, %v5489_v42  ;;  %v11162_v38 = vsel %vm3312_vm0, %v5489_v42, %v5497_v19  ;;  %v5381_v21 = vmul.f32 %v5359_v31, %v10883_v20  ;;  %v11216_v18 = vmul.f32 %v5359_v31, %v10849_v39 }
 0x2ca   : > { %16234 = vst [vmem:[#allocation112_spill] sm:$0xff] %v11157_v36  ;;  %16235 = vst [vmem:[#allocation114_spill] sm:$0xff] %v11162_v38  ;;  %v11165_v8 = vsel %vm1511_vm10, %v5571_v55, %v5572_v48  ;;  %v11168_v9 = vsel %vm1511_vm10, %v5572_v48, %v5580_v60  ;;  %v11200_v60 = vmul.f32 %v5359_v31, %v10886_v50  ;;  %v7733_v55 = vld [vmem:[%s15393_s5 + $0x41] ss:$8 sm:$0xf] }
 0x2cb   : > { %3913 = vrot.lane.b32.xlu0 %v11054_v41, %s8384_s25  ;;  %16236 = vst [vmem:[#allocation117_spill] sm:$0xff] %v11165_v8  ;;  %16237 = vst [vmem:[#allocation119_spill] sm:$0xff] %v11168_v9  ;;  %v11207_v45 = vmul.f32 %v5442_v43, %v10886_v50  ;;  %v5464_v0 = vmul.f32 %v5442_v43, %v10883_v20  ;;  %v11219_v42 = vmul.f32 %v5442_v43, %v10849_v39 }
 0x2cc   : > { %3915 = vrot.lane.b32.xlu1 %v11035_v40, %s8384_s25  ;;  %16239 = vst [vmem:[#allocation107_spill] sm:$0xff] %v11200_v60  ;;  %16242 = vst [vmem:[#allocation38_spill] sm:$0xff] %v11216_v18  ;;  %v5114_v19 = vrot.slane %v7732_v23, %v16184_v16  ;;  %v5197_v31 = vrot.slane %v7733_v55, %v16184_v16  ;;  %v5118_v51 = vrot.slane %v7732_v23, %v16215_v6 }
 0x2cd   : > { %16241 = vst [vmem:[#allocation110_spill] sm:$0xff] %v11207_v45  ;;  %16243 = vst [vmem:[#allocation113_spill] sm:$0xff] %v11219_v42  ;;  %v5493_v9 = vrot.slane %v5464_v0, 7  ;;  %v16245_v0 = vrot.slane %v11200_v60, 4 }
 0x2ce   : > { %v5125_v8 = vmul.f32 0.0, %v5114_v19  ;;  %v5129_v36 = vmul.f32 %v5114_v19, %v10935_v24  ;;  %v5133_v1 = vmul.f32 %v5114_v19, %v10916_v3  ;;  %v5216_v43 = vmul.f32 %v5197_v31, %v10916_v3 }
 0x2cf   : > { %4488 = vrot.lane.b32.xlu0 %v11054_v41, %s8386_s14  ;;  %v5212_v25 = vmul.f32 %v5197_v31, %v10935_v24  ;;  %v5126_v19 = vmul.f32 0.0, %v5118_v51  ;;  %v5130_v35 = vmul.f32 %v5118_v51, %v11032_v10 }
 0x2d0   : > { %3935 = vrot.lane.b32.xlu1 %v3344_v56, %s8384_s25  ;;  %v5154_v34 = vrot.slane %v5129_v36, 3 }
 0x2d1   : > { %v5237_v2 = vrot.slane %v5212_v25, 6  ;;  %v5156_v11 = vrot.slane %v5126_v19, 3 }
 0x2d3   : > { %4508 = vrot.lane.b32.xlu0 %v11020_v49, %s8386_s14 }
 0x2d4   : > { %3917 = vrot.lane.b32.xlu1 %v11040_v61, %s8384_s25  ;;  %s15347_s25 = scalar_lea.sflag [#allocation4], %s475_s20 }
 0x2d7   : > { %4492 = vrot.lane.b32.xlu0 %v11040_v61, %s8386_s14  ;;  %v5276_v61 = vrot.slane %v10925_v22, %v16166_v7 }
 0x2d8   : > { %4506 = vrot.lane.b32.xlu1 %v11032_v10, %s8386_s14 }
 0x2d9   : > { %v11196_v57 = vmul.f32 %v5276_v61, %v10886_v50  ;;  %v11204_v22 = vmul.f32 %v5276_v61, %v10849_v39 }
 0x2db   : > { %4510 = vrot.lane.b32.xlu0 %v3344_v56, %s8386_s14  ;;  %v5525_v56 = vrot.slane %v10952_v52, %v16166_v7  ;;  %16238 = vst [vmem:[#allocation123_spill] sm:$0xff] %v11196_v57  ;;  %16240 = vst [vmem:[#allocation104_spill] sm:$0xff] %v11204_v22  ;;  %v15531_v48 = vrot.slane %v11196_v57, 1 }
 0x2dc   : > { %4490 = vrot.lane.b32.xlu1 %v11035_v40, %s8386_s14 }
 0x2dd   : > { %v5547_v52 = vmul.f32 0.0, %v5525_v56  ;;  %v5539_v33 = vmul.f32 %v5525_v56, %v10886_v50  ;;  %v5543_v37 = vmul.f32 %v5525_v56, %v10883_v20  ;;  %v5410_v56 = vrot.slane %v5381_v21, 4 }
 0x2df   : > { %4498 = vrot.lane.b32.xlu0 %v10883_v20, %s8386_s14  ;;  %v5576_v26 = vrot.slane %v5547_v52, 2  ;;  %v5565_v38 = vrot.slane %v5539_v33, 2  ;;  %v5566_v32 = vrot.slane %v5543_v37, 2  ;;  %v11243_v33 = vsel %vm1679_vm12, %v16245_v0, %v5410_v56 }
 0x2e0   : > { %4500 = vrot.lane.b32.xlu1 %v10935_v24, %s8386_s14  ;;  %16246 = vst [vmem:[#allocation120_spill] sm:$0xff] %v11243_v33  ;;  %v5208_v37 = vmul.f32 0.0, %v5197_v31  ;;  %v5189_v56 = vrot.slane %v7733_v55, %v16214_v17  ;;  %v5153_v0 = vrot.slane %v5125_v8, 3  ;;  %v11499_v33 = vld [vmem:[%s15393_s5 + $0xa0] ss:$8 sm:$0xf] }
 0x2e1   : > { %16288 = vst [vmem:[#allocation96_spill] sm:$0xff] %v11499_v33  ;;  %v11543_v57 = vrot.slane %v11499_v33, %v16214_v17 }
 0x2e2   : > { %v5236_v29 = vrot.slane %v5208_v37, 6  ;;  %v5214_v8 = vmul.f32 %v5189_v56, %v11035_v40  ;;  %v5210_v36 = vmul.f32 %v5189_v56, %v11054_v41  ;;  %v5372_v37 = vmul.f32 %v11063_v53, %v11054_v41  ;;  %v11295_v53 = vld [vmem:[%s15393_s5 + $0x23] ss:$8 sm:$0xf] }
 0x2e3   : > { %4504 = vrot.lane.b32.xlu0 %v10938_v4, %s8386_s14  ;;  %v5298_v4 = vmul.f32 %v5276_v61, %v10883_v20  ;;  %v16247_v20 = vrot.slane %v11207_v45, 7  ;;  %16299 = vst [vmem:[#allocation52_spill] sm:$0xff] %v11543_v57  ;;  %v11555_v47 = vrot.slane %v11295_v53, %v16184_v16  ;;  %v11567_v50 = vrot.slane %v11295_v53, %v16214_v17 }
 0x2e4   : > { %4502 = vrot.lane.b32.xlu1 %v10916_v3, %s8386_s14  ;;  %v5134_v3 = vmul.f32 %v5118_v51, %v11020_v49  ;;  %v5546_v51 = vmul.f32 0.0, %v11067_v5  ;;  %v5231_v19 = vrot.slane %v5210_v36, 6  ;;  %s8388_s14 = smov [#allocation8]  }
 0x2e5   : > { %v5327_v61 = vrot.slane %v5298_v4, 1  ;;  %v5201_v4 = vrot.slane %v7733_v55, %v16215_v6  ;;  %v11251_v21 = vsel %vm3312_vm0, %v16247_v20, %v5493_v9  ;;  %v5163_v20 = vrot.slane %v5133_v1, 3  ;;  %16303 = vst [vmem:[#allocation121_spill] sm:$0xff] %v11555_v47  ;;  %s8310_s23 = sshll.u32 %s8388_s14, 4  ;;  %s8311_s23 = int_to_ptr.vmem [resolvable:$false] %s8310_s23 }
 0x2e6   : > { %16248 = vst [vmem:[#allocation40_spill] sm:$0xff] %v11251_v21  ;;  %v11268_v55 = vsel %vm1595_vm11, %v5153_v0, %v5154_v34  ;;  %v5165_v63 = vrot.slane %v5134_v3, 3  ;;  %v5157_v1 = vrot.slane %v5130_v35, 3  ;;  %v5242_v0 = vrot.slane %v5214_v8, 6  ;;  %s8312_s19 = scalar_lea.vmem %s8311_s23, 2048  ;;  %p8313_p7 = scmp.lt.s32.totalorder %s15335_s16, %s8311_s23 }
 0x2e7   : > { %v11238_v52 = vsel %vm1427_vm9, %v15531_v48, %v5327_v61  ;;  %v11254_v61 = vsel %vm1511_vm10, %v5565_v38, %v5566_v32  ;;  %v11257_v48 = vsel %vm1511_vm10, %v5566_v32, %v5576_v26  ;;  %v5209_v59 = vmul.f32 0.0, %v5201_v4  ;;  %16251 = vst [vmem:[#allocation41_spill] sm:$0xff] %v11268_v55  ;;  %v11494_v21 = vld [vmem:[%s15393_s5 + $0x81] ss:$8 sm:$0xf]  ;;  %p8314_p8 = scmp.lt.s32.totalorder %s8312_s19, %s8306_s29 }
 0x2e8   : > { %16244 = vst [vmem:[#allocation39_spill] sm:$0xff] %v11238_v52  ;;  %16249 = vst [vmem:[#allocation65_spill] sm:$0xff] %v11254_v61  ;;  %v5217_v31 = vmul.f32 %v5201_v4, %v11020_v49  ;;  %v5213_v9 = vmul.f32 %v5201_v4, %v11032_v10  ;;  %v5246_v38 = vrot.slane %v5216_v43, 6  ;;  %v5106_v26 = vrot.slane %v7732_v23, %v16214_v17 }
 0x2e9   : > { %16250 = vst [vmem:[#allocation72_spill] sm:$0xff] %v11257_v48  ;;  %v5206_v32 = vmul.f32 0.0, %v5189_v56  ;;  %v5239_v49 = vrot.slane %v5209_v59, 6  ;;  %v5289_v23 = vmul.f32 %v11044_v30, %v11054_v41  ;;  %v5455_v56 = vmul.f32 %v11071_v15, %v11054_v41  ;;  %v11300_v15 = vld [vmem:[%s15393_s5 + $0x42] ss:$8 sm:$0xf]  ;;  %p8315_p11 = por %p8314_p8, %p8313_p7 }
 0x2ea   : > { %v5248_v4 = vrot.slane %v5217_v31, 6  ;;  %v5240_v43 = vrot.slane %v5213_v9, 6  ;;  %v11272_v25 = vmul.f32 %v5106_v26, %v11035_v40  ;;  %v11281_v59 = vmul.f32 %v5106_v26, %v11054_v41  ;;  %16287 = vst [vmem:[#allocation59_spill] sm:$0xff] %v11494_v21  ;;  %v7718_v41 = vld [vmem:[%s15393_s5 + $0x20] ss:$8 sm:$0xf] }
 0x2eb   : > { %v5230_v5 = vrot.slane %v5206_v32, 6  ;;  %v11284_v35 = vsel %vm1595_vm11, %v5154_v34, %v5163_v20  ;;  %v11287_v40 = vsel %vm1278_vm4, %v5236_v29, %v5237_v2  ;;  %v11290_v30 = vsel %vm1278_vm4, %v5237_v2, %v5246_v38  ;;  %v11305_v34 = vld [vmem:[%s15393_s5 + $0x4] ss:$8 sm:$0xf]  ;;  %p8316_p0 = pnand %p8315_p11, %p8309_p12 }
 0x2ec   : > { %16252 = vst [vmem:[#allocation42_spill] sm:$0xff] %v11272_v25  ;;  %16253 = vst [vmem:[#allocation43_spill] sm:$0xff] %v11281_v59  ;;  %v5574_v3 = vrot.slane %v5546_v51, 2  ;;  %v7746_v2 = vld [vmem:[%s15393_s5 + $0x24] ss:$8 sm:$0xf]  ;;  %v11311_v29 = vsel %vm1595_vm11, %v5156_v11, %v5157_v1  ;;  %v11314_v31 = vsel %vm1595_vm11, %v5157_v1, %v5165_v63  ;;  %v11317_v9 = vsel %vm1278_vm4, %v5239_v49, %v5240_v43 }
 0x2ed   : > { %16254 = vst [vmem:[#allocation80_spill] sm:$0xff] %v11284_v35  ;;  %16255 = vst [vmem:[#allocation44_spill] sm:$0xff] %v11287_v40  ;;  %v11320_v20 = vsel %vm1278_vm4, %v5240_v43, %v5248_v4  ;;  %v11325_v38 = vld [vmem:[%s15393_s5] ss:$8 sm:$0xf]  ;;  %v11342_v8 = vmul.f32 0.0, %v5106_v26  ;;  %v11370_v13 = vsel %vm1278_vm4, %v5231_v19, %v5242_v0  ;;  %v11503_v61 = vrot.slane %v11375_v14, %v16166_v7 }
 0x2ee   : > { %16256 = vst [vmem:[#allocation126_spill] sm:$0xff] %v11290_v30  ;;  %16257 = vst [vmem:[#allocation29_spill] sm:$0xff] %v11311_v29  ;;  %v11330_v32 = vld [vmem:[%s15393_s5 + $0x7] ss:$8 sm:$0xf]  ;;  %v5313_v36 = vrot.slane %v5289_v23, 1  ;;  %v11539_v22 = vrot.slane %v11494_v21, %v16214_v17  ;;  %v11559_v24 = vrot.slane %v11300_v15, %v16184_v16  ;;  %v11575_v39 = vrot.slane %v11300_v15, %v16214_v17 }
 0x2ef   : > { %16258 = vst [vmem:[#allocation61_spill] sm:$0xff] %v11314_v31  ;;  %16259 = vst [vmem:[#allocation82_spill] sm:$0xff] %v11317_v9  ;;  %v11335_v63 = vld [vmem:[%s15393_s5 + $0x26] ss:$8 sm:$0xf]  ;;  %v5396_v49 = vrot.slane %v5372_v37, 4  ;;  %v11579_v59 = vrot.slane %v11300_v15, %v16215_v6  ;;  %v11583_v25 = vrot.slane %v11305_v34, %v16214_v17  ;;  %v11595_v57 = vrot.slane %v11305_v34, %v16215_v6 }
 0x2f0   : > { %16260 = vst [vmem:[#allocation130_spill] sm:$0xff] %v11320_v20  ;;  %v11340_v11 = vld [vmem:[%s15393_s5 + $0x45] ss:$8 sm:$0xf]  ;;  %16261 = vst [vmem:[#allocation62_spill] sm:$0xff] %v11342_v8  ;;  %v5479_v51 = vrot.slane %v5455_v56, 7  ;;  %v11367_v56 = vsel %vm1278_vm4, %v5230_v5, %v5231_v19  ;;  %v11571_v8 = vrot.slane %v11295_v53, %v16215_v6  ;;  %v11656_v33 = vrot.slane %v11330_v32, %v16184_v16 }
 0x2f1   : > { %v11347_v4 = vld [vmem:[%s15393_s5 + $0x64] ss:$8 sm:$0xf]  ;;  %v11352_v1 = vld [vmem:[%s15393_s5 + $0x83] ss:$8 sm:$0xf] }
 0x2f2   : > { %v11357_v43 = vld [vmem:[%s15393_s5 + $0xa2] ss:$8 sm:$0xf]  ;;  %v11362_v26 = vld [vmem:[%s15393_s5 + $0x1] ss:$8 sm:$0xf]  ;;  %v11477_v55 = vrot.slane %v11347_v4, %v16214_v17  ;;  %v11481_v46 = vrot.slane %v11352_v1, %v16214_v17 }
 0x2f3   : > { %16262 = vst [vmem:[#allocation63_spill] sm:$0xff] %v11367_v56  ;;  %16263 = vst [vmem:[#allocation87_spill] sm:$0xff] %v11370_v13  ;;  %v11380_v20 = vld [vmem:[%s15393_s5 + $0x80] ss:$8 sm:$0xf]  ;;  %v16264_v5 = vrot.slane %v11051_v27, 1  ;;  %v11489_v48 = vrot.slane %v11362_v26, %v16214_v17  ;;  %v11563_v13 = vrot.slane %v11305_v34, %v16184_v16 }
 0x2f4   : > { %v11385_v37 = vld [vmem:[%s15393_s5 + $0x87] ss:$8 sm:$0xf]  ;;  %v16266_v19 = vrot.slane %v11082_v54, 4  ;;  %v16268_v30 = vrot.slane %v11089_v44, 7  ;;  %v16270_v40 = vrot.slane %v11099_v28, 2  ;;  %v11419_v44 = vrot.slane %v11295_v53, %v16166_v7 }
 0x2f5   : > { %v11390_v0 = vsel %vm1427_vm9, %v5313_v36, %v16264_v5  ;;  %v11410_v27 = vld [vmem:[%s15393_s5 + $0xa6] ss:$8 sm:$0xf]  ;;  %v11415_v54 = vld [vmem:[%s15393_s5 + $0xa3] ss:$8 sm:$0xf]  ;;  %v11423_v28 = vrot.slane %v11300_v15, %v16166_v7  ;;  %v11457_v5 = vrot.slane %v11335_v63, %v16214_v17  ;;  %v11507_v52 = vrot.slane %v11380_v20, %v16166_v7 }
 0x2f6   : > { %16265 = vst [vmem:[#allocation71_spill] sm:$0xff] %v11390_v0  ;;  %v11395_v23 = vsel %vm1679_vm12, %v5396_v49, %v16266_v19  ;;  %v11400_v9 = vsel %vm3312_vm0, %v5479_v51, %v16268_v30  ;;  %v11405_v31 = vsel %vm1511_vm10, %v16270_v40, %v5574_v3  ;;  %16272 = vst [vmem:[#allocation131_spill] sm:$0xff] %v11419_v44  ;;  %v11435_v3 = vld [vmem:[%s15393_s5 + $0x46] ss:$8 sm:$0xf] }
 0x2f7   : > { %16267 = vst [vmem:[#allocation45_spill] sm:$0xff] %v11395_v23  ;;  %16269 = vst [vmem:[#allocation68_spill] sm:$0xff] %v11400_v9  ;;  %v11427_v40 = vrot.slane %v11305_v34, %v16166_v7  ;;  %v11430_v30 = vrot.slane %v7746_v2, %v16214_v17  ;;  %v11440_v36 = vld [vmem:[%s15393_s5 + $0x65] ss:$8 sm:$0xf]  ;;  %v11449_v51 = vrot.slane %v11325_v38, %v16214_v17 }
 0x2f8   : > { %16271 = vst [vmem:[#allocation133_spill] sm:$0xff] %v11405_v31  ;;  %16275 = vst [vmem:[#allocation56_spill] sm:$0xff] %v11435_v3  ;;  %v11445_v49 = vld [vmem:[%s15393_s5 + $0xa7] ss:$8 sm:$0xf]  ;;  %v11453_v2 = vrot.slane %v11330_v32, %v16214_v17  ;;  %v11461_v19 = vrot.slane %v11340_v11, %v16214_v17  ;;  %v11485_v9 = vrot.slane %v11357_v43, %v16214_v17 }
 0x2f9   : > { %16273 = vst [vmem:[#allocation88_spill] sm:$0xff] %v11427_v40  ;;  %16274 = vst [vmem:[#allocation132_spill] sm:$0xff] %v11430_v30  ;;  %v11466_v31 = vld [vmem:[%s15393_s5 + $0x84] ss:$8 sm:$0xf]  ;;  %v11511_v23 = vrot.slane %v11385_v37, %v16166_v7  ;;  %v11515_v0 = vrot.slane %v11410_v27, %v16166_v7  ;;  %v11519_v42 = vrot.slane %v11435_v3, %v16215_v6 }
 0x2fa   : > { %16276 = vst [vmem:[#allocation46_spill] sm:$0xff] %v11440_v36  ;;  %16277 = vst [vmem:[#allocation57_spill] sm:$0xff] %v11453_v2  ;;  %v11471_v35 = vld [vmem:[%s15393_s5 + $0x62] ss:$8 sm:$0xf]  ;;  %v11523_v45 = vrot.slane %v11440_v36, %v16215_v6  ;;  %v11527_v18 = vrot.slane %v11466_v31, %v16215_v6  ;;  %v11531_v60 = vrot.slane %v11415_v54, %v16215_v6 }
 0x2fb   : > { %16278 = vst [vmem:[#allocation77_spill] sm:$0xff] %v11457_v5  ;;  %16279 = vst [vmem:[#allocation90_spill] sm:$0xff] %v11461_v19  ;;  %v11535_v56 = vrot.slane %v11471_v35, %v16214_v17  ;;  %v11547_v10 = vrot.slane %v11445_v49, %v16214_v17  ;;  %v11591_v53 = vld [vmem:[%s15393_s5 + $0x27] ss:$8 sm:$0xf]  ;;  %v11599_v15 = vrot.slane %v11325_v38, %v16215_v6 }
 0x2fc   : > { %16280 = vst [vmem:[#allocation74_spill] sm:$0xff] %v11466_v31  ;;  %16281 = vst [vmem:[#allocation84_spill] sm:$0xff] %v11471_v35  ;;  %v11615_v34 = vrot.slane %v11347_v4, %v16215_v6  ;;  %v11629_v40 = vrot.slane %v11362_v26, %v16215_v6  ;;  %v11648_v30 = vrot.slane %v11325_v38, %v16184_v16 }
 0x2fd   : > { %16283 = vst [vmem:[#allocation76_spill] sm:$0xff] %v11477_v55  ;;  %16284 = vst [vmem:[#allocation78_spill] sm:$0xff] %v11481_v46  ;;  %v11644_v55 = vrot.slane %v11325_v38, %v16166_v7  ;;  %v11652_v19 = vrot.slane %v11330_v32, %v16166_v7  ;;  %v11662_v35 = vrot.slane %v11335_v63, %v16166_v7 }
 0x2fe   : > { %16285 = vst [vmem:[#allocation92_spill] sm:$0xff] %v11485_v9  ;;  %16286 = vst [vmem:[#allocation48_spill] sm:$0xff] %v11489_v48  ;;  %v11666_v31 = vrot.slane %v11335_v63, %v16184_v16  ;;  %v11670_v38 = vrot.slane %v11357_v43, %v16166_v7  ;;  %v11682_v36 = vrot.slane %v11362_v26, %v16166_v7 }
 0x2ff   : > { %16289 = vst [vmem:[#allocation105_spill] sm:$0xff] %v11503_v61  ;;  %16290 = vst [vmem:[#allocation49_spill] sm:$0xff] %v11507_v52  ;;  %v11690_v3 = vrot.slane %v11410_v27, %v16184_v16  ;;  %v11704_v61 = vrot.slane %v11340_v11, %v16166_v7 }
 0x300   : > { %16291 = vst [vmem:[#allocation50_spill] sm:$0xff] %v11511_v23  ;;  %16292 = vst [vmem:[#allocation108_spill] sm:$0xff] %v11515_v0  ;;  %v11674_v23 = vrot.slane %v11357_v43, %v16184_v16 }
 0x301   : > { %16293 = vst [vmem:[#allocation118_spill] sm:$0xff] %v11519_v42  ;;  %16294 = vst [vmem:[#allocation51_spill] sm:$0xff] %v11523_v45  ;;  %v11619_v45 = vrot.slane %v11352_v1, %v16215_v6  ;;  %v11623_v42 = vrot.slane %v11357_v43, %v16215_v6  ;;  %v11696_v43 = vrot.slane %v11380_v20, %v16214_v17 }
 0x302   : > { %16295 = vst [vmem:[#allocation53_spill] sm:$0xff] %v11527_v18  ;;  %16296 = vst [vmem:[#allocation75_spill] sm:$0xff] %v11531_v60  ;;  %v11611_v18 = vrot.slane %v11340_v11, %v16215_v6 }
 0x303   : > { %16297 = vst [vmem:[#allocation81_spill] sm:$0xff] %v11535_v56  ;;  %16298 = vst [vmem:[#allocation102_spill] sm:$0xff] %v11539_v22  ;;  %v11603_v22 = vrot.slane %v11330_v32, %v16215_v6  ;;  %v11607_v56 = vrot.slane %v11335_v63, %v16215_v6  ;;  %v11678_v32 = vrot.slane %v11375_v14, %v16214_v17 }
 0x304   : > { %16300 = vst [vmem:[#allocation109_spill] sm:$0xff] %v11547_v10  ;;  %16304 = vst [vmem:[#allocation66_spill] sm:$0xff] %v11559_v24  ;;  %v11686_v63 = vrot.slane %v11362_v26, %v16184_v16  ;;  %v11708_v26 = vrot.slane %v11410_v27, %v16215_v6 }
 0x305   : > { %16305 = vst [vmem:[#allocation67_spill] sm:$0xff] %v11583_v25  ;;  %16306 = vst [vmem:[#allocation122_spill] sm:$0xff] %v11595_v57 }
 0x306   : > { %v11473_v29 = vpop.permute.xlu0 %3345  ;;  %v11551_v62 = vpop.permute.xlu1 %3911  ;;  %16307 = vst [vmem:[#allocation73_spill] sm:$0xff] %v11603_v22  ;;  %16308 = vst [vmem:[#allocation124_spill] sm:$0xff] %v11607_v56 }
 0x307   : > { %16282 = vst [vmem:[#allocation47_spill] sm:$0xff] %v11473_v29  ;;  %16302 = vst [vmem:[#allocation83_spill] sm:$0xff] %v11551_v62 }
 0x308   : > { %16309 = vst [vmem:[#allocation127_spill] sm:$0xff] %v11611_v18  ;;  %16310 = vst [vmem:[#allocation89_spill] sm:$0xff] %v11615_v34  ;;  %v11632_v18 = vrot.slane %v7718_v41, %v16215_v6  ;;  %v11636_v34 = vrot.slane %v11591_v53, %v16215_v6 }
 0x309   : > { %16311 = vst [vmem:[#allocation94_spill] sm:$0xff] %v11619_v45  ;;  %16312 = vst [vmem:[#allocation58_spill] sm:$0xff] %v11623_v42  ;;  %v11640_v45 = vrot.slane %v11410_v27, %v16214_v17  ;;  %v11729_v27 = vld [vmem:[%s15393_s5 + $0x2] ss:$8 sm:$0xf] }
 0x30a   : > { %v11549_v58 = vpop.permute.xlu0 %4486  ;;  %16313 = vst [vmem:[#allocation125_spill] sm:$0xff] %v11632_v18  ;;  %16314 = vst [vmem:[#allocation128_spill] sm:$0xff] %v11636_v34 }
 0x30b   : > { %16301 = vst [vmem:[#allocation54_spill] sm:$0xff] %v11549_v58  ;;  %16315 = vst [vmem:[#allocation69_spill] sm:$0xff] %v11640_v45  ;;  %v11712_v58 = vrot.slane %v11340_v11, %v16184_v16  ;;  %v11735_v11 = vrot.slane %v11352_v1, %v16184_v16 }
 0x30c   : > { %16316 = vst [vmem:[#allocation95_spill] sm:$0xff] %v11644_v55  ;;  %16317 = vst [vmem:[#allocation79_spill] sm:$0xff] %v11662_v35 }
 0x30d   : > { %16318 = vst [vmem:[#allocation70_spill] sm:$0xff] %v11670_v38  ;;  %16319 = vst [vmem:[#allocation86_spill] sm:$0xff] %v11674_v23 }
 0x30e   : > { %v11625_v46 = vpop.permute.xlu0 %3353  ;;  %16320 = vst [vmem:[#allocation129_spill] sm:$0xff] %v11678_v32  ;;  %16321 = vst [vmem:[#allocation93_spill] sm:$0xff] %v11682_v36  ;;  %v11700_v32 = vrot.slane %v11385_v37, %v16214_v17 }
 0x30f   : > { %16322 = vst [vmem:[#allocation55_spill] sm:$0xff] %v11686_v63  ;;  %16323 = vst [vmem:[#allocation134_spill] sm:$0xff] %v11690_v3 }
 0x310   : > { %16325 = vst [vmem:[#allocation85_spill] sm:$0xff] %v11696_v43  ;;  %16326 = vst [vmem:[#allocation136_spill] sm:$0xff] %v11700_v32  ;;  %v11720_v43 = vrot.slane %v11347_v4, %v16184_v16  ;;  %v11724_v32 = vrot.slane %v11352_v1, %v16166_v7  ;;  %v11756_v1 = vrot.slane %v11375_v14, %v16215_v6 }
 0x311   : > { %16327 = vst [vmem:[#allocation137_spill] sm:$0xff] %v11704_v61  ;;  %16328 = vst [vmem:[#allocation138_spill] sm:$0xff] %v11708_v26 }
 0x312   : > { %v11658_v21 = vpop.permute.xlu1 %3355  ;;  %16329 = vst [vmem:[#allocation139_spill] sm:$0xff] %v11712_v58  ;;  %16331 = vst [vmem:[#allocation141_spill] sm:$0xff] %v11720_v43  ;;  %v11752_v43 = vld [vmem:[%s15393_s5 + $0x3] ss:$8 sm:$0xf]  ;;  %v11773_v58 = vrot.slane %v11591_v53, %v16214_v17 }
 0x313   : > { %v11692_v52 = vpop.permute.xlu0 %3357  ;;  %16332 = vst [vmem:[#allocation142_spill] sm:$0xff] %v11724_v32  ;;  %16333 = vst [vmem:[#allocation143_spill] sm:$0xff] %v11729_v27  ;;  %v11747_v32 = vrot.slane %v11385_v37, %v16184_v16 }
 0x314   : > { %16324 = vst [vmem:[#allocation135_spill] sm:$0xff] %v11692_v52  ;;  %v11716_v52 = vrot.slane %v11347_v4, %v16166_v7  ;;  %16335 = vst [vmem:[#allocation145_spill] sm:$0xff] %v11735_v11  ;;  %v11743_v4 = vrot.slane %v11380_v20, %v16184_v16  ;;  %v11767_v11 = vrot.slane %v7718_v41, %v16214_v17 }
 0x315   : > { %16338 = vst [vmem:[#allocation148_spill] sm:$0xff] %v11747_v32  ;;  %16339 = vst [vmem:[#allocation149_spill] sm:$0xff] %v11752_v43 }
 0x316   : > { %16330 = vst [vmem:[#allocation140_spill] sm:$0xff] %v11716_v52  ;;  %v11731_v61 = vpop.permute.xlu1 %3923  ;;  %v11739_v52 = vrot.slane %v11375_v14, %v16184_v16  ;;  %16337 = vst [vmem:[#allocation147_spill] sm:$0xff] %v11743_v4  ;;  %v11764_v4 = vrot.slane %v11385_v37, %v16215_v6  ;;  %v11777_v14 = vrot.slane %v11415_v54, %v16214_v17 }
 0x317   : > { %16334 = vst [vmem:[#allocation144_spill] sm:$0xff] %v11731_v61  ;;  %16340 = vst [vmem:[#allocation150_spill] sm:$0xff] %v11756_v1  ;;  %v11769_v32 = vpop.permute.xlu0 %3919  ;;  %v11785_v37 = vrot.slane %v11445_v49, %v16166_v7  ;;  %v11795_v1 = vrot.slane %v7718_v41, %v16184_v16  ;;  %v11805_v49 = vmul.f32 %v11423_v28, %v11473_v29 }
 0x318   : > { %16336 = vst [vmem:[#allocation146_spill] sm:$0xff] %v11739_v52  ;;  %v11760_v52 = vrot.slane %v11380_v20, %v16215_v6  ;;  %16342 = vst [vmem:[#allocation152_spill] sm:$0xff] %v11764_v4  ;;  %v11781_v20 = vrot.slane %v11729_v27, %v16214_v17  ;;  %v11789_v4 = vrot.slane %v11729_v27, %v16215_v6 }
 0x319   : > { %16343 = vst [vmem:[#allocation153_spill] sm:$0xff] %v11767_v11  ;;  %16344 = vst [vmem:[#allocation154_spill] sm:$0xff] %v11769_v32  ;;  %v11799_v32 = vrot.slane %v11752_v43, %v16166_v7  ;;  %v11809_v6 = vmul.f32 %v11453_v2, %v11473_v29  ;;  %v11829_v43 = vrot.slane %v11591_v53, %v16166_v7 }
 0x31a   : > { %16341 = vst [vmem:[#allocation151_spill] sm:$0xff] %v11760_v52  ;;  %16345 = vst [vmem:[#allocation155_spill] sm:$0xff] %v11773_v58  ;;  %v11792_v52 = vrot.slane %v7718_v41, %v16166_v7  ;;  %v11801_v61 = vpop.permute.xlu1 %4494  ;;  %v11817_v41 = vmul.f32 %v11485_v9, %v11473_v29  ;;  %v11839_v9 = vmul.f32 %v11547_v10, %v11551_v62 }
 0x31b   : > { %16346 = vst [vmem:[#allocation156_spill] sm:$0xff] %v11777_v14  ;;  %16347 = vst [vmem:[#allocation157_spill] sm:$0xff] %v11781_v20  ;;  %v11851_v17 = vrot.slane %v11415_v54, %v16184_v16  ;;  %v11859_v10 = vmul.f32 %v11489_v48, %v11551_v62 }
 0x31c   : > { %16348 = vst [vmem:[#allocation158_spill] sm:$0xff] %v11785_v37  ;;  %16349 = vst [vmem:[#allocation159_spill] sm:$0xff] %v11789_v4  ;;  %v11813_v37 = vmul.f32 %v11457_v5, %v11473_v29  ;;  %v11833_v5 = vrot.slane %v11591_v53, %v16184_v16  ;;  %v11835_v2 = vpop.permute.xlu0 %3921  ;;  %v11855_v53 = vmul.f32 %v11419_v44, %v11473_v29 }
 0x31d   : > { %16350 = vst [vmem:[#allocation160_spill] sm:$0xff] %v11792_v52  ;;  %16351 = vst [vmem:[#allocation161_spill] sm:$0xff] %v11795_v1  ;;  %v11895_v44 = vmul.f32 %v11575_v39, %v11473_v29  ;;  %v11924_v16 = vmul.f32 %v11607_v56, %v11473_v29  ;;  %v11943_v56 = vmul.f32 %v11632_v18, %v11551_v62 }
 0x31e   : > { %16352 = vst [vmem:[#allocation162_spill] sm:$0xff] %v11799_v32  ;;  %16353 = vst [vmem:[#allocation163_spill] sm:$0xff] %v11801_v61  ;;  %v11821_v32 = vmul.f32 %v11515_v0, %v11473_v29  ;;  %v11825_v61 = vmul.f32 %v11531_v60, %v11551_v62  ;;  %v11843_v0 = vmul.f32 %v11555_v47, %v11473_v29  ;;  %v11869_v27 = vpop.permute.xlu1 %4496 }
 0x31f   : > { %16354 = vst [vmem:[#allocation164_spill] sm:$0xff] %v11805_v49  ;;  %16355 = vst [vmem:[#allocation165_spill] sm:$0xff] %v11817_v41  ;;  %v11847_v60 = vrot.slane %v11415_v54, %v16166_v7  ;;  %v11863_v47 = vmul.f32 %v11449_v51, %v11473_v29  ;;  %v11906_v54 = vmul.f32 %v11579_v59, %v11473_v29 }
 0x320   : > { %16356 = vst [vmem:[#allocation166_spill] sm:$0xff] %v11821_v32  ;;  %16357 = vst [vmem:[#allocation167_spill] sm:$0xff] %v11825_v61  ;;  %v11920_v32 = vmul.f32 %v11603_v22, %v11473_v29  ;;  %v11928_v41 = vmul.f32 %v11623_v42, %v11473_v29  ;;  %v11947_v42 = vmul.f32 %v11636_v34, %v11551_v62 }
 0x321   : > { %16358 = vst [vmem:[#allocation168_spill] sm:$0xff] %v11829_v43  ;;  %16359 = vst [vmem:[#allocation169_spill] sm:$0xff] %v11833_v5  ;;  %v11951_v22 = vmul.f32 %v11640_v45, %v11473_v29  ;;  %v11960_v61 = vmul.f32 %v11599_v15, %v11473_v29  ;;  %v11964_v49 = vmul.f32 %v11629_v40, %v11551_v62 }
 0x322   : > { %16360 = vst [vmem:[#allocation170_spill] sm:$0xff] %v11835_v2  ;;  %16361 = vst [vmem:[#allocation171_spill] sm:$0xff] %v11839_v9  ;;  %v11867_v2 = vmul.f32 %v11559_v24, %v11473_v29  ;;  %v11883_v24 = vmul.f32 %v11571_v8, %v11473_v29  ;;  %v11912_v48 = vpop.permute.xlu1 %3359  ;;  %v11916_v9 = vmul.f32 %v11595_v57, %v11473_v29 }
 0x323   : > { %16362 = vst [vmem:[#allocation172_spill] sm:$0xff] %v11847_v60  ;;  %16363 = vst [vmem:[#allocation173_spill] sm:$0xff] %v11851_v17  ;;  %v11976_v18 = vmul.f32 %v11652_v19, %v11473_v29  ;;  %v12004_v45 = vmul.f32 %v11674_v23, %v11473_v29  ;;  %v12026_v23 = vmul.f32 %v11708_v26, %v11473_v29 }
 0x324   : > { %16364 = vst [vmem:[#allocation174_spill] sm:$0xff] %v11855_v53  ;;  %16365 = vst [vmem:[#allocation175_spill] sm:$0xff] %v11859_v10  ;;  %v11890_v53 = vmul.f32 %v11563_v13, %v11473_v29  ;;  %v12075_v26 = vmul.f32 %v11847_v60, %v11551_v62  ;;  %v16404_v60 = vld [vmem:[#allocation19_spill] sm:$0xff] }
 0x325   : > { %16366 = vst [vmem:[#allocation176_spill] sm:$0xff] %v11863_v47  ;;  %16367 = vst [vmem:[#allocation177_spill] sm:$0xff] %v11869_v27  ;;  %v11879_v47 = vmul.f32 %v11567_v50, %v11473_v29  ;;  %v11885_v27 = vpop.permute.xlu0 %3361 }
 0x326   : > { %16369 = vst [vmem:[#allocation179_spill] sm:$0xff] %v11890_v53  ;;  %16370 = vst [vmem:[#allocation180_spill] sm:$0xff] %v11895_v44  ;;  %v11901_v10 = vsel %vm1740_vm14, %v11658_v21, %v11885_v27  ;;  %v11910_v53 = vmul.f32 %v11583_v25, %v11473_v29  ;;  %v12000_v44 = vmul.f32 %v11670_v38, %v11473_v29  ;;  %v12045_v38 = vpop.permute.xlu1 %3363 }
 0x327   : > { %16368 = vst [vmem:[#allocation178_spill] sm:$0xff] %v11879_v47  ;;  %16372 = vst [vmem:[#allocation182_spill] sm:$0xff] %v11916_v9  ;;  %v11936_v9 = vsel %vm1740_vm14, %v11625_v46, %v11912_v48  ;;  %v12008_v47 = vmul.f32 %v11648_v30, %v11473_v29 }
 0x328   : > { %16371 = vst [vmem:[#allocation181_spill] sm:$0xff] %v11910_v53  ;;  %v5752_v53 = vmul.f32 %v11423_v28, %v11901_v10  ;;  %16373 = vst [vmem:[#allocation183_spill] sm:$0xff] %v11951_v22  ;;  %v11955_v57 = vmul.f32 %v11423_v28, %v11936_v9  ;;  %v11971_v28 = vmul.f32 %v11644_v55, %v11473_v29 }
 0x329   : > { %16375 = vst [vmem:[#allocation185_spill] sm:$0xff] %v11964_v49  ;;  %16377 = vst [vmem:[#allocation187_spill] sm:$0xff] %v11976_v18  ;;  %v11980_v49 = vmul.f32 %v11656_v33, %v11473_v29  ;;  %v11996_v55 = vmul.f32 %v11666_v31, %v11473_v29  ;;  %v12043_v22 = vmul.f32 %v11792_v52, %v11551_v62 }
 0x32a   : > { %16374 = vst [vmem:[#allocation184_spill] sm:$0xff] %v11955_v57  ;;  %16376 = vst [vmem:[#allocation186_spill] sm:$0xff] %v11971_v28  ;;  %v5781_v34 = vrot.slane %v5752_v53, 6  ;;  %v15642_v25 = vrot.slane %v11955_v57, 6  ;;  %v11987_v28 = vmul.f32 %v11662_v35, %v11473_v29  ;;  %v12061_v52 = vmul.f32 %v11829_v43, %v11551_v62  ;;  %v12086_v43 = vpop.permute.xlu0 %3927  ;;  %v16432_v57 = vld [vmem:[#allocation96_spill] sm:$0xff] }
 0x32b   : > { %16380 = vst [vmem:[#allocation190_spill] sm:$0xff] %v12000_v44  ;;  %16381 = vst [vmem:[#allocation191_spill] sm:$0xff] %v12004_v45  ;;  %v12093_v44 = vmul.f32 %v11851_v17, %v11551_v62 }
 0x32c   : > { %16378 = vst [vmem:[#allocation188_spill] sm:$0xff] %v11987_v28  ;;  %v11992_v53 = vsel %vm1278_vm4, %v15642_v25, %v5781_v34  ;;  %v12012_v34 = vmul.f32 %v11682_v36, %v11551_v62  ;;  %v12016_v25 = vmul.f32 %v11686_v63, %v11551_v62  ;;  %16385 = vst [vmem:[#allocation195_spill] sm:$0xff] %v12026_v23 }
 0x32d   : > { %16379 = vst [vmem:[#allocation189_spill] sm:$0xff] %v11992_v53  ;;  %v12020_v53 = vmul.f32 %v11690_v3, %v11473_v29  ;;  %v12030_v36 = vmul.f32 %v11767_v11, %v11551_v62  ;;  %v12035_v63 = vmul.f32 %v11773_v58, %v11551_v62  ;;  %v12039_v3 = vmul.f32 %v11777_v14, %v11551_v62  ;;  %v16392_v14 = vld [vmem:[#allocation54_spill] sm:$0xff] }
 0x32e   : > { %16382 = vst [vmem:[#allocation192_spill] sm:$0xff] %v12012_v34  ;;  %16383 = vst [vmem:[#allocation193_spill] sm:$0xff] %v12016_v25  ;;  %v12052_v58 = vmul.f32 %v11795_v1, %v11551_v62  ;;  %v12057_v25 = vmul.f32 %v11781_v20, %v16392_v14  ;;  %v12065_v29 = vmul.f32 %v11833_v5, %v11551_v62  ;;  %v7725_v11 = vld [vmem:[%s15393_s5 + $0x21] ss:$8 sm:$0xf] }
 0x32f   : > { %16384 = vst [vmem:[#allocation194_spill] sm:$0xff] %v12020_v53  ;;  %16386 = vst [vmem:[#allocation196_spill] sm:$0xff] %v12030_v36  ;;  %v12071_v1 = vmul.f32 %v11789_v4, %v16392_v14  ;;  %v16400_v4 = vld [vmem:[#allocation105_spill] sm:$0xff]  ;;  %v16412_v53 = vld [vmem:[#allocation46_spill] sm:$0xff] }
 0x330   : > { %16387 = vst [vmem:[#allocation197_spill] sm:$0xff] %v12035_v63  ;;  %16388 = vst [vmem:[#allocation198_spill] sm:$0xff] %v12039_v3  ;;  %v5827_v36 = vmul.f32 %v16400_v4, %v11936_v9  ;;  %v5831_v34 = vmul.f32 %v16400_v4, %v11901_v10  ;;  %v16407_v5 = vld [vmem:[#allocation17_spill] sm:$0xff] }
 0x331   : > { %16389 = vst [vmem:[#allocation199_spill] sm:$0xff] %v12043_v22  ;;  %16390 = vst [vmem:[#allocation200_spill] sm:$0xff] %v12045_v38 }
 0x332   : > { %16391 = vst [vmem:[#allocation201_spill] sm:$0xff] %v12052_v58  ;;  %16393 = vst [vmem:[#allocation202_spill] sm:$0xff] %v12057_v25  ;;  %v16398_v25 = vld [vmem:[#allocation135_spill] sm:$0xff]  ;;  %v5853_v17 = vrot.slane %v5827_v36, 1  ;;  %v16406_v58 = vld [vmem:[#allocation49_spill] sm:$0xff]  ;;  %v5854_v45 = vrot.slane %v5831_v34, 1  ;;  %v12130_v34 = vrot.slane %v16412_v53, %v16407_v5  ;;  %v12144_v53 = vpop.permute.xlu0 %3929 }
 0x333   : > { %16394 = vst [vmem:[#allocation203_spill] sm:$0xff] %v12061_v52  ;;  %16395 = vst [vmem:[#allocation204_spill] sm:$0xff] %v12065_v29  ;;  %v12081_v20 = vsel %vm1740_vm14, %v16398_v25, %v12045_v38  ;;  %v5910_v63 = vmul.f32 %v16406_v58, %v11936_v9  ;;  %v5914_v38 = vmul.f32 %v16406_v58, %v11901_v10  ;;  %v16408_v52 = vld [vmem:[#allocation56_spill] sm:$0xff]  ;;  %v16411_v29 = vld [vmem:[#allocation57_spill] sm:$0xff] }
 0x334   : > { %16396 = vst [vmem:[#allocation205_spill] sm:$0xff] %v12071_v1  ;;  %16397 = vst [vmem:[#allocation206_spill] sm:$0xff] %v12075_v26  ;;  %v16402_v1 = vld [vmem:[#allocation143_spill] sm:$0xff]  ;;  %v5835_v62 = vmul.f32 %v16400_v4, %v12081_v20  ;;  %v12119_v3 = vrot.slane %v16408_v52, %v16407_v5  ;;  %v3440_v4 = vmul.f32 %v16411_v29, %v11936_v9 }
 0x335   : > { %16399 = vst [vmem:[#allocation135_spill] sm:$0xff] %v12086_v43  ;;  %16401 = vst [vmem:[#allocation105_spill] sm:$0xff] %v12093_v44  ;;  %v12097_v23 = vrot.slane %v16402_v1, %v16166_v7  ;;  %v12108_v22 = vrot.slane %v16402_v1, %v16404_v60  ;;  %v12122_v1 = vrot.slane %v7725_v11, %v16166_v7  ;;  %v5936_v28 = vrot.slane %v5910_v63, 4 }
 0x336   : > { %16409 = vst [vmem:[#allocation49_spill] sm:$0xff] %v12119_v3  ;;  %v5864_v36 = vrot.slane %v5835_v62, 1  ;;  %v5918_v60 = vmul.f32 %v16406_v58, %v12081_v20  ;;  %16413 = vst [vmem:[#allocation57_spill] sm:$0xff] %v12130_v34  ;;  %v12133_v26 = vsel %vm1427_vm9, %v5853_v17, %v5854_v45  ;;  %v5937_v52 = vrot.slane %v5914_v38, 4  ;;  %v16415_v3 = vld [vmem:[#allocation50_spill] sm:$0xff] }
 0x337   : > { %16403 = vst [vmem:[#allocation143_spill] sm:$0xff] %v12097_v23  ;;  %16405 = vst [vmem:[#allocation207_spill] sm:$0xff] %v12108_v22  ;;  %v5993_v11 = vmul.f32 %v16415_v3, %v11936_v9  ;;  %v3444_v18 = vmul.f32 %v16411_v29, %v11901_v10  ;;  %v5997_v58 = vmul.f32 %v16415_v3, %v11901_v10  ;;  %v16442_v44 = vrot.slane %v11809_v6, 3 }
 0x338   : > { %16410 = vst [vmem:[#allocation56_spill] sm:$0xff] %v12122_v1  ;;  %16414 = vst [vmem:[#allocation46_spill] sm:$0xff] %v12133_v26  ;;  %v12140_v62 = vsel %vm1427_vm9, %v5854_v45, %v5864_v36  ;;  %v5947_v35 = vrot.slane %v5918_v60, 4  ;;  %v12147_v17 = vsel %vm1679_vm12, %v5936_v28, %v5937_v52  ;;  %v6001_v38 = vmul.f32 %v16415_v3, %v12081_v20  ;;  %v16419_v26 = vld [vmem:[#allocation108_spill] sm:$0xff]  ;;  %v16422_v36 = vld [vmem:[#allocation74_spill] sm:$0xff] }
 0x339   : > { %16416 = vst [vmem:[#allocation50_spill] sm:$0xff] %v12140_v62  ;;  %16417 = vst [vmem:[#allocation208_spill] sm:$0xff] %v12144_v53  ;;  %v6019_v63 = vrot.slane %v5993_v11, 7  ;;  %v6076_v34 = vmul.f32 %v16419_v26, %v11901_v10  ;;  %v6020_v45 = vrot.slane %v5997_v58, 7  ;;  %v12158_v60 = vmul.f32 %v16419_v26, %v12081_v20  ;;  %v16424_v3 = vld [vmem:[#allocation84_spill] sm:$0xff]  ;;  %v16427_v26 = vld [vmem:[#allocation59_spill] sm:$0xff] }
 0x33a   : > { %16418 = vst [vmem:[#allocation209_spill] sm:$0xff] %v12147_v17  ;;  %v12154_v29 = vsel %vm1679_vm12, %v5937_v52, %v5947_v35  ;;  %v12162_v62 = vrot.slane %v16422_v36, %v16407_v5  ;;  %v3461_v28 = vrot.slane %v3440_v4, 3  ;;  %v6030_v17 = vrot.slane %v6001_v38, 7  ;;  %v16429_v4 = vld [vmem:[#allocation77_spill] sm:$0xff] }
 0x33b   : > { %16420 = vst [vmem:[#allocation108_spill] sm:$0xff] %v12154_v29  ;;  %16421 = vst [vmem:[#allocation210_spill] sm:$0xff] %v12158_v60  ;;  %v12166_v11 = vrot.slane %v16424_v3, %v16166_v7  ;;  %v12170_v35 = vsel %vm3312_vm0, %v6019_v63, %v6020_v45  ;;  %v6102_v52 = vrot.slane %v6076_v34, 2  ;;  %v12175_v29 = vrot.slane %v16427_v26, %v16166_v7  ;;  %v12182_v3 = vpop.permute.xlu1 %3925  ;;  %v16434_v34 = vld [vmem:[#allocation170_spill] sm:$0xff] }
 0x33c   : > { %16423 = vst [vmem:[#allocation74_spill] sm:$0xff] %v12162_v62  ;;  %16426 = vst [vmem:[#allocation211_spill] sm:$0xff] %v12170_v35  ;;  %v3472_v36 = vrot.slane %v3444_v18, 3  ;;  %v3523_v38 = vmul.f32 %v16429_v4, %v11936_v9  ;;  %v12180_v62 = vsel %vm3312_vm0, %v6020_v45, %v6030_v17  ;;  %v12186_v63 = vrot.slane %v16432_v57, %v16166_v7  ;;  %v3368_v35 = vpop.permute.xlu0 %3367  ;;  %v16440_v45 = vld [vmem:[#allocation131_spill] sm:$0xff] }
 0x33d   : > { %16425 = vst [vmem:[#allocation84_spill] sm:$0xff] %v12166_v11  ;;  %16428 = vst [vmem:[#allocation59_spill] sm:$0xff] %v12175_v29  ;;  %v12192_v58 = vsel %vm1337_vm13, %v16434_v34, %v12086_v43  ;;  %v16436_v18 = vrot.slane %v12158_v60, 2  ;;  %v12201_v17 = vmul.f32 %v12097_v23, %v16392_v14  ;;  %v12205_v57 = vmul.f32 %v12108_v22, %v16392_v14  ;;  %v16444_v23 = vld [vmem:[#allocation90_spill] sm:$0xff]  ;;  %v16449_v29 = vld [vmem:[#allocation76_spill] sm:$0xff] }
 0x33e   : > { %16430 = vst [vmem:[#allocation77_spill] sm:$0xff] %v12180_v62  ;;  %16431 = vst [vmem:[#allocation212_spill] sm:$0xff] %v12182_v3  ;;  %v12209_v62 = vmul.f32 %v16440_v45, %v11901_v10  ;;  %v3462_v7 = vsel %vm1595_vm11, %v16442_v44, %v3461_v28  ;;  %v3409_v22 = vmul.f32 %v11449_v51, %v11936_v9  ;;  %v16445_v44 = vld [vmem:[#allocation132_spill] sm:$0xff]  ;;  %v16450_v34 = vld [vmem:[#allocation149_spill] sm:$0xff] }
 0x33f   : > { %16433 = vst [vmem:[#allocation96_spill] sm:$0xff] %v12186_v63  ;;  %16435 = vst [vmem:[#allocation213_spill] sm:$0xff] %v12192_v58  ;;  %v12197_v26 = vsel %vm1511_vm10, %v6102_v52, %v16436_v18  ;;  %v3473_v52 = vsel %vm1595_vm11, %v3461_v28, %v3472_v36  ;;  %v3527_v18 = vmul.f32 %v16429_v4, %v11901_v10  ;;  %v3544_v28 = vrot.slane %v3523_v38, 6 }
 0x340   : > { %16437 = vst [vmem:[#allocation214_spill] sm:$0xff] %v12197_v26  ;;  %16438 = vst [vmem:[#allocation215_spill] sm:$0xff] %v12201_v17  ;;  %v12219_v26 = vmul.f32 %v16440_v45, %v11936_v9  ;;  %v3602_v17 = vmul.f32 %v16444_v23, %v11936_v9  ;;  %v3610_v6 = vmul.f32 %v16444_v23, %v12081_v20  ;;  %v16448_v45 = vld [vmem:[#allocation176_spill] sm:$0xff] }
 0x341   : > { %16439 = vst [vmem:[#allocation216_spill] sm:$0xff] %v12205_v57  ;;  %16441 = vst [vmem:[#allocation131_spill] sm:$0xff] %v12209_v62  ;;  %v12229_v57 = vmul.f32 %v16445_v44, %v12192_v58  ;;  %v3606_v36 = vmul.f32 %v16444_v23, %v11901_v10  ;;  %v12235_v4 = vmul.f32 %v12122_v1, %v16392_v14  ;;  %v16452_v44 = vld [vmem:[#allocation88_spill] sm:$0xff]  ;;  %v3555_v60 = vrot.slane %v3527_v18, 6 }
 0x342   : > { %16443 = vst [vmem:[#allocation217_spill] sm:$0xff] %v12219_v26  ;;  %v3488_v51 = vadd.f32 %v3462_v7, %v16448_v45  ;;  %v3492_v63 = vadd.f32 %v3473_v52, %v3409_v22  ;;  %v12240_v11 = vmul.f32 %v16449_v29, %v11901_v10  ;;  %v12244_v43 = vrot.slane %v16450_v34, %v16407_v5  ;;  %v3366_v7 = vpop.permute.xlu1 %3365 }
 0x343   : > { %16446 = vst [vmem:[#allocation90_spill] sm:$0xff] %v12229_v57  ;;  %16447 = vst [vmem:[#allocation218_spill] sm:$0xff] %v12235_v4  ;;  %v12249_v23 = vmul.f32 %v16452_v44, %v11936_v9  ;;  %v16454_v4 = vld [vmem:[#allocation78_spill] sm:$0xff]  ;;  %v3626_v52 = vrot.slane %v3602_v17, 1  ;;  %v3638_v45 = vrot.slane %v3610_v6, 1  ;;  %v12258_v34 = vmul.f32 %v16449_v29, %v11936_v9 }
 0x344   : > { %16451 = vst [vmem:[#allocation176_spill] sm:$0xff] %v12244_v43  ;;  %v12253_v14 = vmul.f32 %v16454_v4, %v11901_v10  ;;  %v3350_v43 = vpop.permute.xlu0 %3349  ;;  %v16455_v44 = vrot.slane %v11813_v37, 6  ;;  %v3627_v62 = vrot.slane %v3606_v36, 1  ;;  %v12269_v17 = vmul.f32 %v16449_v29, %v12081_v20  ;;  %v16458_v36 = vld [vmem:[#allocation66_spill] sm:$0xff] }
 0x345   : > { %16453 = vst [vmem:[#allocation76_spill] sm:$0xff] %v12249_v23  ;;  %v3556_v23 = vsel %vm1278_vm4, %v3544_v28, %v3555_v60  ;;  %v12275_v38 = vsel %vm1740_vm14, %v11885_v27, %v3368_v35  ;;  %v12280_v37 = vsel %vm1740_vm14, %v11912_v48, %v3366_v7  ;;  %v12285_v60 = vsel %vm1740_vm14, %v3350_v43, %v11658_v21 }
 0x346   : > { %v3545_v18 = vsel %vm1278_vm4, %v16455_v44, %v3544_v28  ;;  %v12265_v1 = vadd.f32 %v3556_v23, %v3492_v63  ;;  %16456 = vst [vmem:[#allocation149_spill] sm:$0xff] %v12285_v60  ;;  %v12289_v29 = vsel %vm1740_vm14, %v3368_v35, %v3350_v43  ;;  %v3628_v63 = vsel %vm1427_vm9, %v3626_v52, %v3627_v62  ;;  %v16457_v28 = vld [vmem:[#allocation121_spill] sm:$0xff] }
 0x347   : > { %v3571_v5 = vadd.f32 %v3545_v18, %v3488_v51  ;;  %v12293_v44 = vsel %vm1427_vm9, %v3627_v62, %v3638_v45  ;;  %v5670_v48 = vmul.f32 %v16457_v28, %v12275_v38  ;;  %v5753_v51 = vmul.f32 %v16458_v36, %v12275_v38  ;;  %v3348_v62 = vpop.permute.xlu1 %3347 }
 0x348   : > { %v12302_v21 = vmul.f32 %v11563_v13, %v12280_v37  ;;  %v5666_v43 = vmul.f32 %v16457_v28, %v12280_v37  ;;  %v5749_v35 = vmul.f32 %v16458_v36, %v12280_v37  ;;  %v12310_v23 = vmul.f32 %v16454_v4, %v11936_v9 }
 0x349   : > { %v5668_v52 = vmul.f32 %v11567_v50, %v12285_v60  ;;  %v5671_v45 = vmul.f32 %v11571_v8, %v12289_v29  ;;  %v5751_v13 = vmul.f32 %v11575_v39, %v12285_v60  ;;  %v5700_v18 = vrot.slane %v5670_v48, 3 }
 0x34a   : > { %16459 = vst [vmem:[#allocation78_spill] sm:$0xff] %v12302_v21  ;;  %v5783_v22 = vrot.slane %v5753_v51, 6  ;;  %v5691_v28 = vrot.slane %v5666_v43, 3  ;;  %v5774_v27 = vrot.slane %v5749_v35, 6  ;;  %v12318_v6 = vadd.f32 %v3628_v63, %v3571_v5 }
 0x34b   : > { %v5696_v36 = vrot.slane %v5668_v52, 3  ;;  %v5754_v9 = vmul.f32 %v11579_v59, %v12289_v29  ;;  %v12325_v21 = vsel %vm1740_vm14, %v3348_v62, %v11625_v46  ;;  %v16461_v57 = vrot.slane %v11843_v0, 3 }
 0x34c   : > { %16460 = vst [vmem:[#allocation121_spill] sm:$0xff] %v12325_v21  ;;  %v12333_v48 = vsel %vm1595_vm11, %v5691_v28, %v5700_v18  ;;  %v16464_v5 = vrot.slane %v11867_v2, 6  ;;  %v12341_v51 = vsel %vm1278_vm4, %v5774_v27, %v5783_v22  ;;  %v5702_v43 = vrot.slane %v5671_v45, 3 }
 0x34d   : > { %v12330_v26 = vsel %vm1595_vm11, %v16461_v57, %v5691_v28  ;;  %16463 = vst [vmem:[#allocation219_spill] sm:$0xff] %v12333_v48  ;;  %16466 = vst [vmem:[#allocation221_spill] sm:$0xff] %v12341_v51  ;;  %v5779_v35 = vrot.slane %v5751_v13, 6  ;;  %v12345_v46 = vsel %vm1740_vm14, %v3366_v7, %v3348_v62  ;;  %v12349_v0 = vmul.f32 %v11567_v50, %v12325_v21  ;;  %v16468_v57 = vld [vmem:[#allocation122_spill] sm:$0xff]  ;;  %v16471_v62 = vld [vmem:[#allocation73_spill] sm:$0xff] }
 0x34e   : > { %16462 = vst [vmem:[#allocation66_spill] sm:$0xff] %v12330_v26  ;;  %v12338_v63 = vsel %vm1278_vm4, %v16464_v5, %v5774_v27  ;;  %v12353_v52 = vmul.f32 %v16468_v57, %v12345_v46  ;;  %v5667_v2 = vmul.f32 %v11571_v8, %v12345_v46  ;;  %v12359_v22 = vmul.f32 %v11575_v39, %v12325_v21  ;;  %v16472_v39 = vld [vmem:[#allocation124_spill] sm:$0xff]  ;;  %v16494_v26 = vld [vmem:[#allocation75_spill] sm:$0xff] }
 0x34f   : > { %16465 = vst [vmem:[#allocation220_spill] sm:$0xff] %v12338_v63  ;;  %16467 = vst [vmem:[#allocation222_spill] sm:$0xff] %v12349_v0  ;;  %v5750_v27 = vmul.f32 %v11579_v59, %v12345_v46  ;;  %v15717_v7 = vrot.slane %v12349_v0, 3  ;;  %v3412_v50 = vmul.f32 %v11599_v15, %v12325_v21  ;;  %v3443_v45 = vmul.f32 %v16471_v62, %v12325_v21 }
 0x350   : > { %16469 = vst [vmem:[#allocation122_spill] sm:$0xff] %v12353_v52  ;;  %16470 = vst [vmem:[#allocation223_spill] sm:$0xff] %v12359_v22  ;;  %v3447_v13 = vmul.f32 %v16471_v62, %v12285_v60  ;;  %v5694_v18 = vrot.slane %v5667_v2, 3  ;;  %v15716_v8 = vrot.slane %v12359_v22, 6  ;;  %v3526_v5 = vmul.f32 %v16472_v39, %v12325_v21 }
 0x351   : > { %v5777_v28 = vrot.slane %v5750_v27, 6  ;;  %v5785_v57 = vrot.slane %v5754_v9, 6  ;;  %v12376_v59 = vsel %vm1595_vm11, %v15717_v7, %v5696_v36  ;;  %v3470_v15 = vrot.slane %v3443_v45, 3 }
 0x352   : > { %16473 = vst [vmem:[#allocation73_spill] sm:$0xff] %v12376_v59  ;;  %v3478_v52 = vrot.slane %v3447_v13, 3  ;;  %v3721_v51 = vrot.slane %v12269_v17, 4  ;;  %v16474_v48 = vrot.slane %v11883_v24, 3  ;;  %v12385_v27 = vsel %vm1595_vm11, %v5694_v18, %v5702_v43  ;;  %v16504_v59 = vld [vmem:[#allocation125_spill] sm:$0xff] }
 0x353   : > { %16476 = vst [vmem:[#allocation224_spill] sm:$0xff] %v12385_v27  ;;  %v16477_v62 = vrot.slane %v11906_v54, 6  ;;  %v12395_v36 = vsel %vm1278_vm4, %v15716_v8, %v5779_v35  ;;  %v12398_v17 = vsel %vm1278_vm4, %v5777_v28, %v5785_v57  ;;  %v16481_v24 = vrot.slane %v11920_v32, 3  ;;  %v16483_v32 = vld [vmem:[#allocation89_spill] sm:$0xff] }
 0x354   : > { %v12382_v2 = vsel %vm1595_vm11, %v16474_v48, %v5694_v18  ;;  %16479 = vst [vmem:[#allocation226_spill] sm:$0xff] %v12395_v36  ;;  %16480 = vst [vmem:[#allocation227_spill] sm:$0xff] %v12398_v17  ;;  %v3479_v43 = vsel %vm1595_vm11, %v3470_v15, %v3478_v52  ;;  %v3530_v13 = vmul.f32 %v16472_v39, %v12285_v60  ;;  %v3553_v18 = vrot.slane %v3526_v5, 6  ;;  %v16485_v5 = vld [vmem:[#allocation94_spill] sm:$0xff] }
 0x355   : > { %16475 = vst [vmem:[#allocation124_spill] sm:$0xff] %v12382_v2  ;;  %v12390_v9 = vsel %vm1278_vm4, %v16477_v62, %v5777_v28  ;;  %v3471_v48 = vsel %vm1595_vm11, %v16481_v24, %v3470_v15  ;;  %v3495_v54 = vadd.f32 %v3479_v43, %v3412_v50  ;;  %v16482_v62 = vld [vmem:[#allocation127_spill] sm:$0xff]  ;;  %v3688_v57 = vmul.f32 %v16483_v32, %v12325_v21 }
 0x356   : > { %16478 = vst [vmem:[#allocation225_spill] sm:$0xff] %v12390_v9  ;;  %v3491_v45 = vadd.f32 %v3471_v48, %v11960_v61  ;;  %v3605_v35 = vmul.f32 %v16482_v62, %v12325_v21  ;;  %v12411_v28 = vmul.f32 %v16482_v62, %v12285_v60  ;;  %v12417_v52 = vmul.f32 %v16483_v32, %v12285_v60 }
 0x357   : > { %v16484_v61 = vrot.slane %v11924_v16, 6  ;;  %v3561_v39 = vrot.slane %v3530_v13, 6  ;;  %v3771_v15 = vmul.f32 %v16485_v5, %v12325_v21  ;;  %v12426_v24 = vmul.f32 %v16485_v5, %v12285_v60 }
 0x358   : > { %v3635_v43 = vrot.slane %v3605_v35, 1  ;;  %v15718_v8 = vrot.slane %v12411_v28, 1  ;;  %v3718_v7 = vrot.slane %v3688_v57, 4  ;;  %v15719_v27 = vrot.slane %v12417_v52, 4  ;;  %v16486_v35 = vld [vmem:[#allocation58_spill] sm:$0xff] }
 0x359   : > { %v3554_v50 = vsel %vm1278_vm4, %v16484_v61, %v3553_v18  ;;  %v3562_v17 = vsel %vm1278_vm4, %v3553_v18, %v3561_v39  ;;  %v3801_v16 = vrot.slane %v3771_v15, 7  ;;  %v15720_v61 = vrot.slane %v12426_v24, 7  ;;  %v16487_v18 = vld [vmem:[#allocation118_spill] sm:$0xff] }
 0x35a   : > { %v3574_v48 = vadd.f32 %v3554_v50, %v3491_v45  ;;  %v12434_v13 = vmul.f32 %v16454_v4, %v12081_v20  ;;  %v12436_v9 = vadd.f32 %v3562_v17, %v3495_v54  ;;  %v3637_v45 = vsel %vm1427_vm9, %v3635_v43, %v15718_v8 }
 0x35b   : > { %v12443_v57 = vmul.f32 %v16486_v35, %v12285_v60  ;;  %v12447_v50 = vmul.f32 %v16487_v18, %v12192_v58  ;;  %v3720_v4 = vsel %vm1679_vm12, %v3718_v7, %v15719_v27  ;;  %v3803_v17 = vsel %vm3312_vm0, %v3801_v16, %v15720_v61  ;;  %v16491_v7 = vld [vmem:[#allocation53_spill] sm:$0xff] }
 0x35c   : > { %v3657_v39 = vadd.f32 %v3637_v45, %v3574_v48  ;;  %v12457_v54 = vadd.f32 %v12293_v44, %v12265_v1  ;;  %v16488_v15 = vrot.slane %v12240_v11, 4  ;;  %v16489_v43 = vrot.slane %v12258_v34, 4  ;;  %v16490_v48 = vld [vmem:[#allocation51_spill] sm:$0xff]  ;;  %v16492_v1 = vld [vmem:[#allocation92_spill] sm:$0xff]  ;;  %v16495_v11 = vld [vmem:[#allocation129_spill] sm:$0xff] }
 0x35d   : > { %v12466_v45 = vmul.f32 %v16490_v48, %v12192_v58  ;;  %v12470_v27 = vmul.f32 %v16491_v7, %v12192_v58  ;;  %v12476_v44 = vmul.f32 %v16492_v1, %v11901_v10  ;;  %v12489_v16 = vmul.f32 %v16494_v26, %v12192_v58 }
 0x35e   : > { %v3711_v8 = vsel %vm1679_vm12, %v16489_v43, %v16488_v15  ;;  %v3740_v2 = vadd.f32 %v3720_v4, %v3657_v39  ;;  %v16493_v34 = vmov %v16488_v15  ;;  %v12493_v61 = vmul.f32 %v16492_v1, %v12081_v20  ;;  %v12510_v1 = vpop.permute.xlu0 %3351 }
 0x35f   : > { %v12481_v15 = vsel %vm1679_vm12, %v16493_v34, %v3721_v51  ;;  %v12484_v43 = vadd.f32 %v3711_v8, %v12318_v6  ;;  %v5826_v51 = vmul.f32 %v16495_v11, %v12325_v21  ;;  %v16496_v8 = vld [vmem:[#allocation144_spill] sm:$0xff]  ;;  %v12508_v20 = vmul.f32 %v16495_v11, %v12285_v60  ;;  %v16500_v6 = vld [vmem:[#allocation85_spill] sm:$0xff] }
 0x360   : > { %v3823_v39 = vadd.f32 %v3803_v17, %v3740_v2  ;;  %v12504_v34 = vsel %vm1337_vm13, %v16496_v8, %v12144_v53  ;;  %v16498_v2 = vld [vmem:[#allocation154_spill] sm:$0xff]  ;;  %v5909_v4 = vmul.f32 %v16500_v6, %v12325_v21  ;;  %v12522_v10 = vmul.f32 %v16500_v6, %v12285_v60  ;;  %v16502_v8 = vld [vmem:[#allocation136_spill] sm:$0xff] }
 0x361   : > { %16497 = vst [vmem:[#allocation127_spill] sm:$0xff] %v12508_v20  ;;  %v12516_v17 = vsel %vm1337_vm13, %v16498_v2, %v12182_v3  ;;  %v5850_v63 = vrot.slane %v5826_v51, 1  ;;  %v5992_v53 = vmul.f32 %v16502_v8, %v12325_v21  ;;  %v12530_v22 = vmul.f32 %v16502_v8, %v12285_v60 }
 0x362   : > { %16499 = vst [vmem:[#allocation89_spill] sm:$0xff] %v12516_v17  ;;  %16501 = vst [vmem:[#allocation94_spill] sm:$0xff] %v12522_v10  ;;  %v12534_v51 = vmul.f32 %v16487_v18, %v12504_v34  ;;  %v5933_v2 = vrot.slane %v5909_v4, 4  ;;  %v15731_v0 = vrot.slane %v12522_v10, 4  ;;  %v12541_v36 = vsel %vm1740_vm14, %v12510_v1, %v16398_v25 }
 0x363   : > { %16503 = vst [vmem:[#allocation58_spill] sm:$0xff] %v12530_v22  ;;  %v4018_v21 = vmul.f32 %v16504_v59, %v12516_v17  ;;  %v16505_v3 = vrot.slane %v12508_v20, 1  ;;  %v6016_v8 = vrot.slane %v5992_v53, 7  ;;  %v15734_v6 = vrot.slane %v12530_v22, 7  ;;  %v16509_v22 = vld [vmem:[#allocation128_spill] sm:$0xff] }
 0x364   : > { %v12554_v4 = vsel %vm1679_vm12, %v5933_v2, %v15731_v0  ;;  %v3613_v25 = vmul.f32 %v16482_v62, %v12541_v36  ;;  %v3696_v11 = vmul.f32 %v16483_v32, %v12541_v36  ;;  %v3779_v20 = vmul.f32 %v16485_v5, %v12541_v36 }
 0x365   : > { %v12548_v60 = vsel %vm1427_vm9, %v5850_v63, %v16505_v3  ;;  %16507 = vst [vmem:[#allocation51_spill] sm:$0xff] %v12554_v4  ;;  %v12564_v3 = vmul.f32 %v16490_v48, %v12504_v34  ;;  %v12568_v53 = vmul.f32 %v16491_v7, %v12504_v34  ;;  %v12573_v63 = vsel %vm3312_vm0, %v6016_v8, %v15734_v6 }
 0x366   : > { %16506 = vst [vmem:[#allocation118_spill] sm:$0xff] %v12548_v60  ;;  %16508 = vst [vmem:[#allocation53_spill] sm:$0xff] %v12573_v63  ;;  %v3858_v62 = vmul.f32 %v16486_v35, %v12541_v36  ;;  %v4263_v32 = vmul.f32 %v16490_v48, %v12516_v17  ;;  %v3644_v5 = vrot.slane %v3613_v25, 1  ;;  %v3727_v2 = vrot.slane %v3696_v11, 4 }
 0x367   : > { %v3810_v0 = vrot.slane %v3779_v20, 7  ;;  %v12581_v4 = vmul.f32 %v16494_v26, %v12504_v34  ;;  %v3884_v60 = vrot.slane %v12443_v57, 2  ;;  %v4101_v10 = vmul.f32 %v16509_v22, %v12516_v17 }
 0x368   : > { %v3885_v8 = vrot.slane %v3858_v62, 2  ;;  %v4045_v6 = vrot.slane %v4018_v21, 3  ;;  %v16510_v63 = vrot.slane %v12411_v28, 1  ;;  %v16511_v48 = vrot.slane %v12417_v52, 4 }
 0x369   : > { %v16512_v20 = vrot.slane %v12426_v24, 7  ;;  %v4219_v25 = vrot.slane %v12534_v51, 1  ;;  %v4180_v57 = vmul.f32 %v16487_v18, %v12516_v17  ;;  %v4302_v28 = vrot.slane %v12564_v3, 4 }
 0x36a   : > { %v3645_v35 = vsel %vm1427_vm9, %v16510_v63, %v3644_v5  ;;  %v3728_v11 = vsel %vm1679_vm12, %v16511_v48, %v3727_v2  ;;  %v3886_v21 = vsel %vm1511_vm10, %v3884_v60, %v3885_v8  ;;  %v4293_v63 = vrot.slane %v4263_v32, 4 }
 0x36b   : > { %v3811_v26 = vsel %vm3312_vm0, %v16512_v20, %v3810_v0  ;;  %v3661_v62 = vadd.f32 %v3645_v35, %v12436_v9  ;;  %v4346_v52 = vmul.f32 %v16491_v7, %v12516_v17  ;;  %v3906_v5 = vadd.f32 %v3886_v21, %v3823_v39 }
 0x36c   : > { %v4128_v2 = vrot.slane %v4101_v10, 6  ;;  %v12605_v0 = vmul.f32 %v11648_v30, %v12345_v46  ;;  %v12609_v18 = vmul.f32 %v11656_v33, %v12345_v46  ;;  %v3979_v60 = vmul.f32 %v11629_v40, %v12516_v17  ;;  %v16514_v10 = vld [vmem:[#allocation185_spill] sm:$0xff] }
 0x36d   : > { %v3744_v24 = vadd.f32 %v3728_v11, %v3661_v62  ;;  %v4022_v9 = vmul.f32 %v16504_v59, %v12192_v58  ;;  %v16513_v51 = vrot.slane %v11943_v56, 3  ;;  %v3983_v39 = vadd.f32 %v16514_v10, %v3906_v5  ;;  %v16516_v11 = vld [vmem:[#allocation139_spill] sm:$0xff]  ;;  %v16689_v17 = vld [vmem:[#allocation201_spill] sm:$0xff] }
 0x36e   : > { %v4210_v3 = vrot.slane %v4180_v57, 1  ;;  %v3467_v30 = vrot.slane %v12609_v18, 3  ;;  %v12622_v35 = vmul.f32 %v11666_v31, %v12345_v46  ;;  %v4105_v40 = vmul.f32 %v16509_v22, %v12192_v58 }
 0x36f   : > { %v4046_v7 = vsel %vm1595_vm11, %v16513_v51, %v4045_v6  ;;  %v3827_v32 = vadd.f32 %v3811_v26, %v3744_v24  ;;  %v16515_v48 = vrot.slane %v11928_v41, 2  ;;  %v12631_v20 = vmul.f32 %v16516_v11, %v12345_v46 }
 0x370   : > { %v4066_v56 = vadd.f32 %v4046_v7, %v3983_v39  ;;  %v16517_v26 = vrot.slane %v11947_v42, 6  ;;  %v16518_v21 = vrot.slane %v11980_v49, 3  ;;  %v3550_v41 = vrot.slane %v12622_v35, 6 }
 0x371   : > { %v3894_v59 = vsel %vm1511_vm10, %v3885_v8, %v16515_v48  ;;  %v4460_v8 = vrot.slane %v12581_v4, 2  ;;  %v4053_v5 = vrot.slane %v4022_v9, 3  ;;  %v4376_v7 = vrot.slane %v4346_v52, 7  ;;  %v16522_v52 = vld [vmem:[#allocation141_spill] sm:$0xff] }
 0x372   : > { %v4129_v57 = vsel %vm1278_vm4, %v16517_v26, %v4128_v2  ;;  %v3910_v62 = vadd.f32 %v3894_v59, %v3827_v32  ;;  %v3468_v22 = vsel %vm1595_vm11, %v16518_v21, %v3467_v30  ;;  %v16519_v42 = vrot.slane %v12447_v50, 1  ;;  %v16531_v50 = vld [vmem:[#allocation152_spill] sm:$0xff] }
 0x373   : > { %v4149_v24 = vadd.f32 %v4129_v57, %v4066_v56  ;;  %v3490_v51 = vadd.f32 %v3468_v22, %v12008_v47  ;;  %v16520_v32 = vrot.slane %v11996_v55, 6  ;;  %v4054_v48 = vsel %vm1595_vm11, %v4045_v6, %v4053_v5  ;;  %v16524_v6 = vld [vmem:[#allocation146_spill] sm:$0xff] }
 0x374   : > { %v4212_v10 = vsel %vm1427_vm9, %v4210_v3, %v16519_v42  ;;  %v3987_v39 = vadd.f32 %v3979_v60, %v3910_v62  ;;  %v4136_v59 = vrot.slane %v4105_v40, 6  ;;  %v16521_v4 = vrot.slane %v12466_v45, 4  ;;  %v16523_v60 = vld [vmem:[#allocation145_spill] sm:$0xff]  ;;  %v16525_v62 = vld [vmem:[#allocation150_spill] sm:$0xff] }
 0x375   : > { %v3551_v49 = vsel %vm1278_vm4, %v16520_v32, %v3550_v41  ;;  %v4232_v35 = vadd.f32 %v4212_v10, %v4149_v24  ;;  %v12656_v56 = vmul.f32 %v16522_v52, %v12345_v46  ;;  %v12660_v3 = vmul.f32 %v16523_v60, %v12345_v46 }
 0x376   : > { %v3573_v26 = vadd.f32 %v3551_v49, %v3490_v51  ;;  %v4295_v9 = vsel %vm1679_vm12, %v4293_v63, %v16521_v4  ;;  %v4070_v47 = vadd.f32 %v4054_v48, %v3987_v39  ;;  %v4137_v55 = vsel %vm1278_vm4, %v4128_v2, %v4136_v59  ;;  %v12677_v2 = vpop.permute.xlu1 %3369  ;;  %v16529_v48 = vld [vmem:[#allocation151_spill] sm:$0xff]  ;;  %v16530_v59 = vld [vmem:[#allocation148_spill] sm:$0xff] }
 0x377   : > { %v4315_v57 = vadd.f32 %v4295_v9, %v4232_v35  ;;  %v12665_v40 = vmul.f32 %v16524_v6, %v12280_v37  ;;  %v12669_v21 = vmul.f32 %v16525_v62, %v12345_v46  ;;  %v3741_v63 = vadd.f32 %v12481_v15, %v12457_v54  ;;  %v16528_v54 = vld [vmem:[#allocation147_spill] sm:$0xff] }
 0x378   : > { %v4385_v22 = vrot.slane %v12568_v53, 7  ;;  %v16526_v5 = vrot.slane %v12470_v27, 7  ;;  %v4153_v51 = vadd.f32 %v4137_v55, %v4070_v47  ;;  %v4220_v10 = vsel %vm1427_vm9, %v16519_v42, %v4219_v25 }
 0x379   : > { %v16527_v39 = vrot.slane %v12489_v16, 2  ;;  %v12687_v15 = vmul.f32 %v16528_v54, %v12280_v37  ;;  %v12695_v35 = vmul.f32 %v16530_v59, %v12280_v37  ;;  %v12699_v25 = vmul.f32 %v16531_v50, %v12345_v46 }
 0x37a   : > { %v4378_v24 = vsel %vm3312_vm0, %v4376_v7, %v16526_v5  ;;  %v4236_v53 = vadd.f32 %v4220_v10, %v4153_v51  ;;  %v12691_v7 = vmul.f32 %v16529_v48, %v12345_v46  ;;  %v16532_v16 = vrot.slane %v12253_v14, 7 }
 0x37b   : > { %v4461_v32 = vsel %vm1511_vm10, %v16527_v39, %v4460_v8  ;;  %v4398_v49 = vadd.f32 %v4378_v24, %v4315_v57  ;;  %v16533_v4 = vrot.slane %v12310_v23, 7  ;;  %v16534_v47 = vrot.slane %v12466_v45, 4 }
 0x37c   : > { %v12715_v5 = vsel %vm1740_vm14, %v12677_v2, %v12510_v1  ;;  %v16535_v46 = vrot.slane %v12434_v13, 7  ;;  %v16536_v24 = vmov %v16532_v16  ;;  %v3875_v51 = vrot.slane %v12476_v44, 2  ;;  %v16538_v44 = vld [vmem:[#allocation167_spill] sm:$0xff] }
 0x37d   : > { %v3794_v9 = vsel %vm3312_vm0, %v16533_v4, %v16532_v16  ;;  %v4303_v55 = vsel %vm1679_vm12, %v16534_v47, %v4302_v28  ;;  %v12709_v57 = vadd.f32 %v4461_v32, %v4398_v49  ;;  %v3876_v45 = vrot.slane %v12493_v61, 2  ;;  %v16541_v4 = vld [vmem:[#allocation184_spill] sm:$0xff] }
 0x37e   : > { %v3805_v23 = vsel %vm3312_vm0, %v16536_v24, %v16535_v46  ;;  %v4319_v42 = vadd.f32 %v4303_v55, %v4236_v53  ;;  %v3820_v28 = vadd.f32 %v3794_v9, %v12484_v43  ;;  %v16537_v10 = vrot.slane %v12470_v27, 7  ;;  %v16543_v47 = vld [vmem:[#allocation164_spill] sm:$0xff] }
 0x37f   : > { %v3446_v1 = vmul.f32 %v11656_v33, %v12289_v29  ;;  %v3529_v13 = vmul.f32 %v11666_v31, %v12289_v29  ;;  %v3824_v14 = vadd.f32 %v3805_v23, %v3741_v63  ;;  %v3632_v49 = vrot.slane %v12631_v20, 1 }
 0x380   : > { %v4386_v39 = vsel %vm3312_vm0, %v16537_v10, %v4385_v22  ;;  %v3608_v61 = vmul.f32 %v16516_v11, %v12289_v29  ;;  %v16539_v53 = vrot.slane %v16538_v44, 2  ;;  %v12740_v27 = vmul.f32 %v11652_v19, %v12280_v37 }
 0x381   : > { %v4402_v32 = vadd.f32 %v4386_v39, %v4319_v42  ;;  %v3476_v22 = vrot.slane %v3446_v1, 3  ;;  %v3559_v33 = vrot.slane %v3529_v13, 6  ;;  %v3877_v16 = vsel %vm1511_vm10, %v3875_v51, %v3876_v45  ;;  %v16546_v51 = vld [vmem:[#allocation165_spill] sm:$0xff] }
 0x382   : > { %v4469_v43 = vsel %vm1511_vm10, %v4460_v8, %v16539_v53  ;;  %v3612_v20 = vmul.f32 %v16516_v11, %v12715_v5  ;;  %v3633_v63 = vrot.slane %v3608_v61, 1  ;;  %v16542_v9 = vrot.slane %v16541_v4, 6  ;;  %v16548_v11 = vld [vmem:[#allocation79_spill] sm:$0xff] }
 0x383   : > { %v12743_v31 = vadd.f32 %v4469_v43, %v4402_v32  ;;  %v16544_v55 = vrot.slane %v16543_v47, 6  ;;  %v3903_v46 = vadd.f32 %v3877_v16, %v3820_v28  ;;  %v3477_v24 = vsel %vm1595_vm11, %v3467_v30, %v3476_v22  ;;  %v16551_v43 = vld [vmem:[#allocation175_spill] sm:$0xff]  ;;  %v16554_v22 = vld [vmem:[#allocation210_spill] sm:$0xff] }
 0x384   : > { %v3560_v23 = vsel %vm1278_vm4, %v3550_v41, %v3559_v33  ;;  %v16547_v42 = vrot.slane %v16546_v51, 2  ;;  %v12763_v39 = vmul.f32 %v16548_v11, %v12280_v37  ;;  %v3494_v1 = vadd.f32 %v3477_v24, %v12605_v0  ;;  %v16549_v41 = vld [vmem:[#allocation81_spill] sm:$0xff] }
 0x385   : > { %16540 = vst [vmem:[#allocation92_spill] sm:$0xff] %v12743_v31  ;;  %v12752_v8 = vsel %vm1278_vm4, %v16544_v55, %v16542_v9  ;;  %v3634_v13 = vsel %vm1427_vm9, %v3632_v49, %v3633_v63  ;;  %v3464_v18 = vrot.slane %v12740_v27, 3  ;;  %v3642_v28 = vrot.slane %v3612_v20, 1  ;;  %v16552_v49 = vld [vmem:[#allocation166_spill] sm:$0xff]  ;;  %v16561_v51 = vld [vmem:[#allocation137_spill] sm:$0xff] }
 0x386   : > { %16545 = vst [vmem:[#allocation75_spill] sm:$0xff] %v12752_v8  ;;  %v3888_v10 = vsel %vm1511_vm10, %v3876_v45, %v16547_v42  ;;  %v3656_v30 = vadd.f32 %v3634_v13, %v3573_v26  ;;  %v12772_v61 = vmul.f32 %v16549_v41, %v12192_v58  ;;  %v3715_v45 = vrot.slane %v12656_v56, 4  ;;  %v16557_v56 = vld [vmem:[#allocation102_spill] sm:$0xff] }
 0x387   : > { %v12767_v32 = vadd.f32 %v3888_v10, %v3824_v14  ;;  %v3577_v44 = vadd.f32 %v3560_v23, %v3494_v1  ;;  %v3691_v53 = vmul.f32 %v16522_v52, %v12289_v29  ;;  %v12778_v0 = vadd.f32 %v16551_v43, %v3903_v46  ;;  %v16559_v46 = vld [vmem:[#allocation187_spill] sm:$0xff] }
 0x388   : > { %16550 = vst [vmem:[#allocation125_spill] sm:$0xff] %v12772_v61  ;;  %v16553_v14 = vrot.slane %v16552_v49, 2  ;;  %v16555_v33 = vrot.slane %v16554_v22, 2  ;;  %v3643_v26 = vsel %vm1427_vm9, %v3633_v63, %v3642_v28  ;;  %v3695_v20 = vmul.f32 %v16522_v52, %v12715_v5  ;;  %v16564_v43 = vld [vmem:[#allocation95_spill] sm:$0xff] }
 0x389   : > { %v12792_v4 = vmul.f32 %v16557_v56, %v12192_v58  ;;  %v15735_v9 = vrot.slane %v12763_v39, 6  ;;  %v3660_v47 = vadd.f32 %v3643_v26, %v3577_v44  ;;  %v3716_v55 = vrot.slane %v3691_v53, 4  ;;  %v16562_v44 = vld [vmem:[#allocation52_spill] sm:$0xff] }
 0x38a   : > { %v12785_v16 = vsel %vm1511_vm10, %v16555_v33, %v16553_v14  ;;  %v16560_v24 = vrot.slane %v16559_v46, 3  ;;  %v12802_v63 = vmul.f32 %v16561_v51, %v12280_v37  ;;  %v3725_v42 = vrot.slane %v3695_v20, 4  ;;  %v16565_v33 = vld [vmem:[#allocation186_spill] sm:$0xff] }
 0x38b   : > { %16556 = vst [vmem:[#allocation128_spill] sm:$0xff] %v12785_v16  ;;  %16558 = vst [vmem:[#allocation185_spill] sm:$0xff] %v12792_v4  ;;  %v3774_v52 = vmul.f32 %v16523_v60, %v12289_v29  ;;  %v3798_v1 = vrot.slane %v12660_v3, 7  ;;  %v3717_v13 = vsel %vm1679_vm12, %v3715_v45, %v3716_v55  ;;  %v3778_v28 = vmul.f32 %v16523_v60, %v12715_v5  ;;  %v16566_v3 = vld [vmem:[#allocation188_spill] sm:$0xff] }
 0x38c   : > { %v3465_v23 = vsel %vm1595_vm11, %v16560_v24, %v3464_v18  ;;  %v12813_v53 = vmul.f32 %v16562_v44, %v12192_v58  ;;  %v12817_v49 = vmul.f32 %v16564_v43, %v12280_v37  ;;  %v3726_v14 = vsel %vm1679_vm12, %v3716_v55, %v3725_v42  ;;  %v16568_v55 = vld [vmem:[#allocation86_spill] sm:$0xff]  ;;  %v16572_v24 = vld [vmem:[#allocation193_spill] sm:$0xff]  ;;  %v16687_v58 = vld [vmem:[#allocation144_spill] sm:$0xff] }
 0x38d   : > { %v3739_v22 = vadd.f32 %v3717_v13, %v3656_v30  ;;  %v12821_v26 = vadd.f32 %v3465_v23, %v16565_v33  ;;  %v16567_v45 = vrot.slane %v16566_v3, 6  ;;  %v3743_v20 = vadd.f32 %v3726_v14, %v3660_v47  ;;  %v16569_v47 = vld [vmem:[#allocation200_spill] sm:$0xff] }
 0x38e   : > { %16563 = vst [vmem:[#allocation139_spill] sm:$0xff] %v12813_v53  ;;  %v3799_v46 = vrot.slane %v3774_v52, 7  ;;  %v5856_v43 = vrot.slane %v12665_v40, 1  ;;  %v3808_v10 = vrot.slane %v3778_v28, 7  ;;  %v3853_v30 = vmul.f32 %v16568_v55, %v12289_v29 }
 0x38f   : > { %v12828_v60 = vsel %vm1278_vm4, %v16567_v45, %v15735_v9  ;;  %v5859_v23 = vrot.slane %v12669_v21, 1  ;;  %v5939_v42 = vrot.slane %v12687_v15, 4  ;;  %v3857_v33 = vmul.f32 %v16568_v55, %v12715_v5 }
 0x390   : > { %v3800_v13 = vsel %vm3312_vm0, %v3798_v1, %v3799_v46  ;;  %v12843_v52 = vsel %vm1740_vm14, %v16569_v47, %v12677_v2  ;;  %v3445_v40 = vmul.f32 %v11652_v19, %v12275_v38  ;;  %v3809_v28 = vsel %vm3312_vm0, %v3799_v46, %v3808_v10  ;;  %v16570_v46 = vld [vmem:[#allocation191_spill] sm:$0xff] }
 0x391   : > { %v3822_v14 = vadd.f32 %v3800_v13, %v3739_v22  ;;  %v5942_v21 = vrot.slane %v12691_v7, 4  ;;  %v6022_v15 = vrot.slane %v12695_v35, 7  ;;  %v6025_v1 = vrot.slane %v12699_v25, 7 }
 0x392   : > { %v3826_v3 = vadd.f32 %v3809_v28, %v3743_v20  ;;  %v3881_v45 = vrot.slane %v3853_v30, 2  ;;  %v3882_v55 = vrot.slane %v3857_v33, 2  ;;  %v5832_v9 = vmul.f32 %v16524_v6, %v12275_v38 }
 0x393   : > { %v5833_v2 = vmul.f32 %v16525_v62, %v12289_v29  ;;  %v12857_v19 = vmul.f32 %v16548_v11, %v12275_v38  ;;  %v12861_v7 = vmul.f32 %v16561_v51, %v12275_v38  ;;  %v5836_v35 = vmul.f32 %v16524_v6, %v12843_v52 }
 0x394   : > { %v5837_v25 = vmul.f32 %v16525_v62, %v12715_v5  ;;  %v3474_v10 = vrot.slane %v3445_v40, 3  ;;  %v12869_v22 = vmul.f32 %v16561_v51, %v12843_v52  ;;  %v3883_v20 = vsel %vm1511_vm10, %v3881_v45, %v3882_v55 }
 0x395   : > { %v16571_v11 = vrot.slane %v16570_v46, 2  ;;  %v3905_v13 = vadd.f32 %v3883_v20, %v3822_v14  ;;  %v5857_v47 = vrot.slane %v5832_v9, 1  ;;  %v5860_v28 = vrot.slane %v5833_v2, 1 }
 0x396   : > { %v3475_v6 = vsel %vm1595_vm11, %v3464_v18, %v3474_v10  ;;  %v5866_v62 = vrot.slane %v5836_v35, 1  ;;  %v5868_v40 = vrot.slane %v5837_v25, 1  ;;  %v5915_v51 = vmul.f32 %v16528_v54, %v12275_v38 }
 0x397   : > { %v3892_v30 = vsel %vm1511_vm10, %v3882_v55, %v16571_v11  ;;  %v12883_v45 = vadd.f32 %v16572_v24, %v3905_v13  ;;  %v12886_v46 = vsel %vm1427_vm9, %v5856_v43, %v5857_v47  ;;  %v12889_v14 = vsel %vm1427_vm9, %v5859_v23, %v5860_v28 }
 0x398   : > { %v12875_v33 = vadd.f32 %v3892_v30, %v3826_v3  ;;  %16573 = vst [vmem:[#allocation141_spill] sm:$0xff] %v12886_v46  ;;  %16574 = vst [vmem:[#allocation145_spill] sm:$0xff] %v12889_v14  ;;  %v5916_v9 = vmul.f32 %v16529_v48, %v12289_v29  ;;  %v12894_v27 = vsel %vm1427_vm9, %v5857_v47, %v5866_v62  ;;  %v5940_v43 = vrot.slane %v5915_v51, 4  ;;  %v16664_v14 = vld [vmem:[#allocation57_spill] sm:$0xff] }
 0x399   : > { %16575 = vst [vmem:[#allocation146_spill] sm:$0xff] %v12894_v27  ;;  %v12897_v18 = vsel %vm1427_vm9, %v5860_v28, %v5868_v40  ;;  %v5919_v3 = vmul.f32 %v16528_v54, %v12843_v52  ;;  %v5920_v24 = vmul.f32 %v16529_v48, %v12715_v5  ;;  %v5998_v23 = vmul.f32 %v16530_v59, %v12275_v38  ;;  %v16584_v40 = vld [vmem:[#allocation138_spill] sm:$0xff] }
 0x39a   : > { %16576 = vst [vmem:[#allocation150_spill] sm:$0xff] %v12897_v18  ;;  %v5943_v55 = vrot.slane %v5916_v9, 4  ;;  %v5999_v2 = vmul.f32 %v16531_v50, %v12289_v29  ;;  %v6002_v10 = vmul.f32 %v16530_v59, %v12843_v52  ;;  %v6003_v20 = vmul.f32 %v16531_v50, %v12715_v5  ;;  %v16628_v18 = vld [vmem:[#allocation178_spill] sm:$0xff] }
 0x39b   : > { %v5949_v35 = vrot.slane %v5919_v3, 4  ;;  %v5951_v25 = vrot.slane %v5920_v24, 4  ;;  %v12912_v54 = vsel %vm1679_vm12, %v5939_v42, %v5940_v43  ;;  %v6023_v11 = vrot.slane %v5998_v23, 7  ;;  %v16583_v42 = vld [vmem:[#allocation134_spill] sm:$0xff] }
 0x39c   : > { %16577 = vst [vmem:[#allocation147_spill] sm:$0xff] %v12912_v54  ;;  %v12915_v48 = vsel %vm1679_vm12, %v5942_v21, %v5943_v55  ;;  %v6026_v30 = vrot.slane %v5999_v2, 7  ;;  %v6032_v28 = vrot.slane %v6002_v10, 7  ;;  %v6034_v62 = vrot.slane %v6003_v20, 7  ;;  %v16672_v54 = vld [vmem:[#allocation196_spill] sm:$0xff] }
 0x39d   : > { %16578 = vst [vmem:[#allocation151_spill] sm:$0xff] %v12915_v48  ;;  %v12918_v13 = vsel %vm1679_vm12, %v5940_v43, %v5949_v35  ;;  %v12921_v47 = vsel %vm1679_vm12, %v5943_v55, %v5951_v25  ;;  %v12924_v59 = vsel %vm3312_vm0, %v6022_v15, %v6023_v11  ;;  %v6077_v21 = vmul.f32 %v16583_v42, %v12275_v38  ;;  %v16587_v43 = vld [vmem:[#allocation140_spill] sm:$0xff] }
 0x39e   : > { %16579 = vst [vmem:[#allocation148_spill] sm:$0xff] %v12918_v13  ;;  %16580 = vst [vmem:[#allocation152_spill] sm:$0xff] %v12921_v47  ;;  %v12927_v50 = vsel %vm3312_vm0, %v6025_v1, %v6026_v30  ;;  %v6078_v51 = vmul.f32 %v16584_v40, %v12289_v29  ;;  %v12934_v9 = vsel %vm3312_vm0, %v6023_v11, %v6032_v28  ;;  %v3557_v29 = vrot.slane %v12857_v19, 6  ;;  %v16667_v13 = vld [vmem:[#allocation48_spill] sm:$0xff] }
 0x39f   : > { %16581 = vst [vmem:[#allocation167_spill] sm:$0xff] %v12924_v59  ;;  %16582 = vst [vmem:[#allocation184_spill] sm:$0xff] %v12927_v50  ;;  %v12937_v3 = vsel %vm3312_vm0, %v6026_v30, %v6034_v62  ;;  %v6081_v24 = vmul.f32 %v16583_v42, %v12843_v52  ;;  %v6082_v15 = vmul.f32 %v16584_v40, %v12715_v5  ;;  %v3640_v23 = vrot.slane %v12869_v22, 1  ;;  %v16590_v22 = vld [vmem:[#allocation194_spill] sm:$0xff]  ;;  %v16633_v50 = vld [vmem:[#allocation180_spill] sm:$0xff] }
 0x3a0   : > { %16585 = vst [vmem:[#allocation164_spill] sm:$0xff] %v12934_v9  ;;  %16586 = vst [vmem:[#allocation165_spill] sm:$0xff] %v12937_v3  ;;  %v3572_v1 = vadd.f32 %v12828_v60, %v12821_v26  ;;  %v3686_v55 = vmul.f32 %v16587_v43, %v12280_v37  ;;  %v6105_v2 = vrot.slane %v6077_v21, 2  ;;  %v6108_v25 = vrot.slane %v6078_v51, 2  ;;  %v16596_v21 = vld [vmem:[#allocation142_spill] sm:$0xff] }
 0x3a1   : > { %v6106_v35 = vrot.slane %v6081_v24, 2  ;;  %v6109_v10 = vrot.slane %v6082_v15, 2  ;;  %v3493_v20 = vadd.f32 %v3475_v6, %v12817_v49  ;;  %v3630_v11 = vrot.slane %v12861_v7, 1  ;;  %v16593_v49 = vld [vmem:[#allocation195_spill] sm:$0xff] }
 0x3a2   : > { %v3690_v5 = vmul.f32 %v16587_v43, %v12275_v38  ;;  %v3694_v26 = vmul.f32 %v16587_v43, %v12843_v52  ;;  %v16591_v30 = vrot.slane %v16590_v22, 2  ;;  %v16594_v6 = vrot.slane %v16593_v49, 2 }
 0x3a3   : > { %v12956_v60 = vsel %vm1511_vm10, %v6105_v2, %v6106_v35  ;;  %v12959_v19 = vsel %vm1511_vm10, %v6108_v25, %v6109_v10  ;;  %v6371_v62 = vmul.f32 %v16549_v41, %v12504_v34  ;;  %v3712_v42 = vrot.slane %v3686_v55, 4 }
 0x3a4   : > { %16588 = vst [vmem:[#allocation79_spill] sm:$0xff] %v12956_v60  ;;  %16589 = vst [vmem:[#allocation175_spill] sm:$0xff] %v12959_v19  ;;  %v12964_v28 = vsel %vm1511_vm10, %v6106_v35, %v16591_v30  ;;  %v12969_v7 = vsel %vm1511_vm10, %v6109_v10, %v16594_v6  ;;  %v3769_v40 = vmul.f32 %v16596_v21, %v12280_v37  ;;  %v16597_v51 = vrot.slane %v12802_v63, 1  ;;  %v3932_v6 = vpop.permute.xlu0 %3931  ;;  %v16602_v63 = vld [vmem:[#allocation129_spill] sm:$0xff]  ;;  %v16668_v60 = vld [vmem:[#allocation84_spill] sm:$0xff] }
 0x3a5   : > { %16592 = vst [vmem:[#allocation166_spill] sm:$0xff] %v12964_v28  ;;  %16595 = vst [vmem:[#allocation210_spill] sm:$0xff] %v12969_v7  ;;  %v6454_v15 = vmul.f32 %v16557_v56, %v12504_v34  ;;  %v16598_v43 = vrot.slane %v12763_v39, 6  ;;  %v3641_v35 = vsel %vm1427_vm9, %v3630_v11, %v3640_v23  ;;  %v3713_v22 = vrot.slane %v3690_v5, 4  ;;  %v16603_v10 = vld [vmem:[#allocation85_spill] sm:$0xff] }
 0x3a6   : > { %v3631_v24 = vsel %vm1427_vm9, %v16597_v51, %v3630_v11  ;;  %v3773_v37 = vmul.f32 %v16596_v21, %v12275_v38  ;;  %v6537_v30 = vmul.f32 %v16562_v44, %v12504_v34  ;;  %v3723_v49 = vrot.slane %v3694_v26, 4 }
 0x3a7   : > { %v3558_v2 = vsel %vm1278_vm4, %v16598_v43, %v3557_v29  ;;  %v3655_v25 = vadd.f32 %v3631_v24, %v3572_v1  ;;  %v3777_v39 = vmul.f32 %v16596_v21, %v12843_v52  ;;  %v12992_v29 = vpop.permute.xlu1 %3933  ;;  %v3795_v23 = vrot.slane %v3769_v40, 7  ;;  %v16600_v43 = vld [vmem:[#allocation109_spill] sm:$0xff] }
 0x3a8   : > { %v3576_v55 = vadd.f32 %v3558_v2, %v3493_v20  ;;  %v3714_v11 = vsel %vm1679_vm12, %v3712_v42, %v3713_v22  ;;  %v16599_v20 = vld [vmem:[#allocation70_spill] sm:$0xff]  ;;  %v6399_v51 = vrot.slane %v6371_v62, 1  ;;  %v6482_v24 = vrot.slane %v6454_v15, 4  ;;  %v16605_v62 = vld [vmem:[#allocation69_spill] sm:$0xff] }
 0x3a9   : > { %v3856_v5 = vmul.f32 %v16599_v20, %v12843_v52  ;;  %v12999_v2 = vmul.f32 %v16600_v43, %v12504_v34  ;;  %v3738_v26 = vadd.f32 %v3714_v11, %v3655_v25  ;;  %v5834_v21 = vmul.f32 %v16602_v63, %v12541_v36  ;;  %v16604_v52 = vld [vmem:[#allocation136_spill] sm:$0xff] }
 0x3aa   : > { %v3659_v1 = vadd.f32 %v3641_v35, %v3576_v55  ;;  %v5917_v40 = vmul.f32 %v16603_v10, %v12541_v36  ;;  %v3796_v35 = vrot.slane %v3773_v37, 7  ;;  %v3852_v42 = vmul.f32 %v16599_v20, %v12275_v38 }
 0x3ab   : > { %16601 = vst [vmem:[#allocation187_spill] sm:$0xff] %v12999_v2  ;;  %v6000_v55 = vmul.f32 %v16604_v52, %v12541_v36  ;;  %v6079_v15 = vmul.f32 %v16605_v62, %v12541_v36  ;;  %v3724_v34 = vsel %vm1679_vm12, %v3713_v22, %v3723_v49  ;;  %v3806_v7 = vrot.slane %v3777_v39, 7  ;;  %v3916_v22 = vpop.permute.xlu1 %3915  ;;  %v16610_v49 = vld [vmem:[#allocation149_spill] sm:$0xff] }
 0x3ac   : > { %v6565_v25 = vrot.slane %v6537_v30, 7  ;;  %v3742_v11 = vadd.f32 %v3724_v34, %v3659_v1  ;;  %v3797_v63 = vsel %vm3312_vm0, %v3795_v23, %v3796_v35  ;;  %v3879_v3 = vrot.slane %v3856_v5, 2  ;;  %v16611_v1 = vld [vmem:[#allocation212_spill] sm:$0xff] }
 0x3ad   : > { %v16606_v10 = vrot.slane %v12772_v61, 1  ;;  %v16608_v38 = vrot.slane %v12792_v4, 4  ;;  %v15736_v36 = vrot.slane %v12999_v2, 2  ;;  %v3821_v52 = vadd.f32 %v3797_v63, %v3738_v26  ;;  %v16613_v63 = vld [vmem:[#allocation135_spill] sm:$0xff] }
 0x3ae   : > { %v6075_v30 = vmul.f32 %v16605_v62, %v16610_v49  ;;  %v5862_v39 = vrot.slane %v5834_v21, 1  ;;  %v3878_v23 = vrot.slane %v3852_v42, 2  ;;  %v13029_v5 = vsel %vm1337_vm13, %v16611_v1, %v3932_v6  ;;  %v16615_v42 = vld [vmem:[#allocation205_spill] sm:$0xff] }
 0x3af   : > { %v13016_v37 = vsel %vm1427_vm9, %v16606_v10, %v6399_v51  ;;  %v13021_v20 = vsel %vm1679_vm12, %v16608_v38, %v6482_v24  ;;  %16612 = vst [vmem:[#allocation186_spill] sm:$0xff] %v13029_v5  ;;  %v3914_v51 = vpop.permute.xlu0 %3913  ;;  %v5945_v34 = vrot.slane %v5917_v40, 4  ;;  %v6028_v10 = vrot.slane %v6000_v55, 7  ;;  %v16619_v55 = vld [vmem:[#allocation171_spill] sm:$0xff]  ;;  %v16623_v1 = vld [vmem:[#allocation121_spill] sm:$0xff] }
 0x3b0   : > { %16607 = vst [vmem:[#allocation137_spill] sm:$0xff] %v13016_v37  ;;  %16609 = vst [vmem:[#allocation95_spill] sm:$0xff] %v13021_v20  ;;  %v6100_v47 = vrot.slane %v6079_v15, 2  ;;  %v3807_v24 = vsel %vm3312_vm0, %v3796_v35, %v3806_v7  ;;  %v3880_v26 = vsel %vm1511_vm10, %v3878_v23, %v3879_v3  ;;  %v13037_v21 = vsel %vm1337_vm13, %v16613_v63, %v12992_v29  ;;  %v16626_v63 = vld [vmem:[#allocation222_spill] sm:$0xff] }
 0x3b1   : > { %v3825_v38 = vadd.f32 %v3807_v24, %v3742_v11  ;;  %16614 = vst [vmem:[#allocation188_spill] sm:$0xff] %v13037_v21  ;;  %v13041_v62 = vadd.f32 %v16615_v42, %v12709_v57  ;;  %v16617_v49 = vrot.slane %v12813_v53, 7  ;;  %v16620_v7 = vrot.slane %v16619_v55, 2  ;;  %v16622_v11 = vld [vmem:[#allocation153_spill] sm:$0xff]  ;;  %v16624_v24 = vld [vmem:[#allocation67_spill] sm:$0xff] }
 0x3b2   : > { %v3904_v15 = vadd.f32 %v3880_v26, %v3821_v52  ;;  %v4015_v23 = vmul.f32 %v16622_v11, %v13029_v5  ;;  %v13059_v57 = vmul.f32 %v16624_v24, %v16623_v1  ;;  %v16627_v42 = vrot.slane %v16626_v63, 3  ;;  %v16631_v55 = vld [vmem:[#allocation223_spill] sm:$0xff]  ;;  %v16639_v24 = vld [vmem:[#allocation94_spill] sm:$0xff] }
 0x3b3   : > { %16616 = vst [vmem:[#allocation86_spill] sm:$0xff] %v13041_v62  ;;  %v13046_v40 = vsel %vm3312_vm0, %v16617_v49, %v6565_v25  ;;  %v13053_v35 = vsel %vm1511_vm10, %v15736_v36, %v16620_v7  ;;  %v16629_v25 = vrot.slane %v16628_v18, 3  ;;  %v16632_v19 = vrot.slane %v16631_v55, 6  ;;  %v16636_v36 = vld [vmem:[#allocation127_spill] sm:$0xff]  ;;  %v16691_v62 = vld [vmem:[#allocation172_spill] sm:$0xff] }
 0x3b4   : > { %16618 = vst [vmem:[#allocation200_spill] sm:$0xff] %v13046_v40  ;;  %16621 = vst [vmem:[#allocation191_spill] sm:$0xff] %v13053_v35  ;;  %v16634_v7 = vrot.slane %v16633_v50, 6  ;;  %v6099_v26 = vrot.slane %v6075_v30, 2  ;;  %v16637_v48 = vrot.slane %v16636_v36, 1  ;;  %v16640_v63 = vrot.slane %v16639_v24, 4 }
 0x3b5   : > { %16625 = vst [vmem:[#allocation193_spill] sm:$0xff] %v13059_v57  ;;  %v13066_v49 = vsel %vm1595_vm11, %v16629_v25, %v16627_v42  ;;  %v16642_v42 = vld [vmem:[#allocation190_spill] sm:$0xff]  ;;  %v4019_v50 = vmul.f32 %v16622_v11, %v13037_v21  ;;  %v16652_v11 = vld [vmem:[#allocation192_spill] sm:$0xff]  ;;  %v4264_v28 = vmul.f32 %v16664_v14, %v13037_v21  ;;  %v3976_v27 = vmul.f32 %v16667_v13, %v13029_v5 }
 0x3b6   : > { %16630 = vst [vmem:[#allocation134_spill] sm:$0xff] %v13066_v49  ;;  %v13073_v52 = vsel %vm1278_vm4, %v16634_v7, %v16632_v19  ;;  %v13078_v1 = vsel %vm1427_vm9, %v16637_v48, %v5862_v39  ;;  %v13083_v18 = vsel %vm1679_vm12, %v16640_v63, %v5945_v34  ;;  %v16643_v25 = vrot.slane %v16642_v42, 2  ;;  %v13090_v19 = vpop.permute.xlu1 %3935  ;;  %v16644_v30 = vld [vmem:[#allocation58_spill] sm:$0xff]  ;;  %v16648_v39 = vld [vmem:[#allocation183_spill] sm:$0xff] }
 0x3b7   : > { %16635 = vst [vmem:[#allocation138_spill] sm:$0xff] %v13073_v52  ;;  %16638 = vst [vmem:[#allocation140_spill] sm:$0xff] %v13078_v1  ;;  %v16645_v7 = vrot.slane %v16644_v30, 7  ;;  %v13098_v48 = vsel %vm1511_vm10, %v6099_v26, %v6100_v47  ;;  %v16649_v34 = vrot.slane %v16648_v39, 2  ;;  %v13110_v42 = vadd.f32 %v16652_v11, %v3904_v15  ;;  %v16659_v15 = vld [vmem:[#allocation49_spill] sm:$0xff] }
 0x3b8   : > { %16641 = vst [vmem:[#allocation194_spill] sm:$0xff] %v13083_v18  ;;  %v3890_v55 = vsel %vm1511_vm10, %v3879_v3, %v16643_v25  ;;  %16647 = vst [vmem:[#allocation142_spill] sm:$0xff] %v13098_v48  ;;  %v13107_v3 = vpop.permute.xlu0 %4488  ;;  %v16653_v25 = vld [vmem:[#allocation154_spill] sm:$0xff]  ;;  %v13119_v26 = vsel %vm1337_vm13, %v3932_v6, %v3914_v51  ;;  %v4036_v30 = vrot.slane %v4015_v23, 3  ;;  %v4181_v39 = vmul.f32 %v16659_v15, %v13037_v21 }
 0x3b9   : > { %v13095_v36 = vsel %vm3312_vm0, %v16645_v7, %v6028_v10  ;;  %v13103_v24 = vsel %vm1511_vm10, %v6100_v47, %v16649_v34  ;;  %v13105_v63 = vadd.f32 %v3890_v55, %v3825_v38  ;;  %16651 = vst [vmem:[#allocation129_spill] sm:$0xff] %v13107_v3  ;;  %v13115_v10 = vsel %vm1337_vm13, %v3914_v51, %v16653_v25  ;;  %v16656_v7 = vld [vmem:[#allocation170_spill] sm:$0xff]  ;;  %v16658_v38 = vld [vmem:[#allocation155_spill] sm:$0xff]  ;;  %v16660_v34 = vld [vmem:[#allocation208_spill] sm:$0xff] }
 0x3ba   : > { %16646 = vst [vmem:[#allocation195_spill] sm:$0xff] %v13095_v36  ;;  %16650 = vst [vmem:[#allocation70_spill] sm:$0xff] %v13103_v24  ;;  %v13124_v47 = vsel %vm1337_vm13, %v3916_v22, %v16656_v7  ;;  %v4102_v55 = vmul.f32 %v16658_v38, %v13037_v21  ;;  %v13134_v11 = vsel %vm1337_vm13, %v16660_v34, %v13090_v19  ;;  %v16662_v51 = vld [vmem:[#allocation163_spill] sm:$0xff]  ;;  %v4047_v25 = vrot.slane %v4019_v50, 3  ;;  %v16665_v34 = vld [vmem:[#allocation74_spill] sm:$0xff] }
 0x3bb   : > { %16654 = vst [vmem:[#allocation85_spill] sm:$0xff] %v13115_v10  ;;  %16655 = vst [vmem:[#allocation136_spill] sm:$0xff] %v13119_v26  ;;  %v13139_v6 = vsel %vm1337_vm13, %v12992_v29, %v3916_v22  ;;  %v13145_v23 = vsel %vm2519_vm15, %v13107_v3, %v16662_v51  ;;  %v4098_v7 = vmul.f32 %v16658_v38, %v13029_v5  ;;  %v16666_v29 = vld [vmem:[#allocation156_spill] sm:$0xff]  ;;  %v16670_v38 = vld [vmem:[#allocation59_spill] sm:$0xff]  ;;  %v16673_v46 = vrot.slane %v16672_v54, 3 }
 0x3bc   : > { %16657 = vst [vmem:[#allocation69_spill] sm:$0xff] %v13124_v47  ;;  %16661 = vst [vmem:[#allocation149_spill] sm:$0xff] %v13139_v6  ;;  %v13153_v9 = vmul.f32 %v16665_v34, %v13037_v21  ;;  %v13157_v22 = vmul.f32 %v16666_v29, %v13037_v21  ;;  %v13163_v50 = vmul.f32 %v16668_v60, %v13037_v21  ;;  %v4130_v40 = vrot.slane %v4102_v55, 6  ;;  %v16674_v24 = vld [vmem:[#allocation96_spill] sm:$0xff] }
 0x3bd   : > { %16663 = vst [vmem:[#allocation212_spill] sm:$0xff] %v13145_v23  ;;  %v13167_v59 = vmul.f32 %v16670_v38, %v13037_v21  ;;  %v4037_v16 = vsel %vm1595_vm11, %v16673_v46, %v4036_v30  ;;  %v4185_v35 = vmul.f32 %v16659_v15, %v13134_v11  ;;  %v4202_v20 = vrot.slane %v4181_v39, 1  ;;  %v8206_v1 = vld [vmem:[%s15393_s5 + $0x46] ss:$8 sm:$0xf] }
 0x3be   : > { %16669 = vst [vmem:[#allocation135_spill] sm:$0xff] %v13163_v50  ;;  %v4177_v13 = vmul.f32 %v16659_v15, %v13029_v5  ;;  %v4268_v37 = vmul.f32 %v16664_v14, %v13134_v11  ;;  %v13180_v36 = vmul.f32 %v16674_v24, %v13037_v21  ;;  %v4048_v18 = vsel %vm1595_vm11, %v4036_v30, %v4047_v25 }
 0x3bf   : > { %16671 = vst [vmem:[#allocation205_spill] sm:$0xff] %v13167_v59  ;;  %v4119_v54 = vrot.slane %v4098_v7, 6  ;;  %v4260_v46 = vmul.f32 %v16664_v14, %v13029_v5  ;;  %v4285_v8 = vrot.slane %v4264_v28, 4  ;;  %v3984_v39 = vadd.f32 %v3976_v27, %v12767_v32  ;;  %v16676_v7 = vld [vmem:[#allocation197_spill] sm:$0xff] }
 0x3c0   : > { %16675 = vst [vmem:[#allocation171_spill] sm:$0xff] %v13180_v36  ;;  %v4063_v15 = vadd.f32 %v4037_v16, %v12778_v0  ;;  %v4213_v2 = vrot.slane %v4185_v35, 1  ;;  %v4201_v30 = vrot.slane %v4177_v13, 1  ;;  %v4296_v25 = vrot.slane %v4268_v37, 4 }
 0x3c1   : > { %v4067_v53 = vadd.f32 %v4048_v18, %v3984_v39  ;;  %v4343_v14 = vmul.f32 %v16665_v34, %v13029_v5  ;;  %v16677_v55 = vrot.slane %v16676_v7, 6  ;;  %v4284_v0 = vrot.slane %v4260_v46, 4  ;;  %v16678_v39 = vld [vmem:[#allocation160_spill] sm:$0xff]  ;;  %v16679_v46 = vld [vmem:[#allocation161_spill] sm:$0xff] }
 0x3c2   : > { %v13199_v16 = vmul.f32 %v16665_v34, %v13134_v11  ;;  %v4131_v27 = vsel %vm1278_vm4, %v4119_v54, %v4130_v40  ;;  %v4203_v18 = vsel %vm1427_vm9, %v4201_v30, %v4202_v20  ;;  %v13205_v37 = vmul.f32 %v16666_v29, %v13134_v11  ;;  %v16680_v34 = vld [vmem:[#allocation168_spill] sm:$0xff] }
 0x3c3   : > { %v4120_v32 = vsel %vm1278_vm4, %v16677_v55, %v4119_v54  ;;  %v4214_v13 = vsel %vm1427_vm9, %v4202_v20, %v4213_v2  ;;  %v13210_v7 = vmul.f32 %v16678_v39, %v13139_v6  ;;  %v4021_v55 = vmul.f32 %v16679_v46, %v13124_v47 }
 0x3c4   : > { %v4146_v35 = vadd.f32 %v4120_v32, %v4063_v15  ;;  %v13216_v28 = vmul.f32 %v16680_v34, %v13139_v6  ;;  %v4150_v40 = vadd.f32 %v4131_v27, %v4067_v53  ;;  %v13219_v54 = vsel %vm1679_vm12, %v4284_v0, %v4285_v8  ;;  %v16682_v32 = vld [vmem:[#allocation169_spill] sm:$0xff] }
 0x3c5   : > { %v13222_v29 = vsel %vm1679_vm12, %v4285_v8, %v4296_v25  ;;  %v4367_v15 = vrot.slane %v4343_v14, 7  ;;  %v13227_v20 = vmul.f32 %v16668_v60, %v13029_v5  ;;  %v13231_v30 = vmul.f32 %v16668_v60, %v13134_v11  ;;  %v16686_v14 = vld [vmem:[#allocation55_spill] sm:$0xff] }
 0x3c6   : > { %v4104_v53 = vmul.f32 %v16682_v32, %v13124_v47  ;;  %v13235_v27 = vadd.f32 %v4203_v18, %v4146_v35  ;;  %v13237_v0 = vadd.f32 %v4214_v13, %v4150_v40  ;;  %v16683_v8 = vrot.slane %v13153_v9, 7  ;;  %v16684_v35 = vld [vmem:[#allocation18_spill] sm:$0xff]  ;;  %v3918_v13 = vpop.permute.xlu1 %3917  ;;  %v16685_v40 = vld [vmem:[#allocation19_spill] sm:$0xff] }
 0x3c7   : > { %16681 = vst [vmem:[#allocation153_spill] sm:$0xff] %v13227_v20  ;;  %v4051_v57 = vrot.slane %v4021_v55, 3  ;;  %v13251_v18 = vrot.slane %v8206_v1, %v16684_v35  ;;  %v4168_v2 = vrot.slane %v8206_v1, %v16685_v40  ;;  %v3978_v60 = vmul.f32 %v16686_v14, %v13115_v10 }
 0x3c8   : > { %v13242_v25 = vsel %vm3312_vm0, %v4367_v15, %v16683_v8  ;;  %v8207_v15 = vld [vmem:[%s15393_s5 + $0x65] ss:$8 sm:$0xf]  ;;  %v4134_v21 = vrot.slane %v4104_v53, 6  ;;  %v13265_v4 = vmul.f32 %v16678_v39, %v13119_v26  ;;  %v4017_v1 = vmul.f32 %v16679_v46, %v13115_v10 }
 0x3c9   : > { %v13258_v8 = vrot.slane %v8207_v15, %v16684_v35  ;;  %v4251_v55 = vrot.slane %v8207_v15, %v16685_v40  ;;  %v4100_v61 = vmul.f32 %v16682_v32, %v13115_v10  ;;  %v13273_v43 = vmul.f32 %v13251_v18, %v13139_v6  ;;  %v8208_v46 = vld [vmem:[%s15393_s5 + $0x84] ss:$8 sm:$0xf] }
 0x3ca   : > { %v4183_v15 = vmul.f32 %v4168_v2, %v13124_v47  ;;  %v13279_v53 = vsel %vm1337_vm13, %v3918_v13, %v16687_v58  ;;  %v3986_v39 = vadd.f32 %v3978_v60, %v12875_v33  ;;  %v13286_v14 = vrot.slane %v8208_v46, %v16684_v35 }
 0x3cb   : > { %16688 = vst [vmem:[#allocation121_spill] sm:$0xff] %v13279_v53  ;;  %v4334_v32 = vrot.slane %v8208_v46, %v16685_v40  ;;  %v4042_v48 = vrot.slane %v4017_v1, 3  ;;  %v4125_v44 = vrot.slane %v4100_v61, 6  ;;  %v13291_v56 = vmul.f32 %v13258_v8, %v13139_v6 }
 0x3cc   : > { %v4266_v58 = vmul.f32 %v4251_v55, %v13124_v47  ;;  %v13296_v33 = vmul.f32 %v16680_v34, %v13119_v26  ;;  %v4179_v60 = vmul.f32 %v4168_v2, %v13115_v10  ;;  %v16690_v52 = vrot.slane %v16689_v17, 3  ;;  %v16692_v17 = vld [vmem:[#allocation204_spill] sm:$0xff] }
 0x3cd   : > { %v4052_v61 = vsel %vm1595_vm11, %v4042_v48, %v4051_v57  ;;  %v4187_v1 = vmul.f32 %v4168_v2, %v13279_v53  ;;  %v4208_v49 = vrot.slane %v4183_v15, 1  ;;  %v13307_v31 = vmul.f32 %v16691_v62, %v13139_v6 }
 0x3ce   : > { %v4043_v46 = vsel %vm1595_vm11, %v16690_v52, %v4042_v48  ;;  %v4069_v51 = vadd.f32 %v4052_v61, %v3986_v39  ;;  %v13313_v41 = vmul.f32 %v13286_v14, %v13139_v6  ;;  %v16693_v52 = vrot.slane %v16692_v17, 6  ;;  %v16695_v61 = vld [vmem:[#allocation199_spill] sm:$0xff] }
 0x3cf   : > { %v4065_v34 = vadd.f32 %v4043_v46, %v12883_v45  ;;  %v4135_v48 = vsel %vm1278_vm4, %v4125_v44, %v4134_v21  ;;  %v13320_v2 = vmul.f32 %v4334_v32, %v13124_v47  ;;  %v4207_v59 = vrot.slane %v4179_v60, 1  ;;  %v7254_v45 = vld [vmem:[#allocation5 + $0x78] sm:$0xff] }
 0x3d0   : > { %v4126_v57 = vsel %vm1278_vm4, %v16693_v52, %v4125_v44  ;;  %v4152_v36 = vadd.f32 %v4135_v48, %v4069_v51  ;;  %v4291_v39 = vrot.slane %v4266_v58, 4  ;;  %v16694_v46 = vrot.slane %v13265_v4, 3  ;;  %7952 = vmatprep.subr.mxu1 %v7254_v45  ;;  %v7253_v58 = vld [vmem:[#allocation5 + $0x70] sm:$0xff]  ;;  %v7252_v48 = vld [vmem:[#allocation5 + $0x68] sm:$0xff] }
 0x3d1   : > { %v4148_v15 = vadd.f32 %v4126_v57, %v4065_v34  ;;  %v16696_v40 = vrot.slane %v16695_v61, 3  ;;  %v15758_v17 = vrot.slane %v13296_v33, 6  ;;  %v4217_v3 = vrot.slane %v4187_v1, 1  ;;  %7953 = vmatpush3.msra.mxu1 %v7254_v45  ;;  %v16699_v45 = vld [vmem:[#allocation93_spill] sm:$0xff] }
 0x3d2   : > { %v4209_v21 = vsel %vm1427_vm9, %v4207_v59, %v4208_v49  ;;  %v4262_v34 = vmul.f32 %v4251_v55, %v13115_v10  ;;  %v4270_v51 = vmul.f32 %v4251_v55, %v13279_v53  ;;  %v13335_v60 = vsel %vm1337_vm13, %v13090_v19, %v3918_v13  ;;  %7954 = vmatprep.subr.mxu1 %v7253_v58  ;;  %v16700_v13 = vld [vmem:[#allocation203_spill] sm:$0xff] }
 0x3d3   : > { %v4040_v6 = vsel %vm1595_vm11, %v16696_v40, %v16694_v46  ;;  %16697 = vst [vmem:[#allocation67_spill] sm:$0xff] %v13335_v60  ;;  %v4178_v40 = vmul.f32 %v13251_v18, %v13119_v26  ;;  %v4218_v1 = vsel %vm1427_vm9, %v4208_v49, %v4217_v3  ;;  %v4231_v52 = vadd.f32 %v4209_v21, %v4148_v15 }
 0x3d4   : > { %v4064_v44 = vadd.f32 %v4040_v6, %v13110_v42  ;;  %v4374_v59 = vrot.slane %v13320_v2, 7  ;;  %v16698_v42 = vld [vmem:[#allocation173_spill] sm:$0xff]  ;;  %v4235_v55 = vadd.f32 %v4218_v1, %v4152_v36  ;;  %v4290_v57 = vrot.slane %v4262_v34, 4  ;;  %7955 = vmatpush3.msra.mxu1 %v7253_v58  ;;  %v7250_v58 = vld [vmem:[#allocation5 + $0x58] sm:$0xff] }
 0x3d5   : > { %v4428_v6 = vmul.f32 %v16698_v42, %v13124_v47  ;;  %v3977_v19 = vmul.f32 %v16699_v45, %v13119_v26  ;;  %v16701_v46 = vrot.slane %v16700_v13, 6  ;;  %v4300_v3 = vrot.slane %v4270_v51, 4  ;;  %7956 = vmatprep.subr.mxu1 %v7252_v48  ;;  %v7251_v34 = vld [vmem:[#allocation5 + $0x60] sm:$0xff] }
 0x3d6   : > { %v4345_v15 = vmul.f32 %v4334_v32, %v13115_v10  ;;  %v4186_v36 = vmul.f32 %v13251_v18, %v13335_v60  ;;  %v4261_v61 = vmul.f32 %v13258_v8, %v13119_v26  ;;  %v4292_v21 = vsel %vm1679_vm12, %v4290_v57, %v4291_v39  ;;  %7957 = vmatpush3.msra.mxu1 %v7252_v48  ;;  %v16766_v10 = vld [vmem:[#allocation217_spill] sm:$0xff] }
 0x3d7   : > { %v4123_v49 = vsel %vm1278_vm4, %v16701_v46, %v15758_v17  ;;  %v4204_v1 = vrot.slane %v4178_v40, 1  ;;  %v4301_v45 = vsel %vm1679_vm12, %v4291_v39, %v4300_v3  ;;  %v4314_v13 = vadd.f32 %v4292_v21, %v4231_v52  ;;  %7958 = vmatprep.subr.mxu1 %v7251_v34  ;;  %v7249_v17 = vld [vmem:[#allocation5 + $0x50] sm:$0xff] }
 0x3d8   : > { %v4147_v2 = vadd.f32 %v4123_v49, %v4064_v44  ;;  %v4353_v51 = vmul.f32 %v4334_v32, %v13279_v53  ;;  %v4288_v44 = vrot.slane %v13291_v56, 4  ;;  %v3985_v46 = vadd.f32 %v3977_v19, %v13105_v63  ;;  %7959 = vmatpush3.msra.mxu1 %v7251_v34 }
 0x3d9   : > { %v4318_v18 = vadd.f32 %v4301_v45, %v4235_v55  ;;  %v4373_v49 = vrot.slane %v4345_v15, 7  ;;  %v16702_v57 = vrot.slane %v13210_v7, 3  ;;  %v16703_v48 = vrot.slane %v13265_v4, 3  ;;  %7960 = vmatprep.subr.mxu1 %v7250_v58  ;;  %v7248_v7 = vld [vmem:[#allocation5 + $0x48] sm:$0xff] }
 0x3da   : > { %v16704_v39 = vrot.slane %v13273_v43, 1  ;;  %v4383_v32 = vrot.slane %v4353_v51, 7  ;;  %v4432_v3 = vmul.f32 %v16698_v42, %v13279_v53  ;;  %v4215_v63 = vrot.slane %v4186_v36, 1  ;;  %7961 = vmatpush3.msra.mxu1 %v7250_v58 }
 0x3db   : > { %v4050_v40 = vsel %vm1595_vm11, %v16703_v48, %v16702_v57  ;;  %v4287_v19 = vrot.slane %v4261_v61, 4  ;;  %v4375_v15 = vsel %vm3312_vm0, %v4373_v49, %v4374_v59  ;;  %v4344_v4 = vmul.f32 %v13286_v14, %v13119_v26  ;;  %7962 = vmatprep.subr.mxu1 %v7249_v17  ;;  %v7247_v61 = vld [vmem:[#allocation5 + $0x40] sm:$0xff]  ;;  %v7246_v48 = vld [vmem:[#allocation5 + $0x38] sm:$0xff] }
 0x3dc   : > { %v4206_v52 = vsel %vm1427_vm9, %v4204_v1, %v16704_v39  ;;  %v4384_v21 = vsel %vm3312_vm0, %v4374_v59, %v4383_v32  ;;  %v4397_v34 = vadd.f32 %v4375_v15, %v4314_v13  ;;  %v13376_v1 = vmul.f32 %v16691_v62, %v13335_v60  ;;  %7963 = vmatpush3.msra.mxu1 %v7249_v17 }
 0x3dd   : > { %v4230_v55 = vadd.f32 %v4206_v52, %v4147_v2  ;;  %v4456_v42 = vrot.slane %v4428_v6, 2  ;;  %v4068_v45 = vadd.f32 %v4050_v40, %v3985_v46  ;;  %v4401_v36 = vadd.f32 %v4384_v21, %v4318_v18  ;;  %7964 = vmatprep.subr.mxu1 %v7248_v7 }
 0x3de   : > { %v4457_v2 = vrot.slane %v4432_v3, 2  ;;  %v4371_v58 = vrot.slane %v13313_v41, 7  ;;  %v16705_v51 = vrot.slane %v13216_v28, 6  ;;  %v16706_v49 = vrot.slane %v13296_v33, 6  ;;  %v16708_v28 = vld [vmem:[#allocation105_spill] sm:$0xff]  ;;  %7965 = vmatpush3.msra.mxu1 %v7248_v7 }
 0x3df   : > { %v4269_v13 = vmul.f32 %v13258_v8, %v13335_v60  ;;  %v4289_v62 = vsel %vm1679_vm12, %v4287_v19, %v4288_v44  ;;  %v16707_v6 = vmov %v16704_v39  ;;  %v16709_v57 = vrot.slane %v16708_v28, 2  ;;  %7966 = vmatprep.subr.mxu1 %v7247_v61  ;;  %v16722_v28 = vld [vmem:[#allocation56_spill] sm:$0xff] }
 0x3e0   : > { %v4133_v59 = vsel %vm1278_vm4, %v16706_v49, %v16705_v51  ;;  %v4216_v17 = vsel %vm1427_vm9, %v16707_v6, %v4215_v63  ;;  %v4313_v46 = vadd.f32 %v4289_v62, %v4230_v55  ;;  %v4458_v18 = vsel %vm1511_vm10, %v4456_v42, %v4457_v2  ;;  %7967 = vmatpush3.msra.mxu1 %v7247_v61  ;;  %v7245_v55 = vld [vmem:[#allocation5 + $0x30] sm:$0xff]  ;;  %v16717_v61 = vld [vmem:[#allocation198_spill] sm:$0xff] }
 0x3e1   : > { %v4467_v33 = vsel %vm1511_vm10, %v4457_v2, %v16709_v57  ;;  %v4370_v40 = vrot.slane %v4344_v4, 7  ;;  %v4454_v8 = vrot.slane %v13376_v1, 2  ;;  %v4480_v39 = vadd.f32 %v4458_v18, %v4397_v34  ;;  %v16710_v4 = vld [vmem:[#allocation216_spill] sm:$0xff]  ;;  %7968 = vmatprep.subr.mxu1 %v7246_v48 }
 0x3e2   : > { %v13397_v52 = vadd.f32 %v4467_v33, %v4401_v36  ;;  %v4312_v43 = vadd.f32 %v13219_v54, %v13235_v27  ;;  %v6401_v32 = vrot.slane %v13231_v30, 1  ;;  %v4453_v3 = vrot.slane %v13307_v31, 2  ;;  %7969 = vmatpush3.msra.mxu1 %v7246_v48 }
 0x3e3   : > { %v4151_v63 = vadd.f32 %v4133_v59, %v4068_v45  ;;  %v4298_v19 = vrot.slane %v4269_v13, 4  ;;  %v4352_v15 = vmul.f32 %v13286_v14, %v13335_v60  ;;  %v4372_v7 = vsel %vm3312_vm0, %v4370_v40, %v4371_v58  ;;  %v7244_v14 = vld [vmem:[#allocation5 + $0x28] sm:$0xff]  ;;  %7970 = vmatprep.subr.mxu1 %v7245_v55  ;;  %v16736_v13 = vld [vmem:[#allocation143_spill] sm:$0xff] }
 0x3e4   : > { %v13409_v21 = vadd.f32 %v16710_v4, %v4480_v39  ;;  %v4316_v54 = vadd.f32 %v13222_v29, %v13237_v0  ;;  %v16711_v31 = vrot.slane %v13199_v16, 7  ;;  %v16712_v30 = vrot.slane %v13153_v9, 7  ;;  %v13431_v9 = vld [vmem:[%s15393_s5 + $0x40] ss:$8 sm:$0xf]  ;;  %7971 = vmatpush3.msra.mxu1 %v7245_v55 }
 0x3e5   : > { %v4234_v34 = vadd.f32 %v4216_v17, %v4151_v63  ;;  %v4396_v42 = vadd.f32 %v4372_v7, %v4313_v46  ;;  %v13420_v45 = vmul.f32 %v16670_v38, %v13029_v5  ;;  %v6455_v36 = vmul.f32 %v16670_v38, %v13134_v11  ;;  %v13452_v17 = vpop.permute.xlu0 %4508  ;;  %v7243_v46 = vld [vmem:[#allocation5 + $0x20] sm:$0xff]  ;;  %7972 = vmatprep.subr.mxu1 %v7244_v14  ;;  %v16723_v55 = vld [vmem:[#allocation158_spill] sm:$0xff]  ;;  %v16764_v60 = vld [vmem:[#allocation131_spill] sm:$0xff] }
 0x3e6   : > { %v4380_v27 = vsel %vm3312_vm0, %v16712_v30, %v16711_v31  ;;  %v13426_v29 = vmul.f32 %v16674_v24, %v13029_v5  ;;  %v4455_v16 = vsel %vm1511_vm10, %v4453_v3, %v4454_v8  ;;  %v16715_v0 = vrot.slane %v13205_v37, 2  ;;  %7973 = vmatpush3.msra.mxu1 %v7244_v14  ;;  %v13485_v7 = vld [vmem:[%s15393_s5 + $0x21] ss:$8 sm:$0xf] }
 0x3e7   : > { %16713 = vst [vmem:[#allocation222_spill] sm:$0xff] %v13420_v45  ;;  %v16716_v2 = vrot.slane %v13157_v22, 2  ;;  %v16718_v51 = vrot.slane %v16717_v61, 2  ;;  %v16720_v62 = vrot.slane %v13163_v50, 1  ;;  %v4395_v22 = vadd.f32 %v13242_v25, %v4312_v43  ;;  %v7242_v25 = vld [vmem:[#allocation5 + $0x18] sm:$0xff]  ;;  %7974 = vmatprep.subr.mxu1 %v7243_v46  ;;  %v16725_v4 = vld [vmem:[#allocation17_spill] sm:$0xff] }
 0x3e8   : > { %16714 = vst [vmem:[#allocation178_spill] sm:$0xff] %v13426_v29  ;;  %v16719_v49 = vmov %v16715_v0  ;;  %v4299_v18 = vsel %vm1679_vm12, %v4288_v44, %v4298_v19  ;;  %v4381_v37 = vrot.slane %v4352_v15, 7  ;;  %v13460_v57 = vmul.f32 %v16722_v28, %v13145_v23  ;;  %7975 = vmatpush3.msra.mxu1 %v7243_v46  ;;  %v16728_v14 = vld [vmem:[#allocation54_spill] sm:$0xff] }
 0x3e9   : > { %v4452_v38 = vsel %vm1511_vm10, %v16716_v2, %v16715_v0  ;;  %v4463_v59 = vsel %vm1511_vm10, %v16719_v49, %v16718_v51  ;;  %v13450_v6 = vsel %vm1427_vm9, %v16720_v62, %v6401_v32  ;;  %v4399_v33 = vadd.f32 %v4380_v27, %v4316_v54  ;;  %v13466_v32 = vpop.permute.xlu1 %4506  ;;  %v7241_v54 = vld [vmem:[#allocation5 + $0x10] sm:$0xff]  ;;  %v16726_v27 = vld [vmem:[#allocation129_spill] sm:$0xff]  ;;  %7976 = vmatprep.subr.mxu1 %v7242_v25  ;;  %v13508_v0 = vpop.permute.xlu0 %4492  ;;  %v16730_v61 = vld [vmem:[#allocation218_spill] sm:$0xff] }
 0x3ea   : > { %16721 = vst [vmem:[#allocation223_spill] sm:$0xff] %v13450_v6  ;;  %v13464_v48 = vrot.slane %v13431_v9, %v16684_v35  ;;  %v4317_v40 = vadd.f32 %v4299_v18, %v4234_v34  ;;  %v4479_v39 = vadd.f32 %v4455_v16, %v4396_v42  ;;  %v6484_v44 = vrot.slane %v6455_v36, 4  ;;  %v16729_v16 = vld [vmem:[#allocation215_spill] sm:$0xff]  ;;  %7977 = vmatpush3.msra.mxu1 %v7242_v25  ;;  %v16734_v25 = vld [vmem:[#allocation206_spill] sm:$0xff] }
 0x3eb   : > { %v13471_v43 = vmul.f32 %v16674_v24, %v13134_v11  ;;  %v4478_v63 = vadd.f32 %v4452_v38, %v4395_v22  ;;  %v13476_v19 = vmul.f32 %v16723_v55, %v13134_v11  ;;  %v13489_v24 = vrot.slane %v13485_v7, %v16725_v4  ;;  %v13513_v2 = vld [vmem:[%s15393_s5 + $0x47] ss:$8 sm:$0xf]  ;;  %v13529_v46 = vld [vmem:[%s15393_s5 + $0x66] ss:$8 sm:$0xf]  ;;  %7978 = vmatprep.subr.mxu1 %v7241_v54 }
 0x3ec   : > { %v13480_v15 = vmul.f32 %v13464_v48, %v13145_v23  ;;  %v4382_v11 = vsel %vm3312_vm0, %v4371_v58, %v4381_v37  ;;  %v15759_v31 = vrot.slane %v13460_v57, 3  ;;  %v13497_v30 = vrot.slane %v13431_v9, %v16725_v4  ;;  %v7240_v38 = vld [vmem:[#allocation5 + $0x8] sm:$0xff]  ;;  %v16731_v22 = vld [vmem:[#allocation205_spill] sm:$0xff]  ;;  %7979 = vmatpush3.msra.mxu1 %v7241_v54 }
 0x3ed   : > { %16724 = vst [vmem:[#allocation180_spill] sm:$0xff] %v13476_v19  ;;  %v13503_v34 = vsel %vm2519_vm15, %v13466_v32, %v16726_v27  ;;  %v4482_v42 = vadd.f32 %v4463_v59, %v4399_v33  ;;  %v4670_v36 = vmul.f32 %v13464_v48, %v16728_v14  ;;  %v4400_v41 = vadd.f32 %v4382_v11, %v4317_v40 }
 0x3ee   : > { %16727 = vst [vmem:[#allocation127_spill] sm:$0xff] %v13503_v34  ;;  %v4556_v58 = vadd.f32 %v16729_v16, %v4479_v39  ;;  %v4613_v51 = vrot.slane %v16730_v61, 3  ;;  %v4586_v49 = vmul.f32 %v13489_v24, %v16728_v14  ;;  %v13520_v59 = vmul.f32 %v13489_v24, %v13503_v34  ;;  %7980 = vmatprep.subr.mxu1 %v7240_v38 }
 0x3ef   : > { %v13524_v62 = vmul.f32 %v13497_v30, %v13503_v34  ;;  %v16732_v18 = vrot.slane %v16731_v22, 4  ;;  %v15760_v33 = vrot.slane %v13480_v15, 6  ;;  %v4735_v40 = vrot.slane %v13513_v2, %v16725_v4  ;;  %7981 = vmatpush3.msra.mxu1 %v7240_v38  ;;  %v13576_v38 = vpop.permute.xlu0 %4510 }
 0x3f0   : > { %v4818_v39 = vrot.slane %v13529_v46, %v16725_v4  ;;  %v16735_v11 = vrot.slane %v16734_v25, 2  ;;  %v4669_v16 = vmul.f32 %v13497_v30, %v16728_v14  ;;  %v4611_v61 = vrot.slane %v13520_v59, 3 }
 0x3f1   : > { %v13534_v37 = vsel %vm1679_vm12, %v16732_v18, %v6484_v44  ;;  %v4615_v44 = vsel %vm1595_vm11, %v4613_v51, %v15759_v31  ;;  %v13555_v18 = vld [vmem:[%s15393_s5 + $0xa4] ss:$8 sm:$0xf]  ;;  %v6567_v54 = vrot.slane %v13471_v43, 7  ;;  %v4696_v1 = vrot.slane %v4670_v36, 6 }
 0x3f2   : > { %16733 = vst [vmem:[#allocation94_spill] sm:$0xff] %v13534_v37  ;;  %v4465_v27 = vsel %vm1511_vm10, %v4454_v8, %v16735_v11  ;;  %v4639_v8 = vadd.f32 %v4615_v44, %v4556_v58  ;;  %v13561_v51 = vld [vmem:[%s15393_s5 + $0x85] ss:$8 sm:$0xf]  ;;  %v4610_v59 = vrot.slane %v4586_v49, 3  ;;  %v4694_v3 = vrot.slane %v13524_v62, 6  ;;  %v4491_v11 = vpop.permute.xlu1 %4490 }
 0x3f3   : > { %v4483_v25 = vadd.f32 %v4465_v27, %v4400_v41  ;;  %v4901_v56 = vrot.slane %v13561_v51, %v16725_v4  ;;  %v4552_v43 = vmul.f32 %v16736_v13, %v13145_v23  ;;  %v4698_v36 = vsel %vm1278_vm4, %v4696_v1, %v15760_v33  ;;  %v16737_v62 = vld [vmem:[#allocation157_spill] sm:$0xff]  ;;  %v16738_v31 = vld [vmem:[#allocation202_spill] sm:$0xff]  ;;  %v16739_v1 = vld [vmem:[#allocation171_spill] sm:$0xff]  ;;  %v13748_v50 = vpop.permute.xlu0 %4498 }
 0x3f4   : > { %v4752_v41 = vmul.f32 %v4735_v40, %v13503_v34  ;;  %v13574_v58 = vmul.f32 %v4818_v39, %v13503_v34  ;;  %v4693_v49 = vrot.slane %v4669_v16, 6  ;;  %v4551_v27 = vmul.f32 %v16737_v62, %v13503_v34  ;;  %v7239_v16 = vld [vmem:[#allocation5] sm:$0xff] }
 0x3f5   : > { %v4612_v44 = vsel %vm1595_vm11, %v4610_v59, %v4611_v61  ;;  %v4984_v13 = vrot.slane %v13555_v18, %v16725_v4  ;;  %v4555_v37 = vadd.f32 %v16738_v31, %v4478_v63  ;;  %v16740_v33 = vrot.slane %v16739_v1, 7  ;;  %7982 = vmatprep.subr.mxu1 %v7239_v16 }
 0x3f6   : > { %v13589_v53 = vadd.f32 %v4552_v43, %v4483_v25  ;;  %v13591_v19 = vadd.f32 %v4698_v36, %v4639_v8  ;;  %v4559_v29 = vadd.f32 %v4551_v27, %v4482_v42  ;;  %v4695_v62 = vsel %vm1278_vm4, %v4693_v49, %v4694_v3  ;;  %7983 = vmatpush3.msra.mxu1 %v7239_v16  ;;  %v16744_v49 = vld [vmem:[#allocation177_spill] sm:$0xff] }
 0x3f7   : > { %v13587_v6 = vsel %vm3312_vm0, %v16740_v33, %v6567_v54  ;;  %v13595_v59 = vmul.f32 %v4901_v56, %v13503_v34  ;;  %v13601_v63 = vsel %vm2519_vm15, %v13576_v38, %v13508_v0  ;;  %v4638_v31 = vadd.f32 %v4612_v44, %v4555_v37 }
 0x3f8   : > { %16741 = vst [vmem:[#allocation190_spill] sm:$0xff] %v13587_v6  ;;  %16742 = vst [vmem:[#allocation58_spill] sm:$0xff] %v13601_v63  ;;  %v4776_v33 = vrot.slane %v4752_v41, 1  ;;  %v4859_v54 = vrot.slane %v13574_v58, 4  ;;  %v13607_v42 = vsel %vm2519_vm15, %v13452_v17, %v4491_v11  ;;  %v5009_v25 = vmul.f32 %v4984_v13, %v16728_v14 }
 0x3f9   : > { %16743 = vst [vmem:[#allocation183_spill] sm:$0xff] %v13607_v42  ;;  %v4594_v8 = vmul.f32 %v13489_v24, %v13607_v42  ;;  %v4677_v43 = vmul.f32 %v13497_v30, %v13607_v42  ;;  %v4756_v36 = vmul.f32 %v4735_v40, %v13607_v42  ;;  %v4760_v37 = vmul.f32 %v4735_v40, %v13601_v63 }
 0x3fa   : > { %v4843_v41 = vmul.f32 %v4818_v39, %v13601_v63  ;;  %v4926_v58 = vmul.f32 %v4901_v56, %v13601_v63  ;;  %v13621_v27 = vsel %vm2519_vm15, %v4491_v11, %v16744_v49  ;;  %v4839_v24 = vmul.f32 %v4818_v39, %v13607_v42 }
 0x3fb   : > { %16745 = vst [vmem:[#allocation192_spill] sm:$0xff] %v13621_v27  ;;  %v4622_v44 = vrot.slane %v4594_v8, 3  ;;  %v4705_v16 = vrot.slane %v4677_v43, 6  ;;  %v4777_v6 = vrot.slane %v4756_v36, 1  ;;  %v4721_v1 = vadd.f32 %v4695_v62, %v4638_v31 }
 0x3fc   : > { %v4942_v30 = vrot.slane %v13595_v59, 7  ;;  %v5005_v45 = vmul.f32 %v4984_v13, %v13601_v63  ;;  %v13628_v40 = vrot.slane %v13513_v2, %v16684_v35  ;;  %v4922_v11 = vmul.f32 %v4901_v56, %v13607_v42 }
 0x3fd   : > { %v4623_v22 = vsel %vm1595_vm11, %v4611_v61, %v4622_v44  ;;  %v4778_v34 = vsel %vm1427_vm9, %v4776_v33, %v4777_v6  ;;  %v4595_v8 = vmul.f32 %v16722_v28, %v13621_v27  ;;  %v5037_v43 = vrot.slane %v5009_v25, 2 }
 0x3fe   : > { %v4788_v39 = vrot.slane %v4760_v37, 1  ;;  %v4642_v62 = vadd.f32 %v4623_v22, %v4559_v29  ;;  %v4678_v59 = vmul.f32 %v13464_v48, %v13621_v27  ;;  %v4871_v31 = vrot.slane %v4843_v41, 4 }
 0x3ff   : > { %v4954_v36 = vrot.slane %v4926_v58, 7  ;;  %v4706_v63 = vsel %vm1278_vm4, %v4694_v3, %v4705_v16  ;;  %v4860_v55 = vrot.slane %v4839_v24, 4  ;;  %v4804_v61 = vadd.f32 %v4778_v34, %v4721_v1 }
 0x400   : > { %v4725_v20 = vadd.f32 %v4706_v63, %v4642_v62  ;;  %v5001_v33 = vmul.f32 %v4984_v13, %v13607_v42  ;;  %v4753_v56 = vmul.f32 %v13628_v40, %v13145_v23  ;;  %v4789_v28 = vsel %vm1427_vm9, %v4777_v6, %v4788_v39 }
 0x401   : > { %v4943_v25 = vrot.slane %v4922_v11, 7  ;;  %v4624_v37 = vrot.slane %v4595_v8, 3  ;;  %v13644_v29 = vmul.f32 %v13628_v40, %v13621_v27  ;;  %v5026_v48 = vrot.slane %v5005_v45, 2 }
 0x402   : > { %v4808_v22 = vadd.f32 %v4789_v28, %v4725_v20  ;;  %v4707_v41 = vrot.slane %v4678_v59, 6  ;;  %v13648_v3 = vrot.slane %v13529_v46, %v16684_v35  ;;  %v4861_v34 = vsel %vm1679_vm12, %v4859_v54, %v4860_v55 }
 0x403   : > { %v4872_v13 = vsel %vm1679_vm12, %v4860_v55, %v4871_v31  ;;  %v15774_v1 = vrot.slane %v13644_v29, 1  ;;  %v13655_v6 = vrot.slane %v13561_v51, %v16684_v35  ;;  %v4887_v63 = vadd.f32 %v4861_v34, %v4804_v61  ;;  %v13686_v61 = vld [vmem:[%s15393_s5 + $0x62] ss:$8 sm:$0xf] }
 0x404   : > { %v4891_v58 = vadd.f32 %v4872_v13, %v4808_v22  ;;  %v4779_v44 = vrot.slane %v4753_v56, 1  ;;  %v13659_v20 = vmul.f32 %v13648_v3, %v13621_v27  ;;  %v4955_v45 = vsel %vm3312_vm0, %v4943_v25, %v4954_v36  ;;  %v16748_v22 = vld [vmem:[#allocation34_spill] sm:$0xff]  ;;  %v16749_v34 = vld [vmem:[#allocation176_spill] sm:$0xff] }
 0x405   : > { %v5025_v16 = vrot.slane %v5001_v33, 2  ;;  %v16746_v54 = vrot.slane %v13460_v57, 3  ;;  %v13667_v24 = vrot.slane %v13555_v18, %v16684_v35  ;;  %v4836_v39 = vmul.f32 %v13648_v3, %v13145_v23  ;;  %v16747_v33 = vld [vmem:[#allocation19_spill] sm:$0xff] }
 0x406   : > { %v4974_v11 = vadd.f32 %v4955_v45, %v4891_v58  ;;  %v4781_v8 = vsel %vm1427_vm9, %v4779_v44, %v15774_v1  ;;  %v13676_v62 = vmul.f32 %v13655_v6, %v13621_v27  ;;  %v5038_v57 = vsel %vm1511_vm10, %v5026_v48, %v5037_v43 }
 0x407   : > { %v4625_v55 = vsel %vm1595_vm11, %v16746_v54, %v4624_v37  ;;  %v4944_v59 = vsel %vm3312_vm0, %v4942_v30, %v4943_v25  ;;  %v4919_v36 = vmul.f32 %v13655_v6, %v13145_v23  ;;  %v13690_v56 = vrot.slane %v13686_v61, %v16747_v33 }
 0x408   : > { %v4643_v31 = vadd.f32 %v4625_v55, %v13589_v53  ;;  %v4970_v28 = vadd.f32 %v4944_v59, %v4887_v63  ;;  %v15773_v37 = vrot.slane %v13659_v20, 4  ;;  %v5057_v43 = vadd.f32 %v5038_v57, %v4974_v11  ;;  %v8211_v55 = vld [vmem:[%s15393_s5 + $0x22] ss:$8 sm:$0xf] }
 0x409   : > { %v5027_v30 = vsel %vm1511_vm10, %v5025_v16, %v5026_v48  ;;  %v4805_v53 = vadd.f32 %v4781_v8, %v13591_v19  ;;  %v13697_v25 = vmul.f32 %v13667_v24, %v13621_v27  ;;  %v5088_v13 = vmul.f32 %v16749_v34, %v16748_v22  ;;  %v16753_v59 = vld [vmem:[#allocation43_spill] sm:$0xff] }
 0x40a   : > { %v16750_v58 = vrot.slane %v13480_v15, 6  ;;  %v4862_v45 = vrot.slane %v4836_v39, 4  ;;  %v15772_v63 = vrot.slane %v13676_v62, 7  ;;  %v13707_v54 = vmul.f32 %v13667_v24, %v16728_v14  ;;  %v16751_v39 = vld [vmem:[#allocation42_spill] sm:$0xff] }
 0x40b   : > { %v4945_v19 = vrot.slane %v4919_v36, 7  ;;  %v5096_v16 = vadd.f32 %v5088_v13, %v5057_v43  ;;  %v5110_v11 = vrot.slane %v8211_v55, %v16684_v35  ;;  %v5084_v8 = vmul.f32 0.0, %v16749_v34  ;;  %v8213_v34 = vld [vmem:[%s15393_s5 + $0x3] ss:$8 sm:$0xf] }
 0x40c   : > { %v4708_v44 = vsel %vm1278_vm4, %v16750_v58, %v4707_v41  ;;  %v4864_v15 = vsel %vm1679_vm12, %v4862_v45, %v15773_v37  ;;  %v5053_v41 = vadd.f32 %v5027_v30, %v4970_v28  ;;  %v16752_v57 = vrot.slane %v16751_v39, 3  ;;  %v8212_v58 = vld [vmem:[%s15393_s5 + $0x41] ss:$8 sm:$0xf] }
 0x40d   : > { %v13709_v48 = vadd.f32 %v4708_v44, %v4643_v31  ;;  %v16754_v31 = vrot.slane %v16753_v59, 3  ;;  %v4888_v43 = vadd.f32 %v4864_v15, %v4805_v53  ;;  %v5028_v22 = vrot.slane %v13697_v25, 2  ;;  %v16755_v25 = vld [vmem:[#allocation20_spill] sm:$0xff]  ;;  %v16757_v39 = vld [vmem:[#allocation98_spill] sm:$0xff]  ;;  %v16760_v37 = vld [vmem:[#allocation87_spill] sm:$0xff] }
 0x40e   : > { %v5193_v44 = vrot.slane %v8212_v58, %v16684_v35  ;;  %v4947_v28 = vsel %vm3312_vm0, %v4945_v19, %v15772_v63  ;;  %v5075_v53 = vrot.slane %v8213_v34, %v16747_v33  ;;  %v5079_v45 = vrot.slane %v8213_v34, %v16755_v25  ;;  %v16759_v63 = vld [vmem:[#allocation91_spill] sm:$0xff] }
 0x40f   : > { %v5160_v36 = vsel %vm1595_vm11, %v16754_v31, %v16752_v57  ;;  %v5124_v15 = vmul.f32 0.0, %v5110_v11  ;;  %v5128_v57 = vmul.f32 %v5110_v11, %v16757_v39  ;;  %v16758_v31 = vld [vmem:[#allocation62_spill] sm:$0xff]  ;;  %v5092_v19 = vadd.f32 %v5084_v8, %v5053_v41 }
 0x410   : > { %v5179_v13 = vadd.f32 %v5160_v36, %v5096_v16  ;;  %v16756_v16 = vld [vmem:[#allocation162_spill] sm:$0xff]  ;;  %v5147_v36 = vrot.slane %v16758_v31, 3  ;;  %v13741_v58 = vmul.f32 0.0, %v5075_v53  ;;  %v5132_v30 = vmul.f32 %v5110_v11, %v16759_v63  ;;  %v16761_v31 = vld [vmem:[#allocation97_spill] sm:$0xff]  ;;  %v16762_v11 = vld [vmem:[#allocation103_spill] sm:$0xff] }
 0x411   : > { %v5085_v55 = vmul.f32 0.0, %v16756_v16  ;;  %v4971_v27 = vadd.f32 %v4947_v28, %v4888_v43  ;;  %v13745_v23 = vmul.f32 0.0, %v5079_v45  ;;  %v5207_v42 = vmul.f32 0.0, %v5193_v44 }
 0x412   : > { %v5262_v1 = vadd.f32 %v16760_v37, %v5179_v13  ;;  %v5211_v34 = vmul.f32 %v5193_v44, %v16757_v39  ;;  %v13752_v5 = vmul.f32 %v16756_v16, %v16757_v39  ;;  %v13755_v35 = vmul.f32 %v5075_v53, %v16761_v31  ;;  %v16768_v31 = vld [vmem:[#allocation32_spill] sm:$0xff] }
 0x413   : > { %v5215_v41 = vmul.f32 %v5193_v44, %v16759_v63  ;;  %v16763_v37 = vrot.slane %v16753_v59, 3  ;;  %v5150_v13 = vrot.slane %v5124_v15, 3  ;;  %v5151_v28 = vrot.slane %v5128_v57, 3 }
 0x414   : > { %v5345_v8 = vadd.f32 %v16762_v11, %v5262_v1  ;;  %v16765_v4 = vrot.slane %v16764_v60, 3  ;;  %v16767_v26 = vrot.slane %v16766_v10, 3  ;;  %v5161_v39 = vrot.slane %v5132_v30, 3 }
 0x415   : > { %v5149_v43 = vsel %vm1595_vm11, %v5147_v36, %v16763_v37  ;;  %v13774_v1 = vsel %vm2519_vm15, %v13508_v0, %v13748_v50  ;;  %v5233_v63 = vrot.slane %v5207_v42, 6  ;;  %v5234_v59 = vrot.slane %v5211_v34, 6  ;;  %v16771_v0 = vld [vmem:[#allocation31_spill] sm:$0xff]  ;;  %v16774_v34 = vld [vmem:[#allocation104_spill] sm:$0xff] }
 0x416   : > { %v13767_v16 = vsel %vm1595_vm11, %v16767_v26, %v16765_v4  ;;  %v5175_v53 = vadd.f32 %v5149_v43, %v5092_v19  ;;  %v5428_v47 = vadd.f32 %v16768_v31, %v5345_v8  ;;  %16769 = vst [vmem:[#allocation154_spill] sm:$0xff] %v13774_v1  ;;  %v4761_v60 = vmul.f32 %v13628_v40, %v13774_v1  ;;  %v16770_v4 = vld [vmem:[#allocation60_spill] sm:$0xff]  ;;  %v16772_v42 = vld [vmem:[#allocation123_spill] sm:$0xff] }
 0x417   : > { %v4844_v44 = vmul.f32 %v13648_v3, %v13774_v1  ;;  %v5244_v26 = vrot.slane %v5215_v41, 6  ;;  %v4927_v15 = vmul.f32 %v13655_v6, %v13774_v1  ;;  %v5006_v57 = vmul.f32 %v13667_v24, %v13774_v1  ;;  %v16776_v24 = vld [vmem:[#allocation63_spill] sm:$0xff] }
 0x418   : > { %v13781_v30 = vadd.f32 %v16770_v4, %v5428_v47  ;;  %v13788_v36 = vmul.f32 %v5079_v45, %v16771_v0  ;;  %v16773_v19 = vrot.slane %v16772_v42, 1  ;;  %v16775_v40 = vrot.slane %v16774_v34, 1  ;;  %v16777_v43 = vld [vmem:[#allocation107_spill] sm:$0xff]  ;;  %v16779_v4 = vld [vmem:[#allocation38_spill] sm:$0xff] }
 0x419   : > { %v4790_v3 = vrot.slane %v4761_v60, 1  ;;  %v4873_v41 = vrot.slane %v4844_v44, 4  ;;  %v5152_v47 = vsel %vm1595_vm11, %v5150_v13, %v5151_v28  ;;  %v5162_v8 = vsel %vm1595_vm11, %v5151_v28, %v5161_v39  ;;  %v16782_v34 = vld [vmem:[#allocation110_spill] sm:$0xff] }
 0x41a   : > { %v5318_v11 = vsel %vm1427_vm9, %v16775_v40, %v16773_v19  ;;  %v5029_v37 = vrot.slane %v5006_v57, 2  ;;  %v13799_v6 = vrot.slane %v13485_v7, %v16747_v33  ;;  %v5258_v45 = vadd.f32 %v16776_v24, %v5175_v53  ;;  %v4501_v19 = vpop.permute.xlu1 %4500  ;;  %v16784_v24 = vld [vmem:[#allocation113_spill] sm:$0xff] }
 0x41b   : > { %v16778_v31 = vrot.slane %v16777_v43, 4  ;;  %v16780_v0 = vrot.slane %v16779_v4, 4  ;;  %v16781_v60 = vrot.slane %v13644_v29, 1  ;;  %v4956_v13 = vrot.slane %v4927_v15, 7 }
 0x41c   : > { %v5235_v28 = vsel %vm1278_vm4, %v5233_v63, %v5234_v59  ;;  %v5245_v39 = vsel %vm1278_vm4, %v5234_v59, %v5244_v26  ;;  %v5030_v53 = vsel %vm1511_vm10, %v5028_v22, %v5029_v37  ;;  %v16783_v40 = vrot.slane %v16782_v34, 7  ;;  %v16787_v26 = vld [vmem:[#allocation163_spill] sm:$0xff] }
 0x41d   : > { %v5401_v42 = vsel %vm1679_vm12, %v16780_v0, %v16778_v31  ;;  %v4791_v44 = vsel %vm1427_vm9, %v16781_v60, %v4790_v3  ;;  %v16785_v43 = vrot.slane %v16784_v24, 7  ;;  %v16786_v29 = vrot.slane %v13659_v20, 4  ;;  %v16790_v0 = vld [vmem:[#allocation207_spill] sm:$0xff] }
 0x41e   : > { %v4809_v57 = vadd.f32 %v4791_v44, %v13709_v48  ;;  %v5054_v15 = vadd.f32 %v5030_v53, %v4971_v27  ;;  %v13824_v63 = vrot.slane %v13485_v7, %v16755_v25  ;;  %v4588_v48 = vmul.f32 %v13799_v6, %v16728_v14  ;;  %v16793_v24 = vld [vmem:[#allocation71_spill] sm:$0xff] }
 0x41f   : > { %v5484_v31 = vsel %vm3312_vm0, %v16785_v43, %v16783_v40  ;;  %v4874_v3 = vsel %vm1679_vm12, %v16786_v29, %v4873_v41  ;;  %v13831_v22 = vsel %vm2519_vm15, %v4501_v19, %v13466_v32  ;;  %v13836_v20 = vsel %vm2519_vm15, %v16787_v26, %v4501_v19  ;;  %v16791_v32 = vld [vmem:[#allocation159_spill] sm:$0xff]  ;;  %v16796_v26 = vld [vmem:[#allocation88_spill] sm:$0xff] }
 0x420   : > { %v4892_v59 = vadd.f32 %v4874_v3, %v4809_v57  ;;  %16788 = vst [vmem:[#allocation170_spill] sm:$0xff] %v13836_v20  ;;  %v16789_v27 = vrot.slane %v13676_v62, 7  ;;  %v5093_v7 = vadd.f32 %v5085_v55, %v5054_v15  ;;  %v13843_v4 = vrot.slane %v13431_v9, %v16747_v33  ;;  %v16794_v15 = vld [vmem:[#allocation92_spill] sm:$0xff] }
 0x421   : > { %v4553_v60 = vmul.f32 %v16790_v0, %v13836_v20  ;;  %v4554_v57 = vmul.f32 %v16791_v32, %v13831_v22  ;;  %v13851_v19 = vmul.f32 %v13799_v6, %v13836_v20  ;;  %v13855_v62 = vmul.f32 %v13824_v63, %v13831_v22  ;;  %v16797_v32 = vld [vmem:[#allocation45_spill] sm:$0xff] }
 0x422   : > { %v4957_v41 = vsel %vm3312_vm0, %v16789_v27, %v4956_v13  ;;  %v16792_v55 = vrot.slane %v13707_v54, 2  ;;  %v5176_v53 = vadd.f32 %v5152_v47, %v5093_v7  ;;  %v13862_v34 = vrot.slane %v13431_v9, %v16755_v25 }
 0x423   : > { %v4975_v44 = vadd.f32 %v4957_v41, %v4892_v59  ;;  %v13865_v40 = vadd.f32 %v4553_v60, %v13397_v52  ;;  %v5341_v43 = vadd.f32 %v16793_v24, %v5258_v45  ;;  %v4589_v3 = vmul.f32 %v13824_v63, %v16728_v14  ;;  %v16795_v52 = vld [vmem:[#allocation47_spill] sm:$0xff] }
 0x424   : > { %v5040_v13 = vsel %vm1511_vm10, %v5029_v37, %v16792_v55  ;;  %v13871_v59 = vadd.f32 %v4554_v57, %v16794_v15  ;;  %v5259_v54 = vadd.f32 %v5235_v28, %v5176_v53  ;;  %v4671_v47 = vmul.f32 %v13843_v4, %v16728_v14  ;;  %v16798_v55 = vld [vmem:[#allocation174_spill] sm:$0xff] }
 0x425   : > { %v5058_v29 = vadd.f32 %v5040_v13, %v4975_v44  ;;  %v15796_v37 = vrot.slane %v13851_v19, 3  ;;  %v13878_v9 = vmul.f32 %v13843_v4, %v13836_v20  ;;  %v5622_v45 = vmul.f32 %v16796_v26, %v16795_v52 }
 0x426   : > { %v15797_v41 = vrot.slane %v13855_v62, 3  ;;  %v13886_v7 = vmul.f32 %v13862_v34, %v13831_v22  ;;  %v5342_v28 = vadd.f32 %v5318_v11, %v5259_v54  ;;  %v4616_v0 = vrot.slane %v4588_v48, 3 }
 0x427   : > { %v5097_v27 = vadd.f32 %v13752_v5, %v5058_v29  ;;  %v4672_v60 = vmul.f32 %v13862_v34, %v16728_v14  ;;  %v13892_v44 = vrot.slane %v13513_v2, %v16747_v33  ;;  %v13895_v57 = vadd.f32 %v16797_v32, %v5341_v43 }
 0x428   : > { %v5687_v5 = vrot.slane %v16798_v55, 3  ;;  %v4619_v53 = vrot.slane %v4589_v3, 3  ;;  %v5425_v24 = vadd.f32 %v5401_v42, %v5342_v28  ;;  %v4699_v29 = vrot.slane %v4671_v47, 6  ;;  %v16802_v55 = vld [vmem:[#allocation86_spill] sm:$0xff] }
 0x429   : > { %v5180_v13 = vadd.f32 %v5162_v8, %v5097_v27  ;;  %v4618_v11 = vsel %vm1595_vm11, %v4616_v0, %v15796_v37  ;;  %v15795_v48 = vrot.slane %v13878_v9, 6  ;;  %v15794_v43 = vrot.slane %v13886_v7, 6 }
 0x42a   : > { %v4621_v54 = vsel %vm1595_vm11, %v4619_v53, %v15797_v41  ;;  %v13908_v52 = vrot.slane %v13513_v2, %v16755_v25  ;;  %v5508_v8 = vadd.f32 %v5484_v31, %v5425_v24  ;;  %v4702_v42 = vrot.slane %v4672_v60, 6  ;;  %v16801_v60 = vld [vmem:[#allocation65_spill] sm:$0xff]  ;;  %v16803_v53 = vld [vmem:[#allocation120_spill] sm:$0xff] }
 0x42b   : > { %v5263_v15 = vadd.f32 %v5245_v39, %v5180_v13  ;;  %v13912_v3 = vmul.f32 %v13892_v44, %v13836_v20  ;;  %v13916_v47 = vrot.slane %v13529_v46, %v16747_v33  ;;  %v16799_v39 = vld [vmem:[#allocation39_spill] sm:$0xff]  ;;  %v4640_v27 = vadd.f32 %v4618_v11, %v13409_v21 }
 0x42c   : > { %v13922_v28 = vrot.slane %v13529_v46, %v16755_v25  ;;  %v13926_v2 = vrot.slane %v13561_v51, %v16747_v33  ;;  %v16800_v31 = vrot.slane %v16766_v10, 3  ;;  %v5591_v32 = vadd.f32 %v16801_v60, %v5508_v8 }
 0x42d   : > { %v5346_v26 = vadd.f32 %v16799_v39, %v5263_v15  ;;  %v4641_v13 = vadd.f32 %v4621_v54, %v16802_v55  ;;  %v4701_v21 = vsel %vm1278_vm4, %v4699_v29, %v15795_v48  ;;  %v4704_v46 = vsel %vm1278_vm4, %v4702_v42, %v15794_v43  ;;  %v16804_v42 = vld [vmem:[#allocation40_spill] sm:$0xff] }
 0x42e   : > { %v5689_v0 = vsel %vm1595_vm11, %v5687_v5, %v16800_v31  ;;  %v13942_v11 = vmul.f32 %v13908_v52, %v13831_v22  ;;  %v13946_v10 = vrot.slane %v13561_v51, %v16755_v25  ;;  %v4505_v5 = vpop.permute.xlu0 %4504  ;;  %v5630_v15 = vadd.f32 %v5622_v45, %v5591_v32  ;;  %v4503_v32 = vpop.permute.xlu1 %4502  ;;  %v16806_v55 = vld [vmem:[#allocation72_spill] sm:$0xff] }
 0x42f   : > { %v5429_v24 = vadd.f32 %v16803_v53, %v5346_v26  ;;  %v4782_v54 = vrot.slane %v13912_v3, 1  ;;  %v13951_v29 = vmul.f32 %v13916_v47, %v13836_v20  ;;  %v13955_v8 = vrot.slane %v13555_v18, %v16747_v33 }
 0x430   : > { %v13958_v26 = vadd.f32 %v4701_v21, %v4640_v27  ;;  %v13962_v51 = vmul.f32 %v13922_v28, %v13831_v22  ;;  %v13966_v45 = vmul.f32 %v13926_v2, %v13836_v20  ;;  %v13968_v3 = vadd.f32 %v5689_v0, %v5630_v15  ;;  %v16807_v15 = vld [vmem:[#allocation76_spill] sm:$0xff] }
 0x431   : > { %v5512_v39 = vadd.f32 %v16804_v42, %v5429_v24  ;;  %v13972_v31 = vrot.slane %v13555_v18, %v16755_v25  ;;  %v13977_v60 = vsel %vm2519_vm15, %v4505_v5, %v13576_v38  ;;  %v13982_v27 = vsel %vm2519_vm15, %v13748_v50, %v4505_v5 }
 0x432   : > { %16805 = vst [vmem:[#allocation155_spill] sm:$0xff] %v13982_v27  ;;  %v4724_v53 = vadd.f32 %v4704_v46, %v4641_v13  ;;  %v4785_v0 = vrot.slane %v13942_v11, 1  ;;  %v13988_v18 = vmul.f32 %v13946_v10, %v13831_v22  ;;  %v4865_v24 = vrot.slane %v13951_v29, 4 }
 0x433   : > { %v5595_v21 = vadd.f32 %v16806_v55, %v5512_v39  ;;  %v13993_v38 = vmul.f32 %v13955_v8, %v16728_v14  ;;  %v4762_v50 = vmul.f32 %v13892_v44, %v13982_v27  ;;  %v4763_v5 = vmul.f32 %v13908_v52, %v13977_v60 }
 0x434   : > { %v4845_v46 = vmul.f32 %v13916_v47, %v13982_v27  ;;  %v4846_v11 = vmul.f32 %v13922_v28, %v13977_v60  ;;  %v14007_v29 = vsel %vm2519_vm15, %v4503_v32, %v13452_v17  ;;  %v4868_v42 = vrot.slane %v13962_v51, 4 }
 0x435   : > { %v5634_v13 = vadd.f32 %v16807_v15, %v5595_v21  ;;  %v14013_v55 = vmul.f32 %v13972_v31, %v16728_v14  ;;  %v14017_v21 = vmul.f32 %v13926_v2, %v13982_v27  ;;  %v14025_v17 = vmul.f32 %v13946_v10, %v13977_v60 }
 0x436   : > { %v14029_v51 = vmul.f32 %v13955_v8, %v13982_v27  ;;  %v4792_v39 = vrot.slane %v4762_v50, 1  ;;  %v4794_v48 = vrot.slane %v4763_v5, 1  ;;  %v14034_v37 = vsel %vm2519_vm15, %v16744_v49, %v4503_v32 }
 0x437   : > { %v14020_v15 = vadd.f32 %v13767_v16, %v5634_v13  ;;  %16808 = vst [vmem:[#allocation49_spill] sm:$0xff] %v14034_v37  ;;  %v4597_v16 = vmul.f32 %v13824_v63, %v14007_v29  ;;  %v4875_v13 = vrot.slane %v4845_v46, 4  ;;  %v4877_v43 = vrot.slane %v4846_v11, 4 }
 0x438   : > { %v4596_v41 = vmul.f32 %v13799_v6, %v14034_v37  ;;  %v4679_v20 = vmul.f32 %v13843_v4, %v14034_v37  ;;  %v4958_v27 = vrot.slane %v14017_v21, 7  ;;  %v14045_v50 = vmul.f32 %v13972_v31, %v13977_v60 }
 0x439   : > { %v4628_v12 = vrot.slane %v4597_v16, 3  ;;  %v4680_v49 = vmul.f32 %v13862_v34, %v14007_v29  ;;  %v4758_v5 = vmul.f32 %v13892_v44, %v14034_v37  ;;  %v4759_v6 = vmul.f32 %v13908_v52, %v14007_v29 }
 0x43a   : > { %v4626_v32 = vrot.slane %v4596_v41, 3  ;;  %v4709_v63 = vrot.slane %v4679_v20, 6  ;;  %v16809_v4 = vrot.slane %v13855_v62, 3  ;;  %v4841_v21 = vmul.f32 %v13916_v47, %v14034_v37 }
 0x43b   : > { %v4711_v11 = vrot.slane %v4680_v49, 6  ;;  %v4842_v16 = vmul.f32 %v13922_v28, %v14007_v29  ;;  %v16810_v34 = vrot.slane %v13851_v19, 3  ;;  %v16811_v44 = vrot.slane %v13878_v9, 6 }
 0x43c   : > { %v4629_v46 = vsel %vm1595_vm11, %v16809_v4, %v4628_v12  ;;  %v4783_v62 = vrot.slane %v4758_v5, 1  ;;  %v16812_v49 = vrot.slane %v13886_v7, 6  ;;  %v4786_v4 = vrot.slane %v4759_v6, 1 }
 0x43d   : > { %v4627_v20 = vsel %vm1595_vm11, %v16810_v34, %v4626_v32  ;;  %v4645_v41 = vadd.f32 %v4629_v46, %v13871_v59  ;;  %v4710_v52 = vsel %vm1278_vm4, %v16811_v44, %v4709_v63  ;;  %v4866_v1 = vrot.slane %v4841_v21, 4 }
 0x43e   : > { %v4644_v12 = vadd.f32 %v4627_v20, %v13865_v40  ;;  %v4712_v47 = vsel %vm1278_vm4, %v16812_v49, %v4711_v11  ;;  %v4784_v19 = vsel %vm1427_vm9, %v4782_v54, %v4783_v62  ;;  %v4793_v32 = vsel %vm1427_vm9, %v4783_v62, %v4792_v39 }
 0x43f   : > { %v4728_v28 = vadd.f32 %v4712_v47, %v4645_v41  ;;  %v4869_v34 = vrot.slane %v4842_v16, 4  ;;  %v4787_v9 = vsel %vm1427_vm9, %v4785_v0, %v4786_v4  ;;  %v4795_v63 = vsel %vm1427_vm9, %v4786_v4, %v4794_v48 }
 0x440   : > { %v4727_v59 = vadd.f32 %v4710_v52, %v4644_v12  ;;  %v4806_v5 = vadd.f32 %v4784_v19, %v13958_v26  ;;  %v4807_v40 = vadd.f32 %v4787_v9, %v4724_v53  ;;  %v4867_v7 = vsel %vm1679_vm12, %v4865_v24, %v4866_v1 }
 0x441   : > { %v4811_v46 = vadd.f32 %v4795_v63, %v4728_v28  ;;  %v4870_v6 = vsel %vm1679_vm12, %v4868_v42, %v4869_v34  ;;  %v4876_v21 = vsel %vm1679_vm12, %v4866_v1, %v4875_v13  ;;  %v4878_v54 = vsel %vm1679_vm12, %v4869_v34, %v4877_v43 }
 0x442   : > { %v4810_v11 = vadd.f32 %v4793_v32, %v4727_v59  ;;  %v4889_v39 = vadd.f32 %v4867_v7, %v4806_v5  ;;  %v4890_v16 = vadd.f32 %v4870_v6, %v4807_v40  ;;  %v4924_v0 = vmul.f32 %v13926_v2, %v14034_v37  ;;  %v8214_v59 = vld [vmem:[%s15393_s5 + $0x81] ss:$8 sm:$0xf] }
 0x443   : > { %v4894_v20 = vadd.f32 %v4878_v54, %v4811_v46  ;;  %v4925_v48 = vmul.f32 %v13946_v10, %v14007_v29  ;;  %v4960_v26 = vrot.slane %v14025_v17, 7  ;;  %v5003_v24 = vmul.f32 %v13955_v8, %v14034_v37  ;;  %v16818_v5 = vld [vmem:[#allocation68_spill] sm:$0xff]  ;;  %v16873_v37 = vld [vmem:[#allocation109_spill] sm:$0xff] }
 0x444   : > { %v4893_v53 = vadd.f32 %v4876_v21, %v4810_v11  ;;  %v5004_v1 = vmul.f32 %v13972_v31, %v14007_v29  ;;  %v5032_v43 = vrot.slane %v14029_v51, 2  ;;  %v5035_v42 = vrot.slane %v14045_v50, 2  ;;  %v8215_v11 = vld [vmem:[%s15393_s5 + $0xa0] ss:$8 sm:$0xf] }
 0x445   : > { %v4949_v13 = vrot.slane %v4924_v0, 7  ;;  %v4952_v41 = vrot.slane %v4925_v48, 7  ;;  %v5041_v2 = vrot.slane %v13993_v38, 2  ;;  %v5043_v44 = vrot.slane %v14013_v55, 2  ;;  %v16825_v0 = vld [vmem:[#allocation80_spill] sm:$0xff] }
 0x446   : > { %v5031_v10 = vrot.slane %v5003_v24, 2  ;;  %v5034_v52 = vrot.slane %v5004_v1, 2  ;;  %v16813_v17 = vrot.slane %v13966_v45, 7  ;;  %v16814_v8 = vrot.slane %v13988_v18, 7  ;;  %v16827_v24 = vld [vmem:[#allocation149_spill] sm:$0xff] }
 0x447   : > { %v4959_v51 = vsel %vm3312_vm0, %v4949_v13, %v4958_v27  ;;  %v4961_v50 = vsel %vm3312_vm0, %v4952_v41, %v4960_v26  ;;  %v5042_v55 = vsel %vm1511_vm10, %v5032_v43, %v5041_v2  ;;  %v5044_v4 = vsel %vm1511_vm10, %v5035_v42, %v5043_v44  ;;  %v16826_v26 = vld [vmem:[#allocation61_spill] sm:$0xff]  ;;  %v16833_v44 = vld [vmem:[#allocation44_spill] sm:$0xff] }
 0x448   : > { %v4950_v62 = vsel %vm3312_vm0, %v16813_v17, %v4949_v13  ;;  %v4953_v31 = vsel %vm3312_vm0, %v16814_v8, %v4952_v41  ;;  %v4976_v47 = vadd.f32 %v4959_v51, %v4893_v53  ;;  %v4977_v38 = vadd.f32 %v4961_v50, %v4894_v20  ;;  %v16832_v41 = vld [vmem:[#allocation181_spill] sm:$0xff] }
 0x449   : > { %v4972_v12 = vadd.f32 %v4950_v62, %v4889_v39  ;;  %v4973_v49 = vadd.f32 %v4953_v31, %v4890_v16  ;;  %v5033_v45 = vsel %vm1511_vm10, %v5031_v10, %v5032_v43  ;;  %v5036_v28 = vsel %vm1511_vm10, %v5034_v52, %v5035_v42  ;;  %v16824_v16 = vld [vmem:[#allocation29_spill] sm:$0xff]  ;;  %v16834_v52 = vld [vmem:[#allocation82_spill] sm:$0xff] }
 0x44a   : > { %v5059_v32 = vadd.f32 %v5042_v55, %v4976_v47  ;;  %v5060_v34 = vadd.f32 %v5044_v4, %v4977_v38  ;;  %v14107_v27 = vrot.slane %v13686_v61, %v16755_v25  ;;  %v14113_v9 = vrot.slane %v8214_v59, %v16747_v33  ;;  %v16829_v43 = vld [vmem:[#allocation69_spill] sm:$0xff]  ;;  %v16835_v62 = vld [vmem:[#allocation126_spill] sm:$0xff]  ;;  %v16842_v4 = vld [vmem:[#allocation99_spill] sm:$0xff] }
 0x44b   : > { %v5055_v19 = vadd.f32 %v5033_v45, %v4972_v12  ;;  %v5056_v18 = vadd.f32 %v5036_v28, %v4973_v49  ;;  %v14116_v63 = vrot.slane %v8214_v59, %v16755_v25  ;;  %v5507_v40 = vadd.f32 %v16818_v5, %v13895_v57  ;;  %v16836_v31 = vld [vmem:[#allocation130_spill] sm:$0xff]  ;;  %v16843_v28 = vld [vmem:[#allocation35_spill] sm:$0xff] }
 0x44c   : > { %16815 = vst [vmem:[#allocation208_spill] sm:$0xff] %v14107_v27  ;;  %16816 = vst [vmem:[#allocation57_spill] sm:$0xff] %v14113_v9  ;;  %v5098_v61 = vadd.f32 %v13755_v35, %v5059_v32  ;;  %v5099_v6 = vadd.f32 %v13788_v36, %v5060_v34  ;;  %v14128_v21 = vrot.slane %v8215_v11, %v16747_v33  ;;  %v16822_v35 = vld [vmem:[#allocation33_spill] sm:$0xff]  ;;  %v16840_v47 = vld [vmem:[#allocation134_spill] sm:$0xff] }
 0x44d   : > { %16817 = vst [vmem:[#allocation74_spill] sm:$0xff] %v14116_v63  ;;  %v5094_v46 = vadd.f32 %v13741_v58, %v5055_v19  ;;  %v5095_v7 = vadd.f32 %v13745_v23, %v5056_v18  ;;  %v14131_v54 = vrot.slane %v8215_v11, %v16755_v25  ;;  %v8216_v58 = vld [vmem:[%s15393_s5 + $0xa7] ss:$8 sm:$0xf]  ;;  %v5590_v57 = vadd.f32 %v16822_v35, %v5507_v40 }
 0x44e   : > { %16819 = vst [vmem:[#allocation156_spill] sm:$0xff] %v14128_v21  ;;  %v14137_v23 = vrot.slane %v8216_v58, %v16747_v33  ;;  %v16823_v36 = vld [vmem:[#allocation41_spill] sm:$0xff]  ;;  %v5181_v48 = vadd.f32 %v16825_v0, %v5098_v61  ;;  %v5182_v53 = vadd.f32 %v16826_v26, %v5099_v6  ;;  %v14146_v1 = vmul.f32 %v13690_v56, %v16827_v24  ;;  %v16845_v18 = vld [vmem:[#allocation115_spill] sm:$0xff]  ;;  %v16847_v34 = vld [vmem:[#allocation36_spill] sm:$0xff] }
 0x44f   : > { %16820 = vst [vmem:[#allocation48_spill] sm:$0xff] %v14131_v54  ;;  %v5177_v39 = vadd.f32 %v16823_v36, %v5094_v46  ;;  %v5178_v20 = vadd.f32 %v16824_v16, %v5095_v7  ;;  %v14150_v42 = vmul.f32 %v14107_v27, %v16829_v43  ;;  %v14154_v13 = vmul.f32 %v14113_v9, %v16827_v24  ;;  %v14177_v55 = vld [vmem:[%s15393_s5 + $0x63] ss:$8 sm:$0xf] }
 0x450   : > { %16821 = vst [vmem:[#allocation84_spill] sm:$0xff] %v14137_v23  ;;  %16828 = vst [vmem:[#allocation59_spill] sm:$0xff] %v14146_v1  ;;  %v5629_v2 = vadd.f32 %v16832_v41, %v5590_v57  ;;  %v5264_v8 = vadd.f32 %v16835_v62, %v5181_v48  ;;  %v5265_v51 = vadd.f32 %v16836_v31, %v5182_v53  ;;  %v14194_v5 = vld [vmem:[%s15393_s5 + $0x43] ss:$8 sm:$0xf] }
 0x451   : > { %16830 = vst [vmem:[#allocation196_spill] sm:$0xff] %v14150_v42  ;;  %16831 = vst [vmem:[#allocation96_spill] sm:$0xff] %v14154_v13  ;;  %v5260_v10 = vadd.f32 %v16833_v44, %v5177_v39  ;;  %v5261_v17 = vadd.f32 %v16834_v52, %v5178_v20  ;;  %v14163_v50 = vmul.f32 %v14116_v63, %v16829_v43  ;;  %v16850_v7 = vld [vmem:[#allocation136_spill] sm:$0xff]  ;;  %v16852_v6 = vld [vmem:[#allocation138_spill] sm:$0xff] }
 0x452   : > { %v14167_v12 = vmul.f32 %v14128_v21, %v16827_v24  ;;  %v14171_v49 = vmul.f32 %v14131_v54, %v16829_v43  ;;  %v5712_v38 = vadd.f32 %v16840_v47, %v5629_v2  ;;  %16841 = vst [vmem:[#allocation168_spill] sm:$0xff] %v14177_v55  ;;  %v14186_v32 = vadd.f32 %v16845_v18, %v5264_v8  ;;  %v14208_v35 = vld [vmem:[%s15393_s5 + $0x5] ss:$8 sm:$0xf] }
 0x453   : > { %16837 = vst [vmem:[#allocation197_spill] sm:$0xff] %v14163_v50  ;;  %v14180_v45 = vadd.f32 %v16842_v4, %v5260_v10  ;;  %v14183_v19 = vadd.f32 %v16843_v28, %v5261_v17  ;;  %v14189_v59 = vadd.f32 %v16847_v34, %v5265_v51  ;;  %v14198_v46 = vrot.slane %v8216_v58, %v16755_v25  ;;  %v16854_v39 = vld [vmem:[#allocation85_spill] sm:$0xff]  ;;  %v16858_v53 = vld [vmem:[#allocation118_spill] sm:$0xff]  ;;  %v16860_v62 = vld [vmem:[#allocation132_spill] sm:$0xff] }
 0x454   : > { %16838 = vst [vmem:[#allocation160_spill] sm:$0xff] %v14167_v12  ;;  %16839 = vst [vmem:[#allocation161_spill] sm:$0xff] %v14171_v49  ;;  %v14202_v61 = vmul.f32 %v13690_v56, %v16850_v7  ;;  %v5795_v11 = vadd.f32 %v16852_v6, %v5712_v38  ;;  %v14214_v16 = vmul.f32 %v14107_v27, %v16854_v39  ;;  %v16856_v58 = vld [vmem:[#allocation17_spill] sm:$0xff]  ;;  %v16861_v31 = vld [vmem:[#allocation67_spill] sm:$0xff] }
 0x455   : > { %16844 = vst [vmem:[#allocation169_spill] sm:$0xff] %v14183_v19  ;;  %16846 = vst [vmem:[#allocation55_spill] sm:$0xff] %v14186_v32  ;;  %v6883_v20 = vrot.slane %v14177_v55, %v16856_v58  ;;  %v14223_v26 = vld [vmem:[%s15393_s5 + $0x82] ss:$8 sm:$0xf]  ;;  %v14228_v2 = vrot.slane %v14194_v5, %v16856_v58  ;;  %v14235_v52 = vrot.slane %v14208_v35, %v16856_v58 }
 0x456   : > { %16848 = vst [vmem:[#allocation144_spill] sm:$0xff] %v14189_v59  ;;  %16849 = vst [vmem:[#allocation201_spill] sm:$0xff] %v14198_v46  ;;  %v5878_v41 = vadd.f32 %v16858_v53, %v5795_v11  ;;  %v6966_v10 = vrot.slane %v14223_v26, %v16856_v58  ;;  %v16859_v17 = vld [vmem:[#allocation89_spill] sm:$0xff]  ;;  %v14243_v51 = vmul.f32 %v13690_v56, %v16861_v31  ;;  %v16862_v38 = vld [vmem:[#allocation51_spill] sm:$0xff] }
 0x457   : > { %16851 = vst [vmem:[#allocation172_spill] sm:$0xff] %v14202_v61  ;;  %16853 = vst [vmem:[#allocation204_spill] sm:$0xff] %v14208_v35  ;;  %v14239_v8 = vmul.f32 %v16860_v62, %v16859_v17  ;;  %v14249_v28 = vmul.f32 %v14228_v2, %v16859_v17  ;;  %v14253_v34 = vmul.f32 %v6883_v20, %v13977_v60  ;;  %v16863_v6 = vld [vmem:[#allocation83_spill] sm:$0xff]  ;;  %v16864_v53 = vld [vmem:[#allocation81_spill] sm:$0xff] }
 0x458   : > { %16855 = vst [vmem:[#allocation199_spill] sm:$0xff] %v14214_v16  ;;  %16857 = vst [vmem:[#allocation173_spill] sm:$0xff] %v14223_v26  ;;  %v5961_v4 = vadd.f32 %v16862_v38, %v5878_v41  ;;  %v6197_v11 = vmul.f32 %v16860_v62, %v16863_v6  ;;  %v6363_v56 = vmul.f32 %v16864_v53, %v16859_v17  ;;  %v14262_v44 = vld [vmem:[%s15393_s5 + $0x6] ss:$8 sm:$0xf] }
 0x459   : > { %16865 = vst [vmem:[#allocation93_spill] sm:$0xff] %v14262_v44  ;;  %v16866_v41 = vld [vmem:[#allocation53_spill] sm:$0xff]  ;;  %v6280_v0 = vmul.f32 %v14228_v2, %v16863_v6  ;;  %v16867_v18 = vld [vmem:[#allocation102_spill] sm:$0xff]  ;;  %v16868_v47 = vld [vmem:[#allocation52_spill] sm:$0xff]  ;;  %v14273_v62 = vmul.f32 %v14113_v9, %v16861_v31  ;;  %v14276_v53 = vmul.f32 %v6966_v10, %v13977_v60  ;;  %v6158_v36 = vmul.f32 %v14235_v52, %v16863_v6 }
 0x45a   : > { %v6044_v38 = vadd.f32 %v16866_v41, %v5961_v4  ;;  %v6446_v57 = vmul.f32 %v16867_v18, %v16859_v17  ;;  %v6529_v48 = vmul.f32 %v16868_v47, %v16859_v17  ;;  %v14284_v41 = vld [vmem:[%s15393_s5 + $0x25] ss:$8 sm:$0xf]  ;;  %v14292_v50 = vrot.slane %v14262_v44, %v16856_v58  ;;  %v14297_v4 = vld [vmem:[%s15393_s5 + $0x44] ss:$8 sm:$0xf] }
 0x45b   : > { %16869 = vst [vmem:[#allocation203_spill] sm:$0xff] %v14273_v62  ;;  %16870 = vst [vmem:[#allocation105_spill] sm:$0xff] %v14284_v41  ;;  %v16871_v18 = vld [vmem:[#allocation142_spill] sm:$0xff]  ;;  %v16872_v27 = vld [vmem:[#allocation213_spill] sm:$0xff]  ;;  %v6387_v47 = vrot.slane %v6363_v56, 1  ;;  %v6304_v59 = vrot.slane %v6280_v0, 6  ;;  %v14310_v25 = vrot.slane %v14284_v41, %v16856_v58  ;;  %v14314_v12 = vrot.slane %v14297_v4, %v16856_v58 }
 0x45c   : > { %v6127_v40 = vadd.f32 %v16871_v18, %v6044_v38  ;;  %v6612_v49 = vmul.f32 %v16873_v37, %v16872_v27  ;;  %16874 = vst [vmem:[#allocation216_spill] sm:$0xff] %v14297_v4  ;;  %v16875_v43 = vld [vmem:[#allocation18_spill] sm:$0xff]  ;;  %v6221_v18 = vrot.slane %v6197_v11, 3  ;;  %v6470_v37 = vrot.slane %v6446_v57, 4  ;;  %v16882_v38 = vld [vmem:[#allocation139_spill] sm:$0xff]  ;;  %v16889_v31 = vld [vmem:[#allocation193_spill] sm:$0xff] }
 0x45d   : > { %v14301_v16 = vrot.slane %v14177_v55, %v16875_v43  ;;  %v6553_v19 = vrot.slane %v6529_v48, 7  ;;  %v16876_v32 = vrot.slane %v14239_v8, 3  ;;  %v6695_v0 = vmul.f32 %v14292_v50, %v16728_v14  ;;  %v16878_v48 = vld [vmem:[#allocation125_spill] sm:$0xff] }
 0x45e   : > { %v6166_v42 = vadd.f32 %v6158_v36, %v6127_v40  ;;  %v16877_v40 = vrot.slane %v14249_v28, 6  ;;  %v6636_v36 = vrot.slane %v6612_v49, 2  ;;  %v16879_v56 = vrot.slane %v16878_v48, 1 }
 0x45f   : > { %v6223_v24 = vsel %vm1595_vm11, %v6221_v18, %v16876_v32  ;;  %v14326_v18 = vmul.f32 %v14310_v25, %v13831_v22  ;;  %v14330_v61 = vmul.f32 %v14314_v12, %v13831_v22  ;;  %v16883_v55 = vrot.slane %v16882_v38, 7 }
 0x460   : > { %v6249_v11 = vadd.f32 %v6223_v24, %v6166_v42  ;;  %v6306_v57 = vsel %vm1278_vm4, %v6304_v59, %v16877_v40  ;;  %v6389_v32 = vsel %vm1427_vm9, %v6387_v47, %v16879_v56  ;;  %v6900_v24 = vmul.f32 %v6883_v20, %v13831_v22  ;;  %v16880_v59 = vld [vmem:[#allocation185_spill] sm:$0xff] }
 0x461   : > { %v16881_v49 = vrot.slane %v16880_v59, 4  ;;  %v6555_v48 = vsel %vm3312_vm0, %v6553_v19, %v16883_v55  ;;  %v14340_v47 = vmul.f32 %v6883_v20, %v14007_v29  ;;  %v6734_v56 = vmul.f32 %v14310_v25, %v16728_v14  ;;  %v14357_v55 = vld [vmem:[%s15393_s5 + $0xc0] ss:$8 sm:$0xf] }
 0x462   : > { %v6332_v42 = vadd.f32 %v6306_v57, %v6249_v11  ;;  %v6817_v33 = vmul.f32 %v14314_v12, %v16728_v14  ;;  %v14347_v13 = vmul.f32 %v6966_v10, %v14007_v29  ;;  %16885 = vst [vmem:[#allocation56_spill] sm:$0xff] %v14357_v55  ;;  %v16886_v19 = vld [vmem:[#allocation133_spill] sm:$0xff]  ;;  %v16887_v11 = vld [vmem:[#allocation187_spill] sm:$0xff]  ;;  %v15834_v46 = vrot.slane %v14326_v18, 3 }
 0x463   : > { %v6472_v40 = vsel %vm1679_vm12, %v6470_v37, %v16881_v49  ;;  %v14352_v37 = vld [vmem:[%s15393_s5 + $0xa1] ss:$8 sm:$0xf]  ;;  %v5594_v20 = vadd.f32 %v16886_v19, %v13781_v30  ;;  %v16888_v57 = vrot.slane %v16887_v11, 2  ;;  %v6983_v49 = vmul.f32 %v6966_v10, %v13831_v22 }
 0x464   : > { %16884 = vst [vmem:[#allocation198_spill] sm:$0xff] %v14352_v37  ;;  %v6415_v38 = vadd.f32 %v6389_v32, %v6332_v42  ;;  %v14367_v1 = vrot.slane %v14352_v37, %v16856_v58  ;;  %v15835_v23 = vrot.slane %v14330_v61, 6  ;;  %v6924_v54 = vrot.slane %v6900_v24, 1  ;;  %v14385_v24 = vld [vmem:[%s15394_s6] sm:$0xf] }
 0x465   : > { %v6638_v59 = vsel %vm1511_vm10, %v6636_v36, %v16888_v57  ;;  %v5633_v21 = vadd.f32 %v16889_v31, %v5594_v20  ;;  %v15838_v30 = vrot.slane %v14340_v47, 1  ;;  %v14379_v10 = vrot.slane %v14357_v55, %v16856_v58  ;;  %v16890_v31 = vld [vmem:[#allocation73_spill] sm:$0xff] }
 0x466   : > { %v6498_v62 = vadd.f32 %v6472_v40, %v6415_v38  ;;  %v14375_v32 = vmul.f32 %v14367_v1, %v14007_v29  ;;  %v6758_v36 = vrot.slane %v6734_v56, 3  ;;  %v6841_v42 = vrot.slane %v6817_v33, 6 }
 0x467   : > { %v5716_v40 = vadd.f32 %v16890_v31, %v5633_v21  ;;  %v7007_v38 = vrot.slane %v6983_v49, 4  ;;  %v7066_v11 = vmul.f32 %v14367_v1, %v13831_v22  ;;  %v7149_v57 = vmul.f32 %v14379_v10, %v14007_v29  ;;  %v16891_v21 = vld [vmem:[#allocation226_spill] sm:$0xff] }
 0x468   : > { %v6581_v20 = vadd.f32 %v6555_v48, %v6498_v62  ;;  %v6760_v33 = vsel %vm1595_vm11, %v6758_v36, %v15834_v46  ;;  %v6843_v56 = vsel %vm1278_vm4, %v6841_v42, %v15835_v23  ;;  %v14400_v19 = vmul.f32 %v14379_v10, %v13977_v60  ;;  %v16893_v23 = vld [vmem:[#allocation140_spill] sm:$0xff]  ;;  %v16895_v31 = vld [vmem:[#allocation90_spill] sm:$0xff] }
 0x469   : > { %v5799_v62 = vadd.f32 %v16891_v21, %v5716_v40  ;;  %v6926_v49 = vsel %vm1427_vm9, %v6924_v54, %v15838_v30  ;;  %v14409_v36 = vrot.slane %v14385_v24, %v16856_v58  ;;  %v16892_v46 = vrot.slane %v14347_v13, 4 }
 0x46a   : > { %v6664_v48 = vadd.f32 %v6638_v59, %v6581_v20  ;;  %v6162_v40 = vmul.f32 %v14235_v52, %v16859_v17  ;;  %v16894_v59 = vld [vmem:[#allocation75_spill] sm:$0xff]  ;;  %v7090_v54 = vrot.slane %v7066_v11, 7  ;;  %v7173_v30 = vrot.slane %v7149_v57, 2 }
 0x46b   : > { %v7009_v42 = vsel %vm1679_vm12, %v7007_v38, %v16892_v46  ;;  %v5882_v63 = vadd.f32 %v16893_v23, %v5799_v62  ;;  %v5796_v20 = vadd.f32 %v16894_v59, %v13968_v3  ;;  %v16896_v39 = vrot.slane %v16895_v31, 3  ;;  %v16898_v46 = vld [vmem:[#allocation194_spill] sm:$0xff] }
 0x46c   : > { %v6703_v21 = vadd.f32 %v6695_v0, %v6664_v48  ;;  %v16897_v58 = vrot.slane %v14239_v8, 3  ;;  %v15843_v7 = vrot.slane %v14400_v19, 2  ;;  %v16899_v23 = vld [vmem:[#allocation46_spill] sm:$0xff]  ;;  %v16900_v8 = vrot.slane %v14375_v32, 7  ;;  %v16901_v0 = vld [vmem:[#allocation195_spill] sm:$0xff]  ;;  %v16902_v48 = vld [vmem:[#allocation209_spill] sm:$0xff] }
 0x46d   : > { %v5965_v38 = vadd.f32 %v16898_v46, %v5882_v63  ;;  %v5879_v62 = vadd.f32 %v16899_v23, %v5796_v20  ;;  %v14430_v52 = vld [vmem:[%s15393_s5 + $0x24] ss:$8 sm:$0xf]  ;;  %v14443_v63 = vrot.slane %v14194_v5, %v16875_v43  ;;  %v6742_v57 = vmul.f32 %v14310_v25, %v14007_v29 }
 0x46e   : > { %v6234_v9 = vsel %vm1595_vm11, %v16897_v58, %v16896_v39  ;;  %v14434_v3 = vrot.slane %v14430_v52, %v16875_v43  ;;  %v6786_v17 = vadd.f32 %v6760_v33, %v6703_v21  ;;  %v7092_v39 = vsel %vm3312_vm0, %v7090_v54, %v16900_v8  ;;  %v16904_v54 = vld [vmem:[#allocation70_spill] sm:$0xff] }
 0x46f   : > { %v6288_v58 = vmul.f32 %v14228_v2, %v16872_v27  ;;  %v6048_v11 = vadd.f32 %v16901_v0, %v5965_v38  ;;  %v5962_v31 = vadd.f32 %v16902_v48, %v5879_v62  ;;  %v14451_v33 = vrot.slane %v14208_v35, %v16875_v43  ;;  %v16903_v27 = vld [vmem:[#allocation186_spill] sm:$0xff]  ;;  %v16905_v38 = vld [vmem:[#allocation211_spill] sm:$0xff] }
 0x470   : > { %v6869_v59 = vadd.f32 %v6843_v56, %v6786_v17  ;;  %v6198_v20 = vmul.f32 %v14434_v3, %v16863_v6  ;;  %v14457_v2 = vmul.f32 %v14434_v3, %v16903_v27  ;;  %v14461_v21 = vmul.f32 %v14443_v63, %v16903_v27 }
 0x471   : > { %v7175_v25 = vsel %vm1511_vm10, %v7173_v30, %v15843_v7  ;;  %v6131_v46 = vadd.f32 %v16904_v54, %v6048_v11  ;;  %v14469_v56 = vmul.f32 %v14292_v50, %v13831_v22  ;;  %v6045_v23 = vadd.f32 %v16905_v38, %v5962_v31  ;;  %v16906_v30 = vld [vmem:[#allocation214_spill] sm:$0xff]  ;;  %v14491_v38 = vld [vmem:[#allocation7 + $0x78] sm:$0xff] }
 0x472   : > { %v6952_v62 = vadd.f32 %v6926_v49, %v6869_v59  ;;  %v6825_v17 = vmul.f32 %v14314_v12, %v14007_v29  ;;  %v15845_v8 = vrot.slane %v14457_v2, 3  ;;  %v6281_v0 = vmul.f32 %v14443_v63, %v16863_v6  ;;  %7996 = vmatprep.subr.mxu0 %v14491_v38  ;;  %8040 = vmatprep.subr.mxu1 %v14491_v38 }
 0x473   : > { %v6170_v48 = vadd.f32 %v6162_v40, %v6131_v46  ;;  %v6316_v35 = vrot.slane %v6288_v58, 6  ;;  %v6128_v7 = vadd.f32 %v16906_v30, %v6045_v23  ;;  %v6159_v11 = vmul.f32 %v14451_v33, %v16863_v6  ;;  %7997 = vmatpush3.msra.mxu0 %v14491_v38 }
 0x474   : > { %v7035_v22 = vadd.f32 %v7009_v42, %v6952_v62  ;;  %v6770_v50 = vrot.slane %v6742_v57, 3  ;;  %v6224_v54 = vrot.slane %v6198_v20, 3  ;;  %v15844_v49 = vrot.slane %v14461_v21, 6  ;;  %v14493_v42 = vld [vmem:[#allocation7 + $0x70] sm:$0xff]  ;;  %v14510_v62 = vld [vmem:[#allocation7 + $0x68] sm:$0xff] }
 0x475   : > { %v6253_v31 = vadd.f32 %v6234_v9, %v6170_v48  ;;  %v16907_v29 = vrot.slane %v14249_v28, 6  ;;  %v16908_v59 = vrot.slane %v14253_v34, 1  ;;  %v16909_v40 = vrot.slane %v14340_v47, 1  ;;  %7998 = vmatprep.subr.mxu0 %v14493_v42 }
 0x476   : > { %v6167_v46 = vadd.f32 %v6159_v11, %v6128_v7  ;;  %v7118_v57 = vadd.f32 %v7092_v39, %v7035_v22  ;;  %v6853_v20 = vrot.slane %v6825_v17, 6  ;;  %v6226_v9 = vsel %vm1595_vm11, %v6224_v54, %v15845_v8  ;;  %7999 = vmatpush3.msra.mxu0 %v14493_v42  ;;  %v14533_v11 = vld [vmem:[#allocation7 + $0x60] sm:$0xff] }
 0x477   : > { %v6317_v12 = vsel %vm1278_vm4, %v16907_v29, %v6316_v35  ;;  %v14489_v58 = vsel %vm1427_vm9, %v16909_v40, %v16908_v59  ;;  %v6307_v28 = vrot.slane %v6281_v0, 6  ;;  %v16910_v34 = vrot.slane %v14276_v53, 4  ;;  %v16915_v29 = vld [vmem:[#allocation135_spill] sm:$0xff]  ;;  %v16919_v40 = vld [vmem:[#allocation188_spill] sm:$0xff]  ;;  %8000 = vmatprep.subr.mxu0 %v14510_v62 }
 0x478   : > { %v6336_v35 = vadd.f32 %v6317_v12, %v6253_v31  ;;  %v16911_v7 = vrot.slane %v14347_v13, 4  ;;  %v7074_v39 = vmul.f32 %v14367_v1, %v13977_v60  ;;  %v6250_v23 = vadd.f32 %v6226_v9, %v6167_v46  ;;  %v16912_v60 = vld [vmem:[#allocation137_spill] sm:$0xff]  ;;  %v16920_v46 = vld [vmem:[#allocation158_spill] sm:$0xff]  ;;  %v16921_v9 = vld [vmem:[#allocation95_spill] sm:$0xff]  ;;  %8001 = vmatpush3.msra.mxu0 %v14510_v62 }
 0x479   : > { %v7201_v17 = vadd.f32 %v7175_v25, %v7118_v57  ;;  %v14514_v0 = vmul.f32 %v14379_v10, %v16728_v14  ;;  %v6309_v13 = vsel %vm1278_vm4, %v6307_v28, %v15844_v49  ;;  %v14521_v53 = vrot.slane %v14284_v41, %v16875_v43  ;;  %8002 = vmatprep.subr.mxu0 %v14533_v11 }
 0x47a   : > { %v14505_v47 = vsel %vm1679_vm12, %v16911_v7, %v16910_v34  ;;  %v6419_v1 = vadd.f32 %v16912_v60, %v6336_v35  ;;  %v16913_v48 = vrot.slane %v14326_v18, 3  ;;  %v6333_v30 = vadd.f32 %v6309_v13, %v6250_v23  ;;  %v16917_v18 = vld [vmem:[#allocation153_spill] sm:$0xff]  ;;  %v16922_v7 = vld [vmem:[#allocation127_spill] sm:$0xff]  ;;  %v16925_v60 = vld [vmem:[#allocation222_spill] sm:$0xff]  ;;  %8003 = vmatpush3.msra.mxu0 %v14533_v11 }
 0x47b   : > { %v14530_v10 = vrot.slane %v14297_v4, %v16875_v43  ;;  %v7231_v22 = vadd.f32 %v14409_v36, %v7201_v17  ;;  %v16914_v54 = vrot.slane %v14330_v61, 6  ;;  %v16916_v12 = vrot.slane %v16915_v29, 1  ;;  %v16923_v17 = vld [vmem:[#allocation205_spill] sm:$0xff] }
 0x47c   : > { %v6771_v25 = vsel %vm1595_vm11, %v16913_v48, %v6770_v50  ;;  %v16918_v59 = vrot.slane %v16917_v18, 1  ;;  %v6613_v57 = vmul.f32 %v16920_v46, %v16919_v40  ;;  %v6502_v28 = vadd.f32 %v16921_v9, %v6419_v1  ;;  %v16929_v9 = vld [vmem:[#allocation171_spill] sm:$0xff] }
 0x47d   : > { %v6854_v31 = vsel %vm1278_vm4, %v16914_v54, %v6853_v20  ;;  %v7102_v35 = vrot.slane %v7074_v39, 7  ;;  %v14550_v61 = vmul.f32 %v14521_v53, %v16922_v7  ;;  %v14553_v20 = vld [vmem:[#allocation7 + $0x58] sm:$0xff]  ;;  %7984 = vmatprep.mubr.f32.mxu1 %v7231_v22  ;;  %v16924_v13 = vrot.slane %v16923_v17, 4 }
 0x47e   : > { %v6392_v50 = vsel %vm1427_vm9, %v16918_v59, %v16916_v12  ;;  %v16926_v48 = vrot.slane %v16925_v60, 4  ;;  %v14563_v39 = vrot.slane %v14262_v44, %v16875_v43  ;;  %v6735_v1 = vmul.f32 %v14521_v53, %v16728_v14  ;;  %8004 = vmatprep.subr.mxu0 %v14553_v20  ;;  %v16939_v44 = vld [vmem:[#allocation189_spill] sm:$0xff] }
 0x47f   : > { %v6416_v34 = vadd.f32 %v6392_v50, %v6333_v30  ;;  %v16927_v30 = vld [vmem:[#allocation200_spill] sm:$0xff]  ;;  %v16928_v22 = vrot.slane %v14375_v32, 7  ;;  %v6818_v59 = vmul.f32 %v14530_v10, %v16728_v14  ;;  %v14577_v50 = vld [vmem:[#allocation7 + $0x50] sm:$0xff]  ;;  %v16930_v17 = vrot.slane %v16929_v9, 7  ;;  %8005 = vmatpush3.msra.mxu0 %v14553_v20 }
 0x480   : > { %v6475_v54 = vsel %vm1679_vm12, %v16926_v48, %v16924_v13  ;;  %v6585_v29 = vadd.f32 %v16927_v30, %v6502_v28  ;;  %v16931_v13 = vld [vmem:[#allocation178_spill] sm:$0xff]  ;;  %v6639_v28 = vrot.slane %v6613_v57, 2  ;;  %v14586_v32 = vmul.f32 %v14530_v10, %v16922_v7  ;;  %v16934_v9 = vld [vmem:[#allocation183_spill] sm:$0xff]  ;;  %8006 = vmatprep.subr.mxu0 %v14577_v50 }
 0x481   : > { %v14572_v12 = vsel %vm3312_vm0, %v16928_v22, %v7102_v35  ;;  %v6499_v18 = vadd.f32 %v6475_v54, %v6416_v34  ;;  %v16932_v60 = vrot.slane %v16931_v13, 7  ;;  %v6901_v35 = vmul.f32 %v14301_v16, %v16922_v7  ;;  %v16933_v34 = vld [vmem:[#allocation191_spill] sm:$0xff]  ;;  %v14598_v57 = vld [vmem:[#allocation7 + $0x48] sm:$0xff]  ;;  %8007 = vmatpush3.msra.mxu0 %v14577_v50 }
 0x482   : > { %v6668_v54 = vadd.f32 %v16933_v34, %v6585_v29  ;;  %v14595_v13 = vmul.f32 %v14301_v16, %v16934_v9  ;;  %v6696_v8 = vmul.f32 %v14563_v39, %v16728_v14  ;;  %v6761_v23 = vrot.slane %v6735_v1, 3  ;;  %8008 = vmatprep.subr.mxu0 %v14598_v57 }
 0x483   : > { %v6558_v48 = vsel %vm3312_vm0, %v16932_v60, %v16930_v17  ;;  %v16936_v17 = vld [vmem:[#allocation180_spill] sm:$0xff]  ;;  %v14607_v29 = vrot.slane %v14223_v26, %v16875_v43  ;;  %v6844_v34 = vrot.slane %v6818_v59, 6  ;;  %v14613_v22 = vrot.slane %v14352_v37, %v16875_v43  ;;  %8009 = vmatpush3.msra.mxu0 %v14598_v57  ;;  %v14650_v37 = vld [vmem:[#allocation7 + $0x30] sm:$0xff] }
 0x484   : > { %v6582_v30 = vadd.f32 %v6558_v48, %v6499_v18  ;;  %16935 = vst [vmem:[#allocation129_spill] sm:$0xff] %v14595_v13  ;;  %v16937_v60 = vrot.slane %v16936_v17, 2  ;;  %v6707_v18 = vadd.f32 %v14469_v56, %v6668_v54  ;;  %v5800_v56 = vadd.f32 %v16939_v44, %v14020_v15 }
 0x485   : > { %v14621_v26 = vmul.f32 %v14607_v29, %v16934_v9  ;;  %v16940_v54 = vrot.slane %v14550_v61, 3  ;;  %v6984_v1 = vmul.f32 %v14607_v29, %v16922_v7  ;;  %v14637_v15 = vmul.f32 %v14613_v22, %v16934_v9 }
 0x486   : > { %v6641_v49 = vsel %vm1511_vm10, %v6639_v28, %v16937_v60  ;;  %v14616_v28 = vld [vmem:[#allocation7 + $0x40] sm:$0xff]  ;;  %v6927_v60 = vrot.slane %v6901_v35, 1  ;;  %v14631_v35 = vld [vmem:[#allocation7 + $0x38] sm:$0xff]  ;;  %v14641_v44 = vrot.slane %v14357_v55, %v16875_v43  ;;  %v16943_v4 = vrot.slane %v14586_v32, 6 }
 0x487   : > { %v6665_v48 = vadd.f32 %v6641_v49, %v6582_v30  ;;  %16938 = vst [vmem:[#allocation54_spill] sm:$0xff] %v14616_v28  ;;  %v6790_v49 = vadd.f32 %v6771_v25, %v6707_v18  ;;  %v6763_v30 = vsel %vm1595_vm11, %v6761_v23, %v16940_v54  ;;  %16941 = vst [vmem:[#allocation215_spill] sm:$0xff] %v14631_v35  ;;  %8010 = vmatprep.subr.mxu0 %v14616_v28 }
 0x488   : > { %v6206_v54 = vmul.f32 %v14434_v3, %v16919_v40  ;;  %8011 = vmatpush3.msra.mxu0 %v14616_v28  ;;  %v6846_v55 = vsel %vm1278_vm4, %v6844_v34, %v16943_v4  ;;  %v6289_v28 = vmul.f32 %v14443_v63, %v16919_v40  ;;  %v14667_v4 = vld [vmem:[#allocation7 + $0x28] sm:$0xff]  ;;  %v7010_v34 = vrot.slane %v6984_v1, 4 }
 0x489   : > { %v6704_v59 = vadd.f32 %v6696_v8, %v6665_v48  ;;  %v16942_v8 = vld [vmem:[#allocation50_spill] sm:$0xff]  ;;  %v6873_v23 = vadd.f32 %v6854_v31, %v6790_v49  ;;  %v7067_v48 = vmul.f32 %v14613_v22, %v16922_v7  ;;  %v7150_v31 = vmul.f32 %v14641_v44, %v16934_v9  ;;  %v16944_v49 = vld [vmem:[#allocation108_spill] sm:$0xff]  ;;  %8012 = vmatprep.subr.mxu0 %v14631_v35 }
 0x48a   : > { %v5883_v25 = vadd.f32 %v16942_v8, %v5800_v56  ;;  %v16945_v8 = vrot.slane %v14595_v13, 1  ;;  %8013 = vmatpush3.msra.mxu0 %v14631_v35  ;;  %v6235_v63 = vrot.slane %v6206_v54, 3  ;;  %v16948_v40 = vrot.slane %v14621_v26, 4  ;;  %v16949_v56 = vld [vmem:[#allocation128_spill] sm:$0xff] }
 0x48b   : > { %v6787_v18 = vadd.f32 %v6763_v30, %v6704_v59  ;;  %v6956_v30 = vadd.f32 %v14489_v58, %v6873_v23  ;;  %v16947_v58 = vld [vmem:[#allocation77_spill] sm:$0xff]  ;;  %8014 = vmatprep.subr.mxu0 %v14650_v37  ;;  %v6163_v13 = vmul.f32 %v14451_v33, %v16903_v27  ;;  %v14698_v27 = vrot.slane %v14385_v24, %v16875_v43 }
 0x48c   : > { %v5966_v59 = vadd.f32 %v16944_v49, %v5883_v25  ;;  %v6929_v41 = vsel %vm1427_vm9, %v6927_v60, %v16945_v8  ;;  %v16946_v25 = vld [vmem:[#allocation58_spill] sm:$0xff]  ;;  %8015 = vmatpush3.msra.mxu0 %v14650_v37  ;;  %v7012_v1 = vsel %vm1679_vm12, %v7010_v34, %v16948_v40  ;;  %v7176_v8 = vrot.slane %v7150_v31, 2 }
 0x48d   : > { %v6870_v3 = vadd.f32 %v6846_v55, %v6787_v18  ;;  %v14672_v49 = vmul.f32 %v14641_v44, %v16946_v25  ;;  %v7039_v60 = vadd.f32 %v14505_v47, %v6956_v30  ;;  %v7093_v18 = vrot.slane %v7067_v48, 7  ;;  %8016 = vmatprep.subr.mxu0 %v14667_v4 }
 0x48e   : > { %v6049_v55 = vadd.f32 %v16947_v58, %v5966_v59  ;;  %v16951_v47 = vrot.slane %v14400_v19, 2  ;;  %v6318_v30 = vrot.slane %v6289_v28, 6  ;;  %8017 = vmatpush3.msra.mxu0 %v14667_v4  ;;  %v16952_v31 = vrot.slane %v14637_v15, 7  ;;  %v16954_v28 = vld [vmem:[#allocation106_spill] sm:$0xff] }
 0x48f   : > { %v6953_v23 = vadd.f32 %v6929_v41, %v6870_v3  ;;  %v7122_v59 = vadd.f32 %v14572_v12, %v7039_v60  ;;  %v16950_v41 = vrot.slane %v14514_v0, 2  ;;  %v15862_v33 = vrot.slane %v14672_v49, 2  ;;  %v16955_v60 = vld [vmem:[#allocation136_spill] sm:$0xff]  ;;  %v17000_v43 = vld [vmem:[#allocation54_spill] sm:$0xff] }
 0x490   : > { %v6132_v35 = vadd.f32 %v16949_v56, %v6049_v55  ;;  %v7095_v56 = vsel %vm3312_vm0, %v7093_v18, %v16952_v31  ;;  %v16953_v19 = vrot.slane %v14457_v2, 3  ;;  %v5426_v58 = vadd.f32 %v16954_v28, %v14180_v45  ;;  %v16963_v31 = vld [vmem:[#allocation156_spill] sm:$0xff] }
 0x491   : > { %v7186_v48 = vsel %vm1511_vm10, %v16951_v47, %v16950_v41  ;;  %v7036_v54 = vadd.f32 %v7012_v1, %v6953_v23  ;;  %v6403_v55 = vrot.slane %v14243_v51, 1  ;;  %v16956_v23 = vld [vmem:[#allocation57_spill] sm:$0xff]  ;;  %v7178_v40 = vsel %vm1511_vm10, %v7176_v8, %v15862_v33  ;;  %v16960_v51 = vld [vmem:[#allocation74_spill] sm:$0xff]  ;;  %v16968_v28 = vld [vmem:[#allocation84_spill] sm:$0xff] }
 0x492   : > { %v6171_v12 = vadd.f32 %v6163_v13, %v6132_v35  ;;  %v7205_v0 = vadd.f32 %v7186_v48, %v7122_v59  ;;  %v6236_v34 = vsel %vm1595_vm11, %v16953_v19, %v6235_v63  ;;  %v14708_v18 = vmul.f32 %v16956_v23, %v16955_v60  ;;  %v16958_v59 = vld [vmem:[#allocation111_spill] sm:$0xff]  ;;  %v16959_v41 = vld [vmem:[#allocation85_spill] sm:$0xff]  ;;  %v16966_v19 = vld [vmem:[#allocation48_spill] sm:$0xff] }
 0x493   : > { %v7119_v3 = vadd.f32 %v7095_v56, %v7036_v54  ;;  %v16957_v2 = vrot.slane %v14461_v21, 6  ;;  %v5509_v45 = vadd.f32 %v16958_v59, %v5426_v58  ;;  %v14720_v47 = vmul.f32 %v16960_v51, %v16959_v41  ;;  %v16962_v48 = vld [vmem:[#allocation203_spill] sm:$0xff]  ;;  %v16969_v23 = vld [vmem:[#allocation121_spill] sm:$0xff]  ;;  %v16979_v59 = vld [vmem:[#allocation66_spill] sm:$0xff] }
 0x494   : > { %v6254_v13 = vadd.f32 %v6236_v34, %v6171_v12  ;;  %v7235_v35 = vadd.f32 %v14409_v36, %v7205_v0  ;;  %v6486_v54 = vrot.slane %v16962_v48, 4  ;;  %v14725_v56 = vmul.f32 %v16963_v31, %v16955_v60  ;;  %v16964_v12 = vld [vmem:[#allocation67_spill] sm:$0xff]  ;;  %v16965_v0 = vld [vmem:[#allocation30_spill] sm:$0xff] }
 0x495   : > { %v7202_v1 = vadd.f32 %v7178_v40, %v7119_v3  ;;  %v6319_v63 = vsel %vm1278_vm4, %v16957_v2, %v6318_v30  ;;  %16961 = vst [vmem:[#allocation218_spill] sm:$0xff] %v14720_v47  ;;  %v6539_v36 = vmul.f32 %v16963_v31, %v16964_v12  ;;  %v6621_v30 = vmul.f32 %v16920_v46, %v16863_v6  ;;  %v16970_v40 = vld [vmem:[#allocation201_spill] sm:$0xff]  ;;  %v16975_v48 = vld [vmem:[#allocation179_spill] sm:$0xff]  ;;  %v17038_v47 = vld [vmem:[#allocation182_spill] sm:$0xff] }
 0x496   : > { %v6337_v8 = vadd.f32 %v6319_v63, %v6254_v13  ;;  %7985 = vmatmul.mubr.f32.vlgmr.msra.gmra.mxu1 %v7235_v35  ;;  %v5592_v3 = vadd.f32 %v16965_v0, %v5509_v45  ;;  %v14735_v34 = vmul.f32 %v16966_v19, %v16959_v41  ;;  %v14739_v58 = vmul.f32 %v16968_v28, %v16964_v12  ;;  %v16972_v35 = vld [vmem:[#allocation223_spill] sm:$0xff]  ;;  %v16976_v0 = vld [vmem:[#allocation96_spill] sm:$0xff]  ;;  %v16980_v12 = vld [vmem:[#allocation190_spill] sm:$0xff] }
 0x497   : > { %v7232_v21 = vadd.f32 %v14698_v27, %v7202_v1  ;;  %v14743_v13 = vmul.f32 %v16970_v40, %v16969_v23  ;;  %8056 = vmatpush3.msra.mxu1 %v14491_v38  ;;  %v16973_v1 = vld [vmem:[#allocation59_spill] sm:$0xff]  ;;  %v6743_v45 = vmul.f32 %v14521_v53, %v16934_v9  ;;  %v16977_v33 = vrot.slane %v16976_v0, 4 }
 0x498   : > { %16967 = vst [vmem:[#allocation206_spill] sm:$0xff] %v14735_v34  ;;  %v6420_v2 = vadd.f32 %v16972_v35, %v6337_v8  ;;  %v16974_v46 = vrot.slane %v16973_v1, 1  ;;  %v5631_v31 = vadd.f32 %v16975_v48, %v5592_v3  ;;  %v16978_v35 = vld [vmem:[#allocation94_spill] sm:$0xff]  ;;  %8041 = vmatprep.subr.mxu1 %v14493_v42  ;;  %v6826_v53 = vmul.f32 %v14530_v10, %v16934_v9 }
 0x499   : > { %16971 = vst [vmem:[#allocation143_spill] sm:$0xff] %v14743_v13  ;;  %7987 = vmatprep.mubr.f32.mxu1 %v7232_v21  ;;  %v14760_v8 = vsel %vm1679_vm12, %v16977_v33, %v6486_v54  ;;  %v6650_v21 = vrot.slane %v6621_v30, 2  ;;  %8057 = vmatpush3.msra.mxu1 %v14493_v42  ;;  %v16981_v30 = vrot.slane %v16936_v17, 2  ;;  %v6772_v9 = vrot.slane %v6743_v45, 3  ;;  %v16985_v17 = vld [vmem:[#allocation160_spill] sm:$0xff] }
 0x49a   : > { %v14750_v63 = vsel %vm1427_vm9, %v16974_v46, %v6403_v55  ;;  %v6503_v55 = vadd.f32 %v16978_v35, %v6420_v2  ;;  %v6569_v46 = vrot.slane %v6539_v36, 7  ;;  %v5714_v3 = vadd.f32 %v16979_v59, %v5631_v31  ;;  %8042 = vmatprep.subr.mxu1 %v14510_v62  ;;  %v16982_v2 = vld [vmem:[#allocation220_spill] sm:$0xff]  ;;  %v16983_v59 = vld [vmem:[#allocation19_spill] sm:$0xff] }
 0x49b   : > { %v6909_v36 = vmul.f32 %v14301_v16, %v16946_v25  ;;  %v6651_v10 = vsel %vm1511_vm10, %v16981_v30, %v6650_v21  ;;  %8058 = vmatpush3.msra.mxu1 %v14510_v62  ;;  %v16984_v31 = vld [vmem:[#allocation168_spill] sm:$0xff]  ;;  %v14789_v16 = vrot.slane %v14430_v52, %v16983_v59  ;;  %v16986_v45 = vrot.slane %v16985_v17, 7  ;;  %v16987_v21 = vld [vmem:[#allocation141_spill] sm:$0xff] }
 0x49c   : > { %v6586_v38 = vadd.f32 %v16980_v12, %v6503_v55  ;;  %v5797_v42 = vadd.f32 %v16982_v2, %v5714_v3  ;;  %v14783_v35 = vrot.slane %v16984_v31, %v16983_v59  ;;  %v6700_v12 = vmul.f32 %v14563_v39, %v16922_v7  ;;  %8043 = vmatprep.subr.mxu1 %v14533_v11  ;;  %v16988_v7 = vld [vmem:[#allocation154_spill] sm:$0xff] }
 0x49d   : > { %v14795_v55 = vsel %vm3312_vm0, %v16986_v45, %v6569_v46  ;;  %v6855_v62 = vrot.slane %v6826_v53, 6  ;;  %8059 = vmatpush3.msra.mxu1 %v14533_v11  ;;  %v14811_v46 = vmul.f32 %v14789_v16, %v16955_v60  ;;  %v16989_v53 = vrot.slane %v14550_v61, 3 }
 0x49e   : > { %v6669_v54 = vadd.f32 %v6651_v10, %v6586_v38  ;;  %v5880_v3 = vadd.f32 %v16987_v21, %v5797_v42  ;;  %v14800_v38 = vrot.slane %v14194_v5, %v16983_v59  ;;  %v14805_v39 = vmul.f32 %v14783_v35, %v16988_v7  ;;  %8044 = vmatprep.subr.mxu1 %v14553_v20  ;;  %v16990_v42 = vld [vmem:[#allocation147_spill] sm:$0xff] }
 0x49f   : > { %v6992_v10 = vmul.f32 %v14607_v29, %v16946_v25  ;;  %v6773_v2 = vsel %vm1595_vm11, %v16989_v53, %v6772_v9  ;;  %v7075_v11 = vmul.f32 %v14613_v22, %v16946_v25  ;;  %8060 = vmatpush3.msra.mxu1 %v14553_v20  ;;  %v6938_v21 = vrot.slane %v6909_v36, 1 }
 0x4a0   : > { %v6708_v30 = vadd.f32 %v6700_v12, %v6669_v54  ;;  %v5963_v45 = vadd.f32 %v16990_v42, %v5880_v3  ;;  %v16991_v54 = vld [vmem:[#allocation204_spill] sm:$0xff]  ;;  %v6199_v48 = vmul.f32 %v14789_v16, %v16863_v6  ;;  %v14829_v61 = vmul.f32 %v14800_v38, %v16955_v60  ;;  %8045 = vmatprep.subr.mxu1 %v14577_v50  ;;  %v16993_v3 = vld [vmem:[#allocation167_spill] sm:$0xff] }
 0x4a1   : > { %v14822_v12 = vrot.slane %v16991_v54, %v16983_v59  ;;  %v16992_v22 = vrot.slane %v14586_v32, 6  ;;  %v7158_v9 = vmul.f32 %v14641_v44, %v16728_v14  ;;  %v6282_v36 = vmul.f32 %v14800_v38, %v16863_v6  ;;  %8061 = vmatpush3.msra.mxu1 %v14577_v50 }
 0x4a2   : > { %v6791_v29 = vadd.f32 %v6773_v2, %v6708_v30  ;;  %v6046_v20 = vadd.f32 %v16993_v3, %v5963_v45  ;;  %v16994_v30 = vld [vmem:[#allocation20_spill] sm:$0xff]  ;;  %v7021_v42 = vrot.slane %v6992_v10, 4  ;;  %8046 = vmatprep.subr.mxu1 %v14598_v57  ;;  %v7104_v45 = vrot.slane %v7075_v11, 7  ;;  %v16998_v3 = vld [vmem:[#allocation79_spill] sm:$0xff] }
 0x4a3   : > { %v6856_v25 = vsel %vm1278_vm4, %v16992_v22, %v6855_v62  ;;  %v14843_v53 = vrot.slane %v16984_v31, %v16994_v30  ;;  %v16996_v62 = vld [vmem:[#allocation129_spill] sm:$0xff]  ;;  %v6160_v50 = vmul.f32 %v14822_v12, %v16863_v6  ;;  %8062 = vmatpush3.msra.mxu1 %v14598_v57  ;;  %v15864_v32 = vrot.slane %v14829_v61, 6 }
 0x4a4   : > { %v6874_v2 = vadd.f32 %v6856_v25, %v6791_v29  ;;  %v16997_v22 = vrot.slane %v16996_v62, 1  ;;  %v6129_v33 = vadd.f32 %v16998_v3, %v6046_v20  ;;  %v16999_v29 = vrot.slane %v14621_v26, 4  ;;  %8047 = vmatprep.subr.mxu1 %v17000_v43 }
 0x4a5   : > { %16995 = vst [vmem:[#allocation157_spill] sm:$0xff] %v14843_v53  ;;  %v6227_v25 = vrot.slane %v6199_v48, 3  ;;  %v7187_v20 = vrot.slane %v7158_v9, 2  ;;  %8063 = vmatpush3.msra.mxu1 %v17000_v43  ;;  %v17003_v48 = vld [vmem:[#allocation105_spill] sm:$0xff] }
 0x4a6   : > { %v6939_v44 = vsel %vm1427_vm9, %v16997_v22, %v6938_v21  ;;  %v7022_v10 = vsel %vm1679_vm12, %v16999_v29, %v7021_v42  ;;  %v17001_v21 = vrot.slane %v14637_v15, 7  ;;  %v6168_v62 = vadd.f32 %v6160_v50, %v6129_v33  ;;  %v17005_v15 = vld [vmem:[#allocation215_spill] sm:$0xff]  ;;  %v17035_v53 = vld [vmem:[#allocation117_spill] sm:$0xff] }
 0x4a7   : > { %v6957_v31 = vadd.f32 %v6939_v44, %v6874_v2  ;;  %v6310_v22 = vrot.slane %v6282_v36, 6  ;;  %v17002_v2 = vrot.slane %v14811_v46, 3  ;;  %v14868_v42 = vrot.slane %v17003_v48, %v16983_v59  ;;  %v17004_v44 = vld [vmem:[#allocation216_spill] sm:$0xff]  ;;  %8048 = vmatprep.subr.mxu1 %v17005_v15  ;;  %v17007_v36 = vld [vmem:[#allocation149_spill] sm:$0xff]  ;;  %v17008_v50 = vld [vmem:[#allocation55_spill] sm:$0xff] }
 0x4a8   : > { %v7105_v11 = vsel %vm3312_vm0, %v17001_v21, %v7104_v45  ;;  %v14872_v3 = vrot.slane %v17004_v44, %v16983_v59  ;;  %v17006_v33 = vrot.slane %v14672_v49, 2  ;;  %v6614_v45 = vmul.f32 %v16968_v28, %v17007_v36  ;;  %8064 = vmatpush3.msra.mxu1 %v17005_v15  ;;  %v17010_v21 = vld [vmem:[#allocation93_spill] sm:$0xff]  ;;  %v17011_v49 = vld [vmem:[#allocation212_spill] sm:$0xff] }
 0x4a9   : > { %v7040_v57 = vadd.f32 %v7022_v10, %v6957_v31  ;;  %v6229_v26 = vsel %vm1595_vm11, %v6227_v25, %v17002_v2  ;;  %v17009_v31 = vld [vmem:[#allocation101_spill] sm:$0xff]  ;;  %v6312_v25 = vsel %vm1278_vm4, %v6310_v22, %v15864_v32  ;;  %v14888_v2 = vrot.slane %v17010_v21, %v16983_v59  ;;  %8049 = vmatprep.subr.mxu1 %v14650_v37 }
 0x4aa   : > { %v7188_v9 = vsel %vm1511_vm10, %v17006_v33, %v7187_v20  ;;  %v6251_v43 = vadd.f32 %v6229_v26, %v6168_v62  ;;  %v5430_v29 = vadd.f32 %v17009_v31, %v17008_v50  ;;  %v14892_v20 = vmul.f32 %v14868_v42, %v17011_v49  ;;  %v17013_v33 = vld [vmem:[#allocation172_spill] sm:$0xff]  ;;  %8065 = vmatpush3.msra.mxu1 %v14650_v37 }
 0x4ab   : > { %v7123_v10 = vadd.f32 %v7105_v11, %v7040_v57  ;;  %v17012_v26 = vrot.slane %v16973_v1, 1  ;;  %v17014_v15 = vrot.slane %v17013_v33, 1  ;;  %v17015_v57 = vrot.slane %v16976_v0, 4  ;;  %v17017_v31 = vld [vmem:[#allocation100_spill] sm:$0xff]  ;;  %8050 = vmatprep.subr.mxu1 %v14667_v4 }
 0x4ac   : > { %v6334_v62 = vadd.f32 %v6312_v25, %v6251_v43  ;;  %v17016_v22 = vrot.slane %v14708_v18, 4  ;;  %v5513_v32 = vadd.f32 %v17017_v31, %v5430_v29  ;;  %v6736_v43 = vmul.f32 %v14868_v42, %v16728_v14  ;;  %8066 = vmatpush3.msra.mxu1 %v14667_v4 }
 0x4ad   : > { %v6395_v11 = vsel %vm1427_vm9, %v17014_v15, %v17012_v26  ;;  %v7206_v19 = vadd.f32 %v7188_v9, %v7123_v10  ;;  %v6819_v1 = vmul.f32 %v14872_v3, %v16728_v14  ;;  %v14913_v25 = vmul.f32 %v14872_v3, %v17011_v49  ;;  %v17020_v10 = vld [vmem:[#allocation64_spill] sm:$0xff] }
 0x4ae   : > { %v6478_v50 = vsel %vm1679_vm12, %v17016_v22, %v17015_v57  ;;  %v6417_v18 = vadd.f32 %v6395_v11, %v6334_v62  ;;  %v17018_v0 = vrot.slane %v16985_v17, 7  ;;  %v17019_v29 = vrot.slane %v14725_v56, 7  ;;  %v17021_v11 = vld [vmem:[#allocation192_spill] sm:$0xff]  ;;  %v17022_v22 = vld [vmem:[#allocation173_spill] sm:$0xff]  ;;  %v17026_v62 = vld [vmem:[#allocation219_spill] sm:$0xff] }
 0x4af   : > { %v6902_v9 = vmul.f32 %v14783_v35, %v17011_v49  ;;  %v5596_v26 = vadd.f32 %v17020_v10, %v5513_v32  ;;  %v7236_v33 = vadd.f32 %v14698_v27, %v7206_v19  ;;  %v6642_v15 = vrot.slane %v6614_v45, 2  ;;  %v17023_v32 = vld [vmem:[#allocation78_spill] sm:$0xff] }
 0x4b0   : > { %v6561_v37 = vsel %vm3312_vm0, %v17019_v29, %v17018_v0  ;;  %v6697_v57 = vmul.f32 %v14888_v2, %v16728_v14  ;;  %v6500_v17 = vadd.f32 %v6478_v50, %v6417_v18  ;;  %v14931_v56 = vmul.f32 %v14783_v35, %v17021_v11  ;;  %v17025_v35 = vld [vmem:[#allocation198_spill] sm:$0xff] }
 0x4b1   : > { %v14935_v31 = vrot.slane %v17022_v22, %v16983_v59  ;;  %v5635_v0 = vadd.f32 %v17023_v32, %v5596_v26  ;;  %7988 = vmatmul.mubr.f32.gmra.mxu1 %v7236_v33  ;;  %v17024_v4 = vrot.slane %v14739_v58, 2  ;;  %v6764_v19 = vrot.slane %v6736_v43, 3  ;;  %v17028_v43 = vld [vmem:[#allocation56_spill] sm:$0xff] }
 0x4b2   : > { %v6847_v45 = vrot.slane %v6819_v1, 6  ;;  %v6583_v50 = vadd.f32 %v6561_v37, %v6500_v17  ;;  %v6930_v18 = vrot.slane %v6902_v9, 1  ;;  %v14944_v10 = vrot.slane %v17025_v35, %v16983_v59  ;;  %v17029_v37 = vld [vmem:[#allocation169_spill] sm:$0xff]  ;;  %v17030_v9 = vld [vmem:[#allocation116_spill] sm:$0xff] }
 0x4b3   : > { %v6644_v27 = vsel %vm1511_vm10, %v6642_v15, %v17024_v4  ;;  %v5718_v22 = vadd.f32 %v17026_v62, %v5635_v0  ;;  %v17027_v51 = vrot.slane %v14892_v20, 3  ;;  %v14952_v33 = vmul.f32 %v14935_v31, %v17021_v11  ;;  %v17031_v0 = vld [vmem:[#allocation221_spill] sm:$0xff] }
 0x4b4   : > { %v14956_v1 = vrot.slane %v17028_v43, %v16983_v59  ;;  %v5427_v15 = vadd.f32 %v17030_v9, %v17029_v37  ;;  %v6666_v17 = vadd.f32 %v6644_v27, %v6583_v50  ;;  %v6985_v62 = vmul.f32 %v14935_v31, %v17011_v49  ;;  %v17032_v37 = vld [vmem:[#allocation112_spill] sm:$0xff] }
 0x4b5   : > { %v6766_v26 = vsel %vm1595_vm11, %v6764_v19, %v17027_v51  ;;  %v5801_v4 = vadd.f32 %v17031_v0, %v5718_v22  ;;  %v14966_v51 = vmul.f32 %v14944_v10, %v17021_v11  ;;  %v17033_v9 = vrot.slane %v14913_v25, 6  ;;  %v17034_v0 = vld [vmem:[#allocation146_spill] sm:$0xff] }
 0x4b6   : > { %v7151_v19 = vmul.f32 %v14956_v1, %v17021_v11  ;;  %v14972_v29 = vmul.f32 %v14956_v1, %v16988_v7  ;;  %v5510_v27 = vadd.f32 %v17032_v37, %v5427_v15  ;;  %v6705_v50 = vadd.f32 %v6697_v57, %v6666_v17 }
 0x4b7   : > { %v6849_v32 = vsel %vm1278_vm4, %v6847_v45, %v17033_v9  ;;  %v7068_v22 = vmul.f32 %v14944_v10, %v17011_v49  ;;  %v5884_v23 = vadd.f32 %v17034_v0, %v5801_v4  ;;  %v6207_v35 = vmul.f32 %v14789_v16, %v17007_v36  ;;  %v17037_v9 = vld [vmem:[#allocation148_spill] sm:$0xff] }
 0x4b8   : > { %v6290_v13 = vmul.f32 %v14800_v38, %v17007_v36  ;;  %v5593_v15 = vadd.f32 %v17035_v53, %v5510_v27  ;;  %v6788_v57 = vadd.f32 %v6766_v26, %v6705_v50  ;;  %v17036_v17 = vrot.slane %v14931_v56, 1  ;;  %v17039_v38 = vld [vmem:[#allocation164_spill] sm:$0xff] }
 0x4b9   : > { %v7013_v37 = vrot.slane %v6985_v62, 4  ;;  %v5967_v34 = vadd.f32 %v17037_v9, %v5884_v23  ;;  %v7097_v4 = vrot.slane %v14966_v51, 7  ;;  %v7179_v0 = vrot.slane %v7151_v19, 2  ;;  %v17041_v27 = vld [vmem:[#allocation124_spill] sm:$0xff]  ;;  %v17046_v9 = vld [vmem:[#allocation145_spill] sm:$0xff] }
 0x4ba   : > { %v6932_v45 = vsel %vm1427_vm9, %v6930_v18, %v17036_v17  ;;  %v7180_v43 = vrot.slane %v14972_v29, 2  ;;  %v5632_v16 = vadd.f32 %v17038_v47, %v5593_v15  ;;  %v6871_v21 = vadd.f32 %v6849_v32, %v6788_v57  ;;  %v17042_v47 = vld [vmem:[#allocation166_spill] sm:$0xff]  ;;  %v17074_v29 = vld [vmem:[#allocation119_spill] sm:$0xff] }
 0x4bb   : > { %v7096_v44 = vrot.slane %v7068_v22, 7  ;;  %v6050_v36 = vadd.f32 %v17039_v38, %v5967_v34  ;;  %v6622_v53 = vmul.f32 %v16968_v28, %v16863_v6  ;;  %v17040_v26 = vrot.slane %v14952_v33, 4 }
 0x4bc   : > { %v6237_v62 = vrot.slane %v6207_v35, 3  ;;  %v6320_v23 = vrot.slane %v6290_v13, 6  ;;  %v5715_v50 = vadd.f32 %v17041_v27, %v5632_v16  ;;  %v6954_v19 = vadd.f32 %v6932_v45, %v6871_v21  ;;  %v17043_v35 = vld [vmem:[#allocation225_spill] sm:$0xff] }
 0x4bd   : > { %v7015_v18 = vsel %vm1679_vm12, %v7013_v37, %v17040_v26  ;;  %v15003_v17 = vrot.slane %v14385_v24, %v16983_v59  ;;  %v6133_v32 = vadd.f32 %v17042_v47, %v6050_v36  ;;  %v6164_v34 = vmul.f32 %v14822_v12, %v16955_v60 }
 0x4be   : > { %v7098_v28 = vsel %vm3312_vm0, %v7096_v44, %v7097_v4  ;;  %v7181_v13 = vsel %vm1511_vm10, %v7179_v0, %v7180_v43  ;;  %v6744_v21 = vmul.f32 %v14868_v42, %v17021_v11  ;;  %v5798_v22 = vadd.f32 %v17043_v35, %v5715_v50  ;;  %v17048_v50 = vld [vmem:[#allocation184_spill] sm:$0xff] }
 0x4bf   : > { %v7037_v24 = vadd.f32 %v7015_v18, %v6954_v19  ;;  %v6172_v15 = vadd.f32 %v6164_v34, %v6133_v32  ;;  %v6652_v57 = vrot.slane %v6622_v53, 2  ;;  %v15019_v45 = vrot.slane %v14430_v52, %v16994_v30  ;;  %v17047_v53 = vld [vmem:[#allocation151_spill] sm:$0xff] }
 0x4c0   : > { %v17044_v60 = vrot.slane %v14811_v46, 3  ;;  %v17045_v44 = vrot.slane %v14829_v61, 6  ;;  %v6827_v42 = vmul.f32 %v14872_v3, %v17021_v11  ;;  %v5881_v0 = vadd.f32 %v17046_v9, %v5798_v22 }
 0x4c1   : > { %v7120_v16 = vadd.f32 %v7098_v28, %v7037_v24  ;;  %v15032_v36 = vmul.f32 %v15019_v45, %v16959_v41  ;;  %v15036_v52 = vrot.slane %v14194_v5, %v16994_v30  ;;  %v6774_v46 = vrot.slane %v6744_v21, 3  ;;  %v17049_v21 = vld [vmem:[#allocation175_spill] sm:$0xff] }
 0x4c2   : > { %v6238_v12 = vsel %vm1595_vm11, %v17044_v60, %v6237_v62  ;;  %v6321_v37 = vsel %vm1278_vm4, %v17045_v44, %v6320_v23  ;;  %v6993_v61 = vmul.f32 %v14935_v31, %v16988_v7  ;;  %v5964_v26 = vadd.f32 %v17047_v53, %v5881_v0 }
 0x4c3   : > { %v6255_v38 = vadd.f32 %v6238_v12, %v6172_v15  ;;  %v15043_v3 = vrot.slane %v16991_v54, %v16994_v30  ;;  %v7203_v11 = vadd.f32 %v7181_v13, %v7120_v16  ;;  %v6200_v62 = vmul.f32 %v15019_v45, %v16863_v6 }
 0x4c4   : > { %v15049_v23 = vmul.f32 %v15036_v52, %v16959_v41  ;;  %v6857_v5 = vrot.slane %v6827_v42, 6  ;;  %v6940_v27 = vrot.slane %v14805_v39, 1  ;;  %v7076_v31 = vmul.f32 %v14944_v10, %v16988_v7 }
 0x4c5   : > { %v6338_v18 = vadd.f32 %v6321_v37, %v6255_v38  ;;  %v6047_v19 = vadd.f32 %v17048_v50, %v5964_v26  ;;  %v7233_v54 = vadd.f32 %v15003_v17, %v7203_v11  ;;  %v6231_v32 = vrot.slane %v15032_v36, 3  ;;  %v17055_v38 = vld [vmem:[#allocation144_spill] sm:$0xff]  ;;  %v17059_v11 = vld [vmem:[#allocation199_spill] sm:$0xff] }
 0x4c6   : > { %v6283_v34 = vmul.f32 %v15036_v52, %v16863_v6  ;;  %v7023_v28 = vrot.slane %v6993_v61, 4  ;;  %v7159_v13 = vmul.f32 %v14956_v1, %v16728_v14  ;;  %v6161_v7 = vmul.f32 %v15043_v3, %v16863_v6  ;;  %v17057_v26 = vld [vmem:[#allocation196_spill] sm:$0xff] }
 0x4c7   : > { %v6421_v47 = vadd.f32 %v14750_v63, %v6338_v18  ;;  %v6130_v39 = vadd.f32 %v17049_v21, %v6047_v19  ;;  %7990 = vmatprep.mubr.f32.mxu1 %v7233_v54  ;;  %v6701_v63 = vmul.f32 %v14888_v2, %v17011_v49  ;;  %v6230_v35 = vrot.slane %v6200_v62, 3 }
 0x4c8   : > { %v6314_v22 = vrot.slane %v15049_v23, 6  ;;  %v17050_v24 = vrot.slane %v14739_v58, 2  ;;  %v17051_v1 = vrot.slane %v14892_v20, 3  ;;  %v17052_v12 = vrot.slane %v14913_v25, 6 }
 0x4c9   : > { %v6504_v10 = vadd.f32 %v14760_v8, %v6421_v47  ;;  %v6169_v37 = vadd.f32 %v6161_v7, %v6130_v39  ;;  %v17053_v2 = vrot.slane %v14931_v56, 1  ;;  %v6232_v58 = vsel %vm1595_vm11, %v6230_v35, %v6231_v32  ;;  %v17064_v47 = vld [vmem:[#allocation170_spill] sm:$0xff] }
 0x4ca   : > { %v6653_v15 = vsel %vm1511_vm10, %v17050_v24, %v6652_v57  ;;  %v6775_v60 = vsel %vm1595_vm11, %v17051_v1, %v6774_v46  ;;  %v6858_v44 = vsel %vm1278_vm4, %v17052_v12, %v6857_v5  ;;  %v6313_v57 = vrot.slane %v6283_v34, 6  ;;  %v17056_v46 = vld [vmem:[#allocation37_spill] sm:$0xff]  ;;  %v17068_v35 = vld [vmem:[#allocation218_spill] sm:$0xff] }
 0x4cb   : > { %v6587_v8 = vadd.f32 %v14795_v55, %v6504_v10  ;;  %v6941_v49 = vsel %vm1427_vm9, %v17053_v2, %v6940_v27  ;;  %v17054_v20 = vrot.slane %v14952_v33, 4  ;;  %v7106_v9 = vrot.slane %v7076_v31, 7  ;;  %v17061_v5 = vld [vmem:[#allocation69_spill] sm:$0xff]  ;;  %v17062_v31 = vld [vmem:[#allocation216_spill] sm:$0xff] }
 0x4cc   : > { %v7189_v25 = vrot.slane %v7159_v13, 2  ;;  %v6252_v0 = vadd.f32 %v6232_v58, %v6169_v37  ;;  %v6315_v55 = vsel %vm1278_vm4, %v6313_v57, %v6314_v22  ;;  %v15093_v56 = vrot.slane %v17003_v48, %v16994_v30  ;;  %v17063_v48 = vld [vmem:[#allocation93_spill] sm:$0xff] }
 0x4cd   : > { %v7024_v42 = vsel %vm1679_vm12, %v17054_v20, %v7023_v28  ;;  %v6670_v16 = vadd.f32 %v6653_v15, %v6587_v8  ;;  %v5431_v61 = vadd.f32 %v17056_v46, %v17055_v38  ;;  %v17058_v33 = vrot.slane %v17057_v26, 1  ;;  %v17065_v28 = vld [vmem:[#allocation114_spill] sm:$0xff]  ;;  %v17066_v10 = vld [vmem:[#allocation197_spill] sm:$0xff] }
 0x4ce   : > { %v6335_v53 = vadd.f32 %v6315_v55, %v6252_v0  ;;  %v17060_v18 = vrot.slane %v17059_v11, 1  ;;  %v6615_v27 = vmul.f32 %v16970_v40, %v17061_v5  ;;  %v15106_v50 = vrot.slane %v17062_v31, %v16994_v30  ;;  %v17070_v12 = vld [vmem:[#allocation161_spill] sm:$0xff]  ;;  %v17072_v8 = vld [vmem:[#allocation206_spill] sm:$0xff] }
 0x4cf   : > { %v6709_v19 = vadd.f32 %v6701_v63, %v6670_v16  ;;  %v15110_v54 = vrot.slane %v17063_v48, %v16994_v30  ;;  %v15114_v34 = vmul.f32 %v15093_v56, %v17064_v47  ;;  %v5514_v13 = vadd.f32 %v17065_v28, %v5431_v61  ;;  %v17075_v16 = vld [vmem:[#allocation122_spill] sm:$0xff]  ;;  %v17076_v46 = vld [vmem:[#allocation157_spill] sm:$0xff]  ;;  %v17080_v48 = vld [vmem:[#allocation224_spill] sm:$0xff] }
 0x4d0   : > { %v6398_v62 = vsel %vm1427_vm9, %v17060_v18, %v17058_v33  ;;  %v7107_v21 = vsel %vm3312_vm0, %v7097_v4, %v7106_v9  ;;  %v7190_v39 = vsel %vm1511_vm10, %v7180_v43, %v7189_v25  ;;  %v17067_v63 = vrot.slane %v17066_v10, 4  ;;  %v8218_v11 = vld [vmem:[%s15393_s5 + $0x82] ss:$8 sm:$0xf] }
 0x4d1   : > { %v6418_v7 = vadd.f32 %v6398_v62, %v6335_v53  ;;  %v17069_v24 = vrot.slane %v17068_v35, 4  ;;  %v6792_v1 = vadd.f32 %v6775_v60, %v6709_v19  ;;  %v17071_v37 = vrot.slane %v17070_v12, 7  ;;  %v17077_v53 = vld [vmem:[#allocation49_spill] sm:$0xff]  ;;  %v17078_v62 = vld [vmem:[#allocation143_spill] sm:$0xff]  ;;  %v17081_v35 = vld [vmem:[#allocation198_spill] sm:$0xff] }
 0x4d2   : > { %v17073_v2 = vrot.slane %v17072_v8, 7  ;;  %v6737_v4 = vmul.f32 %v15093_v56, %v16728_v14  ;;  %v5597_v58 = vadd.f32 %v17074_v29, %v5514_v13  ;;  %v6645_v57 = vrot.slane %v6615_v27, 2 }
 0x4d3   : > { %v6481_v15 = vsel %vm1679_vm12, %v17069_v24, %v17067_v63  ;;  %v6820_v20 = vmul.f32 %v15106_v50, %v16728_v14  ;;  %v15140_v9 = vmul.f32 %v15106_v50, %v17064_v47  ;;  %v6875_v60 = vadd.f32 %v6858_v44, %v6792_v1 }
 0x4d4   : > { %v6564_v51 = vsel %vm3312_vm0, %v17073_v2, %v17071_v37  ;;  %v6501_v43 = vadd.f32 %v6481_v15, %v6418_v7  ;;  %v6698_v25 = vmul.f32 %v15110_v54, %v16728_v14  ;;  %v6768_v0 = vrot.slane %v15114_v34, 3  ;;  %v17082_v37 = vld [vmem:[#allocation227_spill] sm:$0xff] }
 0x4d5   : > { %v5636_v55 = vadd.f32 %v17075_v16, %v5597_v58  ;;  %v6903_v61 = vmul.f32 %v17076_v46, %v17064_v47  ;;  %v15150_v33 = vmul.f32 %v17076_v46, %v17077_v53  ;;  %v15156_v44 = vrot.slane %v8218_v11, %v16994_v30 }
 0x4d6   : > { %v6584_v38 = vadd.f32 %v6564_v51, %v6501_v43  ;;  %v6958_v18 = vadd.f32 %v6941_v49, %v6875_v60  ;;  %v17079_v27 = vrot.slane %v17078_v62, 2  ;;  %v6767_v19 = vrot.slane %v6737_v4, 3  ;;  %v17083_v43 = vld [vmem:[#allocation56_spill] sm:$0xff] }
 0x4d7   : > { %v5719_v28 = vadd.f32 %v17080_v48, %v5636_v55  ;;  %v6850_v7 = vrot.slane %v6820_v20, 6  ;;  %v6851_v63 = vrot.slane %v15140_v9, 6  ;;  %v15165_v24 = vrot.slane %v17081_v35, %v16994_v30  ;;  %v17084_v20 = vld [vmem:[#allocation150_spill] sm:$0xff]  ;;  %v17087_v35 = vld [vmem:[#allocation165_spill] sm:$0xff] }
 0x4d8   : > { %v6647_v31 = vsel %vm1511_vm10, %v6645_v57, %v17079_v27  ;;  %v7041_v15 = vadd.f32 %v7024_v42, %v6958_v18  ;;  %v6769_v49 = vsel %vm1595_vm11, %v6767_v19, %v6768_v0  ;;  %v15172_v1 = vmul.f32 %v15156_v44, %v17077_v53  ;;  %v17085_v18 = vld [vmem:[#allocation152_spill] sm:$0xff] }
 0x4d9   : > { %v6667_v13 = vadd.f32 %v6647_v31, %v6584_v38  ;;  %v5802_v8 = vadd.f32 %v17082_v37, %v5719_v28  ;;  %v6933_v51 = vrot.slane %v6903_v61, 1  ;;  %v6934_v4 = vrot.slane %v15150_v33, 1  ;;  %v17089_v37 = vld [vmem:[#allocation208_spill] sm:$0xff] }
 0x4da   : > { %v6986_v29 = vmul.f32 %v15156_v44, %v17064_v47  ;;  %v7124_v58 = vadd.f32 %v7107_v21, %v7041_v15  ;;  %v15180_v42 = vmul.f32 %v15165_v24, %v17077_v53  ;;  %v15184_v57 = vrot.slane %v17083_v43, %v16994_v30 }
 0x4db   : > { %v6706_v2 = vadd.f32 %v6698_v25, %v6667_v13  ;;  %v5885_v60 = vadd.f32 %v17084_v20, %v5802_v8  ;;  %v6852_v25 = vsel %vm1278_vm4, %v6850_v7, %v6851_v63  ;;  %v7069_v55 = vmul.f32 %v15165_v24, %v17064_v47  ;;  %v17091_v20 = vld [vmem:[#allocation74_spill] sm:$0xff] }
 0x4dc   : > { %v6208_v21 = vmul.f32 %v15019_v45, %v17061_v5  ;;  %v7207_v38 = vadd.f32 %v7190_v39, %v7124_v58  ;;  %v7017_v61 = vrot.slane %v15172_v1, 4  ;;  %v7152_v11 = vmul.f32 %v15184_v57, %v17077_v53  ;;  %v17086_v39 = vld [vmem:[#allocation155_spill] sm:$0xff] }
 0x4dd   : > { %v6789_v16 = vadd.f32 %v6769_v49, %v6706_v2  ;;  %v5968_v27 = vadd.f32 %v17085_v18, %v5885_v60  ;;  %v6935_v19 = vsel %vm1427_vm9, %v6933_v51, %v6934_v4  ;;  %v7016_v48 = vrot.slane %v6986_v29, 4  ;;  %v17088_v49 = vld [vmem:[#allocation121_spill] sm:$0xff]  ;;  %v7425_v18 = vld [vmem:[#allocation7 + $0x18] sm:$0xff] }
 0x4de   : > { %v6291_v28 = vmul.f32 %v15036_v52, %v17061_v5  ;;  %v7237_v13 = vadd.f32 %v15003_v17, %v7207_v38  ;;  %v7100_v45 = vrot.slane %v15180_v42, 7  ;;  %v15207_v7 = vmul.f32 %v15184_v57, %v17086_v39  ;;  %v17090_v5 = vld [vmem:[#allocation210_spill] sm:$0xff]  ;;  %v7426_v38 = vld [vmem:[#allocation7 + $0x20] sm:$0xff] }
 0x4df   : > { %v6872_v31 = vadd.f32 %v6852_v25, %v6789_v16  ;;  %v6051_v15 = vadd.f32 %v17087_v35, %v5968_v27  ;;  %v6374_v8 = vmul.f32 %v17089_v37, %v17088_v49  ;;  %v7099_v58 = vrot.slane %v7069_v55, 7  ;;  %v17092_v55 = vld [vmem:[#allocation48_spill] sm:$0xff]  ;;  %8018 = vmatprep.subr.mxu0 %v7426_v38  ;;  %8051 = vmatprep.subr.mxu1 %v7426_v38 }
 0x4e0   : > { %v6239_v51 = vrot.slane %v6208_v21, 3  ;;  %7991 = vmatmul.mubr.f32.gmra.mxu1 %v7237_v13  ;;  %v7018_v52 = vsel %vm1679_vm12, %v7016_v48, %v7017_v61  ;;  %v7182_v17 = vrot.slane %v7152_v11, 2  ;;  %v6165_v43 = vmul.f32 %v15043_v3, %v16959_v41  ;;  %8019 = vmatpush3.msra.mxu0 %v7426_v38 }
 0x4e1   : > { %v6955_v2 = vadd.f32 %v6935_v19, %v6872_v31  ;;  %v6134_v29 = vadd.f32 %v17090_v5, %v6051_v15  ;;  %v6457_v60 = vmul.f32 %v17091_v20, %v17088_v49  ;;  %v6322_v25 = vrot.slane %v6291_v28, 6  ;;  %v8219_v19 = vld [vmem:[%s15394_s6] sm:$0xf]  ;;  %8067 = vmatpush3.msra.mxu1 %v7426_v38  ;;  %8020 = vmatprep.subr.mxu0 %v7425_v18 }
 0x4e2   : > { %v6540_v21 = vmul.f32 %v17092_v55, %v17088_v49  ;;  %v7101_v27 = vsel %vm3312_vm0, %v7099_v58, %v7100_v45  ;;  %v7183_v11 = vrot.slane %v15207_v7, 2  ;;  %v6405_v41 = vrot.slane %v6374_v8, 1  ;;  %8052 = vmatprep.subr.mxu1 %v7425_v18  ;;  %8021 = vmatpush3.msra.mxu0 %v7425_v18 }
 0x4e3   : > { %v7038_v16 = vadd.f32 %v7018_v52, %v6955_v2  ;;  %v6173_v31 = vadd.f32 %v6165_v43, %v6134_v29  ;;  %v15230_v48 = vrot.slane %v8219_v19, %v16994_v30  ;;  %v6240_v28 = vsel %vm1595_vm11, %v6231_v32, %v6239_v51  ;;  %8068 = vmatpush3.msra.mxu1 %v7425_v18 }
 0x4e4   : > { %v7184_v13 = vsel %vm1511_vm10, %v7182_v17, %v7183_v11  ;;  %v6488_v15 = vrot.slane %v6457_v60, 4  ;;  %v6323_v37 = vsel %vm1278_vm4, %v6314_v22, %v6322_v25  ;;  %v17093_v32 = vrot.slane %v17057_v26, 1 }
 0x4e5   : > { %v7121_v3 = vadd.f32 %v7101_v27, %v7038_v16  ;;  %v6256_v35 = vadd.f32 %v6240_v28, %v6173_v31  ;;  %v6571_v2 = vrot.slane %v6540_v21, 7  ;;  %v6623_v51 = vmul.f32 %v16970_v40, %v16863_v6  ;;  %v7424_v27 = vld [vmem:[#allocation7 + $0x10] sm:$0xff] }
 0x4e6   : > { %v6406_v8 = vsel %vm1427_vm9, %v17093_v32, %v6405_v41  ;;  %v17094_v17 = vrot.slane %v17066_v10, 4  ;;  %v6745_v22 = vmul.f32 %v15093_v56, %v17077_v53  ;;  %v17095_v26 = vrot.slane %v17070_v12, 7  ;;  %8022 = vmatprep.subr.mxu0 %v7424_v27  ;;  %8053 = vmatprep.subr.mxu1 %v7424_v27 }
 0x4e7   : > { %v7204_v49 = vadd.f32 %v7184_v13, %v7121_v3  ;;  %v6339_v36 = vadd.f32 %v6323_v37, %v6256_v35  ;;  %v6654_v43 = vrot.slane %v6623_v51, 2  ;;  %v6828_v20 = vmul.f32 %v15106_v50, %v17077_v53  ;;  %8023 = vmatpush3.msra.mxu0 %v7424_v27  ;;  %8069 = vmatpush3.msra.mxu1 %v7424_v27  ;;  %v17097_v13 = vld [vmem:[#allocation17_spill] sm:$0xff] }
 0x4e8   : > { %v6489_v23 = vsel %vm1679_vm12, %v17094_v17, %v6488_v15  ;;  %v6572_v29 = vsel %vm3312_vm0, %v17095_v26, %v6571_v2  ;;  %v17096_v6 = vrot.slane %v17078_v62, 2  ;;  %v6776_v10 = vrot.slane %v6745_v22, 3 }
 0x4e9   : > { %v7234_v58 = vadd.f32 %v15230_v48, %v7204_v49  ;;  %v6422_v52 = vadd.f32 %v6406_v8, %v6339_v36  ;;  %v6702_v25 = vmul.f32 %v15110_v54, %v17064_v47  ;;  %v6911_v56 = vmul.f32 %v17076_v46, %v17086_v39 }
 0x4ea   : > { %v6655_v40 = vsel %vm1511_vm10, %v17096_v6, %v6654_v43  ;;  %v6859_v12 = vrot.slane %v6828_v20, 6  ;;  %v6777_v18 = vsel %vm1595_vm11, %v6768_v0, %v6776_v10  ;;  %v6994_v50 = vmul.f32 %v15156_v44, %v17086_v39 }
 0x4eb   : > { %7993 = vmatprep.mubr.f32.mxu1 %v7234_v58  ;;  %v6505_v5 = vadd.f32 %v6489_v23, %v6422_v52  ;;  %v6942_v55 = vrot.slane %v6911_v56, 1  ;;  %v7077_v54 = vmul.f32 %v15165_v24, %v17086_v39  ;;  %v7160_v0 = vmul.f32 %v15184_v57, %v16728_v14  ;;  %v7422_v57 = vld [vmem:[#allocation7] sm:$0xff]  ;;  %v17098_v23 = vld [vmem:[#allocation22_spill] sm:$0xff] }
 0x4ec   : > { %v6860_v62 = vsel %vm1278_vm4, %v6851_v63, %v6859_v12  ;;  %v7025_v34 = vrot.slane %v6994_v50, 4 }
 0x4ed   : > { %v6588_v60 = vadd.f32 %v6572_v29, %v6505_v5  ;;  %v6943_v46 = vsel %vm1427_vm9, %v6934_v4, %v6942_v55  ;;  %v7108_v44 = vrot.slane %v7077_v54, 7  ;;  %v7191_v39 = vrot.slane %v7160_v0, 2  ;;  %v7423_v4 = vld [vmem:[#allocation7 + $0x8] sm:$0xff]  ;;  %v17099_v5 = vld [vmem:[#allocation21_spill] sm:$0xff] }
 0x4ee   : > { %v7026_v9 = vsel %vm1679_vm12, %v7017_v61, %v7025_v34  ;;  %8024 = vmatprep.subr.mxu0 %v7423_v4  ;;  %8054 = vmatprep.subr.mxu1 %v7423_v4  ;;  %v1170_v61 = vpop.f32.mrf.mxu1  ;;  %v17100_v29 = vld [vmem:[#allocation18_spill] sm:$0xff] }
 0x4ef   : > { %v6671_v16 = vadd.f32 %v6655_v40, %v6588_v60  ;;  %v7109_v24 = vsel %vm3312_vm0, %v7100_v45, %v7108_v44  ;;  %v7192_v14 = vsel %vm1511_vm10, %v7183_v11, %v7191_v39  ;;  %8025 = vmatpush3.msra.mxu0 %v7423_v4  ;;  %8070 = vmatpush3.msra.mxu1 %v7423_v4  ;;  %v1246_v45 = vsub.f32 0.0, %v1170_v61 }
 0x4f0   : > { %8026 = vmatprep.subr.mxu0 %v7422_v57  ;;  %8055 = vmatprep.subr.mxu1 %v7422_v57  ;;  %v1172_v41 = vpop.f32.mrf.mxu1 }
 0x4f1   : > { %v6710_v38 = vadd.f32 %v6702_v25, %v6671_v16  ;;  %8027 = vmatpush3.msra.mxu0 %v7422_v57  ;;  %8071 = vmatpush3.msra.mxu1 %v7422_v57  ;;  %v1250_v31 = vmul.f32 1.442695, %v1246_v45  ;;  %v1247_v3 = vsub.f32 0.0, %v1172_v41 }
 0x4f2   : > { %v1241_v28 = vpop.f32.mrf.mxu1 }
 0x4f3   : > { %v6793_v53 = vadd.f32 %v6777_v18, %v6710_v38  ;;  %8184 = vpow2.f32 %v1250_v31  ;;  %v1252_v19 = vmul.f32 1.442695, %v1247_v3  ;;  %v1248_v6 = vsub.f32 0.0, %v1241_v28  ;;  %v17101_v18 = vld [vmem:[#allocation24_spill] sm:$0xff] }
 0x4f4   : > { %v1243_v15 = vpop.f32.mrf.mxu1 }
 0x4f5   : > { %v6876_v47 = vadd.f32 %v6860_v62, %v6793_v53  ;;  %v1254_v12 = vmul.f32 1.442695, %v1248_v6  ;;  %v17102_v53 = vld [vmem:[#allocation23_spill] sm:$0xff]  ;;  %v8223_v6 = vld [vmem:[%s8577_s24 + $0x8] sm:$0xff] }
 0x4f7   : > { %v6959_v21 = vadd.f32 %v6943_v46, %v6876_v47  ;;  %v1249_v47 = vsub.f32 0.0, %v1243_v15 }
 0x4f9   : > { %v7042_v63 = vadd.f32 %v7026_v9, %v6959_v21  ;;  %v1256_v46 = vmul.f32 1.442695, %v1249_v47 }
 0x4fb   : > { %v7125_v33 = vadd.f32 %v7109_v24, %v7042_v63 }
 0x4fd   : > { %v7208_v1 = vadd.f32 %v7192_v14, %v7125_v33  ;;  %v17103_v33 = vld [vmem:[#allocation26_spill] sm:$0xff]  ;;  %v17104_v14 = vld [vmem:[#allocation25_spill] sm:$0xff] }
 0x4ff   : > { %v7238_v42 = vadd.f32 %v15230_v48, %v7208_v1  ;;  %v7360_v48 = vld [vmem:[%s15396_s8] sm:$0xf] }
 0x500   : > { %v8185_v7 = vpop.eup %8184  ;;  %v7365_v35 = vrot.slane %v7360_v48, %v17097_v13  ;;  %v7369_v43 = vrot.slane %v7360_v48, %v17100_v29  ;;  %v7373_v34 = vrot.slane %v7360_v48, %v16983_v59  ;;  %v7377_v61 = vrot.slane %v7360_v48, %v16994_v30  ;;  %v7543_v48 = vld [vmem:[%s15400_s12] sm:$0xf] }
 0x501   : > { %7994 = vmatmul.mubr.f32.gmra.mxu1 %v7238_v42  ;;  %v1258_v11 = vadd.f32 1.0, %v8185_v7 }
 0x503   : > { %8186 = vrcp.f32 %v1258_v11 }
 0x504   : > { %8188 = vpow2.f32 %v1252_v19 }
 0x510   : > { %v8187_v49 = vpop.eup %8186 }
 0x511   : > { %v7393_v32 = vrot.slane %v8187_v49, %v17097_v13  ;;  %v8189_v58 = vpop.eup %8188  ;;  %v17106_v49 = vld [vmem:[#allocation27_spill] sm:$0xff] }
 0x512   : > { %v1259_v17 = vadd.f32 1.0, %v8189_v58  ;;  %v8220_v58 = vld [vmem:[%s8577_s24 + $0x20] sm:$0xff] }
 0x514   : > { %8190 = vrcp.f32 %v1259_v17  ;;  %v8221_v17 = vld [vmem:[%s8577_s24] sm:$0xff] }
 0x515   : > { %8192 = vpow2.f32 %v1254_v12 }
 0x521   : > { %v8191_v20 = vpop.eup %8190 }
 0x522   : > { %v7397_v10 = vrot.slane %v8191_v20, %v17097_v13  ;;  %v8193_v55 = vpop.eup %8192 }
 0x523   : > { %v1260_v54 = vadd.f32 1.0, %v8193_v55 }
 0x525   : > { %8194 = vrcp.f32 %v1260_v54  ;;  %v8226_v54 = vld [vmem:[%s8577_s24 + $0x38] sm:$0xff] }
 0x526   : > { %8196 = vpow2.f32 %v1256_v46 }
 0x532   : > { %v8195_v0 = vpop.eup %8194 }
 0x533   : > { %v7401_v44 = vrot.slane %v8195_v0, %v17097_v13  ;;  %v8197_v42 = vpop.eup %8196 }
 0x534   : > { %v1261_v57 = vadd.f32 1.0, %v8197_v42 }
 0x536   : > { %8198 = vrcp.f32 %v1261_v57 }
 0x543   : > { %v8199_v45 = vpop.eup %8198 }
 0x544   : > { %v7405_v41 = vrot.slane %v8199_v45, %v17097_v13 }
 0x556   : > { %v7986_v37 = vpop.f32.mrf.mxu1 }
 0x557   : > { %v7386_v36 = vadd.f32 %v7986_v37, %v7365_v35 }
 0x558   : > { %v7321_v8 = vpop.f32.mrf.mxu1 }
 0x559   : > { %v7382_v2 = vadd.f32 %v7365_v35, %v7321_v8  ;;  %v7410_v51 = vmul.f32 %v7393_v32, %v7386_v36  ;;  %v17105_v35 = vld [vmem:[#allocation28_spill] sm:$0xff]  ;;  %v7548_v36 = vrot.slane %v7543_v48, %v17097_v13  ;;  %v7552_v13 = vrot.slane %v7543_v48, %v17100_v29 }
 0x55b   : > { %v7406_v52 = vmul.f32 %v7393_v32, %v7382_v2  ;;  %v7418_v26 = vmul.f32 %v7410_v51, %v17099_v5 }
 0x55d   : > { %v7414_v22 = vmul.f32 %v7406_v52, %v17098_v23 }
 0x55f   : > { %8028 = vmatprep.mubr.f32.mxu0 %v7414_v22 }
 0x560   : > { %8029 = vmatmul.mubr.f32.vlgmr.msra.gmra.mxu0 %v7418_v26 }
 0x571   : > { %v7989_v60 = vpop.f32.mrf.mxu1 }
 0x572   : > { %v7387_v40 = vadd.f32 %v7989_v60, %v7369_v43 }
 0x573   : > { %v7331_v16 = vpop.f32.mrf.mxu1 }
 0x574   : > { %v7383_v25 = vadd.f32 %v7369_v43, %v7331_v16  ;;  %v7411_v56 = vmul.f32 %v7397_v10, %v7387_v40  ;;  %v8222_v43 = vld [vmem:[%s8577_s24 + $0x28] sm:$0xff] }
 0x576   : > { %v7407_v38 = vmul.f32 %v7397_v10, %v7383_v25  ;;  %v7419_v62 = vmul.f32 %v7411_v56, %v17102_v53  ;;  %v7556_v10 = vrot.slane %v7543_v48, %v16983_v59  ;;  %v8224_v56 = vld [vmem:[%s8577_s24 + $0x30] sm:$0xff]  ;;  %v7560_v53 = vrot.slane %v7543_v48, %v16994_v30 }
 0x578   : > { %v7415_v50 = vmul.f32 %v7407_v38, %v17101_v18  ;;  %v8225_v18 = vld [vmem:[%s8577_s24 + $0x10] sm:$0xff] }
 0x57a   : > { %8031 = vmatprep.mubr.f32.mxu0 %v7415_v50 }
 0x57b   : > { %8032 = vmatmul.mubr.f32.gmra.mxu0 %v7419_v62 }
 0x5a0   : > { %v7992_v21 = vpop.f32.mrf.mxu1 }
 0x5a1   : > { %v7388_v9 = vadd.f32 %v7992_v21, %v7373_v34 }
 0x5a2   : > { %v7341_v63 = vpop.f32.mrf.mxu1 }
 0x5a3   : > { %v7384_v27 = vadd.f32 %v7373_v34, %v7341_v63  ;;  %v7412_v24 = vmul.f32 %v7401_v44, %v7388_v9  ;;  %v8227_v34 = vld [vmem:[%s8577_s24 + $0x18] sm:$0xff] }
 0x5a5   : > { %v7408_v39 = vmul.f32 %v7401_v44, %v7384_v27  ;;  %v7420_v1 = vmul.f32 %v7412_v24, %v17104_v14 }
 0x5a7   : > { %v7416_v4 = vmul.f32 %v7408_v39, %v17103_v33 }
 0x5a9   : > { %8034 = vmatprep.mubr.f32.mxu0 %v7416_v4 }
 0x5aa   : > { %8035 = vmatmul.mubr.f32.gmra.mxu0 %v7420_v1 }
 0x5c1   : > { %v7995_v31 = vpop.f32.mrf.mxu1 }
 0x5c2   : > { %v7389_v7 = vadd.f32 %v7995_v31, %v7377_v61 }
 0x5c3   : > { %v7351_v11 = vpop.f32.mrf.mxu1 }
 0x5c4   : > { %v7385_v3 = vadd.f32 %v7377_v61, %v7351_v11  ;;  %v7413_v19 = vmul.f32 %v7405_v41, %v7389_v7 }
 0x5c6   : > { %v7409_v28 = vmul.f32 %v7405_v41, %v7385_v3  ;;  %v7421_v37 = vmul.f32 %v7413_v19, %v17106_v49 }
 0x5c8   : > { %v7417_v15 = vmul.f32 %v7409_v28, %v17105_v35 }
 0x5ca   : > { %8037 = vmatprep.mubr.f32.mxu1 %v7417_v15 }
 0x5cb   : > { %8038 = vmatmul.mubr.f32.vlgmr.msra.gmra.mxu1 %v7421_v37 }
 0x620   : > { %v8030_v32 = vpop.f32.mrf.mxu0 }
 0x621   : > { %v7569_v8 = vadd.f32 %v8030_v32, %v7548_v36 }
 0x622   : > { %v7504_v2 = vpop.f32.mrf.mxu0 }
 0x623   : > { %v7577_v51 = vadd.f32 %v8220_v58, %v7569_v8  ;;  %v7565_v52 = vadd.f32 %v7548_v36, %v7504_v2 }
 0x625   : > { %7585 = vst [vmem:[%s15316_s30 + $0x20] sm:$0xff] %v7577_v51  ;;  %v7573_v23 = vadd.f32 %v8221_v17, %v7565_v52 }
 0x627   : > { %7581 = vst [vmem:[%s15316_s30] sm:$0xff] %v7573_v23 }
 0x63b   : > { %v8033_v22 = vpop.f32.mrf.mxu0 }
 0x63c   : > { %v7570_v5 = vadd.f32 %v8033_v22, %v7552_v13 }
 0x63d   : > { %v7514_v26 = vpop.f32.mrf.mxu0 }
 0x63e   : > { %v7578_v20 = vadd.f32 %v8222_v43, %v7570_v5  ;;  %v7566_v60 = vadd.f32 %v7552_v13, %v7514_v26 }
 0x640   : > { %7586 = vst [vmem:[%s15316_s30 + $0x28] sm:$0xff] %v7578_v20  ;;  %v7574_v40 = vadd.f32 %v8223_v6, %v7566_v60 }
 0x642   : > { %7582 = vst [vmem:[%s15316_s30 + $0x8] sm:$0xff] %v7574_v40 }
 0x66a   : > { %v8036_v16 = vpop.f32.mrf.mxu0 }
 0x66b   : > { %v7571_v29 = vadd.f32 %v8036_v16, %v7556_v10 }
 0x66c   : > { %v7524_v25 = vpop.f32.mrf.mxu0 }
 0x66d   : > { %v7579_v12 = vadd.f32 %v8224_v56, %v7571_v29  ;;  %v7567_v38 = vadd.f32 %v7556_v10, %v7524_v25 }
 0x66f   : > { %7587 = vst [vmem:[%s15316_s30 + $0x30] sm:$0xff] %v7579_v12  ;;  %v7575_v50 = vadd.f32 %v8225_v18, %v7567_v38 }
 0x671   : > { %7583 = vst [vmem:[%s15316_s30 + $0x10] sm:$0xff] %v7575_v50 }
 0x68b   : > { %v8039_v62 = vpop.f32.mrf.mxu1 }
 0x68c   : > { %v7572_v59 = vadd.f32 %v8039_v62, %v7560_v53 }
 0x68d   : > { %v7534_v55 = vpop.f32.mrf.mxu1 }
 0x68e   : > { %v7580_v47 = vadd.f32 %v8226_v54, %v7572_v59  ;;  %v7568_v46 = vadd.f32 %v7560_v53, %v7534_v55 }
 0x690   : > { %7588 = vst [vmem:[%s15316_s30 + $0x38] sm:$0xff] %v7580_v47  ;;  %v7576_v0 = vadd.f32 %v8227_v34, %v7568_v46 }
 0x692   : > { %7584 = vst [vmem:[%s15316_s30 + $0x18] sm:$0xff] %v7576_v0 }
 0x693   : > { %8319 = shalt.err (!%p8316_p0)
}
 0x694   : > { %s8320_s24 = scalar_lea.hbm %s15342_s22, 1024  ;;  %s8324_s21 = scalar_lea.hbm %s15401_s13, 2048 }
 0x695   : > { %p8321_p1 = scmp.ne.s32.totalorder %s15342_s22, %s8320_s24  ;;  %p8325_p4 = scmp.lt.s32.totalorder %s15342_s22, %s15401_s13 }
 0x696   : > { %p8326_p13 = scmp.lt.s32.totalorder %s8324_s21, %s8320_s24 }
 0x697   : > { %p8322_p2 = pnand %p8321_p1, %p8498_p5 }
 0x698   : > { %p8327_p9 = por %p8326_p13, %p8325_p4 }
 0x699   : > { %p8323_p3 = pneg %p8322_p2 }
 0x69b   : > { %p8328_p10 = pnand %p8327_p9, %p8323_p3 }
 0x69d   : > { %8331 = shalt.err (!%p8328_p10)
}
 0x69e   : > { %s8389_s29 = smov 512  }
 0x69f   : > { %8084 = dma.vmem_to_hbm [thread:$0]  (%p8498_p5), %s15335_s16, 1024, %s15342_s22, %s15347_s25, %s8389_s29, %s8389_s29, %s8385_s27  }
 0x6a0 PF: > { %s17107_s14 = sld [smem:[#allocation12_spill]]  ;;  %p8106_p12 = scmp.ge.s32.totalorder %s8374_s28, 2 }
 0x6a2   : > { %p8097_p7 = pnand %p8106_p12, %p8502_p6 }
 0x6a4   : > { %p8098_p8 = pneg %p8097_p7 }
 0x6a6   : > { %s7618_s19 = sand.u32 1, %s17107_s14  }
 0x6a7   : > { %s7619_s24 = scalar_lea.sflag [#allocation4], %s7618_s19 }
 0x6a8   : > { %8357 = dma.done.wait (%p8098_p8), %s7619_s24, 1024  }
 0x6a9   : > { %8359 = vsyncadd (%p8098_p8), %s7619_s24, 4294966272  ;;  %s17109_s28 = sld [smem:[#allocation14_spill]]  ;;  %s17112_s25 = smov %s8366_s26 }
 0x6aa   : > { %s17110_s18 = sld [smem:[#allocation13_spill]] }
 0x6ab   : > { %s17111_s27 = sld [smem:[#allocation15_spill]] }
 0x6af   : > { %p25_p11 = scmp.ge.s32.totalorder %s17109_s28, 4  }
 0x6b0   : > { %s17113_s26 = smov %s17110_s18 }
 0x6b1   :  { %27 = sbr.rel (!%p25_p11) target bundleno = 5 (0x5), region = 192 }
 0x6b6   :  { %7624 = vsyncpa [#allocation3], 1 }
 0x6b7   :  { %7626 = vsyncpa [#allocation3 + $0x1], 1 }
 0x6b8   :  { %7627 = vsyncpa [#allocation6], 1 }
 0x6b9   :  { %7628 = vsyncpa [#allocation4], 1 }
 0x6ba   :  { %7630 = vsyncpa [#allocation4 + $0x1], 1 }

</bundles_post_ra>
